<compile_context>
chip_gen: v7x
topology: tpu7x:2x2x1
jax: 0.10.0
libtpu: 0.0.40
codegen_flags: <defaults>
</compile_context>

<pallas_src>
import functools

import jax
import jax.numpy as jnp
from jax.experimental import pallas as pl
from jax.experimental.pallas import tpu as pltpu


def _layer_norm(v, eps=1e-6):
    mu = jnp.mean(v, axis=-1, keepdims=True)
    var = jnp.mean((v - mu) ** 2, axis=-1, keepdims=True)
    return (v - mu) * jax.lax.rsqrt(var + eps)


# ----------------------------- fused kernel ---------------------------------

def fused_kernel(xt_ref, xu_ref, xd_ref, mod_ref, cse_ref, ws_ref, bs_ref,
                 wconv_ref, out_ref, pad_ref, *, TH, W, C, K, P):
    i = pl.program_id(1)
    n_tiles = pl.num_programs(1)

    m = mod_ref[0]                                     # (6, C): adaLN chunks as sublane rows
    shift_msa, scale_msa, gate_msa = m[0:1], m[1:2], m[2:3]
    shift_con, scale_con, gate_con = m[3:4], m[4:5], m[5:6]
    cse = cse_ref[0]                                   # (1, C) channel gate (from wrapper)

    # Rows [base-1, base+TH]: one halo row above/below for the 3x3 conv.
    x_all = jnp.concatenate([xu_ref[0], xt_ref[0], xd_ref[0]], axis=0)   # (TH+2, W, C)

    # --- LN1 + modulate, SCSE (sSE = lane reduction, not an MXU dot) --------
    h1 = _layer_norm(x_all) * (1.0 + scale_msa) + shift_msa
    sse = jax.nn.sigmoid(jnp.sum(h1 * ws_ref[...], axis=-1, keepdims=True)
                         + bs_ref[...])
    x1 = x_all + gate_msa * (h1 * (cse + sse))

    # --- LN2 + modulate ------------------------------------------------------
    h2 = _layer_norm(x1) * (1.0 + scale_con) + shift_con

    # Halo rows that fall outside the image contribute zeros (conv padding).
    rows = jax.lax.broadcasted_iota(jnp.int32, (TH + 2, 1, 1), 0)
    valid = ((rows > 0) | (i > 0)) & ((rows <= TH) | (i < n_tiles - 1))
    h2 = jnp.where(valid, h2, 0.0)

    # Column-padded bf16 scratch: only the P-wide column borders are re-zeroed
    # (interior fully overwritten every step).
    zeros_col = jnp.zeros((TH + 2, P, C), pad_ref.dtype)
    pad_ref[:, pl.ds(0, P), :] = zeros_col
    pad_ref[:, pl.ds(P + W, P), :] = zeros_col
    pad_ref[:, pl.ds(P, W), :] = h2.astype(pad_ref.dtype)

    def tap(kh, kw):                                   # one shifted 3x3 tap, (TH*W, C)
        return pad_ref[pl.ds(kh, TH), pl.ds(kw, W), :].reshape(TH * W, C)

    if C >= 128:
        # Per-tap accumulation: never materializes the (N, K*K*C) concat.
        y = jnp.zeros((TH * W, C), jnp.float32)
        t = 0
        for kh in range(K):
            for kw in range(K):
                y = y + jnp.dot(tap(kh, kw), wconv_ref[pl.ds(t * C, C), :],
                                preferred_element_type=jnp.float32)
                t += 1
    else:
        # Small C: a single deep-K contraction keeps the MXU K-dim filled.
        h_cat = jnp.concatenate([tap(kh, kw) for kh in range(K) for kw in range(K)],
                                axis=-1)
        y = jnp.dot(h_cat, wconv_ref[...], preferred_element_type=jnp.float32)
    y = y.reshape(TH, W, C)

    out_ref[0] = (x1[1:TH + 1] + gate_con * y).astype(out_ref.dtype)


# ----------------------------- wrapper ---------------------------------------

def _pick_tile_rows(H, W, C, vmem_limit):
    """Largest divisor of H whose per-step footprint fits ~1/3 of the VMEM
    budget, preferring >=2 row tiles so the grid actually pipelines."""
    budget = vmem_limit // 3
    per_row_bytes = W * C * 4 * 14       # x/out double buffers + f32 temps + pad scratch
    divisors = [d for d in range(1, H + 1) if H % d == 0]
    fitting = [d for d in divisors if d * per_row_bytes <= budget]
    if not fitting:
        return 1
    multi = [d for d in fitting if H // d >= 2]
    return max(multi) if multi else max(fitting)


def conv2d_adaln_forward(x, c, params, H, W, K=3, P=1, tile_rows=None,
                         mxu_dtype=jnp.bfloat16):
    B, N, C = x.shape
    assert N == H * W

    # Generation-aware VMEM budget (~96MB on 128MiB v5e/v6e, ~48MB on 64MiB v7x).
    try:
        cap = int(pltpu.get_tpu_info().vmem_capacity_bytes)
    except Exception:
        cap = 128 * 1024 * 1024
    vmem_limit = int(min(100 * 2 ** 20, (cap * 3) // 4))

    if tile_rows is None:
        tile_rows = _pick_tile_rows(H, W, C, vmem_limit)
    TH = min(tile_rows, H)
    assert H % TH == 0, f"tile_rows={TH} must divide H={H}"

    # ---- tiny conditioning math hoisted to XLA ------------------------------
    mod = jax.nn.silu(c) @ params['w_ada'] + params['b_ada']           # (B, 6C)
    mod6 = mod.reshape(B, 6, C)                                        # == chunk(6, dim=1)
    shift_msa, scale_msa = mod6[:, 0], mod6[:, 1]

    # cSE global-average-pool wrapper-side (modulate is a per-channel affine,
    # so it commutes with the mean over N) - this is what makes N-tiling
    # possible without a two-pass grid.
    mu = x.mean(-1, keepdims=True)
    var = ((x - mu) ** 2).mean(-1, keepdims=True)
    xn_mean = ((x - mu) * jax.lax.rsqrt(var + 1e-6)).mean(axis=1)      # (B, C)
    pooled = xn_mean * (1.0 + scale_msa) + shift_msa
    t = pooled @ params['wc1'] + params['bc1']
    t = jnp.where(t > 0, t, 0.01 * t)                                  # LeakyReLU(0.01)
    cse = jax.nn.sigmoid(t @ params['wc2'] + params['bc2'])            # (B, C)

    # HWIO conv weight -> folded (K*K*C, C) matrix, bf16 for the MXU.
    w_conv_folded = params['w_conv'].reshape(K * K * C, C).astype(mxu_dtype)
    w_sse_row = params['w_sse'].reshape(1, C).astype(jnp.float32)
    b_sse = params['b_sse'].reshape(1, 1).astype(jnp.float32)

    x4 = x.reshape(B, H, W, C)
    cse3 = cse.reshape(B, 1, C)

    kernel = functools.partial(fused_kernel, TH=TH, W=W, C=C, K=K, P=P)
    Wp = ((W + 2 * P + 7) // 8) * 8          # 8-sublane-aligned padded width
    grid = (B, H // TH)

    def _build(single_buffer_weights):
        def const_spec(shape):
            if single_buffer_weights:
                return pl.BlockSpec(shape, lambda b, i: (0, 0),
                                    pipeline_mode=pl.Buffered(1))
            return pl.BlockSpec(shape, lambda b, i: (0, 0))

        in_specs = [
            pl.BlockSpec((1, TH, W, C), lambda b, i: (b, i, 0, 0)),                   # x row tile
            pl.BlockSpec((1, 1, W, C),
                         lambda b, i: (b, jnp.maximum(i * TH - 1, 0), 0, 0)),         # halo row above
            pl.BlockSpec((1, 1, W, C),
                         lambda b, i: (b, jnp.minimum((i + 1) * TH, H - 1), 0, 0)),   # halo row below
            pl.BlockSpec((1, 6, C), lambda b, i: (b, 0, 0)),                          # adaLN chunks
            pl.BlockSpec((1, 1, C), lambda b, i: (b, 0, 0)),                          # cSE gate
            const_spec((1, C)),                                                       # sSE weight row
            const_spec((1, 1)),                                                       # sSE bias
            const_spec((K * K * C, C)),                                               # folded conv weight
        ]
        return pl.pallas_call(
            kernel,
            out_shape=jax.ShapeDtypeStruct((B, H, W, C), jnp.float32),
            grid=grid,
            in_specs=in_specs,
            out_specs=pl.BlockSpec((1, TH, W, C), lambda b, i: (b, i, 0, 0)),
            scratch_shapes=[pltpu.VMEM((TH + 2, Wp, C), mxu_dtype)],
            compiler_params=pltpu.CompilerParams(
                dimension_semantics=("parallel", "parallel"),
                vmem_limit_bytes=vmem_limit),
        )

    operands = (x4, x4, x4, mod6, cse3, w_sse_row, b_sse, w_conv_folded)
    try:
        out4 = _build(True)(*operands)
    except Exception:
        # pl.Buffered(1) (single-buffered resident weights) unsupported on this
        # jax version -> fall back to default double-buffered weight blocks.
        out4 = _build(False)(*operands)

    return out4.reshape(B, N, C)


# ----------------------------- reference & setup -----------------------------

def init_params(key, C, K, reduction=16):
    Cr = max(C // reduction, 1)
    ks = jax.random.split(key, 8)
    s = 0.1
    return dict(
        w_ada=jax.random.normal(ks[0], (C, 6 * C), jnp.float32) * s,
        b_ada=jax.random.normal(ks[1], (1, 6 * C), jnp.float32) * s,
        w_conv=jax.random.normal(ks[2], (K, K, C, C), jnp.float32) * s,  # HWIO
        wc1=jax.random.normal(ks[3], (C, Cr), jnp.float32) * s,
        bc1=jax.random.normal(ks[4], (1, Cr), jnp.float32) * s,
        wc2=jax.random.normal(ks[5], (Cr, C), jnp.float32) * s,
        bc2=jax.random.normal(ks[6], (1, C), jnp.float32) * s,
        w_sse=jax.random.normal(ks[7], (C, 1), jnp.float32) * s,
        b_sse=jnp.zeros((1, 1), jnp.float32),
    )


def reference_forward(x, c, params, H, W, K=3, P=1):
    B, N, C = x.shape
    mod = jax.nn.silu(c) @ params['w_ada'] + params['b_ada']
    (shift_msa, scale_msa, gate_msa,
     shift_con, scale_con, gate_con) = jnp.split(mod, 6, axis=1)

    def ln(v):
        mu = v.mean(-1, keepdims=True)
        var = ((v - mu) ** 2).mean(-1, keepdims=True)
        return (v - mu) / jnp.sqrt(var + 1e-6)

    h1 = ln(x) * (1 + scale_msa[:, None, :]) + shift_msa[:, None, :]
    pooled = h1.mean(axis=1)
    t = pooled @ params['wc1'] + params['bc1']
    t = jnp.where(t > 0, t, 0.01 * t)
    cse = jax.nn.sigmoid(t @ params['wc2'] + params['bc2'])
    sse = jax.nn.sigmoid(h1 @ params['w_sse'] + params['b_sse'])   # (B, N, 1)
    attn = h1 * cse[:, None, :] + h1 * sse
    x1 = x + gate_msa[:, None, :] * attn
    h2 = ln(x1) * (1 + scale_con[:, None, :]) + shift_con[:, None, :]
    y = jax.lax.conv_general_dilated(
        h2.reshape(B, H, W, C), params['w_conv'],
        window_strides=(1, 1), padding=((P, P), (P, P)),
        dimension_numbers=('NHWC', 'HWIO', 'NHWC')).reshape(B, N, C)
    return x1 + gate_con[:, None, :] * y


if __name__ == "__main__":
    B, C, H, W = 2, 64, 16, 16
    K, P = 3, 1
    N = H * W
    key = jax.random.PRNGKey(0)
    kx, kc, kp = jax.random.split(key, 3)
    x = jax.random.normal(kx, (B, N, C), jnp.float32)
    c = jax.random.normal(kc, (B, C), jnp.float32)
    params = init_params(kp, C, K)

    out = conv2d_adaln_forward(x, c, params, H, W, K, P, tile_rows=8)
    out = jax.block_until_ready(out)

    ref = reference_forward(x, c, params, H, W, K, P)
    err = float(jnp.max(jnp.abs(out - ref)))
    # bf16 MXU operands for the 3x3 conv -> looser tolerance than the pure-f32 path
    assert jnp.allclose(out, ref, atol=5e-2, rtol=5e-2), f"max abs err {err}"
    print("KERNEL_OK")
</pallas_src>

<mosaic_0001>
module attributes {stable_mosaic.version = 11 : i64} {
  func.func @fused_kernel(%arg0: i32, %arg1: i32, %arg2: memref<1x8x16x64xf32, #tpu.memory_space<vmem>>, %arg3: memref<1x1x16x64xf32, #tpu.memory_space<vmem>>, %arg4: memref<1x1x16x64xf32, #tpu.memory_space<vmem>>, %arg5: memref<1x6x64xf32, #tpu.memory_space<vmem>>, %arg6: memref<1x1x64xf32, #tpu.memory_space<vmem>>, %arg7: memref<1x64xf32, #tpu.memory_space<vmem>>, %arg8: memref<1x1xf32, #tpu.memory_space<vmem>>, %arg9: memref<576x64xbf16, #tpu.memory_space<vmem>>, %arg10: memref<1x8x16x64xf32, #tpu.memory_space<vmem>>, %arg11: memref<10x24x64xbf16, #tpu.memory_space<vmem>>) attributes {dimension_semantics = [#tpu.dimension_semantics<parallel>, #tpu.dimension_semantics<parallel>], iteration_bounds = array<i64: 2, 2>, scalar_prefetch = 0 : i64, scratch_operands = 1 : i64, tpu.core_type = #tpu.core_type<tc>, window_params = [{transform_indices = @transform_0, window_bounds = array<i64: 1, 8, 16, 64>}, {transform_indices = @transform_1, window_bounds = array<i64: 1, 1, 16, 64>}, {transform_indices = @transform_2, window_bounds = array<i64: 1, 1, 16, 64>}, {transform_indices = @transform_3, window_bounds = array<i64: 1, 6, 64>}, {transform_indices = @transform_4, window_bounds = array<i64: 1, 1, 64>}, {pipeline_mode = #tpu.pipeline_mode<synchronous>, transform_indices = @transform_5, window_bounds = array<i64: 1, 64>}, {pipeline_mode = #tpu.pipeline_mode<synchronous>, transform_indices = @transform_6, window_bounds = array<i64: 1, 1>}, {pipeline_mode = #tpu.pipeline_mode<synchronous>, transform_indices = @transform_7, window_bounds = array<i64: 576, 64>}, {transform_indices = @transform_8, window_bounds = array<i64: 1, 8, 16, 64>}]} {
    %c0 = arith.constant 0 : index
    %c0_0 = arith.constant 0 : index
    %c0_1 = arith.constant 0 : index
    %0 = vector.load %arg5[%c0, %c0_0, %c0_1] : memref<1x6x64xf32, #tpu.memory_space<vmem>>, vector<1x6x64xf32>
    %1 = vector.shape_cast %0 : vector<1x6x64xf32> to vector<6x64xf32>
    %2 = vector.extract_strided_slice %1 {offsets = [0, 0], sizes = [1, 64], strides = [1, 1]} : vector<6x64xf32> to vector<1x64xf32>
    %3 = vector.extract_strided_slice %1 {offsets = [1, 0], sizes = [1, 64], strides = [1, 1]} : vector<6x64xf32> to vector<1x64xf32>
    %4 = vector.extract_strided_slice %1 {offsets = [2, 0], sizes = [1, 64], strides = [1, 1]} : vector<6x64xf32> to vector<1x64xf32>
    %5 = vector.extract_strided_slice %1 {offsets = [3, 0], sizes = [1, 64], strides = [1, 1]} : vector<6x64xf32> to vector<1x64xf32>
    %6 = vector.extract_strided_slice %1 {offsets = [4, 0], sizes = [1, 64], strides = [1, 1]} : vector<6x64xf32> to vector<1x64xf32>
    %7 = vector.extract_strided_slice %1 {offsets = [5, 0], sizes = [1, 64], strides = [1, 1]} : vector<6x64xf32> to vector<1x64xf32>
    %c0_2 = arith.constant 0 : index
    %c0_3 = arith.constant 0 : index
    %c0_4 = arith.constant 0 : index
    %8 = vector.load %arg6[%c0_2, %c0_3, %c0_4] : memref<1x1x64xf32, #tpu.memory_space<vmem>>, vector<1x1x64xf32>
    %9 = vector.shape_cast %8 : vector<1x1x64xf32> to vector<1x64xf32>
    %c0_5 = arith.constant 0 : index
    %c0_6 = arith.constant 0 : index
    %c0_7 = arith.constant 0 : index
    %c0_8 = arith.constant 0 : index
    %10 = vector.load %arg3[%c0_5, %c0_6, %c0_7, %c0_8] : memref<1x1x16x64xf32, #tpu.memory_space<vmem>>, vector<1x1x16x64xf32>
    %11 = vector.shape_cast %10 : vector<1x1x16x64xf32> to vector<1x16x64xf32>
    %c0_9 = arith.constant 0 : index
    %c0_10 = arith.constant 0 : index
    %c0_11 = arith.constant 0 : index
    %c0_12 = arith.constant 0 : index
    %12 = vector.load %arg2[%c0_9, %c0_10, %c0_11, %c0_12] : memref<1x8x16x64xf32, #tpu.memory_space<vmem>>, vector<1x8x16x64xf32>
    %13 = vector.shape_cast %12 : vector<1x8x16x64xf32> to vector<8x16x64xf32>
    %c0_13 = arith.constant 0 : index
    %c0_14 = arith.constant 0 : index
    %c0_15 = arith.constant 0 : index
    %c0_16 = arith.constant 0 : index
    %14 = vector.load %arg4[%c0_13, %c0_14, %c0_15, %c0_16] : memref<1x1x16x64xf32, #tpu.memory_space<vmem>>, vector<1x1x16x64xf32>
    %15 = vector.shape_cast %14 : vector<1x1x16x64xf32> to vector<1x16x64xf32>
    %16 = tpu.concatenate %11, %13, %15 in 0 : vector<1x16x64xf32>, vector<8x16x64xf32>, vector<1x16x64xf32> -> vector<10x16x64xf32>
    %cst = arith.constant dense<0.000000e+00> : vector<10x16xf32>
    %17 = vector.multi_reduction <add>, %16, %cst [2] : vector<10x16x64xf32> to vector<10x16xf32>
    %18 = vector.shape_cast %17 : vector<10x16xf32> to vector<10x16x1xf32>
    %cst_17 = arith.constant 6.400000e+01 : f32
    %19 = vector.broadcast %cst_17 : f32 to vector<10x16x1xf32>
    %20 = arith.divf %18, %19 : vector<10x16x1xf32>
    %21 = vector.broadcast %20 : vector<10x16x1xf32> to vector<10x16x64xf32>
    %22 = arith.subf %16, %21 : vector<10x16x64xf32>
    %23 = arith.mulf %22, %22 : vector<10x16x64xf32>
    %cst_18 = arith.constant dense<0.000000e+00> : vector<10x16xf32>
    %24 = vector.multi_reduction <add>, %23, %cst_18 [2] : vector<10x16x64xf32> to vector<10x16xf32>
    %25 = vector.shape_cast %24 : vector<10x16xf32> to vector<10x16x1xf32>
    %cst_19 = arith.constant 6.400000e+01 : f32
    %26 = vector.broadcast %cst_19 : f32 to vector<10x16x1xf32>
    %27 = arith.divf %25, %26 : vector<10x16x1xf32>
    %28 = vector.broadcast %20 : vector<10x16x1xf32> to vector<10x16x64xf32>
    %29 = arith.subf %16, %28 : vector<10x16x64xf32>
    %cst_20 = arith.constant 9.99999997E-7 : f32
    %30 = vector.broadcast %cst_20 : f32 to vector<10x16x1xf32>
    %31 = arith.addf %27, %30 : vector<10x16x1xf32>
    %32 = math.rsqrt %31 : vector<10x16x1xf32>
    %33 = vector.broadcast %32 : vector<10x16x1xf32> to vector<10x16x64xf32>
    %34 = arith.mulf %29, %33 : vector<10x16x64xf32>
    %cst_21 = arith.constant 1.000000e+00 : f32
    %35 = vector.broadcast %cst_21 : f32 to vector<1x64xf32>
    %36 = arith.addf %35, %3 : vector<1x64xf32>
    %37 = vector.shape_cast %36 : vector<1x64xf32> to vector<1x1x64xf32>
    %38 = vector.broadcast %37 : vector<1x1x64xf32> to vector<10x16x64xf32>
    %39 = arith.mulf %34, %38 : vector<10x16x64xf32>
    %40 = vector.shape_cast %2 : vector<1x64xf32> to vector<1x1x64xf32>
    %41 = vector.broadcast %40 : vector<1x1x64xf32> to vector<10x16x64xf32>
    %42 = arith.addf %39, %41 : vector<10x16x64xf32>
    %c0_22 = arith.constant 0 : index
    %c0_23 = arith.constant 0 : index
    %43 = vector.load %arg7[%c0_22, %c0_23] : memref<1x64xf32, #tpu.memory_space<vmem>>, vector<1x64xf32>
    %44 = vector.shape_cast %43 : vector<1x64xf32> to vector<1x1x64xf32>
    %45 = vector.broadcast %44 : vector<1x1x64xf32> to vector<10x16x64xf32>
    %46 = arith.mulf %42, %45 : vector<10x16x64xf32>
    %cst_24 = arith.constant dense<0.000000e+00> : vector<10x16xf32>
    %47 = vector.multi_reduction <add>, %46, %cst_24 [2] : vector<10x16x64xf32> to vector<10x16xf32>
    %48 = vector.shape_cast %47 : vector<10x16xf32> to vector<10x16x1xf32>
    %c0_25 = arith.constant 0 : index
    %c0_26 = arith.constant 0 : index
    %49 = vector.load %arg8[%c0_25, %c0_26] : memref<1x1xf32, #tpu.memory_space<vmem>>, vector<1x1xf32>
    %50 = vector.shape_cast %49 : vector<1x1xf32> to vector<1x1x1xf32>
    %51 = vector.broadcast %50 : vector<1x1x1xf32> to vector<10x16x1xf32>
    %52 = arith.addf %48, %51 : vector<10x16x1xf32>
    %53 = arith.negf %52 : vector<10x16x1xf32>
    %54 = math.exp %53 : vector<10x16x1xf32>
    %cst_27 = arith.constant 1.000000e+00 : f32
    %55 = vector.broadcast %cst_27 : f32 to vector<10x16x1xf32>
    %56 = arith.addf %55, %54 : vector<10x16x1xf32>
    %57 = arith.divf %55, %56 : vector<10x16x1xf32>
    %58 = vector.shape_cast %9 : vector<1x64xf32> to vector<1x1x64xf32>
    %59 = vector.broadcast %58 : vector<1x1x64xf32> to vector<10x16x64xf32>
    %60 = vector.broadcast %57 : vector<10x16x1xf32> to vector<10x16x64xf32>
    %61 = arith.addf %59, %60 : vector<10x16x64xf32>
    %62 = arith.mulf %42, %61 : vector<10x16x64xf32>
    %63 = vector.shape_cast %4 : vector<1x64xf32> to vector<1x1x64xf32>
    %64 = vector.broadcast %63 : vector<1x1x64xf32> to vector<10x16x64xf32>
    %65 = arith.mulf %64, %62 : vector<10x16x64xf32>
    %66 = arith.addf %16, %65 : vector<10x16x64xf32>
    %cst_28 = arith.constant dense<0.000000e+00> : vector<10x16xf32>
    %67 = vector.multi_reduction <add>, %66, %cst_28 [2] : vector<10x16x64xf32> to vector<10x16xf32>
    %68 = vector.shape_cast %67 : vector<10x16xf32> to vector<10x16x1xf32>
    %cst_29 = arith.constant 6.400000e+01 : f32
    %69 = vector.broadcast %cst_29 : f32 to vector<10x16x1xf32>
    %70 = arith.divf %68, %69 : vector<10x16x1xf32>
    %71 = vector.broadcast %70 : vector<10x16x1xf32> to vector<10x16x64xf32>
    %72 = arith.subf %66, %71 : vector<10x16x64xf32>
    %73 = arith.mulf %72, %72 : vector<10x16x64xf32>
    %cst_30 = arith.constant dense<0.000000e+00> : vector<10x16xf32>
    %74 = vector.multi_reduction <add>, %73, %cst_30 [2] : vector<10x16x64xf32> to vector<10x16xf32>
    %75 = vector.shape_cast %74 : vector<10x16xf32> to vector<10x16x1xf32>
    %cst_31 = arith.constant 6.400000e+01 : f32
    %76 = vector.broadcast %cst_31 : f32 to vector<10x16x1xf32>
    %77 = arith.divf %75, %76 : vector<10x16x1xf32>
    %78 = vector.broadcast %70 : vector<10x16x1xf32> to vector<10x16x64xf32>
    %79 = arith.subf %66, %78 : vector<10x16x64xf32>
    %cst_32 = arith.constant 9.99999997E-7 : f32
    %80 = vector.broadcast %cst_32 : f32 to vector<10x16x1xf32>
    %81 = arith.addf %77, %80 : vector<10x16x1xf32>
    %82 = math.rsqrt %81 : vector<10x16x1xf32>
    %83 = vector.broadcast %82 : vector<10x16x1xf32> to vector<10x16x64xf32>
    %84 = arith.mulf %79, %83 : vector<10x16x64xf32>
    %cst_33 = arith.constant 1.000000e+00 : f32
    %85 = vector.broadcast %cst_33 : f32 to vector<1x64xf32>
    %86 = arith.addf %85, %6 : vector<1x64xf32>
    %87 = vector.shape_cast %86 : vector<1x64xf32> to vector<1x1x64xf32>
    %88 = vector.broadcast %87 : vector<1x1x64xf32> to vector<10x16x64xf32>
    %89 = arith.mulf %84, %88 : vector<10x16x64xf32>
    %90 = vector.shape_cast %5 : vector<1x64xf32> to vector<1x1x64xf32>
    %91 = vector.broadcast %90 : vector<1x1x64xf32> to vector<10x16x64xf32>
    %92 = arith.addf %89, %91 : vector<10x16x64xf32>
    %93 = tpu.iota {dimensions = array<i32: 0>} : vector<10x1x1xi32>
    %c0_i32 = arith.constant 0 : i32
    %94 = vector.broadcast %c0_i32 : i32 to vector<10x1x1xi32>
    %95 = arith.cmpi sgt, %93, %94 : vector<10x1x1xi32>
    %c0_i32_34 = arith.constant 0 : i32
    %96 = arith.cmpi sgt, %arg1, %c0_i32_34 : i32
    %97 = vector.broadcast %96 : i1 to vector<10x1x1xi1>
    %98 = arith.ori %95, %97 : vector<10x1x1xi1>
    %c8_i32 = arith.constant 8 : i32
    %99 = vector.broadcast %c8_i32 : i32 to vector<10x1x1xi32>
    %100 = arith.cmpi sle, %93, %99 : vector<10x1x1xi32>
    %c1_i32 = arith.constant 1 : i32
    %101 = arith.cmpi slt, %arg1, %c1_i32 : i32
    %102 = vector.broadcast %101 : i1 to vector<10x1x1xi1>
    %103 = arith.ori %100, %102 : vector<10x1x1xi1>
    %104 = arith.andi %98, %103 : vector<10x1x1xi1>
    %cst_35 = arith.constant 0.000000e+00 : f32
    %105 = vector.shape_cast %104 : vector<10x1x1xi1> to vector<10x1x1xi1>
    %106 = vector.broadcast %105 : vector<10x1x1xi1> to vector<10x16x64xi1>
    %107 = vector.broadcast %cst_35 : f32 to vector<10x16x64xf32>
    %108 = arith.select %106, %92, %107 : vector<10x16x64xi1>, vector<10x16x64xf32>
    %cst_36 = arith.constant 0.000000e+00 : bf16
    %109 = vector.broadcast %cst_36 : bf16 to vector<10x1x64xbf16>
    %c0_37 = arith.constant 0 : index
    %c0_38 = arith.constant 0 : index
    %c0_39 = arith.constant 0 : index
    %110 = vector.load %arg11[%c0_37, %c0_38, %c0_39] : memref<10x24x64xbf16, #tpu.memory_space<vmem>>, vector<10x1x64xbf16>
    tpu.vector_store %arg11[%c0_37, %c0_38, %c0_39], %109 {strides = array<i32>} : memref<10x24x64xbf16, #tpu.memory_space<vmem>>, vector<10x1x64xbf16>,
    %c0_40 = arith.constant 0 : index
    %c17 = arith.constant 17 : index
    %c0_41 = arith.constant 0 : index
    %111 = vector.load %arg11[%c0_40, %c17, %c0_41] : memref<10x24x64xbf16, #tpu.memory_space<vmem>>, vector<10x1x64xbf16>
    tpu.vector_store %arg11[%c0_40, %c17, %c0_41], %109 {strides = array<i32>} : memref<10x24x64xbf16, #tpu.memory_space<vmem>>, vector<10x1x64xbf16>,
    %112 = arith.truncf %108 : vector<10x16x64xf32> to vector<10x16x64xbf16>
    %c0_42 = arith.constant 0 : index
    %c1 = arith.constant 1 : index
    %c0_43 = arith.constant 0 : index
    %113 = vector.load %arg11[%c0_42, %c1, %c0_43] : memref<10x24x64xbf16, #tpu.memory_space<vmem>>, vector<10x16x64xbf16>
    tpu.vector_store %arg11[%c0_42, %c1, %c0_43], %112 {strides = array<i32>} : memref<10x24x64xbf16, #tpu.memory_space<vmem>>, vector<10x16x64xbf16>,
    %c0_44 = arith.constant 0 : index
    %c0_45 = arith.constant 0 : index
    %c0_46 = arith.constant 0 : index
    %114 = vector.load %arg11[%c0_44, %c0_45, %c0_46] : memref<10x24x64xbf16, #tpu.memory_space<vmem>>, vector<8x16x64xbf16>
    %115 = vector.shape_cast %114 : vector<8x16x64xbf16> to vector<128x64xbf16>
    %c0_47 = arith.constant 0 : index
    %c1_48 = arith.constant 1 : index
    %c0_49 = arith.constant 0 : index
    %116 = vector.load %arg11[%c0_47, %c1_48, %c0_49] : memref<10x24x64xbf16, #tpu.memory_space<vmem>>, vector<8x16x64xbf16>
    %117 = vector.shape_cast %116 : vector<8x16x64xbf16> to vector<128x64xbf16>
    %c0_50 = arith.constant 0 : index
    %c2 = arith.constant 2 : index
    %c0_51 = arith.constant 0 : index
    %118 = vector.load %arg11[%c0_50, %c2, %c0_51] : memref<10x24x64xbf16, #tpu.memory_space<vmem>>, vector<8x16x64xbf16>
    %119 = vector.shape_cast %118 : vector<8x16x64xbf16> to vector<128x64xbf16>
    %c1_52 = arith.constant 1 : index
    %c0_53 = arith.constant 0 : index
    %c0_54 = arith.constant 0 : index
    %120 = vector.load %arg11[%c1_52, %c0_53, %c0_54] : memref<10x24x64xbf16, #tpu.memory_space<vmem>>, vector<8x16x64xbf16>
    %121 = vector.shape_cast %120 : vector<8x16x64xbf16> to vector<128x64xbf16>
    %c1_55 = arith.constant 1 : index
    %c1_56 = arith.constant 1 : index
    %c0_57 = arith.constant 0 : index
    %122 = vector.load %arg11[%c1_55, %c1_56, %c0_57] : memref<10x24x64xbf16, #tpu.memory_space<vmem>>, vector<8x16x64xbf16>
    %123 = vector.shape_cast %122 : vector<8x16x64xbf16> to vector<128x64xbf16>
    %c1_58 = arith.constant 1 : index
    %c2_59 = arith.constant 2 : index
    %c0_60 = arith.constant 0 : index
    %124 = vector.load %arg11[%c1_58, %c2_59, %c0_60] : memref<10x24x64xbf16, #tpu.memory_space<vmem>>, vector<8x16x64xbf16>
    %125 = vector.shape_cast %124 : vector<8x16x64xbf16> to vector<128x64xbf16>
    %c2_61 = arith.constant 2 : index
    %c0_62 = arith.constant 0 : index
    %c0_63 = arith.constant 0 : index
    %126 = vector.load %arg11[%c2_61, %c0_62, %c0_63] : memref<10x24x64xbf16, #tpu.memory_space<vmem>>, vector<8x16x64xbf16>
    %127 = vector.shape_cast %126 : vector<8x16x64xbf16> to vector<128x64xbf16>
    %c2_64 = arith.constant 2 : index
    %c1_65 = arith.constant 1 : index
    %c0_66 = arith.constant 0 : index
    %128 = vector.load %arg11[%c2_64, %c1_65, %c0_66] : memref<10x24x64xbf16, #tpu.memory_space<vmem>>, vector<8x16x64xbf16>
    %129 = vector.shape_cast %128 : vector<8x16x64xbf16> to vector<128x64xbf16>
    %c2_67 = arith.constant 2 : index
    %c2_68 = arith.constant 2 : index
    %c0_69 = arith.constant 0 : index
    %130 = vector.load %arg11[%c2_67, %c2_68, %c0_69] : memref<10x24x64xbf16, #tpu.memory_space<vmem>>, vector<8x16x64xbf16>
    %131 = vector.shape_cast %130 : vector<8x16x64xbf16> to vector<128x64xbf16>
    %132 = tpu.concatenate %115, %117, %119, %121, %123, %125, %127, %129, %131 in 1 : vector<128x64xbf16>, vector<128x64xbf16>, vector<128x64xbf16>, vector<128x64xbf16>, vector<128x64xbf16>, vector<128x64xbf16>, vector<128x64xbf16>, vector<128x64xbf16>, vector<128x64xbf16> -> vector<128x576xbf16>
    %c0_70 = arith.constant 0 : index
    %c0_71 = arith.constant 0 : index
    %133 = vector.load %arg9[%c0_70, %c0_71] : memref<576x64xbf16, #tpu.memory_space<vmem>>, vector<576x64xbf16>
    %cst_72 = arith.constant dense<0.000000e+00> : vector<128x64xf32>
    %134 = tpu.matmul %132, %133, %cst_72 {dimension_numbers = #tpu.dot_dimension_numbers<[1], [0], [0], [1], [0, 0, 1, 1], [], []>} : vector<128x576xbf16>, vector<576x64xbf16>, vector<128x64xf32> -> vector<128x64xf32>
    %135 = vector.shape_cast %134 : vector<128x64xf32> to vector<8x16x64xf32>
    %136 = vector.extract_strided_slice %66 {offsets = [1, 0, 0], sizes = [8, 16, 64], strides = [1, 1, 1]} : vector<10x16x64xf32> to vector<8x16x64xf32>
    %137 = vector.shape_cast %7 : vector<1x64xf32> to vector<1x1x64xf32>
    %138 = vector.broadcast %137 : vector<1x1x64xf32> to vector<8x16x64xf32>
    %139 = arith.mulf %138, %135 : vector<8x16x64xf32>
    %140 = arith.addf %136, %139 : vector<8x16x64xf32>
    %c0_73 = arith.constant 0 : index
    %c0_74 = arith.constant 0 : index
    %c0_75 = arith.constant 0 : index
    %c0_76 = arith.constant 0 : index
    %141 = vector.load %arg10[%c0_73, %c0_74, %c0_75, %c0_76] : memref<1x8x16x64xf32, #tpu.memory_space<vmem>>, vector<1x8x16x64xf32>
    %142 = vector.shape_cast %141 : vector<1x8x16x64xf32> to vector<8x16x64xf32>
    %143 = vector.shape_cast %140 : vector<8x16x64xf32> to vector<1x8x16x64xf32>
    tpu.vector_store %arg10[%c0_73, %c0_74, %c0_75, %c0_76], %143 {strides = array<i32>} : memref<1x8x16x64xf32, #tpu.memory_space<vmem>>, vector<1x8x16x64xf32>,
    return
  }
  func.func @transform_0(%arg0: i32, %arg1: i32) -> (i32, i32, i32, i32) {
    %c0_i32 = arith.constant 0 : i32
    %c0_i32_0 = arith.constant 0 : i32
    %c0_i32_1 = arith.constant 0 : i32
    return %arg0, %arg1, %c0_i32, %c0_i32_0 : i32, i32, i32, i32
  }
  func.func @transform_1(%arg0: i32, %arg1: i32) -> (i32, i32, i32, i32) {
    %c8_i32 = arith.constant 8 : i32
    %0 = arith.muli %arg1, %c8_i32 : i32
    %c1_i32 = arith.constant 1 : i32
    %1 = arith.subi %0, %c1_i32 : i32
    %c0_i32 = arith.constant 0 : i32
    %2 = arith.maxsi %1, %c0_i32 : i32
    %c0_i32_0 = arith.constant 0 : i32
    %c0_i32_1 = arith.constant 0 : i32
    %c0_i32_2 = arith.constant 0 : i32
    return %arg0, %2, %c0_i32_0, %c0_i32_1 : i32, i32, i32, i32
  }
  func.func @transform_2(%arg0: i32, %arg1: i32) -> (i32, i32, i32, i32) {
    %c1_i32 = arith.constant 1 : i32
    %0 = arith.addi %arg1, %c1_i32 : i32
    %c8_i32 = arith.constant 8 : i32
    %1 = arith.muli %0, %c8_i32 : i32
    %c15_i32 = arith.constant 15 : i32
    %2 = arith.minsi %1, %c15_i32 : i32
    %c0_i32 = arith.constant 0 : i32
    %c0_i32_0 = arith.constant 0 : i32
    %c0_i32_1 = arith.constant 0 : i32
    return %arg0, %2, %c0_i32, %c0_i32_0 : i32, i32, i32, i32
  }
  func.func @transform_3(%arg0: i32, %arg1: i32) -> (i32, i32, i32) {
    %c0_i32 = arith.constant 0 : i32
    %c0_i32_0 = arith.constant 0 : i32
    %c0_i32_1 = arith.constant 0 : i32
    return %arg0, %c0_i32, %c0_i32_0 : i32, i32, i32
  }
  func.func @transform_4(%arg0: i32, %arg1: i32) -> (i32, i32, i32) {
    %c0_i32 = arith.constant 0 : i32
    %c0_i32_0 = arith.constant 0 : i32
    %c0_i32_1 = arith.constant 0 : i32
    return %arg0, %c0_i32, %c0_i32_0 : i32, i32, i32
  }
  func.func @transform_5(%arg0: i32, %arg1: i32) -> (i32, i32) {
    %c0_i32 = arith.constant 0 : i32
    %c0_i32_0 = arith.constant 0 : i32
    %c0_i32_1 = arith.constant 0 : i32
    return %c0_i32, %c0_i32_0 : i32, i32
  }
  func.func @transform_6(%arg0: i32, %arg1: i32) -> (i32, i32) {
    %c0_i32 = arith.constant 0 : i32
    %c0_i32_0 = arith.constant 0 : i32
    %c0_i32_1 = arith.constant 0 : i32
    return %c0_i32, %c0_i32_0 : i32, i32
  }
  func.func @transform_7(%arg0: i32, %arg1: i32) -> (i32, i32) {
    %c0_i32 = arith.constant 0 : i32
    %c0_i32_0 = arith.constant 0 : i32
    %c0_i32_1 = arith.constant 0 : i32
    return %c0_i32, %c0_i32_0 : i32, i32
  }
  func.func @transform_8(%arg0: i32, %arg1: i32) -> (i32, i32, i32, i32) {
    %c0_i32 = arith.constant 0 : i32
    %c0_i32_0 = arith.constant 0 : i32
    %c0_i32_1 = arith.constant 0 : i32
    return %arg0, %arg1, %c0_i32, %c0_i32_0 : i32, i32, i32, i32
  }
}

module attributes {stable_mosaic.version = 11 : i64} {
  func.func @fused_kernel(%arg0: i32, %arg1: i32, %arg2: memref<1x8x16x64xf32, #tpu.memory_space<vmem>>, %arg3: memref<1x1x16x64xf32, #tpu.memory_space<vmem>>, %arg4: memref<1x1x16x64xf32, #tpu.memory_space<vmem>>, %arg5: memref<1x6x64xf32, #tpu.memory_space<vmem>>, %arg6: memref<1x1x64xf32, #tpu.memory_space<vmem>>, %arg7: memref<1x64xf32, #tpu.memory_space<vmem>>, %arg8: memref<1x1xf32, #tpu.memory_space<vmem>>, %arg9: memref<576x64xbf16, #tpu.memory_space<vmem>>, %arg10: memref<1x8x16x64xf32, #tpu.memory_space<vmem>>, %arg11: memref<10x24x64xbf16, #tpu.memory_space<vmem>>) attributes {dimension_semantics = [#tpu.dimension_semantics<parallel>, #tpu.dimension_semantics<parallel>], iteration_bounds = array<i64: 2, 2>, scalar_prefetch = 0 : i64, scratch_operands = 1 : i64, tpu.core_type = #tpu.core_type<tc>, window_params = [{transform_indices = @transform_0, window_bounds = array<i64: 1, 8, 16, 64>}, {transform_indices = @transform_1, window_bounds = array<i64: 1, 1, 16, 64>}, {transform_indices = @transform_2, window_bounds = array<i64: 1, 1, 16, 64>}, {transform_indices = @transform_3, window_bounds = array<i64: 1, 6, 64>}, {transform_indices = @transform_4, window_bounds = array<i64: 1, 1, 64>}, {pipeline_mode = #tpu.pipeline_mode<synchronous>, transform_indices = @transform_5, window_bounds = array<i64: 1, 64>}, {pipeline_mode = #tpu.pipeline_mode<synchronous>, transform_indices = @transform_6, window_bounds = array<i64: 1, 1>}, {pipeline_mode = #tpu.pipeline_mode<synchronous>, transform_indices = @transform_7, window_bounds = array<i64: 576, 64>}, {transform_indices = @transform_8, window_bounds = array<i64: 1, 8, 16, 64>}]} {
    %c0 = arith.constant 0 : index
    %c0_0 = arith.constant 0 : index
    %c0_1 = arith.constant 0 : index
    %0 = vector.load %arg5[%c0, %c0_0, %c0_1] : memref<1x6x64xf32, #tpu.memory_space<vmem>>, vector<1x6x64xf32>
    %1 = vector.shape_cast %0 : vector<1x6x64xf32> to vector<6x64xf32>
    %2 = vector.extract_strided_slice %1 {offsets = [0, 0], sizes = [1, 64], strides = [1, 1]} : vector<6x64xf32> to vector<1x64xf32>
    %3 = vector.extract_strided_slice %1 {offsets = [1, 0], sizes = [1, 64], strides = [1, 1]} : vector<6x64xf32> to vector<1x64xf32>
    %4 = vector.extract_strided_slice %1 {offsets = [2, 0], sizes = [1, 64], strides = [1, 1]} : vector<6x64xf32> to vector<1x64xf32>
    %5 = vector.extract_strided_slice %1 {offsets = [3, 0], sizes = [1, 64], strides = [1, 1]} : vector<6x64xf32> to vector<1x64xf32>
    %6 = vector.extract_strided_slice %1 {offsets = [4, 0], sizes = [1, 64], strides = [1, 1]} : vector<6x64xf32> to vector<1x64xf32>
    %7 = vector.extract_strided_slice %1 {offsets = [5, 0], sizes = [1, 64], strides = [1, 1]} : vector<6x64xf32> to vector<1x64xf32>
    %c0_2 = arith.constant 0 : index
    %c0_3 = arith.constant 0 : index
    %c0_4 = arith.constant 0 : index
    %8 = vector.load %arg6[%c0_2, %c0_3, %c0_4] : memref<1x1x64xf32, #tpu.memory_space<vmem>>, vector<1x1x64xf32>
    %9 = vector.shape_cast %8 : vector<1x1x64xf32> to vector<1x64xf32>
    %c0_5 = arith.constant 0 : index
    %c0_6 = arith.constant 0 : index
    %c0_7 = arith.constant 0 : index
    %c0_8 = arith.constant 0 : index
    %10 = vector.load %arg3[%c0_5, %c0_6, %c0_7, %c0_8] : memref<1x1x16x64xf32, #tpu.memory_space<vmem>>, vector<1x1x16x64xf32>
    %11 = vector.shape_cast %10 : vector<1x1x16x64xf32> to vector<1x16x64xf32>
    %c0_9 = arith.constant 0 : index
    %c0_10 = arith.constant 0 : index
    %c0_11 = arith.constant 0 : index
    %c0_12 = arith.constant 0 : index
    %12 = vector.load %arg2[%c0_9, %c0_10, %c0_11, %c0_12] : memref<1x8x16x64xf32, #tpu.memory_space<vmem>>, vector<1x8x16x64xf32>
    %13 = vector.shape_cast %12 : vector<1x8x16x64xf32> to vector<8x16x64xf32>
    %c0_13 = arith.constant 0 : index
    %c0_14 = arith.constant 0 : index
    %c0_15 = arith.constant 0 : index
    %c0_16 = arith.constant 0 : index
    %14 = vector.load %arg4[%c0_13, %c0_14, %c0_15, %c0_16] : memref<1x1x16x64xf32, #tpu.memory_space<vmem>>, vector<1x1x16x64xf32>
    %15 = vector.shape_cast %14 : vector<1x1x16x64xf32> to vector<1x16x64xf32>
    %16 = tpu.concatenate %11, %13, %15 in 0 : vector<1x16x64xf32>, vector<8x16x64xf32>, vector<1x16x64xf32> -> vector<10x16x64xf32>
    %cst = arith.constant dense<0.000000e+00> : vector<10x16xf32>
    %17 = vector.multi_reduction <add>, %16, %cst [2] : vector<10x16x64xf32> to vector<10x16xf32>
    %18 = vector.shape_cast %17 : vector<10x16xf32> to vector<10x16x1xf32>
    %cst_17 = arith.constant 6.400000e+01 : f32
    %19 = vector.broadcast %cst_17 : f32 to vector<10x16x1xf32>
    %20 = arith.divf %18, %19 : vector<10x16x1xf32>
    %21 = vector.broadcast %20 : vector<10x16x1xf32> to vector<10x16x64xf32>
    %22 = arith.subf %16, %21 : vector<10x16x64xf32>
    %23 = arith.mulf %22, %22 : vector<10x16x64xf32>
    %cst_18 = arith.constant dense<0.000000e+00> : vector<10x16xf32>
    %24 = vector.multi_reduction <add>, %23, %cst_18 [2] : vector<10x16x64xf32> to vector<10x16xf32>
    %25 = vector.shape_cast %24 : vector<10x16xf32> to vector<10x16x1xf32>
    %cst_19 = arith.constant 6.400000e+01 : f32
    %26 = vector.broadcast %cst_19 : f32 to vector<10x16x1xf32>
    %27 = arith.divf %25, %26 : vector<10x16x1xf32>
    %28 = vector.broadcast %20 : vector<10x16x1xf32> to vector<10x16x64xf32>
    %29 = arith.subf %16, %28 : vector<10x16x64xf32>
    %cst_20 = arith.constant 9.99999997E-7 : f32
    %30 = vector.broadcast %cst_20 : f32 to vector<10x16x1xf32>
    %31 = arith.addf %27, %30 : vector<10x16x1xf32>
    %32 = math.rsqrt %31 : vector<10x16x1xf32>
    %33 = vector.broadcast %32 : vector<10x16x1xf32> to vector<10x16x64xf32>
    %34 = arith.mulf %29, %33 : vector<10x16x64xf32>
    %cst_21 = arith.constant 1.000000e+00 : f32
    %35 = vector.broadcast %cst_21 : f32 to vector<1x64xf32>
    %36 = arith.addf %35, %3 : vector<1x64xf32>
    %37 = vector.shape_cast %36 : vector<1x64xf32> to vector<1x1x64xf32>
    %38 = vector.broadcast %37 : vector<1x1x64xf32> to vector<10x16x64xf32>
    %39 = arith.mulf %34, %38 : vector<10x16x64xf32>
    %40 = vector.shape_cast %2 : vector<1x64xf32> to vector<1x1x64xf32>
    %41 = vector.broadcast %40 : vector<1x1x64xf32> to vector<10x16x64xf32>
    %42 = arith.addf %39, %41 : vector<10x16x64xf32>
    %c0_22 = arith.constant 0 : index
    %c0_23 = arith.constant 0 : index
    %43 = vector.load %arg7[%c0_22, %c0_23] : memref<1x64xf32, #tpu.memory_space<vmem>>, vector<1x64xf32>
    %44 = vector.shape_cast %43 : vector<1x64xf32> to vector<1x1x64xf32>
    %45 = vector.broadcast %44 : vector<1x1x64xf32> to vector<10x16x64xf32>
    %46 = arith.mulf %42, %45 : vector<10x16x64xf32>
    %cst_24 = arith.constant dense<0.000000e+00> : vector<10x16xf32>
    %47 = vector.multi_reduction <add>, %46, %cst_24 [2] : vector<10x16x64xf32> to vector<10x16xf32>
    %48 = vector.shape_cast %47 : vector<10x16xf32> to vector<10x16x1xf32>
    %c0_25 = arith.constant 0 : index
    %c0_26 = arith.constant 0 : index
    %49 = vector.load %arg8[%c0_25, %c0_26] : memref<1x1xf32, #tpu.memory_space<vmem>>, vector<1x1xf32>
    %50 = vector.shape_cast %49 : vector<1x1xf32> to vector<1x1x1xf32>
    %51 = vector.broadcast %50 : vector<1x1x1xf32> to vector<10x16x1xf32>
    %52 = arith.addf %48, %51 : vector<10x16x1xf32>
    %53 = arith.negf %52 : vector<10x16x1xf32>
    %54 = math.exp %53 : vector<10x16x1xf32>
    %cst_27 = arith.constant 1.000000e+00 : f32
    %55 = vector.broadcast %cst_27 : f32 to vector<10x16x1xf32>
    %56 = arith.addf %55, %54 : vector<10x16x1xf32>
    %57 = arith.divf %55, %56 : vector<10x16x1xf32>
    %58 = vector.shape_cast %9 : vector<1x64xf32> to vector<1x1x64xf32>
    %59 = vector.broadcast %58 : vector<1x1x64xf32> to vector<10x16x64xf32>
    %60 = vector.broadcast %57 : vector<10x16x1xf32> to vector<10x16x64xf32>
    %61 = arith.addf %59, %60 : vector<10x16x64xf32>
    %62 = arith.mulf %42, %61 : vector<10x16x64xf32>
    %63 = vector.shape_cast %4 : vector<1x64xf32> to vector<1x1x64xf32>
    %64 = vector.broadcast %63 : vector<1x1x64xf32> to vector<10x16x64xf32>
    %65 = arith.mulf %64, %62 : vector<10x16x64xf32>
    %66 = arith.addf %16, %65 : vector<10x16x64xf32>
    %cst_28 = arith.constant dense<0.000000e+00> : vector<10x16xf32>
    %67 = vector.multi_reduction <add>, %66, %cst_28 [2] : vector<10x16x64xf32> to vector<10x16xf32>
    %68 = vector.shape_cast %67 : vector<10x16xf32> to vector<10x16x1xf32>
    %cst_29 = arith.constant 6.400000e+01 : f32
    %69 = vector.broadcast %cst_29 : f32 to vector<10x16x1xf32>
    %70 = arith.divf %68, %69 : vector<10x16x1xf32>
    %71 = vector.broadcast %70 : vector<10x16x1xf32> to vector<10x16x64xf32>
    %72 = arith.subf %66, %71 : vector<10x16x64xf32>
    %73 = arith.mulf %72, %72 : vector<10x16x64xf32>
    %cst_30 = arith.constant dense<0.000000e+00> : vector<10x16xf32>
    %74 = vector.multi_reduction <add>, %73, %cst_30 [2] : vector<10x16x64xf32> to vector<10x16xf32>
    %75 = vector.shape_cast %74 : vector<10x16xf32> to vector<10x16x1xf32>
    %cst_31 = arith.constant 6.400000e+01 : f32
    %76 = vector.broadcast %cst_31 : f32 to vector<10x16x1xf32>
    %77 = arith.divf %75, %76 : vector<10x16x1xf32>
    %78 = vector.broadcast %70 : vector<10x16x1xf32> to vector<10x16x64xf32>
    %79 = arith.subf %66, %78 : vector<10x16x64xf32>
    %cst_32 = arith.constant 9.99999997E-7 : f32
    %80 = vector.broadcast %cst_32 : f32 to vector<10x16x1xf32>
    %81 = arith.addf %77, %80 : vector<10x16x1xf32>
    %82 = math.rsqrt %81 : vector<10x16x1xf32>
    %83 = vector.broadcast %82 : vector<10x16x1xf32> to vector<10x16x64xf32>
    %84 = arith.mulf %79, %83 : vector<10x16x64xf32>
    %cst_33 = arith.constant 1.000000e+00 : f32
    %85 = vector.broadcast %cst_33 : f32 to vector<1x64xf32>
    %86 = arith.addf %85, %6 : vector<1x64xf32>
    %87 = vector.shape_cast %86 : vector<1x64xf32> to vector<1x1x64xf32>
    %88 = vector.broadcast %87 : vector<1x1x64xf32> to vector<10x16x64xf32>
    %89 = arith.mulf %84, %88 : vector<10x16x64xf32>
    %90 = vector.shape_cast %5 : vector<1x64xf32> to vector<1x1x64xf32>
    %91 = vector.broadcast %90 : vector<1x1x64xf32> to vector<10x16x64xf32>
    %92 = arith.addf %89, %91 : vector<10x16x64xf32>
    %93 = tpu.iota {dimensions = array<i32: 0>} : vector<10x1x1xi32>
    %c0_i32 = arith.constant 0 : i32
    %94 = vector.broadcast %c0_i32 : i32 to vector<10x1x1xi32>
    %95 = arith.cmpi sgt, %93, %94 : vector<10x1x1xi32>
    %c0_i32_34 = arith.constant 0 : i32
    %96 = arith.cmpi sgt, %arg1, %c0_i32_34 : i32
    %97 = vector.broadcast %96 : i1 to vector<10x1x1xi1>
    %98 = arith.ori %95, %97 : vector<10x1x1xi1>
    %c8_i32 = arith.constant 8 : i32
    %99 = vector.broadcast %c8_i32 : i32 to vector<10x1x1xi32>
    %100 = arith.cmpi sle, %93, %99 : vector<10x1x1xi32>
    %c1_i32 = arith.constant 1 : i32
    %101 = arith.cmpi slt, %arg1, %c1_i32 : i32
    %102 = vector.broadcast %101 : i1 to vector<10x1x1xi1>
    %103 = arith.ori %100, %102 : vector<10x1x1xi1>
    %104 = arith.andi %98, %103 : vector<10x1x1xi1>
    %cst_35 = arith.constant 0.000000e+00 : f32
    %105 = vector.shape_cast %104 : vector<10x1x1xi1> to vector<10x1x1xi1>
    %106 = vector.broadcast %105 : vector<10x1x1xi1> to vector<10x16x64xi1>
    %107 = vector.broadcast %cst_35 : f32 to vector<10x16x64xf32>
    %108 = arith.select %106, %92, %107 : vector<10x16x64xi1>, vector<10x16x64xf32>
    %cst_36 = arith.constant 0.000000e+00 : bf16
    %109 = vector.broadcast %cst_36 : bf16 to vector<10x1x64xbf16>
    %c0_37 = arith.constant 0 : index
    %c0_38 = arith.constant 0 : index
    %c0_39 = arith.constant 0 : index
    %110 = vector.load %arg11[%c0_37, %c0_38, %c0_39] : memref<10x24x64xbf16, #tpu.memory_space<vmem>>, vector<10x1x64xbf16>
    tpu.vector_store %arg11[%c0_37, %c0_38, %c0_39], %109 {strides = array<i32>} : memref<10x24x64xbf16, #tpu.memory_space<vmem>>, vector<10x1x64xbf16>,
    %c0_40 = arith.constant 0 : index
    %c17 = arith.constant 17 : index
    %c0_41 = arith.constant 0 : index
    %111 = vector.load %arg11[%c0_40, %c17, %c0_41] : memref<10x24x64xbf16, #tpu.memory_space<vmem>>, vector<10x1x64xbf16>
    tpu.vector_store %arg11[%c0_40, %c17, %c0_41], %109 {strides = array<i32>} : memref<10x24x64xbf16, #tpu.memory_space<vmem>>, vector<10x1x64xbf16>,
    %112 = arith.truncf %108 : vector<10x16x64xf32> to vector<10x16x64xbf16>
    %c0_42 = arith.constant 0 : index
    %c1 = arith.constant 1 : index
    %c0_43 = arith.constant 0 : index
    %113 = vector.load %arg11[%c0_42, %c1, %c0_43] : memref<10x24x64xbf16, #tpu.memory_space<vmem>>, vector<10x16x64xbf16>
    tpu.vector_store %arg11[%c0_42, %c1, %c0_43], %112 {strides = array<i32>} : memref<10x24x64xbf16, #tpu.memory_space<vmem>>, vector<10x16x64xbf16>,
    %c0_44 = arith.constant 0 : index
    %c0_45 = arith.constant 0 : index
    %c0_46 = arith.constant 0 : index
    %114 = vector.load %arg11[%c0_44, %c0_45, %c0_46] : memref<10x24x64xbf16, #tpu.memory_space<vmem>>, vector<8x16x64xbf16>
    %115 = vector.shape_cast %114 : vector<8x16x64xbf16> to vector<128x64xbf16>
    %c0_47 = arith.constant 0 : index
    %c1_48 = arith.constant 1 : index
    %c0_49 = arith.constant 0 : index
    %116 = vector.load %arg11[%c0_47, %c1_48, %c0_49] : memref<10x24x64xbf16, #tpu.memory_space<vmem>>, vector<8x16x64xbf16>
    %117 = vector.shape_cast %116 : vector<8x16x64xbf16> to vector<128x64xbf16>
    %c0_50 = arith.constant 0 : index
    %c2 = arith.constant 2 : index
    %c0_51 = arith.constant 0 : index
    %118 = vector.load %arg11[%c0_50, %c2, %c0_51] : memref<10x24x64xbf16, #tpu.memory_space<vmem>>, vector<8x16x64xbf16>
    %119 = vector.shape_cast %118 : vector<8x16x64xbf16> to vector<128x64xbf16>
    %c1_52 = arith.constant 1 : index
    %c0_53 = arith.constant 0 : index
    %c0_54 = arith.constant 0 : index
    %120 = vector.load %arg11[%c1_52, %c0_53, %c0_54] : memref<10x24x64xbf16, #tpu.memory_space<vmem>>, vector<8x16x64xbf16>
    %121 = vector.shape_cast %120 : vector<8x16x64xbf16> to vector<128x64xbf16>
    %c1_55 = arith.constant 1 : index
    %c1_56 = arith.constant 1 : index
    %c0_57 = arith.constant 0 : index
    %122 = vector.load %arg11[%c1_55, %c1_56, %c0_57] : memref<10x24x64xbf16, #tpu.memory_space<vmem>>, vector<8x16x64xbf16>
    %123 = vector.shape_cast %122 : vector<8x16x64xbf16> to vector<128x64xbf16>
    %c1_58 = arith.constant 1 : index
    %c2_59 = arith.constant 2 : index
    %c0_60 = arith.constant 0 : index
    %124 = vector.load %arg11[%c1_58, %c2_59, %c0_60] : memref<10x24x64xbf16, #tpu.memory_space<vmem>>, vector<8x16x64xbf16>
    %125 = vector.shape_cast %124 : vector<8x16x64xbf16> to vector<128x64xbf16>
    %c2_61 = arith.constant 2 : index
    %c0_62 = arith.constant 0 : index
    %c0_63 = arith.constant 0 : index
    %126 = vector.load %arg11[%c2_61, %c0_62, %c0_63] : memref<10x24x64xbf16, #tpu.memory_space<vmem>>, vector<8x16x64xbf16>
    %127 = vector.shape_cast %126 : vector<8x16x64xbf16> to vector<128x64xbf16>
    %c2_64 = arith.constant 2 : index
    %c1_65 = arith.constant 1 : index
    %c0_66 = arith.constant 0 : index
    %128 = vector.load %arg11[%c2_64, %c1_65, %c0_66] : memref<10x24x64xbf16, #tpu.memory_space<vmem>>, vector<8x16x64xbf16>
    %129 = vector.shape_cast %128 : vector<8x16x64xbf16> to vector<128x64xbf16>
    %c2_67 = arith.constant 2 : index
    %c2_68 = arith.constant 2 : index
    %c0_69 = arith.constant 0 : index
    %130 = vector.load %arg11[%c2_67, %c2_68, %c0_69] : memref<10x24x64xbf16, #tpu.memory_space<vmem>>, vector<8x16x64xbf16>
    %131 = vector.shape_cast %130 : vector<8x16x64xbf16> to vector<128x64xbf16>
    %132 = tpu.concatenate %115, %117, %119, %121, %123, %125, %127, %129, %131 in 1 : vector<128x64xbf16>, vector<128x64xbf16>, vector<128x64xbf16>, vector<128x64xbf16>, vector<128x64xbf16>, vector<128x64xbf16>, vector<128x64xbf16>, vector<128x64xbf16>, vector<128x64xbf16> -> vector<128x576xbf16>
    %c0_70 = arith.constant 0 : index
    %c0_71 = arith.constant 0 : index
    %133 = vector.load %arg9[%c0_70, %c0_71] : memref<576x64xbf16, #tpu.memory_space<vmem>>, vector<576x64xbf16>
    %cst_72 = arith.constant dense<0.000000e+00> : vector<128x64xf32>
    %134 = tpu.matmul %132, %133, %cst_72 {dimension_numbers = #tpu.dot_dimension_numbers<[1], [0], [0], [1], [0, 0, 1, 1], [], []>} : vector<128x576xbf16>, vector<576x64xbf16>, vector<128x64xf32> -> vector<128x64xf32>
    %135 = vector.shape_cast %134 : vector<128x64xf32> to vector<8x16x64xf32>
    %136 = vector.extract_strided_slice %66 {offsets = [1, 0, 0], sizes = [8, 16, 64], strides = [1, 1, 1]} : vector<10x16x64xf32> to vector<8x16x64xf32>
    %137 = vector.shape_cast %7 : vector<1x64xf32> to vector<1x1x64xf32>
    %138 = vector.broadcast %137 : vector<1x1x64xf32> to vector<8x16x64xf32>
    %139 = arith.mulf %138, %135 : vector<8x16x64xf32>
    %140 = arith.addf %136, %139 : vector<8x16x64xf32>
    %c0_73 = arith.constant 0 : index
    %c0_74 = arith.constant 0 : index
    %c0_75 = arith.constant 0 : index
    %c0_76 = arith.constant 0 : index
    %141 = vector.load %arg10[%c0_73, %c0_74, %c0_75, %c0_76] : memref<1x8x16x64xf32, #tpu.memory_space<vmem>>, vector<1x8x16x64xf32>
    %142 = vector.shape_cast %141 : vector<1x8x16x64xf32> to vector<8x16x64xf32>
    %143 = vector.shape_cast %140 : vector<8x16x64xf32> to vector<1x8x16x64xf32>
    tpu.vector_store %arg10[%c0_73, %c0_74, %c0_75, %c0_76], %143 {strides = array<i32>} : memref<1x8x16x64xf32, #tpu.memory_space<vmem>>, vector<1x8x16x64xf32>,
    return
  }
  func.func @transform_0(%arg0: i32, %arg1: i32) -> (i32, i32, i32, i32) {
    %c0_i32 = arith.constant 0 : i32
    %c0_i32_0 = arith.constant 0 : i32
    %c0_i32_1 = arith.constant 0 : i32
    return %arg0, %arg1, %c0_i32, %c0_i32_0 : i32, i32, i32, i32
  }
  func.func @transform_1(%arg0: i32, %arg1: i32) -> (i32, i32, i32, i32) {
    %c8_i32 = arith.constant 8 : i32
    %0 = arith.muli %arg1, %c8_i32 : i32
    %c1_i32 = arith.constant 1 : i32
    %1 = arith.subi %0, %c1_i32 : i32
    %c0_i32 = arith.constant 0 : i32
    %2 = arith.maxsi %1, %c0_i32 : i32
    %c0_i32_0 = arith.constant 0 : i32
    %c0_i32_1 = arith.constant 0 : i32
    %c0_i32_2 = arith.constant 0 : i32
    return %arg0, %2, %c0_i32_0, %c0_i32_1 : i32, i32, i32, i32
  }
  func.func @transform_2(%arg0: i32, %arg1: i32) -> (i32, i32, i32, i32) {
    %c1_i32 = arith.constant 1 : i32
    %0 = arith.addi %arg1, %c1_i32 : i32
    %c8_i32 = arith.constant 8 : i32
    %1 = arith.muli %0, %c8_i32 : i32
    %c15_i32 = arith.constant 15 : i32
    %2 = arith.minsi %1, %c15_i32 : i32
    %c0_i32 = arith.constant 0 : i32
    %c0_i32_0 = arith.constant 0 : i32
    %c0_i32_1 = arith.constant 0 : i32
    return %arg0, %2, %c0_i32, %c0_i32_0 : i32, i32, i32, i32
  }
  func.func @transform_3(%arg0: i32, %arg1: i32) -> (i32, i32, i32) {
    %c0_i32 = arith.constant 0 : i32
    %c0_i32_0 = arith.constant 0 : i32
    %c0_i32_1 = arith.constant 0 : i32
    return %arg0, %c0_i32, %c0_i32_0 : i32, i32, i32
  }
  func.func @transform_4(%arg0: i32, %arg1: i32) -> (i32, i32, i32) {
    %c0_i32 = arith.constant 0 : i32
    %c0_i32_0 = arith.constant 0 : i32
    %c0_i32_1 = arith.constant 0 : i32
    return %arg0, %c0_i32, %c0_i32_0 : i32, i32, i32
  }
  func.func @transform_5(%arg0: i32, %arg1: i32) -> (i32, i32) {
    %c0_i32 = arith.constant 0 : i32
    %c0_i32_0 = arith.constant 0 : i32
    %c0_i32_1 = arith.constant 0 : i32
    return %c0_i32, %c0_i32_0 : i32, i32
  }
  func.func @transform_6(%arg0: i32, %arg1: i32) -> (i32, i32) {
    %c0_i32 = arith.constant 0 : i32
    %c0_i32_0 = arith.constant 0 : i32
    %c0_i32_1 = arith.constant 0 : i32
    return %c0_i32, %c0_i32_0 : i32, i32
  }
  func.func @transform_7(%arg0: i32, %arg1: i32) -> (i32, i32) {
    %c0_i32 = arith.constant 0 : i32
    %c0_i32_0 = arith.constant 0 : i32
    %c0_i32_1 = arith.constant 0 : i32
    return %c0_i32, %c0_i32_0 : i32, i32
  }
  func.func @transform_8(%arg0: i32, %arg1: i32) -> (i32, i32, i32, i32) {
    %c0_i32 = arith.constant 0 : i32
    %c0_i32_0 = arith.constant 0 : i32
    %c0_i32_1 = arith.constant 0 : i32
    return %arg0, %arg1, %c0_i32, %c0_i32_0 : i32, i32, i32, i32
  }
}

</mosaic_0001>

<bundles_post_ra>
// kernel: tpu_custom_call.1
= control target key start
LH: loop header
LB: loop body
LE: loop exit
PB: predicated region body
PF: predicated region fallthrough
CT: control target
= control target key end

     0   :  { %s8016_s0 = inlined_call_operand.hbm [shape: f32[2,16,16,64], index: 0, kind: input, shape index: {}]   ;;  %s8017_s1 = inlined_call_operand.hbm [shape: f32[2,16,16,64], index: 1, kind: input, shape index: {}]   ;;  %s8018_s2 = inlined_call_operand.hbm [shape: f32[2,16,16,64], index: 2, kind: input, shape index: {}]   ;;  %s8019_s3 = inlined_call_operand.hbm [shape: f32[2,6,64], index: 3, kind: input, shape index: {}]   ;;  %s8020_s4 = inlined_call_operand.hbm [shape: f32[2,1,64], index: 4, kind: input, shape index: {}]   ;;  %s8021_s5 = inlined_call_operand.hbm [shape: f32[1,64], index: 5, kind: input, shape index: {}]   ;;  %s8022_s6 = inlined_call_operand.<no memory space> [shape: f32[1,1], index: 6, kind: input, shape index: {}]   ;;  %s8023_s7 = inlined_call_operand.hbm [shape: bf16[576,64], index: 7, kind: input, shape index: {}]   ;;  %s8024_s8 = inlined_call_operand.hbm [shape: f32[2,16,16,64], index: 8, kind: output, shape index: {}]  }
   0x1   :  { %8099 = sst [smem:[#allocation75_spill]] %s8016_s0  ;;  %v13_v0 = vstv %s8022_s6 }
   0x2   :  { %8100 = sst [smem:[#allocation76_spill]] %s8017_s1  ;;  %14 = vst [vmem:[#allocation3] sm:$0x1] %v13_v0 }
   0x3   :  { %8101 = sst [smem:[#allocation77_spill]] %s8018_s2 }
   0x4   :  { %8102 = sst [smem:[#allocation78_spill]] %s8019_s3 }
   0x5   :  { %8103 = sst [smem:[#allocation79_spill]] %s8020_s4 }
   0x6   :  { %8104 = sst [smem:[#allocation80_spill]] %s8021_s5 }
   0x7   :  { %8105 = sst [smem:[#allocation81_spill]] %s8023_s7 }
   0x8   :  { %8106 = sst [smem:[#allocation82_spill]] %s8024_s8 }
   0x9   :  { %15 = vsyncpa [#allocation5], 0 }
   0xa   :  { %17 = vsyncpa [#allocation5 + $0x1], 0 }
   0xb   :  { %18 = vsyncpa [#allocation8], 0 }
   0xc   :  { %20 = vsyncpa [#allocation8 + $0x1], 0 }
   0xd   :  { %21 = vsyncpa [#allocation11], 0 }
   0xe   :  { %23 = vsyncpa [#allocation11 + $0x1], 0 }
   0xf   :  { %24 = vsyncpa [#allocation14], 0 }
  0x10   :  { %25 = vsyncpa [#allocation6], 0 }
  0x11   :  { %27 = vsyncpa [#allocation6 + $0x1], 0  ;;  %s5637_s29 = smov 0   ;;  %s5639_s30 = smov 0  }
  0x12   :  { %s5641_s9 = smov 0   ;;  %s5643_s10 = smov 0  }
  0x13   :  { %s5645_s11 = smov 0   ;;  %s5647_s6 = smov 0  }
  0x14   :  { %s5649_s12 = smov 0   ;;  %s5651_s13 = smov 0  }
  0x15   :  { %s5653_s14 = smov 0   ;;  %s5655_s15 = smov 0  }
  0x16   :  { %s5657_s16 = smov 0   ;;  %s5659_s17 = smov 0  }
  0x17   :  { %s5661_s18 = smov 0   ;;  %s5663_s19 = smov 0  }
  0x18   :  { %s5665_s20 = smov 0   ;;  %s5667_s21 = smov 0  }
  0x19   :  { %s5669_s22 = smov 0  }
  0x1a LB: > { %8107 = sst [smem:[#allocation23_spill]] %s5519_s10  ;;  %s5723_s23 = sadd.s32 4294967295, %s5571_s22   ;;  %s5571_s22 = sphi %s5669_s22, %s33_s22   ;;  %s5567_s21 = sphi %s5667_s21, %s8310_s21   ;;  %s5563_s20 = sphi %s5665_s20, %s8304_s20   ;;  %s5559_s19 = sphi %s5663_s19, %s8309_s19   ;;  %s5555_s18 = sphi %s5661_s18, %s8303_s18   ;;  %s5551_s17 = sphi %s5659_s17, %s8302_s17   ;;  %s5547_s16 = sphi %s5657_s16, %s8301_s16   ;;  %s5543_s15 = sphi %s5655_s15, %s8300_s15   ;;  %s5539_s14 = sphi %s5653_s14, %s8299_s14   ;;  %s5535_s13 = sphi %s5651_s13, %s8298_s13   ;;  %s5531_s12 = sphi %s5649_s12, %s8297_s12   ;;  %s5527_s6 = sphi %s5647_s6, %s8296_s6   ;;  %s5523_s11 = sphi %s5645_s11, %s8295_s11   ;;  %s5519_s10 = sphi %s5643_s10, %s8294_s10   ;;  %s5515_s9 = sphi %s5641_s9, %s8308_s9   ;;  %s5511_s30 = sphi %s5639_s30, %s8307_s30   ;;  %s5507_s29 = sphi %s5637_s29, %s8306_s29  }
  0x1b   : > { %8108 = sst [smem:[#allocation24_spill]] %s5523_s11  ;;  %p4287_p0 = scmp.ge.s32.totalorder %s5571_s22, 1 }
  0x1c   : > { %8109 = sst [smem:[#allocation25_spill]] %s5527_s6  ;;  %p8029_p1 = scmp.eq.s32.totalorder %s5723_s23, 0 }
  0x1d   : > { %8110 = sst [smem:[#allocation26_spill]] %s5535_s13  ;;  %p293_p3 = scmp.lt.s32.totalorder %s5571_s22, 5 }
  0x1e   : > { %8111 = sst [smem:[#allocation27_spill]] %s5539_s14  ;;  %s5573_s25 = smov [#allocation13]  }
  0x1f   : > { %8112 = sst [smem:[#allocation28_spill]] %s5543_s15  ;;  %p5729_p4 = pnand %p4287_p0, %p293_p3 }
  0x20   : > { %8113 = sst [smem:[#allocation29_spill]] %s5547_s16  ;;  %s306_s26 = sshll.u32 %s5573_s25, 4  ;;  %s307_s26 = int_to_ptr.vmem [resolvable:$true] %s306_s26 }
  0x21   : > { %8114 = sst [smem:[#allocation30_spill]] %s5551_s17  ;;  %p4728_p5 = pneg %p5729_p4 }
  0x22   : > { %8115 = sst [smem:[#allocation31_spill]] %s5555_s18  ;;  %s8121_s5 = sld [smem:[#allocation80_spill]] }
  0x23   : > { %8116 = sst [smem:[#allocation32_spill]] %s5559_s19  ;;  %p5737_p6 = pnand %p4728_p5, %p8029_p1 }
  0x24   : > { %8117 = sst [smem:[#allocation33_spill]] %s5563_s20 }
  0x25   : > { %s8118_s24 = scalar_select %p5729_p4, 1, 0 }
  0x26   : > { %p8045_p8 = pneg %p5737_p6 }
  0x27   : > { %8119 = sst [smem:[#allocation34_spill]] %s8118_s24 }
  0x28   : > { %s5179_s19 = scalar_lea.hbm %s8121_s5, 16 }
  0x29   : > { %p5180_p7 = scmp.ne.s32.totalorder %s8121_s5, %s5179_s19  ;;  %p5186_p11 = scmp.lt.u32.totalorder %s5179_s19, %s8121_s5 }
  0x2b   : > { %p5182_p9 = pnand %p8045_p8, %p5180_p7 }
  0x2d   : > { %p5183_p10 = pneg %p5182_p9 }
  0x2f   : > { %p5188_p12 = pnand %p5186_p11, %p5183_p10 }
  0x31   : > { %5191 = shalt.err (!%p5188_p12)
}
  0x32   : > { %s5192_s8 = scalar_lea.vmem %s307_s26, 16  ;;  %s5199_s4 = scalar_lea.vmem %s307_s26, 32 }
  0x33   : > { %p5193_p13 = scmp.ne.s32.totalorder %s307_s26, %s5192_s8  ;;  %p5200_p5 = scmp.lt.s32.totalorder %s307_s26, %s307_s26 }
  0x34   : > { %p5201_p2 = scmp.lt.s32.totalorder %s5199_s4, %s5192_s8 }
  0x35   : > { %p5195_p0 = pnand %p5193_p13, %p8045_p8 }
  0x36   : > { %p5202_p1 = por %p5201_p2, %p5200_p5 }
  0x37   : > { %p5196_p3 = pneg %p5195_p0 }
  0x39   : > { %p5203_p4 = pnand %p5202_p1, %p5196_p3 }
  0x3b   : > { %5206 = shalt.err (!%p5203_p4)
}
  0x3c   : > { %4731 = dma.hbm_to_vmem [thread:$0]  (!%p5737_p6), %s8121_s5, 16, %s307_s26, [#allocation14]  }
  0x3d   : > { %s42_s19 = sadd.s32 1, %s5563_s20  ;;  %s45_s28 = sadd.s32 1, %s5567_s21 }
  0x3e   : > { %p43_p1 = scmp.ge.s32.totalorder %s42_s19, 2  ;;  %p8047_p2 = scmp.eq.s32.totalorder %s5571_s22, 0 }
  0x3f   : > { %s4281_s25 = sshll.u32 %s5563_s20, 3  ;;  %s90_s8 = sadd.s32 1, %s5539_s14 }
  0x40   : > { %s8312_s19 = smov (%p43_p1, %s42_s19), 0  ;;  %s8314_s28 = smov (!%p43_p1, %s45_s28), %s5567_s21 }
  0x41   : > { %8122 = sst [smem:[#allocation35_spill]] %s8312_s19  ;;  %s4282_s18 = sadd.s32 4294967295, %s4281_s25 }
  0x42   : > { %p47_p4 = scmp.ge.s32.totalorder %s8314_s28, 2  ;;  %p79_p7 = scmp.gt.s32.totalorder %s4282_s18, 0 }
  0x43   : > { %s4283_s26 = sshll.u32 %s8312_s19, 3  ;;  %p97_p9 = scmp.ne.s32.totalorder %s5539_s14, %s5535_s13 }
  0x44   : > { %s8316_s28 = smov (%p47_p4, %s8314_s28), 0  ;;  %s8318_s18 = smov (!%p79_p7, %s4282_s18), 0 }
  0x45   : > { %8123 = sst [smem:[#allocation36_spill]] %s8316_s28  ;;  %s5780_s24 = ssub.s32 %s5567_s21, %s8316_s28 }
  0x46   : > { %s4284_s5 = sadd.s32 4294967295, %s4283_s26  ;;  %p5784_p11 = por %p97_p9, %p8047_p2 }
  0x47   : > { %p83_p10 = scmp.gt.s32.totalorder %s4284_s5, 0  ;;  %p103_p12 = scmp.ne.s32.totalorder %s5535_s13, %s5531_s12 }
  0x48   : > { %s5790_s2 = sadd.s32 8, %s4281_s25  ;;  %p8126_p13 = scmp.eq.s32.totalorder %s5723_s23, 0 }
  0x49   : > { %8125 = sst [smem:[#allocation37_spill]] %s5790_s2  ;;  %s8320_s5 = smov (!%p83_p10, %s4284_s5), 0 }
  0x4a   : > { %p5794_p0 = por %p103_p12, %p8126_p13  ;;  %s86_s10 = ssub.s32 %s8318_s18, %s8320_s5 }
  0x4b   : > { %s5799_s11 = sadd.s32 8, %s4283_s26  ;;  %s87_s6 = sor.u32 %s86_s10, %s5780_s24 }
  0x4c   : > { %s8127_s28 = scalar_select %p5794_p0, 1, 0 }
  0x4d   : > { %8129 = sst [smem:[#allocation39_spill]] %s5799_s11  ;;  %p88_p1 = scmp.eq.s32.totalorder %s87_s6, 0 }
  0x4e   : > { %8128 = sst [smem:[#allocation38_spill]] %s8127_s28  ;;  %p8046_p4 = scmp.lt.s32.totalorder %s5571_s22, 4 }
  0x4f   : > { %s5805_s12 = sshll.u32 %s5567_s21, 5  ;;  %s357_s13 = sand.u32 1, %s5571_s22  }
  0x50   : > { %s5808_s25 = scalar_select %p88_p1, %s5539_s14, %s90_s8  }
  0x51   : > { %s359_s0 = sand.u32 1, %s5539_s14   ;;  %s4299_s2 = sshll.u32 %s8318_s18, 1 }
  0x52   : > { %8130 = sst [smem:[#allocation40_spill]] %s5808_s25  ;;  %s4296_s28 = sshll.u32 %s359_s0, 4 }
  0x53   : > { %s371_s5 = sadd.s32 %s4299_s2, %s5805_s12  ;;  %s361_s15 = scalar_lea.vmem [#allocation7], %s4296_s28 }
  0x54   : > { %s4301_s26 = sshll.u32 %s371_s5, 7  ;;  %s374_s16 = sshll.u32 %s361_s15, 4  ;;  %s5818_s16 = int_to_ptr.vmem [resolvable:$true] %s374_s16 }
  0x55   : > { %s8131_s1 = sld [smem:[#allocation76_spill]]  ;;  %p5824_p7 = pnand %p8046_p4, %p5784_p11 }
  0x56   : > { %s5830_s2 = scalar_lea.sflag [#allocation8], %s357_s13 }
  0x57   : > { %p5209_p10 = pneg %p5824_p7 }
  0x5b   : > { %s5816_s11 = scalar_lea.hbm %s8131_s1, %s4301_s26  ;;  %s5212_s28 = scalar_lea.hbm %s8131_s1, 8192 }
  0x5c   : > { %s5207_s6 = scalar_lea.hbm %s5816_s11, 256  ;;  %p5213_p11 = scmp.lt.u32.totalorder %s5816_s11, %s8131_s1 }
  0x5d   : > { %p5208_p9 = scmp.ne.s32.totalorder %s5816_s11, %s5207_s6  ;;  %p5214_p1 = scmp.lt.u32.totalorder %s5212_s28, %s5207_s6 }
  0x5e   : > { %p5216_p3 = scmp.lt.u32.totalorder %s5207_s6, %s5816_s11 }
  0x5f   : > { %p5210_p12 = pnand %p5209_p10, %p5208_p9  ;;  %p5215_p5 = por %p5214_p1, %p5213_p11 }
  0x61   : > { %p5211_p13 = pneg %p5210_p12  ;;  %p5217_p8 = por %p5216_p3, %p5215_p5 }
  0x63   : > { %p5218_p4 = pnand %p5217_p8, %p5211_p13 }
  0x65   : > { %5221 = shalt.err (!%p5218_p4)
}
  0x66   : > { %s5222_s18 = scalar_lea.vmem %s5818_s16, 256  ;;  %s5574_s5 = smov [#allocation7]  }
  0x67   : > { %p5223_p9 = scmp.ne.s32.totalorder %s5818_s16, %s5222_s18  ;;  %s5227_s26 = sshll.u32 %s5574_s5, 4  ;;  %s5228_s26 = int_to_ptr.vmem [resolvable:$false] %s5227_s26 }
  0x68   : > { %s5229_s10 = scalar_lea.vmem %s5228_s26, 512  ;;  %p5230_p0 = scmp.lt.s32.totalorder %s5818_s16, %s5228_s26 }
  0x69   : > { %p5225_p12 = pnand %p5223_p9, %p5209_p10  ;;  %p5231_p11 = scmp.lt.s32.totalorder %s5229_s10, %s5222_s18 }
  0x6b   : > { %p5226_p2 = pneg %p5225_p12  ;;  %p5232_p1 = por %p5231_p11, %p5230_p0 }
  0x6d   : > { %p5233_p3 = pnand %p5232_p1, %p5226_p2 }
  0x6f   : > { %5236 = shalt.err (!%p5233_p3)
}
  0x70   : > { %s8050_s6 = smov 128   ;;  %s8052_s15 = smov 8  }
  0x71   : > { %4741 = dma.hbm_to_vmem [thread:$0]  (!%p5824_p7), %s5816_s11, 256, %s5818_s16, %s5830_s2, %s8050_s6, %s8050_s6, %s8052_s15  }
  0x72   : > { %p150_p8 = scmp.eq.s32.totalorder %s5780_s24, 0  ;;  %s152_s17 = sadd.s32 1, %s5515_s9 }
  0x73   : > { %p159_p2 = scmp.ne.s32.totalorder %s5515_s9, %s5511_s30  ;;  %p165_p0 = scmp.ne.s32.totalorder %s5511_s30, %s5507_s29 }
  0x74   : > { %s5868_s28 = scalar_select %p150_p8, %s5515_s9, %s152_s17  }
  0x75   : > { %p8134_p5 = scmp.eq.s32.totalorder %s5571_s22, 0  ;;  %p8135_p10 = scmp.eq.s32.totalorder %s5723_s23, 0 }
  0x76   : > { %8133 = sst [smem:[#allocation41_spill]] %s5868_s28  ;;  %s8049_s4 = sand.u32 1, %s5515_s9  }
  0x77   : > { %p161_p4 = por %p159_p2, %p8134_p5  ;;  %p5874_p13 = por %p165_p0, %p8135_p10 }
  0x78   : > { %s4307_s0 = sshll.u32 %s8049_s4, 3  ;;  %s4308_s18 = sshll.u32 %s5567_s21, 7 }
  0x79   : > { %s8136_s8 = scalar_select %p5874_p13, 1, 0 }
  0x7a   : > { %s8137_s3 = sld [smem:[#allocation78_spill]]  ;;  %s415_s29 = scalar_lea.vmem [#allocation10], %s4307_s0 }
  0x7b   : > { %s422_s26 = sshll.u32 %s415_s29, 4  ;;  %p8138_p7 = scmp.lt.s32.totalorder %s5571_s22, 4  ;;  %s5893_s26 = int_to_ptr.vmem [resolvable:$true] %s422_s26 }
  0x7c   : > { %s5577_s17 = smov [#allocation15]  }
  0x7d   : > { %p5889_p9 = pnand %p8138_p7, %p161_p4  ;;  %s5895_s4 = sshll.u32 %s5577_s17, 4  ;;  %s320_s4 = int_to_ptr.vmem [resolvable:$true] %s5895_s4 }
  0x7f   : > { %s8139_s10 = scalar_select %p5889_p9, 1, 0 }
  0x80   : > { %s5885_s16 = scalar_lea.hbm %s8137_s3, %s4308_s18  ;;  %s5899_s18 = scalar_lea.sflag [#allocation11], %s357_s13 }
  0x81   : > { %s5237_s5 = scalar_lea.hbm %s5885_s16, 128  ;;  %p8055_p11 = pneg %p5889_p9 }
  0x82   : > { %p5238_p12 = scmp.ne.s32.totalorder %s5885_s16, %s5237_s5  ;;  %s5242_s29 = scalar_lea.hbm %s8137_s3, 256 }
  0x83   : > { %p5243_p8 = scmp.lt.u32.totalorder %s5885_s16, %s8137_s3  ;;  %p5244_p2 = scmp.lt.u32.totalorder %s5242_s29, %s5237_s5 }
  0x84   : > { %p5240_p1 = pnand %p8055_p11, %p5238_p12  ;;  %p5246_p5 = scmp.lt.u32.totalorder %s5237_s5, %s5885_s16 }
  0x85   : > { %p5245_p0 = por %p5244_p2, %p5243_p8 }
  0x86   : > { %p5241_p3 = pneg %p5240_p1 }
  0x87   : > { %p5247_p4 = por %p5246_p5, %p5245_p0 }
  0x89   : > { %p5248_p10 = pnand %p5247_p4, %p5241_p3 }
  0x8b   : > { %5251 = shalt.err (!%p5248_p10)
}
  0x8c   : > { %s5252_s13 = scalar_lea.vmem %s5893_s26, 128  ;;  %s5578_s17 = smov [#allocation10]  }
  0x8d   : > { %p5253_p7 = scmp.ne.s32.totalorder %s5893_s26, %s5252_s13  ;;  %s5257_s0 = sshll.u32 %s5578_s17, 4  ;;  %s5258_s0 = int_to_ptr.vmem [resolvable:$false] %s5257_s0 }
  0x8e   : > { %s5259_s6 = scalar_lea.vmem %s5258_s0, 256  ;;  %p5260_p13 = scmp.lt.s32.totalorder %s5893_s26, %s5258_s0 }
  0x8f   : > { %p5255_p12 = pnand %p5253_p7, %p8055_p11  ;;  %p5261_p8 = scmp.lt.s32.totalorder %s5259_s6, %s5252_s13 }
  0x91   : > { %p5256_p1 = pneg %p5255_p12  ;;  %p5262_p2 = por %p5261_p8, %p5260_p13 }
  0x93   : > { %p5263_p0 = pnand %p5262_p2, %p5256_p1 }
  0x95   : > { %5266 = shalt.err (!%p5263_p0)
}
  0x96   : > { %4747 = dma.hbm_to_vmem [thread:$0]  (!%p5889_p9), %s5885_s16, 128, %s5893_s26, %s5899_s18  }
  0x97   : > { %s8140_s7 = sld [smem:[#allocation81_spill]]  ;;  %p8141_p13 = pneg %p5737_p6 }
  0x9d   : > { %s5267_s11 = scalar_lea.hbm %s8140_s7, 4608 }
  0x9e   : > { %p5268_p3 = scmp.ne.s32.totalorder %s8140_s7, %s5267_s11  ;;  %p5274_p10 = scmp.lt.u32.totalorder %s5267_s11, %s8140_s7 }
  0xa0   : > { %p5270_p5 = pnand %p5268_p3, %p8141_p13 }
  0xa2   : > { %p5271_p4 = pneg %p5270_p5 }
  0xa4   : > { %p5276_p7 = pnand %p5274_p10, %p5271_p4 }
  0xa6   : > { %5279 = shalt.err (!%p5276_p7)
}
  0xa7   : > { %s5280_s16 = scalar_lea.vmem %s320_s4, 4608  ;;  %p8142_p1 = pmov %p8141_p13 }
  0xa8   : > { %p5281_p12 = scmp.ne.s32.totalorder %s320_s4, %s5280_s16  ;;  %p5288_p0 = scmp.lt.s32.totalorder %s320_s4, %s320_s4 }
  0xa9   : > { %p5289_p11 = scmp.lt.s32.totalorder %s5280_s16, %s5280_s16 }
  0xaa   : > { %p5283_p8 = pnand %p5281_p12, %p8142_p1 }
  0xab   : > { %p5290_p9 = por %p5289_p11, %p5288_p0 }
  0xac   : > { %p5284_p2 = pneg %p5283_p8 }
  0xae   : > { %p5291_p3 = pnand %p5290_p9, %p5284_p2 }
  0xb0   : > { %5294 = shalt.err (!%p5291_p3)
}
  0xb1   : > { %s5579_s26 = smov 64   ;;  %s8143_s6 = sld [smem:[#allocation30_spill]] }
  0xb2   : > { %s8144_s15 = sld [smem:[#allocation29_spill]]  ;;  %s8145_s5 = sld [smem:[#allocation28_spill]] }
  0xb3   : > { %s5580_s11 = smov 4   ;;  %s4280_s13 = sadd.s32 4294967294, %s5571_s22  }
  0xb4   : > { %4734 = dma.hbm_to_vmem [thread:$0]  (!%p5737_p6), %s8140_s7, 4608, %s320_s4, [#allocation14], %s5579_s26, %s5579_s26, %s5580_s11  }
  0xb5   : > { %s8146_s0 = ssub.s32 %s5563_s20, %s8312_s19  ;;  %p286_p5 = scmp.eq.s32.totalorder %s4280_s13, 3 }
  0xb6   : > { %s51_s16 = sor.u32 %s8146_s0, %s5780_s24  ;;  %p8148_p4 = scmp.eq.s32.totalorder %s5571_s22, 0 }
  0xb7   : > { %s54_s1 = sadd.s32 1, %s8143_s6  ;;  %p52_p9 = scmp.eq.s32.totalorder %s51_s16, 0 }
  0xb8   : > { %p61_p11 = scmp.ne.s32.totalorder %s8143_s6, %s8144_s15  ;;  %p67_p13 = scmp.ne.s32.totalorder %s8144_s15, %s8145_s5 }
  0xb9   : > { %s5959_s3 = scalar_select %p52_p9, %s8143_s6, %s54_s1  }
  0xba   : > { %p5963_p10 = por %p8148_p4, %p61_p11  ;;  %p8150_p7 = scmp.eq.s32.totalorder %s5723_s23, 0 }
  0xbb   : > { %8147 = sst [smem:[#allocation42_spill]] %s5959_s3  ;;  %p8152_p12 = scmp.eq.s32.totalorder %s5723_s23, 3 }
  0xbc   : > { %p5969_p6 = por %p8150_p7, %p67_p13  ;;  %p5979_p8 = por %p286_p5, %p67_p13 }
  0xbd   : > { %p5975_p1 = por %p8152_p12, %p61_p11  ;;  %s333_s1 = sand.u32 1, %s8143_s6  }
  0xbe   : > { %s8151_s27 = scalar_select %p5969_p6, 1, 0 }
  0xbf   : > { %s8153_s4 = scalar_select %p5975_p1, 1, 0 }
  0xc0   : > { %s8154_s26 = scalar_select %p5979_p8, 1, 0 }
  0xc1   : > { %s4512_s15 = sshll.u32 %s5563_s20, 4  ;;  %s4291_s5 = sshll.u32 %s333_s1, 7 }
  0xc2   : > { %s344_s11 = sadd.s32 %s4512_s15, %s5805_s12  ;;  %s337_s17 = scalar_lea.vmem [#allocation4], %s4291_s5 }
  0xc3   : > { %s4295_s29 = sshll.u32 %s344_s11, 7  ;;  %s347_s13 = sshll.u32 %s337_s17, 4  ;;  %s5991_s13 = int_to_ptr.vmem [resolvable:$true] %s347_s13 }
  0xc4   : > { %s8155_s7 = sld [smem:[#allocation75_spill]]  ;;  %p8156_p2 = scmp.lt.s32.totalorder %s5571_s22, 4 }
  0xc5   : > { %s6001_s15 = scalar_lea.sflag [#allocation5], %s333_s1 }
  0xc6   : > { %p5997_p0 = pnand %p8156_p2, %p5963_p10 }
  0xc8   : > { %p5297_p9 = pneg %p5997_p0 }
  0xca   : > { %s5989_s19 = scalar_lea.hbm %s8155_s7, %s4295_s29  ;;  %s5300_s25 = scalar_lea.hbm %s8155_s7, 8192 }
  0xcb   : > { %s5295_s5 = scalar_lea.hbm %s5989_s19, 2048  ;;  %p5301_p5 = scmp.lt.u32.totalorder %s5989_s19, %s8155_s7 }
  0xcc   : > { %p5296_p3 = scmp.ne.s32.totalorder %s5989_s19, %s5295_s5  ;;  %p5302_p4 = scmp.lt.u32.totalorder %s5300_s25, %s5295_s5 }
  0xcd   : > { %p5304_p7 = scmp.lt.u32.totalorder %s5295_s5, %s5989_s19 }
  0xce   : > { %p5298_p11 = pnand %p5297_p9, %p5296_p3  ;;  %p5303_p10 = por %p5302_p4, %p5301_p5 }
  0xd0   : > { %p5299_p13 = pneg %p5298_p11  ;;  %p5305_p12 = por %p5304_p7, %p5303_p10 }
  0xd2   : > { %p5306_p2 = pnand %p5305_p12, %p5299_p13 }
  0xd4   : > { %5309 = shalt.err (!%p5306_p2)
}
  0xd5   : > { %s5310_s1 = scalar_lea.vmem %s5991_s13, 2048  ;;  %s5581_s16 = smov [#allocation4]  }
  0xd6   : > { %p5311_p3 = scmp.ne.s32.totalorder %s5991_s13, %s5310_s1  ;;  %s5315_s11 = sshll.u32 %s5581_s16, 4  ;;  %s5316_s11 = int_to_ptr.vmem [resolvable:$false] %s5315_s11 }
  0xd7   : > { %s5317_s29 = scalar_lea.vmem %s5316_s11, 4096  ;;  %p5318_p1 = scmp.lt.s32.totalorder %s5991_s13, %s5316_s11 }
  0xd8   : > { %p5313_p11 = pnand %p5311_p3, %p5297_p9  ;;  %p5319_p5 = scmp.lt.s32.totalorder %s5317_s29, %s5310_s1 }
  0xda   : > { %p5314_p8 = pneg %p5313_p11  ;;  %p5320_p4 = por %p5319_p5, %p5318_p1 }
  0xdc   : > { %p5321_p10 = pnand %p5320_p4, %p5314_p8 }
  0xde   : > { %5324 = shalt.err (!%p5321_p10)
}
  0xdf   : > { %s8158_s5 = smov 8   ;;  %s8159_s25 = smov 128  }
  0xe0   : > { %s8160_s17 = sld [smem:[#allocation37_spill]]  ;;  %s8161_s0 = sld [smem:[#allocation39_spill]] }
  0xe1   : > { %s8162_s16 = sld [smem:[#allocation25_spill]]  ;;  %s8163_s7 = sld [smem:[#allocation24_spill]] }
  0xe2   : > { %s8164_s11 = sld [smem:[#allocation23_spill]]  ;;  %p8167_p7 = scmp.eq.s32.totalorder %s5571_s22, 0 }
  0xe3   : > { %4738 = dma.hbm_to_vmem [thread:$0]  (!%p5997_p0), %s5989_s19, 2048, %s5991_s13, %s6001_s15, %s8159_s25, %s8159_s25, %s8158_s5  }
  0xe4   : > { %p8169_p3 = scmp.eq.s32.totalorder %s5723_s23, 0  ;;  %s8172_s3 = sld [smem:[#allocation77_spill]] }
  0xe5   : > { %p8173_p11 = scmp.lt.s32.totalorder %s5571_s22, 4 }
  0xe6   : > { %p8165_p1 = scmp.lt.s32.totalorder %s8160_s17, 15  ;;  %p8166_p8 = scmp.lt.s32.totalorder %s8161_s0, 15 }
  0xe7   : > { %s126_s6 = sadd.s32 1, %s8162_s16  ;;  %p133_p9 = scmp.ne.s32.totalorder %s8162_s16, %s8163_s7 }
  0xe8   : > { %s8322_s17 = smov (!%p8165_p1, %s8160_s17), 15  ;;  %s8324_s0 = smov (!%p8166_p8, %s8161_s0), 15 }
  0xe9   : > { %s122_s1 = ssub.s32 %s8322_s17, %s8324_s0  ;;  %p139_p13 = scmp.ne.s32.totalorder %s8163_s7, %s8164_s11 }
  0xea   : > { %s123_s29 = sor.u32 %s122_s1, %s5780_s24  ;;  %p6046_p12 = por %p133_p9, %p8167_p7 }
  0xeb   : > { %p124_p2 = scmp.eq.s32.totalorder %s123_s29, 0  ;;  %p6052_p0 = por %p139_p13, %p8169_p3 }
  0xec   : > { %s386_s13 = sand.u32 1, %s8162_s16   ;;  %s4304_s15 = sshll.u32 %s8322_s17, 1 }
  0xed   : > { %s8170_s19 = scalar_select %p6052_p0, 1, 0 }
  0xee   : > { %s8326_s16 = smov (!%p124_p2, %s8162_s16), %s126_s6  ;;  %s4302_s0 = sshll.u32 %s386_s13, 4 }
  0xef   : > { %8171 = sst [smem:[#allocation43_spill]] %s8326_s16  ;;  %s398_s7 = sadd.s32 %s4304_s15, %s5805_s12 }
  0xf0   : > { %s4306_s11 = sshll.u32 %s398_s7, 7  ;;  %s388_s29 = scalar_lea.vmem [#allocation9], %s4302_s0 }
  0xf1   : > { %s6064_s14 = scalar_lea.hbm %s8172_s3, %s4306_s11  ;;  %s401_s28 = sshll.u32 %s388_s29, 4  ;;  %s6066_s28 = int_to_ptr.vmem [resolvable:$true] %s401_s28 }
  0xf2   : > { %p6072_p5 = pnand %p8173_p11, %p6046_p12  ;;  %s4309_s12 = sshll.u32 %s5567_s21, 4 }
  0xf3   : > { %s8175_s15 = sld [smem:[#allocation79_spill]]  ;;  %s5325_s24 = scalar_lea.hbm %s6064_s14, 256 }
  0xf4   : > { %p5326_p4 = scmp.ne.s32.totalorder %s6064_s14, %s5325_s24  ;;  %p5327_p10 = pneg %p6072_p5 }
  0xf5   : > { %s5330_s1 = scalar_lea.hbm %s8172_s3, 8192  ;;  %p5331_p9 = scmp.lt.u32.totalorder %s6064_s14, %s8172_s3 }
  0xf6   : > { %p5328_p1 = pnand %p5327_p10, %p5326_p4  ;;  %p5332_p13 = scmp.lt.u32.totalorder %s5330_s1, %s5325_s24 }
  0xf7   : > { %p5334_p12 = scmp.lt.u32.totalorder %s5325_s24, %s6064_s14 }
  0xf8   : > { %p5329_p8 = pneg %p5328_p1  ;;  %p5333_p7 = por %p5332_p13, %p5331_p9 }
  0xf9   : > { %s8176_s7 = smov %s8175_s15  ;;  %s6080_s11 = scalar_lea.hbm %s8175_s15, %s4309_s12 }
  0xfa   : > { %p5335_p2 = por %p5334_p12, %p5333_p7 }
  0xfc   : > { %p5336_p3 = pnand %p5335_p2, %p5329_p8 }
  0xfe   : > { %5339 = shalt.err (!%p5336_p3)
}
  0xff   : > { %s5340_s12 = scalar_lea.vmem %s6066_s28, 256  ;;  %s5582_s6 = smov [#allocation9]  }
 0x100   : > { %p5341_p11 = scmp.ne.s32.totalorder %s6066_s28, %s5340_s12  ;;  %s5345_s13 = sshll.u32 %s5582_s6, 4  ;;  %s5346_s13 = int_to_ptr.vmem [resolvable:$false] %s5345_s13 }
 0x101   : > { %s5347_s16 = scalar_lea.vmem %s5346_s13, 512  ;;  %p5348_p0 = scmp.lt.s32.totalorder %s6066_s28, %s5346_s13 }
 0x102   : > { %p5343_p4 = pnand %p5341_p11, %p5327_p10  ;;  %p5349_p9 = scmp.lt.s32.totalorder %s5347_s16, %s5340_s12 }
 0x104   : > { %p5344_p1 = pneg %p5343_p4  ;;  %p5350_p13 = por %p5349_p9, %p5348_p0 }
 0x106   : > { %p5351_p7 = pnand %p5350_p13, %p5344_p1 }
 0x108   : > { %5354 = shalt.err (!%p5351_p7)
}
 0x109   : > { %4744 = dma.hbm_to_vmem [thread:$0]  (!%p6072_p5), %s6064_s14, 256, %s6066_s28, %s5830_s2, %s8159_s25, %s8159_s25, %s8158_s5  }
 0x10a   : > { %s8177_s15 = sand.u32 1, %s5515_s9   ;;  %s5355_s0 = scalar_lea.hbm %s6080_s11, 16 }
 0x10b   : > { %s432_s24 = scalar_lea.vmem [#allocation12], %s8177_s15  ;;  %p5356_p0 = scmp.ne.s32.totalorder %s6080_s11, %s5355_s0 }
 0x10c   : > { %s439_s20 = sshll.u32 %s432_s24, 4  ;;  %p8178_p10 = scmp.ne.s32.totalorder %s8139_s10, 0  ;;  %s440_s20 = int_to_ptr.vmem [resolvable:$true] %s439_s20 }
 0x10d   : > { %s5360_s29 = scalar_lea.hbm %s8176_s7, 32  ;;  %p5361_p3 = scmp.lt.u32.totalorder %s6080_s11, %s8176_s7 }
 0x10e   : > { %p8179_p8 = pneg %p8178_p10  ;;  %p5362_p11 = scmp.lt.u32.totalorder %s5360_s29, %s5355_s0 }
 0x10f   : > { %p5364_p4 = scmp.lt.u32.totalorder %s5355_s0, %s6080_s11 }
 0x110   : > { %p5358_p12 = pnand %p5356_p0, %p8179_p8  ;;  %p5363_p5 = por %p5362_p11, %p5361_p3 }
 0x112   : > { %p5359_p2 = pneg %p5358_p12  ;;  %p5365_p1 = por %p5364_p4, %p5363_p5 }
 0x114   : > { %p5366_p9 = pnand %p5365_p1, %p5359_p2 }
 0x116   : > { %5369 = shalt.err (!%p5366_p9)
}
 0x117   : > { %s5370_s14 = scalar_lea.vmem %s440_s20, 16  ;;  %p8180_p7 = pmov %p8179_p8 }
 0x118   : > { %p5371_p13 = scmp.ne.s32.totalorder %s440_s20, %s5370_s14  ;;  %s5583_s2 = smov [#allocation12]  }
 0x119   : > { %s5375_s28 = sshll.u32 %s5583_s2, 4  ;;  %s5376_s28 = int_to_ptr.vmem [resolvable:$false] %s5375_s28 }
 0x11a   : > { %p5373_p0 = pnand %p5371_p13, %p8180_p7  ;;  %s5377_s5 = scalar_lea.vmem %s5376_s28, 32 }
 0x11b   : > { %p5378_p12 = scmp.lt.s32.totalorder %s440_s20, %s5376_s28  ;;  %p5379_p6 = scmp.lt.s32.totalorder %s5377_s5, %s5370_s14 }
 0x11c   : > { %p5374_p8 = pneg %p5373_p0 }
 0x11d   : > { %p5380_p3 = por %p5379_p6, %p5378_p12 }
 0x11f   : > { %p5381_p11 = pnand %p5380_p3, %p5374_p8 }
 0x121   : > { %5384 = shalt.err (!%p5381_p11)
}
 0x122   : > { %4750 = dma.hbm_to_vmem [thread:$0]  (!%p8178_p10), %s6080_s11, 16, %s440_s20, %s5899_s18  }
 0x123   : > { %s8181_s25 = sld [smem:[#allocation34_spill]] }
 0x129   : > { %p8182_p2 = scmp.ne.s32.totalorder %s8181_s25, 0 }
 0x12b   : > { %448 = sbr.rel (%p8182_p2) target bundleno = 1807 (0x70f), region = 52 }
 0x132   : > { %s8183_s13 = sld [smem:[#allocation29_spill]]  ;;  %p8184_p6 = scmp.ne.s32.totalorder %s8151_s27, 0 }
 0x138   : > { %s6136_s16 = sand.u32 1, %s8183_s13  }
 0x139   : > { %s4311_s15 = sshll.u32 %s6136_s16, 7  ;;  %s451_s24 = scalar_lea.sflag [#allocation5], %s6136_s16 }
 0x13a   : > { %s6142_s0 = scalar_lea.vmem [#allocation4], %s4311_s15 }
 0x13b   : > { %5482 = dma.done.wait (%p8184_p6), %s451_s24, 2048  }
 0x13c   : > { %5484 = vsyncadd (%p8184_p6), %s451_s24, 4294965248  ;;  %s8185_s10 = sld [smem:[#allocation26_spill]]  ;;  %s8186_s18 = sld [smem:[#allocation38_spill]] }
 0x13d   : > { %s459_s11 = sand.u32 1, %s5723_s23  }
 0x13e   : > { %s460_s1 = scalar_lea.sflag [#allocation8], %s459_s11 }
 0x142   : > { %s461_s20 = sand.u32 1, %s8185_s10   ;;  %p8187_p10 = scmp.ne.s32.totalorder %s8186_s18, 0 }
 0x143   : > { %s4312_s17 = sshll.u32 %s461_s20, 4 }
 0x144   : > { %s6150_s29 = scalar_lea.vmem [#allocation7], %s4312_s17 }
 0x145   : > { %5486 = dma.done.wait (%p8187_p10), %s460_s1, 256  }
 0x146   : > { %5488 = vsyncadd (%p8187_p10), %s460_s1, 4294967040  ;;  %s8188_s12 = sld [smem:[#allocation24_spill]]  ;;  %p8189_p5 = scmp.ne.s32.totalorder %s8170_s19, 0 }
 0x14c   : > { %s470_s6 = sand.u32 1, %s8188_s12  }
 0x14d   : > { %s4313_s14 = sshll.u32 %s470_s6, 4 }
 0x14e   : > { %s6157_s27 = scalar_lea.vmem [#allocation9], %s4313_s14 }
 0x14f   : > { %5490 = dma.done.wait (%p8189_p5), %s460_s1, 256  }
 0x150   : > { %5492 = vsyncadd (%p8189_p5), %s460_s1, 4294967040  ;;  %s479_s2 = sand.u32 1, %s5511_s30   ;;  %s478_s5 = scalar_lea.sflag [#allocation11], %s459_s11 }
 0x151   : > { %s4314_s28 = sshll.u32 %s479_s2, 3  ;;  %p8190_p4 = scmp.ne.s32.totalorder %s8136_s8, 0 }
 0x152   : > { %s6164_s25 = scalar_lea.vmem [#allocation10], %s4314_s28 }
 0x153   : > { %5494 = dma.done.wait (%p8190_p4), %s478_s5, 144  }
 0x154   : > { %5496 = vsyncadd (%p8190_p4), %s478_s5, 4294967152  ;;  %s6170_s13 = scalar_lea.vmem [#allocation12], %s479_s2  ;;  %p8191_p1 = scmp.eq.s32.totalorder %s5723_s23, 0 }
 0x156   : > { %5498 = dma.done.wait (%p8191_p1), [#allocation14], 4624   ;;  %p8192_p9 = pmov %p8191_p1 }
 0x157   : > { %vm582_vm0 = vcmask 523264   ;;  %v6177_v1 = vld [vmem:[%s6150_s29] sm:$0xff]  ;;  %v6183_v3 = vld [vmem:[%s6150_s29 + $0x8] sm:$0xff]  ;;  %vm1657_vm1 = vcmask 516096   ;;  %vm1658_vm2 = vsmask.f32 256 }
 0x158   : > { %5500 = vsyncadd (%p8192_p9), [#allocation14], 4294962672  ;;  %v6180_v2 = vld [vmem:[%s6142_s0 + $0x10] sm:$0xff]  ;;  %v583_v4 = vsel %vm582_vm0, %v6177_v1, 0.0  ;;  %v6190_v6 = vld [vmem:[%s6142_s0 + $0x18] sm:$0xff]  ;;  %v586_v12 = vsel %vm582_vm0, %v6183_v3, 0.0 }
 0x159   : > { %v595_v5 = vsel %vm582_vm0, %v6180_v2, 0.0  ;;  %v6193_v7 = vld [vmem:[%s6142_s0] sm:$0xff]  ;;  %v6196_v8 = vld [vmem:[%s6142_s0 + $0x8] sm:$0xff]  ;;  %584 = vadd.xlane.f32.xlu0 %v583_v4  ;;  %v6205_v11 = vld [vmem:[%s6142_s0 + $0x30] sm:$0xff]  ;;  %v598_v13 = vsel %vm582_vm0, %v6190_v6, 0.0  ;;  %s8214_s23 = sld [smem:[#allocation31_spill]] }
 0x15a   : > { %596 = vadd.xlane.f32.xlu1 %v595_v5  ;;  %v6199_v9 = vld [vmem:[%s6142_s0 + $0x20] sm:$0xff]  ;;  %v6202_v10 = vld [vmem:[%s6142_s0 + $0x28] sm:$0xff]  ;;  %v6212_v14 = vld [vmem:[%s6142_s0 + $0x38] sm:$0xff]  ;;  %v589_v17 = vsel %vm582_vm0, %v6193_v7, 0.0  ;;  %v592_v18 = vsel %vm582_vm0, %v6196_v8, 0.0  ;;  %v607_v24 = vsel %vm582_vm0, %v6205_v11, 0.0 }
 0x15b   : > { %v6215_v15 = vld [vmem:[%s6142_s0 + $0x40] sm:$0xff]  ;;  %v6218_v16 = vld [vmem:[%s6142_s0 + $0x48] sm:$0xff]  ;;  %v6225_v19 = vld [vmem:[%s6142_s0 + $0x50] sm:$0xff]  ;;  %v601_v22 = vsel %vm582_vm0, %v6199_v9, 0.0  ;;  %v604_v23 = vsel %vm582_vm0, %v6202_v10, 0.0  ;;  %v610_v25 = vsel %vm582_vm0, %v6212_v14, 0.0 }
 0x15c   : > { %v6228_v20 = vld [vmem:[%s6142_s0 + $0x58] sm:$0xff]  ;;  %v6231_v21 = vld [vmem:[%s6142_s0 + $0x60] sm:$0xff]  ;;  %v6242_v26 = vld [vmem:[%s6142_s0 + $0x68] sm:$0xff]  ;;  %v613_v27 = vsel %vm582_vm0, %v6215_v15, 0.0  ;;  %v616_v28 = vsel %vm582_vm0, %v6218_v16, 0.0  ;;  %v619_v29 = vsel %vm582_vm0, %v6225_v19, 0.0 }
 0x15d   : > { %587 = vadd.xlane.f32.xlu0 %v586_v12  ;;  %v622_v30 = vsel %vm582_vm0, %v6228_v20, 0.0  ;;  %v625_v31 = vsel %vm582_vm0, %v6231_v21, 0.0  ;;  %v628_v32 = vsel %vm582_vm0, %v6242_v26, 0.0  ;;  %v6257_v33 = vld [vmem:[%s6142_s0 + $0x70] sm:$0xff]  ;;  %v6260_v34 = vld [vmem:[%s6142_s0 + $0x78] sm:$0xff]  ;;  %vm6765_vm3 = vmand %vm1657_vm1, %vm1658_vm2  ;;  %vm1984_vm7 = vcmask 519168  }
 0x15e   : > { %599 = vadd.xlane.f32.xlu1 %v598_v13  ;;  %v631_v35 = vsel %vm582_vm0, %v6257_v33, 0.0  ;;  %v634_v36 = vsel %vm582_vm0, %v6260_v34, 0.0  ;;  %v6267_v37 = vld [vmem:[%s6157_s27] sm:$0xff]  ;;  %v6270_v38 = vld [vmem:[%s6157_s27 + $0x8] sm:$0xff]  ;;  %vm1690_vm4 = vsmask.f32 7938 }
 0x15f   : > { %v637_v39 = vsel %vm582_vm0, %v6267_v37, 0.0  ;;  %v640_v40 = vsel %vm582_vm0, %v6270_v38, 0.0  ;;  %vm6875_vm5 = vmand %vm1657_vm1, %vm1690_vm4  ;;  %p1625_p13 = scmp.gt.s32.totalorder %s8214_s23, 0  ;;  %vm1782_vm9 = vsmask.f32 4368  ;;  %p1629_p7 = scmp.lt.s32.totalorder %s8214_s23, 1 }
 0x160   : > { %vm6962_vm8 = vmand %vm1984_vm7, %vm1690_vm4  ;;  %s5585_s24 = smov 64   ;;  %vm2081_vm11 = vsmask.f32 3328  ;;  %vm2082_vm12 = vsmask.f32 7440  ;;  %vm2308_vm15 = vcmask 1042432  }
 0x161   : > { %590 = vadd.xlane.f32.xlu0 %v589_v17  ;;  %s1626_s8 = scalar_select %p1625_p13, 1, 0  ;;  %vm6972_vm10 = vmor %vm1658_vm2, %vm1782_vm9  ;;  %vm2309_vm1 = vcmask 1046532  }
 0x162   : > { %593 = vadd.xlane.f32.xlu1 %v592_v18  ;;  %s7061_s19 = scalar_select %p1629_p7, 1, 0  ;;  %vm7108_vm14 = vmor %vm2081_vm11, %vm2082_vm12 }
 0x163   : > { %vm7150_vm2 = vmor %vm2308_vm15, %vm2309_vm1  ;;  %s4535_s10 = sshll.u32 %s8214_s23, 4  ;;  %s8287_s12 = sld [smem:[#allocation82_spill]] }
 0x164   : > { %s4065_s14 = scalar_lea.sflag [#allocation6], %s6136_s16  ;;  %p8289_p8 = scmp.ne.s32.totalorder %s8153_s4, 0 }
 0x165   : > { %602 = vadd.xlane.f32.xlu0 %v601_v22  ;;  %s5586_s28 = smov [#allocation16]  }
 0x166   : > { %605 = vadd.xlane.f32.xlu1 %v604_v23  ;;  %s5389_s5 = sshll.u32 %s5586_s28, 4  ;;  %s5390_s5 = int_to_ptr.vmem [resolvable:$false] %s5389_s5 }
 0x169   : > { %608 = vadd.xlane.f32.xlu0 %v607_v24 }
 0x16a   : > { %611 = vadd.xlane.f32.xlu1 %v610_v25 }
 0x16d   : > { %614 = vadd.xlane.f32.xlu0 %v613_v27 }
 0x16e   : > { %617 = vadd.xlane.f32.xlu1 %v616_v28 }
 0x171   : > { %620 = vadd.xlane.f32.xlu0 %v619_v29 }
 0x172   : > { %623 = vadd.xlane.f32.xlu1 %v622_v30 }
 0x175   : > { %626 = vadd.xlane.f32.xlu0 %v625_v31 }
 0x176   : > { %629 = vadd.xlane.f32.xlu1 %v628_v32 }
 0x179   : > { %632 = vadd.xlane.f32.xlu0 %v631_v35 }
 0x17a   : > { %635 = vadd.xlane.f32.xlu1 %v634_v36 }
 0x17d   : > { %638 = vadd.xlane.f32.xlu0 %v637_v39 }
 0x17e   : > { %641 = vadd.xlane.f32.xlu1 %v640_v40 }
 0x1e6   : > { %v585_v41 = vpop.xlane.xlu0 %584 }
 0x1e7   : > { %v597_v42 = vpop.xlane.xlu1 %596  ;;  %v644_v43 = vmul.f32 0.015625, %v585_v41 }
 0x1e8   : > { %v648_v44 = vmul.f32 0.015625, %v597_v42 }
 0x1e9   : > { %v6277_v45 = vsub.f32 %v6177_v1, %v644_v43 }
 0x1ea   : > { %v6280_v46 = vsub.f32 %v6180_v2, %v648_v44  ;;  %v588_v47 = vpop.xlane.xlu0 %587 }
 0x1eb   : > { %v600_v48 = vpop.xlane.xlu1 %599  ;;  %v645_v49 = vmul.f32 0.015625, %v588_v47  ;;  %v684_v51 = vmul.f32 %v6277_v45, %v6277_v45 }
 0x1ec   : > { %v649_v50 = vmul.f32 0.015625, %v600_v48  ;;  %v688_v52 = vmul.f32 %v6280_v46, %v6280_v46 }
 0x1ed   : > { %v6287_v53 = vsub.f32 %v6183_v3, %v645_v49  ;;  %v704_v55 = vsel %vm582_vm0, %v684_v51, 0.0 }
 0x1ee   : > { %v6290_v54 = vsub.f32 %v6190_v6, %v649_v50  ;;  %705 = vadd.xlane.f32.xlu0 %v704_v55  ;;  %v591_v56 = vpop.xlane.xlu0 %590  ;;  %v716_v58 = vsel %vm582_vm0, %v688_v52, 0.0 }
 0x1ef   : > { %v594_v57 = vpop.xlane.xlu1 %593  ;;  %v646_v59 = vmul.f32 0.015625, %v591_v56  ;;  %v685_v61 = vmul.f32 %v6287_v53, %v6287_v53 }
 0x1f0   : > { %v647_v60 = vmul.f32 0.015625, %v594_v57  ;;  %v689_v62 = vmul.f32 %v6290_v54, %v6290_v54 }
 0x1f1   : > { %v6299_v63 = vsub.f32 %v6193_v7, %v646_v59  ;;  %v707_v1 = vsel %vm582_vm0, %v685_v61, 0.0 }
 0x1f2   : > { %v6302_v0 = vsub.f32 %v6196_v8, %v647_v60  ;;  %717 = vadd.xlane.f32.xlu0 %v716_v58  ;;  %708 = vadd.xlane.f32.xlu1 %v707_v1  ;;  %v603_v2 = vpop.xlane.xlu0 %602  ;;  %v719_v4 = vsel %vm582_vm0, %v689_v62, 0.0 }
 0x1f3   : > { %v606_v3 = vpop.xlane.xlu1 %605  ;;  %v650_v5 = vmul.f32 0.015625, %v603_v2  ;;  %v686_v12 = vmul.f32 %v6299_v63, %v6299_v63 }
 0x1f4   : > { %v651_v6 = vmul.f32 0.015625, %v606_v3  ;;  %v687_v7 = vmul.f32 %v6302_v0, %v6302_v0 }
 0x1f5   : > { %v6311_v13 = vsub.f32 %v6199_v9, %v650_v5  ;;  %v710_v17 = vsel %vm582_vm0, %v686_v12, 0.0 }
 0x1f6   : > { %v6314_v8 = vsub.f32 %v6202_v10, %v651_v6  ;;  %720 = vadd.xlane.f32.xlu1 %v719_v4  ;;  %711 = vadd.xlane.f32.xlu0 %v710_v17  ;;  %v609_v18 = vpop.xlane.xlu0 %608  ;;  %v713_v23 = vsel %vm582_vm0, %v687_v7, 0.0 }
 0x1f7   : > { %v612_v22 = vpop.xlane.xlu1 %611  ;;  %v652_v24 = vmul.f32 0.015625, %v609_v18  ;;  %v690_v27 = vmul.f32 %v6311_v13, %v6311_v13 }
 0x1f8   : > { %v653_v25 = vmul.f32 0.015625, %v612_v22  ;;  %v691_v9 = vmul.f32 %v6314_v8, %v6314_v8 }
 0x1f9   : > { %v6323_v28 = vsub.f32 %v6205_v11, %v652_v24  ;;  %v722_v29 = vsel %vm582_vm0, %v690_v27, 0.0 }
 0x1fa   : > { %v6326_v10 = vsub.f32 %v6212_v14, %v653_v25  ;;  %714 = vadd.xlane.f32.xlu1 %v713_v23  ;;  %723 = vadd.xlane.f32.xlu0 %v722_v29  ;;  %v615_v30 = vpop.xlane.xlu0 %614  ;;  %v725_v32 = vsel %vm582_vm0, %v691_v9, 0.0 }
 0x1fb   : > { %v618_v31 = vpop.xlane.xlu1 %617  ;;  %v654_v35 = vmul.f32 0.015625, %v615_v30  ;;  %v692_v39 = vmul.f32 %v6323_v28, %v6323_v28 }
 0x1fc   : > { %v655_v36 = vmul.f32 0.015625, %v618_v31  ;;  %v693_v11 = vmul.f32 %v6326_v10, %v6326_v10 }
 0x1fd   : > { %v6335_v40 = vsub.f32 %v6215_v15, %v654_v35  ;;  %v728_v41 = vsel %vm582_vm0, %v692_v39, 0.0  ;;  %v845_v35 = vlaneseq }
 0x1fe   : > { %v6338_v14 = vsub.f32 %v6218_v16, %v655_v36  ;;  %726 = vadd.xlane.f32.xlu1 %v725_v32  ;;  %729 = vadd.xlane.f32.xlu0 %v728_v41  ;;  %v621_v42 = vpop.xlane.xlu0 %620  ;;  %v731_v44 = vsel %vm582_vm0, %v693_v11, 0.0 }
 0x1ff   : > { %v624_v43 = vpop.xlane.xlu1 %623  ;;  %v656_v47 = vmul.f32 0.015625, %v621_v42  ;;  %v694_v49 = vmul.f32 %v6335_v40, %v6335_v40 }
 0x200   : > { %v657_v48 = vmul.f32 0.015625, %v624_v43  ;;  %v695_v15 = vmul.f32 %v6338_v14, %v6338_v14  ;;  %v6396_v43 = vshrl.u32 %v845_v35, 7 }
 0x201   : > { %v6347_v50 = vsub.f32 %v6225_v19, %v656_v47  ;;  %v734_v51 = vsel %vm582_vm0, %v694_v49, 0.0 }
 0x202   : > { %v6350_v16 = vsub.f32 %v6228_v20, %v657_v48  ;;  %732 = vadd.xlane.f32.xlu1 %v731_v44  ;;  %735 = vadd.xlane.f32.xlu0 %v734_v51  ;;  %v627_v52 = vpop.xlane.xlu0 %626  ;;  %v737_v56 = vsel %vm582_vm0, %v695_v15, 0.0  ;;  %8193 = vst [vmem:[#allocation44_spill] sm:$0xff] %v6396_v43  ;;  %v6399_v48 = vld [vmem:[%s6164_s25] sm:$0x3f] }
 0x203   : > { %v630_v55 = vpop.xlane.xlu1 %629  ;;  %v658_v57 = vmul.f32 0.015625, %v627_v52  ;;  %v696_v59 = vmul.f32 %v6347_v50, %v6347_v50 }
 0x204   : > { %v659_v58 = vmul.f32 0.015625, %v630_v55  ;;  %v697_v19 = vmul.f32 %v6350_v16, %v6350_v16  ;;  %v6402_v55 = vadd.f32 1.0, %v6399_v48 }
 0x205   : > { %v6359_v60 = vsub.f32 %v6231_v21, %v658_v57  ;;  %v740_v61 = vsel %vm582_vm0, %v696_v59, 0.0 }
 0x206   : > { %v6362_v20 = vsub.f32 %v6242_v26, %v659_v58  ;;  %738 = vadd.xlane.f32.xlu1 %v737_v56  ;;  %741 = vadd.xlane.f32.xlu0 %v740_v61  ;;  %v633_v62 = vpop.xlane.xlu0 %632  ;;  %v743_v2 = vsel %vm582_vm0, %v697_v19, 0.0  ;;  %v847_v56 = vsub.s32 1, %v6396_v43  ;;  %v871_v61 = vsub.s32 0, %v6396_v43 }
 0x207   : > { %v636_v1 = vpop.xlane.xlu1 %635  ;;  %v660_v3 = vmul.f32 0.015625, %v633_v62  ;;  %v698_v5 = vmul.f32 %v6359_v60, %v6359_v60 }
 0x208   : > { %v661_v4 = vmul.f32 0.015625, %v636_v1  ;;  %v699_v21 = vmul.f32 %v6362_v20, %v6362_v20 }
 0x209   : > { %v6371_v6 = vsub.f32 %v6257_v33, %v660_v3  ;;  %v746_v12 = vsel %vm582_vm0, %v698_v5, 0.0 }
 0x20a   : > { %v6374_v26 = vsub.f32 %v6260_v34, %v661_v4  ;;  %744 = vadd.xlane.f32.xlu1 %v743_v2  ;;  %747 = vadd.xlane.f32.xlu0 %v746_v12  ;;  %v639_v7 = vpop.xlane.xlu0 %638  ;;  %v749_v18 = vsel %vm582_vm0, %v699_v21, 0.0  ;;  %v6407_v2 = vrot.slane %v6402_v55, %v847_v56 }
 0x20b   : > { %v642_v17 = vpop.xlane.xlu1 %641  ;;  %v662_v22 = vmul.f32 0.015625, %v639_v7  ;;  %v700_v24 = vmul.f32 %v6371_v6, %v6371_v6 }
 0x20c   : > { %v663_v23 = vmul.f32 0.015625, %v642_v17  ;;  %v701_v33 = vmul.f32 %v6374_v26, %v6374_v26  ;;  %v6411_v17 = vrot.slane %v6399_v48, %v871_v61 }
 0x20d   : > { %v6383_v25 = vsub.f32 %v6267_v37, %v662_v22  ;;  %v752_v27 = vsel %vm582_vm0, %v700_v24, 0.0 }
 0x20e   : > { %v6386_v34 = vsub.f32 %v6270_v38, %v663_v23  ;;  %750 = vadd.xlane.f32.xlu1 %v749_v18  ;;  %753 = vadd.xlane.f32.xlu0 %v752_v27  ;;  %v755_v9 = vsel %vm582_vm0, %v701_v33, 0.0 }
 0x20f   : > { %v702_v29 = vmul.f32 %v6383_v25, %v6383_v25 }
 0x210   : > { %v703_v30 = vmul.f32 %v6386_v34, %v6386_v34 }
 0x211   : > { %v758_v31 = vsel %vm582_vm0, %v702_v29, 0.0 }
 0x212   : > { %756 = vadd.xlane.f32.xlu1 %v755_v9  ;;  %759 = vadd.xlane.f32.xlu0 %v758_v31  ;;  %v761_v37 = vsel %vm582_vm0, %v703_v30, 0.0  ;;  %v6414_v9 = vld [vmem:[#allocation13] ss:$0 sm:$0xff] }
 0x216   : > { %762 = vadd.xlane.f32.xlu1 %v761_v37 }
 0x27b   : > { %v706_v38 = vpop.xlane.xlu0 %705 }
 0x27c   : > { %v764_v32 = vmul.f32 0.015625, %v706_v38 }
 0x27e   : > { %v784_v36 = vadd.f32 1e-06, %v764_v32 }
 0x27f   : > { %v709_v39 = vpop.xlane.xlu1 %708  ;;  %v718_v11 = vpop.xlane.xlu0 %717 }
 0x280   : > { %4969 = vrsqrt.f32 %v784_v36  ;;  %v765_v41 = vmul.f32 0.015625, %v709_v39  ;;  %v768_v42 = vmul.f32 0.015625, %v718_v11 }
 0x282   : > { %v785_v44 = vadd.f32 1e-06, %v765_v41  ;;  %v788_v47 = vadd.f32 1e-06, %v768_v42 }
 0x283   : > { %v721_v49 = vpop.xlane.xlu1 %720  ;;  %v712_v15 = vpop.xlane.xlu0 %711 }
 0x284   : > { %4971 = vrsqrt.f32 %v785_v44  ;;  %v769_v51 = vmul.f32 0.015625, %v721_v49  ;;  %v766_v52 = vmul.f32 0.015625, %v712_v15 }
 0x285   : > { %4973 = vrsqrt.f32 %v788_v47 }
 0x286   : > { %v789_v57 = vadd.f32 1e-06, %v769_v51  ;;  %v786_v58 = vadd.f32 1e-06, %v766_v52 }
 0x287   : > { %v715_v59 = vpop.xlane.xlu1 %714  ;;  %v724_v19 = vpop.xlane.xlu0 %723 }
 0x288   : > { %4975 = vrsqrt.f32 %v789_v57  ;;  %v767_v62 = vmul.f32 0.015625, %v715_v59  ;;  %v770_v1 = vmul.f32 0.015625, %v724_v19 }
 0x289   : > { %4977 = vrsqrt.f32 %v786_v58 }
 0x28a   : > { %v4970_v3 = vpop.eup %4969  ;;  %v787_v4 = vadd.f32 1e-06, %v767_v62  ;;  %v790_v5 = vadd.f32 1e-06, %v770_v1 }
 0x28b   : > { %v727_v21 = vpop.xlane.xlu1 %726  ;;  %v730_v12 = vpop.xlane.xlu0 %729  ;;  %v824_v7 = vmul.f32 %v4970_v3, %v6277_v45 }
 0x28c   : > { %4979 = vrsqrt.f32 %v787_v4  ;;  %v771_v18 = vmul.f32 0.015625, %v727_v21  ;;  %v772_v22 = vmul.f32 0.015625, %v730_v12 }
 0x28d   : > { %4981 = vrsqrt.f32 %v790_v5  ;;  %v849_v23 = vmul.f32 %v6407_v2, %v824_v7 }
 0x28e   : > { %v4972_v24 = vpop.eup %4971  ;;  %v791_v33 = vadd.f32 1e-06, %v771_v18  ;;  %v792_v27 = vadd.f32 1e-06, %v772_v22 }
 0x28f   : > { %v4974_v29 = vpop.eup %4973  ;;  %v733_v30 = vpop.xlane.xlu1 %732  ;;  %v6417_v37 = vadd.f32 %v6411_v17, %v849_v23  ;;  %v825_v45 = vmul.f32 %v4972_v24, %v6287_v53 }
 0x290   : > { %v736_v31 = vpop.xlane.xlu0 %735  ;;  %4983 = vrsqrt.f32 %v791_v33  ;;  %v773_v38 = vmul.f32 0.015625, %v733_v30  ;;  %v828_v35 = vmul.f32 %v4974_v29, %v6280_v46 }
 0x291   : > { %v774_v32 = vmul.f32 0.015625, %v736_v31  ;;  %4985 = vrsqrt.f32 %v792_v27  ;;  %v900_v36 = vmul.f32 %v6414_v9, %v6417_v37  ;;  %v850_v39 = vmul.f32 %v6407_v2, %v825_v45 }
 0x292   : > { %v4976_v11 = vpop.eup %4975  ;;  %v793_v41 = vadd.f32 1e-06, %v773_v38  ;;  %v853_v44 = vmul.f32 %v6407_v2, %v828_v35 }
 0x293   : > { %v794_v42 = vadd.f32 1e-06, %v774_v32  ;;  %v4978_v47 = vpop.eup %4977  ;;  %v739_v49 = vpop.xlane.xlu1 %738  ;;  %v920_v53 = vsel %vm582_vm0, %v900_v36, 0.0  ;;  %v6427_v51 = vadd.f32 %v6411_v17, %v850_v39  ;;  %v829_v46 = vmul.f32 %v4976_v11, %v6290_v54 }
 0x294   : > { %v742_v15 = vpop.xlane.xlu0 %741  ;;  %4987 = vrsqrt.f32 %v793_v41  ;;  %v775_v52 = vmul.f32 0.015625, %v739_v49  ;;  %921 = vadd.xlane.f32.xlu0 %v920_v53  ;;  %v6431_v57 = vadd.f32 %v6411_v17, %v853_v44  ;;  %v826_v19 = vmul.f32 %v4978_v47, %v6299_v63 }
 0x295   : > { %v776_v56 = vmul.f32 0.015625, %v742_v15  ;;  %4989 = vrsqrt.f32 %v794_v42  ;;  %v901_v58 = vmul.f32 %v6414_v9, %v6427_v51  ;;  %v854_v59 = vmul.f32 %v6407_v2, %v829_v46 }
 0x296   : > { %v4980_v61 = vpop.eup %4979  ;;  %v795_v62 = vadd.f32 1e-06, %v775_v52  ;;  %v904_v54 = vmul.f32 %v6414_v9, %v6431_v57  ;;  %v851_v7 = vmul.f32 %v6407_v2, %v826_v19 }
 0x297   : > { %v796_v1 = vadd.f32 1e-06, %v776_v56  ;;  %v4982_v3 = vpop.eup %4981  ;;  %v745_v4 = vpop.xlane.xlu1 %744  ;;  %v923_v21 = vsel %vm582_vm0, %v901_v58, 0.0  ;;  %v6441_v12 = vadd.f32 %v6411_v17, %v854_v59  ;;  %v827_v18 = vmul.f32 %v4980_v61, %v6302_v0 }
 0x298   : > { %v748_v5 = vpop.xlane.xlu0 %747  ;;  %4991 = vrsqrt.f32 %v795_v62  ;;  %v777_v63 = vmul.f32 0.015625, %v745_v4  ;;  %924 = vadd.xlane.f32.xlu1 %v923_v21  ;;  %v932_v23 = vsel %vm582_vm0, %v904_v54, 0.0  ;;  %v6449_v33 = vadd.f32 %v6411_v17, %v851_v7 }
 0x299   : > { %v778_v22 = vmul.f32 0.015625, %v748_v5  ;;  %4993 = vrsqrt.f32 %v796_v1  ;;  %933 = vadd.xlane.f32.xlu0 %v932_v23  ;;  %v905_v24 = vmul.f32 %v6414_v9, %v6441_v12  ;;  %v852_v27 = vmul.f32 %v6407_v2, %v827_v18 }
 0x29a   : > { %v4984_v29 = vpop.eup %4983  ;;  %v797_v30 = vadd.f32 1e-06, %v777_v63  ;;  %v830_v0 = vmul.f32 %v4982_v3, %v6311_v13  ;;  %v902_v36 = vmul.f32 %v6414_v9, %v6449_v33 }
 0x29b   : > { %v798_v31 = vadd.f32 1e-06, %v778_v22  ;;  %v4986_v45 = vpop.eup %4985  ;;  %v751_v38 = vpop.xlane.xlu1 %750  ;;  %v935_v35 = vsel %vm582_vm0, %v905_v24, 0.0  ;;  %v6457_v39 = vadd.f32 %v6411_v17, %v852_v27  ;;  %v831_v11 = vmul.f32 %v4984_v29, %v6314_v8 }
 0x29c   : > { %v754_v32 = vpop.xlane.xlu0 %753  ;;  %4995 = vrsqrt.f32 %v797_v30  ;;  %v779_v41 = vmul.f32 0.015625, %v751_v38  ;;  %936 = vadd.xlane.f32.xlu1 %v935_v35  ;;  %v855_v44 = vmul.f32 %v6407_v2, %v830_v0  ;;  %v926_v13 = vsel %vm582_vm0, %v902_v36, 0.0 }
 0x29d   : > { %v780_v42 = vmul.f32 0.015625, %v754_v32  ;;  %4997 = vrsqrt.f32 %v798_v31  ;;  %v903_v47 = vmul.f32 %v6414_v9, %v6457_v39  ;;  %v856_v49 = vmul.f32 %v6407_v2, %v831_v11  ;;  %927 = vadd.xlane.f32.xlu0 %v926_v13 }
 0x29e   : > { %v4988_v15 = vpop.eup %4987  ;;  %v799_v53 = vadd.f32 1e-06, %v779_v41  ;;  %v6466_v8 = vadd.f32 %v6411_v17, %v855_v44  ;;  %v832_v52 = vmul.f32 %v4986_v45, %v6323_v28 }
 0x29f   : > { %v800_v46 = vadd.f32 1e-06, %v780_v42  ;;  %v4990_v56 = vpop.eup %4989  ;;  %v757_v58 = vpop.xlane.xlu1 %756  ;;  %v929_v19 = vsel %vm582_vm0, %v903_v47, 0.0  ;;  %v6471_v61 = vadd.f32 %v6411_v17, %v856_v49  ;;  %v833_v62 = vmul.f32 %v4988_v15, %v6326_v10 }
 0x2a0   : > { %v760_v59 = vpop.xlane.xlu0 %759  ;;  %4999 = vrsqrt.f32 %v799_v53  ;;  %v781_v1 = vmul.f32 0.015625, %v757_v58  ;;  %930 = vadd.xlane.f32.xlu1 %v929_v19  ;;  %v906_v3 = vmul.f32 %v6414_v9, %v6466_v8  ;;  %v857_v4 = vmul.f32 %v6407_v2, %v832_v52 }
 0x2a1   : > { %v782_v54 = vmul.f32 0.015625, %v760_v59  ;;  %5001 = vrsqrt.f32 %v800_v46  ;;  %v907_v28 = vmul.f32 %v6414_v9, %v6471_v61  ;;  %v858_v5 = vmul.f32 %v6407_v2, %v833_v62 }
 0x2a2   : > { %v4992_v21 = vpop.eup %4991  ;;  %v801_v7 = vadd.f32 1e-06, %v781_v1  ;;  %v938_v10 = vsel %vm582_vm0, %v906_v3, 0.0  ;;  %v834_v63 = vmul.f32 %v4990_v56, %v6335_v40  ;;  %v6484_v27 = vadd.f32 %v6411_v17, %v857_v4 }
 0x2a3   : > { %v802_v18 = vadd.f32 1e-06, %v782_v54  ;;  %v4994_v22 = vpop.eup %4993  ;;  %939 = vadd.xlane.f32.xlu0 %v938_v10  ;;  %v763_v23 = vpop.xlane.xlu1 %762  ;;  %v941_v24 = vsel %vm582_vm0, %v907_v28, 0.0  ;;  %v6487_v29 = vadd.f32 %v6411_v17, %v858_v5  ;;  %v835_v30 = vmul.f32 %v4992_v21, %v6338_v14 }
 0x2a4   : > { %5003 = vrsqrt.f32 %v801_v7  ;;  %v783_v31 = vmul.f32 0.015625, %v763_v23  ;;  %942 = vadd.xlane.f32.xlu1 %v941_v24  ;;  %v859_v0 = vmul.f32 %v6407_v2, %v834_v63  ;;  %v836_v40 = vmul.f32 %v4994_v22, %v6347_v50 }
 0x2a5   : > { %5005 = vrsqrt.f32 %v802_v18  ;;  %v908_v45 = vmul.f32 %v6414_v9, %v6484_v27  ;;  %v909_v38 = vmul.f32 %v6414_v9, %v6487_v29  ;;  %v860_v32 = vmul.f32 %v6407_v2, %v835_v30 }
 0x2a6   : > { %v4996_v35 = vpop.eup %4995  ;;  %v803_v36 = vadd.f32 1e-06, %v783_v31  ;;  %v6498_v14 = vadd.f32 %v6411_v17, %v859_v0  ;;  %v861_v11 = vmul.f32 %v6407_v2, %v836_v40 }
 0x2a7   : > { %v4998_v41 = vpop.eup %4997  ;;  %v944_v42 = vsel %vm582_vm0, %v908_v45, 0.0  ;;  %v947_v50 = vsel %vm582_vm0, %v909_v38, 0.0  ;;  %v6504_v44 = vadd.f32 %v6411_v17, %v860_v32  ;;  %v837_v13 = vmul.f32 %v4996_v35, %v6350_v16 }
 0x2a8   : > { %5007 = vrsqrt.f32 %v803_v36  ;;  %945 = vadd.xlane.f32.xlu0 %v944_v42  ;;  %948 = vadd.xlane.f32.xlu1 %v947_v50  ;;  %v910_v47 = vmul.f32 %v6414_v9, %v6498_v14  ;;  %v6510_v49 = vadd.f32 %v6411_v17, %v861_v11  ;;  %v838_v15 = vmul.f32 %v4998_v41, %v6359_v60 }
 0x2a9   : > { %v911_v53 = vmul.f32 %v6414_v9, %v6504_v44  ;;  %v862_v46 = vmul.f32 %v6407_v2, %v837_v13 }
 0x2aa   : > { %v5000_v52 = vpop.eup %4999  ;;  %v950_v56 = vsel %vm582_vm0, %v910_v47, 0.0  ;;  %v912_v16 = vmul.f32 %v6414_v9, %v6510_v49  ;;  %v863_v58 = vmul.f32 %v6407_v2, %v838_v15  ;;  %v6574_v47 = vld [vmem:[#allocation3] ss:$0 sm:$0xff] }
 0x2ab   : > { %v5002_v59 = vpop.eup %5001  ;;  %v953_v19 = vsel %vm582_vm0, %v911_v53, 0.0  ;;  %v6522_v62 = vadd.f32 %v6411_v17, %v862_v46  ;;  %v839_v60 = vmul.f32 %v5000_v52, %v6362_v20 }
 0x2ac   : > { %951 = vadd.xlane.f32.xlu0 %v950_v56  ;;  %954 = vadd.xlane.f32.xlu1 %v953_v19  ;;  %v6526_v1 = vadd.f32 %v6411_v17, %v863_v58  ;;  %v840_v54 = vmul.f32 %v5002_v59, %v6371_v6  ;;  %v956_v3 = vsel %vm582_vm0, %v912_v16, 0.0 }
 0x2ad   : > { %v913_v28 = vmul.f32 %v6414_v9, %v6522_v62  ;;  %v864_v4 = vmul.f32 %v6407_v2, %v839_v60 }
 0x2ae   : > { %v5004_v5 = vpop.eup %5003  ;;  %v914_v21 = vmul.f32 %v6414_v9, %v6526_v1  ;;  %v865_v20 = vmul.f32 %v6407_v2, %v840_v54 }
 0x2af   : > { %v5006_v7 = vpop.eup %5005  ;;  %v959_v18 = vsel %vm582_vm0, %v913_v28, 0.0  ;;  %v6538_v10 = vadd.f32 %v6411_v17, %v864_v4  ;;  %v841_v6 = vmul.f32 %v5004_v5, %v6374_v26 }
 0x2b0   : > { %957 = vadd.xlane.f32.xlu0 %v956_v3  ;;  %960 = vadd.xlane.f32.xlu1 %v959_v18  ;;  %v6542_v63 = vadd.f32 %v6411_v17, %v865_v20  ;;  %v842_v22 = vmul.f32 %v5006_v7, %v6383_v25  ;;  %v962_v23 = vsel %vm582_vm0, %v914_v21, 0.0 }
 0x2b1   : > { %v915_v24 = vmul.f32 %v6414_v9, %v6538_v10  ;;  %v866_v30 = vmul.f32 %v6407_v2, %v841_v6 }
 0x2b2   : > { %v5008_v31 = vpop.eup %5007  ;;  %v916_v0 = vmul.f32 %v6414_v9, %v6542_v63  ;;  %v867_v26 = vmul.f32 %v6407_v2, %v842_v22 }
 0x2b3   : > { %v965_v40 = vsel %vm582_vm0, %v915_v24, 0.0  ;;  %v6554_v45 = vadd.f32 %v6411_v17, %v866_v30  ;;  %v843_v25 = vmul.f32 %v5008_v31, %v6386_v34 }
 0x2b4   : > { %963 = vadd.xlane.f32.xlu0 %v962_v23  ;;  %966 = vadd.xlane.f32.xlu1 %v965_v40  ;;  %v6558_v38 = vadd.f32 %v6411_v17, %v867_v26  ;;  %v968_v32 = vsel %vm582_vm0, %v916_v0, 0.0 }
 0x2b5   : > { %v917_v35 = vmul.f32 %v6414_v9, %v6554_v45  ;;  %v868_v36 = vmul.f32 %v6407_v2, %v843_v25  ;;  %v5584_v2 = vmov 0  }
 0x2b6   : > { %v918_v11 = vmul.f32 %v6414_v9, %v6558_v38  ;;  %4907 = vset.pattern.permute.xlu0 %v5584_v2  ;;  %4908 = vset.pattern.permute.xlu1 %v5584_v2 }
 0x2b7   : > { %v971_v41 = vsel %vm582_vm0, %v917_v35, 0.0  ;;  %v6568_v42 = vadd.f32 %v6411_v17, %v868_v36 }
 0x2b8   : > { %969 = vadd.xlane.f32.xlu0 %v968_v32  ;;  %972 = vadd.xlane.f32.xlu1 %v971_v41  ;;  %v974_v34 = vsel %vm582_vm0, %v918_v11, 0.0 }
 0x2b9   : > { %v919_v50 = vmul.f32 %v6414_v9, %v6568_v42 }
 0x2bb   : > { %v977_v13 = vsel %vm582_vm0, %v919_v50, 0.0 }
 0x2bc   : > { %975 = vadd.xlane.f32.xlu0 %v974_v34  ;;  %978 = vadd.xlane.f32.xlu1 %v977_v13 }
 0x321   : > { %v922_v15 = vpop.xlane.xlu0 %921 }
 0x322   : > { %v987_v17 = vadd.f32 %v6574_v47, %v922_v15 }
 0x324   : > { %v4320_v53 = vmul.f32 -1.442695, %v987_v17 }
 0x325   : > { %v925_v46 = vpop.xlane.xlu1 %924 }
 0x326   : > { %5009 = vpow2.f32 %v4320_v53  ;;  %v988_v52 = vadd.f32 %v6574_v47, %v925_v46  ;;  %v934_v56 = vpop.xlane.xlu0 %933 }
 0x327   : > { %v991_v9 = vadd.f32 %v6574_v47, %v934_v56 }
 0x328   : > { %v4321_v16 = vmul.f32 -1.442695, %v988_v52 }
 0x329   : > { %v4324_v58 = vmul.f32 -1.442695, %v991_v9  ;;  %v937_v59 = vpop.xlane.xlu1 %936 }
 0x32a   : > { %5011 = vpow2.f32 %v4321_v16  ;;  %v992_v19 = vadd.f32 %v6574_v47, %v937_v59  ;;  %v928_v60 = vpop.xlane.xlu0 %927 }
 0x32b   : > { %5013 = vpow2.f32 %v4324_v58  ;;  %v989_v3 = vadd.f32 %v6574_v47, %v928_v60 }
 0x32c   : > { %v4325_v54 = vmul.f32 -1.442695, %v992_v19 }
 0x32d   : > { %v931_v28 = vpop.xlane.xlu1 %930  ;;  %v4322_v4 = vmul.f32 -1.442695, %v989_v3 }
 0x32e   : > { %5015 = vpow2.f32 %v4325_v54  ;;  %v990_v5 = vadd.f32 %v6574_v47, %v931_v28 }
 0x32f   : > { %5017 = vpow2.f32 %v4322_v4 }
 0x330   : > { %v5010_v21 = vpop.eup %5009  ;;  %v940_v20 = vpop.xlane.xlu0 %939  ;;  %v4323_v18 = vmul.f32 -1.442695, %v990_v5 }
 0x331   : > { %v1067_v7 = vadd.f32 1.0, %v5010_v21  ;;  %v993_v6 = vadd.f32 %v6574_v47, %v940_v20  ;;  %v943_v22 = vpop.xlane.xlu1 %942 }
 0x332   : > { %v994_v23 = vadd.f32 %v6574_v47, %v943_v22 }
 0x333   : > { %5019 = vrcp.f32 %v1067_v7  ;;  %v4326_v24 = vmul.f32 -1.442695, %v993_v6 }
 0x334   : > { %v5012_v30 = vpop.eup %5011  ;;  %5021 = vpow2.f32 %v4323_v18  ;;  %v4327_v25 = vmul.f32 -1.442695, %v994_v23 }
 0x335   : > { %v5014_v31 = vpop.eup %5013  ;;  %v1068_v0 = vadd.f32 1.0, %v5012_v30  ;;  %v946_v26 = vpop.xlane.xlu0 %945  ;;  %5023 = vpow2.f32 %v4326_v24 }
 0x336   : > { %v949_v40 = vpop.xlane.xlu1 %948  ;;  %v1071_v35 = vadd.f32 1.0, %v5014_v31  ;;  %v995_v50 = vadd.f32 %v6574_v47, %v946_v26 }
 0x337   : > { %v996_v32 = vadd.f32 %v6574_v47, %v949_v40  ;;  %5025 = vrcp.f32 %v1068_v0 }
 0x338   : > { %v5016_v36 = vpop.eup %5015  ;;  %5027 = vpow2.f32 %v4327_v25  ;;  %v4328_v9 = vmul.f32 -1.442695, %v995_v50 }
 0x339   : > { %v4329_v11 = vmul.f32 -1.442695, %v996_v32  ;;  %v952_v41 = vpop.xlane.xlu0 %951  ;;  %5029 = vrcp.f32 %v1071_v35  ;;  %v1072_v2 = vadd.f32 1.0, %v5016_v36  ;;  %v5018_v15 = vpop.eup %5017 }
 0x33a   : > { %v955_v34 = vpop.xlane.xlu1 %954  ;;  %v997_v17 = vadd.f32 %v6574_v47, %v952_v41  ;;  %v1069_v59 = vadd.f32 1.0, %v5018_v15 }
 0x33b   : > { %v998_v13 = vadd.f32 %v6574_v47, %v955_v34  ;;  %5031 = vpow2.f32 %v4329_v11 }
 0x33c   : > { %5033 = vrcp.f32 %v1072_v2  ;;  %v4330_v60 = vmul.f32 -1.442695, %v997_v17 }
 0x33d   : > { %v4331_v53 = vmul.f32 -1.442695, %v998_v13  ;;  %v5020_v46 = vpop.eup %5019  ;;  %v958_v52 = vpop.xlane.xlu0 %957 }
 0x33e   : > { %v961_v56 = vpop.xlane.xlu1 %960  ;;  %1135 = vperm.xlu0 %4907, %v5020_v46   ;;  %v5022_v58 = vpop.eup %5021  ;;  %v999_v21 = vadd.f32 %v6574_v47, %v958_v52 }
 0x33f   : > { %v1000_v16 = vadd.f32 %v6574_v47, %v961_v56  ;;  %v5024_v19 = vpop.eup %5023  ;;  %5035 = vpow2.f32 %v4331_v53  ;;  %v1070_v5 = vadd.f32 1.0, %v5022_v58 }
 0x340   : > { %5037 = vpow2.f32 %v4328_v9  ;;  %v1073_v7 = vadd.f32 1.0, %v5024_v19  ;;  %v4332_v31 = vmul.f32 -1.442695, %v999_v21 }
 0x341   : > { %v5026_v54 = vpop.eup %5025  ;;  %v4333_v3 = vmul.f32 -1.442695, %v1000_v16  ;;  %v964_v28 = vpop.xlane.xlu0 %963  ;;  %5039 = vrcp.f32 %v1069_v59 }
 0x342   : > { %v967_v4 = vpop.xlane.xlu1 %966  ;;  %1140 = vperm.xlu1 %4908, %v5026_v54   ;;  %v5028_v18 = vpop.eup %5027  ;;  %5041 = vpow2.f32 %v4330_v60  ;;  %v1001_v0 = vadd.f32 %v6574_v47, %v964_v28 }
 0x343   : > { %v1002_v20 = vadd.f32 %v6574_v47, %v967_v4  ;;  %v5030_v22 = vpop.eup %5029  ;;  %5043 = vpow2.f32 %v4333_v3  ;;  %v1074_v40 = vadd.f32 1.0, %v5028_v18 }
 0x344   : > { %5045 = vrcp.f32 %v1070_v5  ;;  %v4334_v34 = vmul.f32 -1.442695, %v1001_v0 }
 0x345   : > { %v4335_v6 = vmul.f32 -1.442695, %v1002_v20  ;;  %v970_v23 = vpop.xlane.xlu0 %969  ;;  %v5032_v30 = vpop.eup %5031  ;;  %5047 = vrcp.f32 %v1073_v7 }
 0x346   : > { %v973_v24 = vpop.xlane.xlu1 %972  ;;  %1155 = vperm.xlu1 %4908, %v5030_v22   ;;  %v1076_v25 = vadd.f32 1.0, %v5032_v30  ;;  %v5034_v35 = vpop.eup %5033  ;;  %v1003_v36 = vadd.f32 %v6574_v47, %v970_v23 }
 0x347   : > { %v1004_v26 = vadd.f32 %v6574_v47, %v973_v24  ;;  %5049 = vpow2.f32 %v4335_v6 }
 0x348   : > { %5051 = vrcp.f32 %v1076_v25  ;;  %v4336_v46 = vmul.f32 -1.442695, %v1003_v36 }
 0x349   : > { %v4337_v32 = vmul.f32 -1.442695, %v1004_v26  ;;  %v5036_v41 = vpop.eup %5035  ;;  %5053 = vpow2.f32 %v4332_v31  ;;  %v976_v2 = vpop.xlane.xlu0 %975 }
 0x34a   : > { %v979_v11 = vpop.xlane.xlu1 %978  ;;  %1160 = vperm.xlu1 %4908, %v5034_v35   ;;  %5055 = vrcp.f32 %v1074_v40  ;;  %v1078_v13 = vadd.f32 1.0, %v5036_v41  ;;  %v5038_v15 = vpop.eup %5037  ;;  %v1005_v56 = vadd.f32 %v6574_v47, %v976_v2  ;;  %v1275_v2 = vsub.s32 2, %v6396_v43 }
 0x34b   : > { %v1006_v50 = vadd.f32 %v6574_v47, %v979_v11  ;;  %5057 = vpow2.f32 %v4337_v32  ;;  %v5040_v53 = vpop.eup %5039  ;;  %v1075_v16 = vadd.f32 1.0, %v5038_v15  ;;  %v6598_v15 = vld [vmem:[%s6170_s13] ss:$0 sm:$0xff] }
 0x34c   : > { %5059 = vrcp.f32 %v1078_v13  ;;  %v5042_v52 = vpop.eup %5041  ;;  %v4338_v54 = vmul.f32 -1.442695, %v1005_v56 }
 0x34d   : > { %v4339_v17 = vmul.f32 -1.442695, %v1006_v50  ;;  %5061 = vpow2.f32 %v4334_v34  ;;  %v5044_v9 = vpop.eup %5043  ;;  %v1077_v28 = vadd.f32 1.0, %v5042_v52 }
 0x34e   : > { %1145 = vperm.xlu1 %4908, %v5040_v53   ;;  %v5046_v58 = vpop.eup %5045  ;;  %v1080_v59 = vadd.f32 1.0, %v5044_v9 }
 0x34f   : > { %5063 = vpow2.f32 %v4339_v17  ;;  %v5048_v19 = vpop.eup %5047 }
 0x350   : > { %5065 = vpow2.f32 %v4336_v46  ;;  %v6602_v46 = vrot.slane %v6399_v48, %v1275_v2 }
 0x351   : > { %v5050_v60 = vpop.eup %5049  ;;  %5067 = vrcp.f32 %v1080_v59  ;;  %v5129_v59 = vld [vmem:[%s6150_s29] sm:$0xff] }
 0x352   : > { %1150 = vperm.xlu1 %4908, %v5046_v58   ;;  %v5052_v3 = vpop.eup %5051  ;;  %5069 = vrcp.f32 %v1075_v16  ;;  %v1082_v4 = vadd.f32 1.0, %v5050_v60 }
 0x353   : > { %v5054_v5 = vpop.eup %5053  ;;  %1180 = vperm.xlu0 %4907, %v5052_v3  }
 0x354   : > { %v5056_v21 = vpop.eup %5055  ;;  %5071 = vrcp.f32 %v1082_v4  ;;  %v1079_v7 = vadd.f32 1.0, %v5054_v5 }
 0x355   : > { %v5058_v47 = vpop.eup %5057  ;;  %5073 = vpow2.f32 %v4338_v54 }
 0x356   : > { %1165 = vperm.xlu1 %4908, %v5048_v19   ;;  %v5060_v20 = vpop.eup %5059  ;;  %5075 = vrcp.f32 %v1077_v28  ;;  %v1084_v18 = vadd.f32 1.0, %v5058_v47  ;;  %v5130_v28 = vld [vmem:[%s6150_s29 + $0x8] sm:$0xff] }
 0x357   : > { %v5062_v6 = vpop.eup %5061  ;;  %1190 = vperm.xlu0 %4907, %v5060_v20  }
 0x358   : > { %5077 = vrcp.f32 %v1084_v18  ;;  %v1081_v30 = vadd.f32 1.0, %v5062_v6 }
 0x359   : > { %v5064_v22 = vpop.eup %5063  ;;  %5079 = vrcp.f32 %v1079_v7  ;;  %v5131_v7 = vld [vmem:[%s6142_s0 + $0x10] sm:$0xff] }
 0x35a   : > { %v1086_v23 = vadd.f32 1.0, %v5064_v22  ;;  %1170 = vperm.xlu1 %4908, %v5056_v21   ;;  %v5066_v24 = vpop.eup %5065 }
 0x35b   : > { %v5068_v31 = vpop.eup %5067  ;;  %v1083_v40 = vadd.f32 1.0, %v5066_v24 }
 0x35c   : > { %5081 = vrcp.f32 %v1086_v23  ;;  %v5070_v0 = vpop.eup %5069  ;;  %1200 = vperm.xlu0 %4907, %v5068_v31  }
 0x35d   : > { %5083 = vrcp.f32 %v1081_v30  ;;  %v5132_v30 = vld [vmem:[%s6142_s0 + $0x18] sm:$0xff] }
 0x35e   : > { %1175 = vperm.xlu1 %4908, %v5070_v0   ;;  %v5072_v26 = vpop.eup %5071  ;;  %5085 = vrcp.f32 %v1083_v40 }
 0x35f   : > { %v5074_v25 = vpop.eup %5073 }
 0x360   : > { %v5076_v32 = vpop.eup %5075  ;;  %1210 = vperm.xlu0 %4907, %v5072_v26   ;;  %v1085_v36 = vadd.f32 1.0, %v5074_v25 }
 0x362   : > { %1185 = vperm.xlu1 %4908, %v5076_v32   ;;  %v5078_v35 = vpop.eup %5077  ;;  %5087 = vrcp.f32 %v1085_v36 }
 0x363   : > { %v5080_v11 = vpop.eup %5079 }
 0x364   : > { %1220 = vperm.xlu0 %4907, %v5078_v35   ;;  %v5133_v35 = vld [vmem:[%s6142_s0] sm:$0xff] }
 0x366   : > { %v5082_v41 = vpop.eup %5081  ;;  %1195 = vperm.xlu1 %4908, %v5080_v11  }
 0x367   : > { %v5084_v34 = vpop.eup %5083 }
 0x368   : > { %1230 = vperm.xlu0 %4907, %v5082_v41   ;;  %v5086_v50 = vpop.eup %5085 }
 0x36a   : > { %1205 = vperm.xlu1 %4908, %v5084_v34  }
 0x36c   : > { %v5088_v13 = vpop.eup %5087 }
 0x36e   : > { %1215 = vperm.xlu1 %4908, %v5086_v50  }
 0x372   : > { %1225 = vperm.xlu1 %4908, %v5088_v13  }
 0x3bd   : > { %v1136_v17 = vpop.permute.xlu0 %1135 }
 0x3be   : > { %v1233_v53 = vadd.f32 %v6598_v15, %v1136_v17  ;;  %v5134_v17 = vld [vmem:[%s6142_s0 + $0x8] sm:$0xff] }
 0x3c0   : > { %v1253_v52 = vmul.f32 %v1233_v53, %v6417_v37 }
 0x3c1   : > { %v1141_v56 = vpop.permute.xlu1 %1140 }
 0x3c2   : > { %v1234_v9 = vadd.f32 %v6598_v15, %v1141_v56  ;;  %v1277_v16 = vmul.f32 %v6602_v46, %v1253_v52 }
 0x3c4   : > { %v1254_v58 = vmul.f32 %v1234_v9, %v6427_v51  ;;  %v6609_v19 = vadd.f32 %v5129_v59, %v1277_v16 }
 0x3c5   : > { %v1156_v60 = vpop.permute.xlu1 %1155 }
 0x3c6   : > { %v1237_v54 = vadd.f32 %v6598_v15, %v1156_v60  ;;  %v1317_v48 = vsel %vm582_vm0, %v6609_v19, 0.0  ;;  %v1278_v3 = vmul.f32 %v6602_v46, %v1254_v58  ;;  %v5135_v60 = vld [vmem:[%s6142_s0 + $0x20] sm:$0xff] }
 0x3c7   : > { %1318 = vadd.xlane.f32.xlu1 %v1317_v48 }
 0x3c8   : > { %v1257_v37 = vmul.f32 %v1237_v54, %v6431_v57  ;;  %v6617_v4 = vadd.f32 %v5130_v28, %v1278_v3 }
 0x3c9   : > { %v1161_v51 = vpop.permute.xlu1 %1160 }
 0x3ca   : > { %v1281_v5 = vmul.f32 %v6602_v46, %v1257_v37  ;;  %v1238_v21 = vadd.f32 %v6598_v15, %v1161_v51  ;;  %v1320_v47 = vsel %vm582_vm0, %v6617_v4, 0.0 }
 0x3cb   : > { %1321 = vadd.xlane.f32.xlu0 %v1320_v47  ;;  %v5136_v47 = vld [vmem:[%s6142_s0 + $0x28] sm:$0xff] }
 0x3cc   : > { %v1258_v20 = vmul.f32 %v1238_v21, %v6441_v12  ;;  %v6625_v18 = vadd.f32 %v5131_v7, %v1281_v5 }
 0x3cd   : > { %v1146_v57 = vpop.permute.xlu1 %1145 }
 0x3ce   : > { %8194 = vst [vmem:[#allocation45_spill] sm:$0xff] %v6625_v18  ;;  %v1282_v6 = vmul.f32 %v6602_v46, %v1258_v20  ;;  %v1235_v22 = vadd.f32 %v6598_v15, %v1146_v57  ;;  %v1329_v23 = vsel %vm582_vm0, %v6625_v18, 0.0 }
 0x3cf   : > { %1330 = vadd.xlane.f32.xlu0 %v1329_v23 }
 0x3d0   : > { %v1255_v24 = vmul.f32 %v1235_v22, %v6449_v33  ;;  %v6633_v31 = vadd.f32 %v5132_v30, %v1282_v6 }
 0x3d1   : > { %v1151_v0 = vpop.permute.xlu1 %1150 }
 0x3d2   : > { %8195 = vst [vmem:[#allocation46_spill] sm:$0xff] %v6633_v31  ;;  %v1279_v12 = vmul.f32 %v6602_v46, %v1255_v24  ;;  %v1236_v26 = vadd.f32 %v6598_v15, %v1151_v0  ;;  %v1332_v40 = vsel %vm582_vm0, %v6633_v31, 0.0  ;;  %v1181_v25 = vpop.permute.xlu0 %1180  ;;  %v5137_v24 = vld [vmem:[%s6142_s0 + $0x38] sm:$0xff] }
 0x3d3   : > { %1333 = vadd.xlane.f32.xlu1 %v1332_v40  ;;  %v1242_v41 = vadd.f32 %v6598_v15, %v1181_v25 }
 0x3d4   : > { %v1256_v32 = vmul.f32 %v1236_v26, %v6457_v39  ;;  %v6641_v36 = vadd.f32 %v5133_v35, %v1279_v12  ;;  %v5138_v26 = vld [vmem:[%s6142_s0 + $0x30] sm:$0xff] }
 0x3d5   : > { %v1166_v33 = vpop.permute.xlu1 %1165  ;;  %v1262_v56 = vmul.f32 %v1242_v41, %v6487_v29 }
 0x3d6   : > { %8196 = vst [vmem:[#allocation47_spill] sm:$0xff] %v6641_v36  ;;  %v1280_v11 = vmul.f32 %v6602_v46, %v1256_v32  ;;  %v1239_v34 = vadd.f32 %v6598_v15, %v1166_v33  ;;  %v1323_v50 = vsel %vm582_vm0, %v6641_v36, 0.0  ;;  %v1191_v13 = vpop.permute.xlu0 %1190  ;;  %v5139_v33 = vld [vmem:[%s6142_s0 + $0x48] sm:$0xff] }
 0x3d7   : > { %1324 = vadd.xlane.f32.xlu0 %v1323_v50  ;;  %v1244_v53 = vadd.f32 %v6598_v15, %v1191_v13  ;;  %v1286_v37 = vmul.f32 %v6602_v46, %v1262_v56 }
 0x3d8   : > { %v1259_v2 = vmul.f32 %v1239_v34, %v6466_v8  ;;  %v6650_v39 = vadd.f32 %v5134_v17, %v1280_v11 }
 0x3d9   : > { %v1171_v52 = vpop.permute.xlu1 %1170  ;;  %v1264_v48 = vmul.f32 %v1244_v53, %v6504_v44  ;;  %v6681_v30 = vadd.f32 %v5137_v24, %v1286_v37 }
 0x3da   : > { %8197 = vst [vmem:[#allocation48_spill] sm:$0xff] %v6650_v39  ;;  %v1283_v9 = vmul.f32 %v6602_v46, %v1259_v2  ;;  %v1240_v16 = vadd.f32 %v6598_v15, %v1171_v52  ;;  %v1326_v58 = vsel %vm582_vm0, %v6650_v39, 0.0  ;;  %v5140_v2 = vld [vmem:[%s6142_s0 + $0x40] sm:$0xff] }
 0x3db   : > { %1327 = vadd.xlane.f32.xlu1 %v1326_v58  ;;  %v1201_v8 = vpop.permute.xlu0 %1200  ;;  %v1288_v20 = vmul.f32 %v6602_v46, %v1264_v48  ;;  %8200 = vst [vmem:[#allocation51_spill] sm:$0xff] %v6681_v30  ;;  %v1344_v50 = vsel %vm582_vm0, %v6681_v30, 0.0  ;;  %v5142_v48 = vld [vmem:[%s6142_s0 + $0x50] sm:$0xff] }
 0x3dc   : > { %v1260_v59 = vmul.f32 %v1240_v16, %v6471_v61  ;;  %v6660_v54 = vadd.f32 %v5135_v60, %v1283_v9  ;;  %v1246_v3 = vadd.f32 %v6598_v15, %v1201_v8  ;;  %v5141_v16 = vld [vmem:[%s6142_s0 + $0x58] sm:$0xff] }
 0x3dd   : > { %v1176_v29 = vpop.permute.xlu1 %1175  ;;  %v6691_v11 = vadd.f32 %v5139_v33, %v1288_v20  ;;  %v5147_v33 = vld [vmem:[%s6157_s27 + $0x8] sm:$0xff] }
 0x3de   : > { %8198 = vst [vmem:[#allocation49_spill] sm:$0xff] %v6660_v54  ;;  %v1284_v28 = vmul.f32 %v6602_v46, %v1260_v59  ;;  %v1241_v51 = vadd.f32 %v6598_v15, %v1176_v29  ;;  %v1335_v5 = vsel %vm582_vm0, %v6660_v54, 0.0  ;;  %v1266_v7 = vmul.f32 %v1246_v3, %v6522_v62 }
 0x3df   : > { %1336 = vadd.xlane.f32.xlu0 %v1335_v5  ;;  %v1211_v21 = vpop.permute.xlu0 %1210  ;;  %8202 = vst [vmem:[#allocation53_spill] sm:$0xff] %v6691_v11  ;;  %v1350_v9 = vsel %vm582_vm0, %v6691_v11, 0.0 }
 0x3e0   : > { %v1261_v61 = vmul.f32 %v1241_v51, %v6484_v27  ;;  %v6671_v44 = vadd.f32 %v5136_v47, %v1284_v28  ;;  %v1248_v57 = vadd.f32 %v6598_v15, %v1211_v21  ;;  %v1290_v40 = vmul.f32 %v6602_v46, %v1266_v7  ;;  %v5143_v51 = vld [vmem:[%s6142_s0 + $0x68] sm:$0xff]  ;;  %v5144_v7 = vld [vmem:[%s6142_s0 + $0x60] sm:$0xff] }
 0x3e1   : > { %v1186_v6 = vpop.permute.xlu1 %1185 }
 0x3e2   : > { %8199 = vst [vmem:[#allocation50_spill] sm:$0xff] %v6671_v44  ;;  %v1285_v22 = vmul.f32 %v6602_v46, %v1261_v61  ;;  %v1243_v23 = vadd.f32 %v6598_v15, %v1186_v6  ;;  %v1338_v27 = vsel %vm582_vm0, %v6671_v44, 0.0  ;;  %v1268_v25 = vmul.f32 %v1248_v57, %v6538_v10 }
 0x3e3   : > { %1339 = vadd.xlane.f32.xlu1 %v1338_v27  ;;  %v1221_v12 = vpop.permute.xlu0 %1220  ;;  %v6708_v58 = vadd.f32 %v5141_v16, %v1290_v40 }
 0x3e4   : > { %v1263_v0 = vmul.f32 %v1243_v23, %v6498_v14  ;;  %v6685_v62 = vadd.f32 %v5138_v26, %v1285_v22  ;;  %v1250_v32 = vadd.f32 %v6598_v15, %v1221_v12  ;;  %v1292_v53 = vmul.f32 %v6602_v46, %v1268_v25  ;;  %v5145_v22 = vld [vmem:[%s6142_s0 + $0x78] sm:$0xff]  ;;  %v5146_v26 = vld [vmem:[%s6142_s0 + $0x70] sm:$0xff]  ;;  %s7852_s0 = scalar_lea.vmem [#allocation16], %s4311_s15  ;;  %s8274_s15 = sld [smem:[#allocation32_spill]] }
 0x3e5   : > { %v1196_v35 = vpop.permute.xlu1 %1195  ;;  %8204 = vst [vmem:[#allocation55_spill] sm:$0xff] %v6708_v58  ;;  %v1356_v28 = vsel %vm582_vm0, %v6708_v58, 0.0  ;;  %s4081_s20 = sshll.u32 %s7852_s0, 4  ;;  %s7917_s20 = int_to_ptr.vmem [resolvable:$true] %s4081_s20 }
 0x3e6   : > { %8201 = vst [vmem:[#allocation52_spill] sm:$0xff] %v6685_v62  ;;  %v1287_v41 = vmul.f32 %v6602_v46, %v1263_v0  ;;  %v1245_v14 = vadd.f32 %v6598_v15, %v1196_v35  ;;  %v1341_v34 = vsel %vm582_vm0, %v6685_v62, 0.0  ;;  %v1270_v52 = vmul.f32 %v1250_v32, %v6554_v45  ;;  %s5385_s2 = scalar_lea.vmem %s7917_s20, 2048  ;;  %p5392_p11 = scmp.lt.s32.totalorder %s7917_s20, %s5390_s5 }
 0x3e7   : > { %1342 = vadd.xlane.f32.xlu0 %v1341_v34  ;;  %1345 = vadd.xlane.f32.xlu1 %v1344_v50  ;;  %v1231_v13 = vpop.permute.xlu0 %1230  ;;  %v6723_v5 = vadd.f32 %v5143_v51, %v1292_v53  ;;  %v1660_v50 = vld [vmem:[#allocation2] sm:$0x1]  ;;  %p5386_p0 = scmp.ne.s32.totalorder %s7917_s20, %s5385_s2 }
 0x3e8   : > { %v1265_v10 = vmul.f32 %v1245_v14, %v6510_v49  ;;  %v6701_v17 = vadd.f32 %v5140_v2, %v1287_v41  ;;  %v1252_v49 = vadd.f32 %v6598_v15, %v1231_v13  ;;  %v1294_v29 = vmul.f32 %v6602_v46, %v1270_v52  ;;  %v5148_v41 = vld [vmem:[%s6157_s27] sm:$0xff]  ;;  %s8288_s27 = smov %s8287_s12 }
 0x3e9   : > { %v1206_v56 = vpop.permute.xlu1 %1205  ;;  %8206 = vst [vmem:[#allocation57_spill] sm:$0xff] %v6723_v5  ;;  %p5387_p12 = pnand %p5386_p0, %p8289_p8 }
 0x3ea   : > { %8203 = vst [vmem:[#allocation54_spill] sm:$0xff] %v6701_v17  ;;  %v1289_v59 = vmul.f32 %v6602_v46, %v1265_v10  ;;  %v1247_v8 = vadd.f32 %v6598_v15, %v1206_v56  ;;  %v1347_v60 = vsel %vm582_vm0, %v6701_v17, 0.0  ;;  %v1272_v61 = vmul.f32 %v1252_v49, %v6568_v42  ;;  %s4504_s18 = sshll.u32 %s8274_s15, 5 }
 0x3eb   : > { %1348 = vadd.xlane.f32.xlu0 %v1347_v60  ;;  %1351 = vadd.xlane.f32.xlu1 %v1350_v9  ;;  %v1362_v42 = vsel %vm582_vm0, %v6723_v5, 0.0  ;;  %v6737_v23 = vadd.f32 %v5145_v22, %v1294_v29  ;;  %v1661_v10 = vsel %vm6765_vm3, 0, %v1660_v50  ;;  %s4078_s11 = sadd.s32 %s4535_s10, %s4504_s18  ;;  %p5388_p3 = pneg %p5387_p12 }
 0x3ec   : > { %v1267_v45 = vmul.f32 %v1247_v8, %v6526_v1  ;;  %v6717_v3 = vadd.f32 %v5142_v48, %v1289_v59  ;;  %v1296_v27 = vmul.f32 %v6602_v46, %v1272_v61  ;;  %1662 = vst [vmem:[#allocation2] sm:$0x1] %v1661_v10  ;;  %s4505_s17 = sshll.u32 %s4078_s11, 7 }
 0x3ed   : > { %v1216_v37 = vpop.permute.xlu1 %1215  ;;  %8208 = vst [vmem:[#allocation59_spill] sm:$0xff] %v6737_v23  ;;  %v1368_v32 = vsel %vm582_vm0, %v6737_v23, 0.0  ;;  %s7925_s6 = scalar_lea.hbm %s8287_s12, %s4505_s17 }
 0x3ee   : > { %8205 = vst [vmem:[#allocation56_spill] sm:$0xff] %v6717_v3  ;;  %v1291_v21 = vmul.f32 %v6602_v46, %v1267_v45  ;;  %v1249_v47 = vadd.f32 %v6598_v15, %v1216_v37  ;;  %v1353_v1 = vsel %vm582_vm0, %v6717_v3, 0.0 }
 0x3ef   : > { %1354 = vadd.xlane.f32.xlu0 %v1353_v1  ;;  %1357 = vadd.xlane.f32.xlu1 %v1356_v28 }
 0x3f0   : > { %v1269_v20 = vmul.f32 %v1249_v47, %v6542_v63  ;;  %v6732_v57 = vadd.f32 %v5144_v7, %v1291_v21 }
 0x3f1   : > { %v1226_v6 = vpop.permute.xlu1 %1225 }
 0x3f2   : > { %8207 = vst [vmem:[#allocation58_spill] sm:$0xff] %v6732_v57  ;;  %v1293_v24 = vmul.f32 %v6602_v46, %v1269_v20  ;;  %v1251_v0 = vadd.f32 %v6598_v15, %v1226_v6  ;;  %v1359_v63 = vsel %vm582_vm0, %v6732_v57, 0.0  ;;  %v6754_v15 = vadd.f32 %v5147_v33, %v1296_v27 }
 0x3f3   : > { %1360 = vadd.xlane.f32.xlu0 %v1359_v63  ;;  %1363 = vadd.xlane.f32.xlu1 %v1362_v42 }
 0x3f4   : > { %v1271_v12 = vmul.f32 %v1251_v0, %v6558_v38  ;;  %v6746_v40 = vadd.f32 %v5146_v26, %v1293_v24  ;;  %v1374_v34 = vsel %vm582_vm0, %v6754_v15, 0.0 }
 0x3f6   : > { %8209 = vst [vmem:[#allocation60_spill] sm:$0xff] %v6746_v40  ;;  %v1365_v25 = vsel %vm582_vm0, %v6746_v40, 0.0  ;;  %v1295_v35 = vmul.f32 %v6602_v46, %v1271_v12 }
 0x3f7   : > { %1366 = vadd.xlane.f32.xlu0 %v1365_v25  ;;  %1369 = vadd.xlane.f32.xlu1 %v1368_v32 }
 0x3f8   : > { %v6757_v14 = vadd.f32 %v5148_v41, %v1295_v35 }
 0x3fa   : > { %v1371_v38 = vsel %vm582_vm0, %v6757_v14, 0.0 }
 0x3fb   : > { %1372 = vadd.xlane.f32.xlu0 %v1371_v38  ;;  %1375 = vadd.xlane.f32.xlu1 %v1374_v34 }
 0x454   : > { %v1319_v13 = vpop.xlane.xlu1 %1318 }
 0x455   : > { %v1377_v2 = vmul.f32 0.015625, %v1319_v13 }
 0x457   : > { %v6772_v53 = vsub.f32 %v6609_v19, %v1377_v2 }
 0x458   : > { %v1322_v52 = vpop.xlane.xlu0 %1321 }
 0x459   : > { %v1378_v56 = vmul.f32 0.015625, %v1322_v52  ;;  %v1417_v9 = vmul.f32 %v6772_v53, %v6772_v53 }
 0x45b   : > { %v6777_v16 = vsub.f32 %v6617_v4, %v1378_v56  ;;  %v1437_v59 = vsel %vm582_vm0, %v1417_v9, 0.0 }
 0x45c   : > { %1438 = vadd.xlane.f32.xlu0 %v1437_v59  ;;  %v1331_v49 = vpop.xlane.xlu0 %1330 }
 0x45d   : > { %v1381_v8 = vmul.f32 0.015625, %v1331_v49  ;;  %v1418_v60 = vmul.f32 %v6777_v16, %v6777_v16 }
 0x45f   : > { %v6783_v45 = vsub.f32 %v6625_v18, %v1381_v8  ;;  %v1440_v19 = vsel %vm582_vm0, %v1418_v60, 0.0 }
 0x460   : > { %v1334_v48 = vpop.xlane.xlu1 %1333  ;;  %1441 = vadd.xlane.f32.xlu1 %v1440_v19 }
 0x461   : > { %v1382_v29 = vmul.f32 0.015625, %v1334_v48  ;;  %v1421_v4 = vmul.f32 %v6783_v45, %v6783_v45 }
 0x463   : > { %v6789_v37 = vsub.f32 %v6633_v31, %v1382_v29  ;;  %v1449_v28 = vsel %vm582_vm0, %v1421_v4, 0.0 }
 0x464   : > { %1450 = vadd.xlane.f32.xlu0 %v1449_v28  ;;  %v1325_v51 = vpop.xlane.xlu0 %1324 }
 0x465   : > { %v1379_v61 = vmul.f32 0.015625, %v1325_v51  ;;  %v1422_v21 = vmul.f32 %v6789_v37, %v6789_v37 }
 0x467   : > { %v6795_v47 = vsub.f32 %v6641_v36, %v1379_v61  ;;  %v1452_v1 = vsel %vm582_vm0, %v1422_v21, 0.0 }
 0x468   : > { %v1328_v20 = vpop.xlane.xlu1 %1327  ;;  %1453 = vadd.xlane.f32.xlu1 %v1452_v1 }
 0x469   : > { %v1380_v7 = vmul.f32 0.015625, %v1328_v20  ;;  %v1419_v6 = vmul.f32 %v6795_v47, %v6795_v47 }
 0x46b   : > { %v6801_v42 = vsub.f32 %v6650_v39, %v1380_v7  ;;  %v1443_v22 = vsel %vm582_vm0, %v1419_v6, 0.0 }
 0x46c   : > { %1444 = vadd.xlane.f32.xlu0 %v1443_v22  ;;  %v1337_v27 = vpop.xlane.xlu0 %1336 }
 0x46d   : > { %v1383_v24 = vmul.f32 0.015625, %v1337_v27  ;;  %v1420_v0 = vmul.f32 %v6801_v42, %v6801_v42 }
 0x46f   : > { %v6807_v63 = vsub.f32 %v6660_v54, %v1383_v24  ;;  %v1446_v12 = vsel %vm582_vm0, %v1420_v0, 0.0 }
 0x470   : > { %v1340_v26 = vpop.xlane.xlu1 %1339  ;;  %1447 = vadd.xlane.f32.xlu1 %v1446_v12 }
 0x471   : > { %v1384_v25 = vmul.f32 0.015625, %v1340_v26  ;;  %v1423_v32 = vmul.f32 %v6807_v63, %v6807_v63 }
 0x473   : > { %v6813_v35 = vsub.f32 %v6671_v44, %v1384_v25  ;;  %v1455_v33 = vsel %vm582_vm0, %v1423_v32, 0.0 }
 0x474   : > { %v1346_v41 = vpop.xlane.xlu1 %1345  ;;  %1456 = vadd.xlane.f32.xlu0 %v1455_v33  ;;  %v1343_v38 = vpop.xlane.xlu0 %1342 }
 0x475   : > { %v1386_v34 = vmul.f32 0.015625, %v1346_v41  ;;  %v1385_v50 = vmul.f32 0.015625, %v1343_v38  ;;  %v1424_v10 = vmul.f32 %v6813_v35, %v6813_v35 }
 0x477   : > { %v6819_v13 = vsub.f32 %v6681_v30, %v1386_v34  ;;  %v6822_v2 = vsub.f32 %v6685_v62, %v1385_v50  ;;  %v1458_v52 = vsel %vm582_vm0, %v1424_v10, 0.0 }
 0x478   : > { %v1352_v56 = vpop.xlane.xlu1 %1351  ;;  %1459 = vadd.xlane.f32.xlu1 %v1458_v52  ;;  %v1349_v9 = vpop.xlane.xlu0 %1348 }
 0x479   : > { %v1388_v59 = vmul.f32 0.015625, %v1352_v56  ;;  %v1387_v49 = vmul.f32 0.015625, %v1349_v9  ;;  %v1426_v8 = vmul.f32 %v6819_v13, %v6819_v13  ;;  %v1425_v60 = vmul.f32 %v6822_v2, %v6822_v2 }
 0x47b   : > { %v6830_v19 = vsub.f32 %v6691_v11, %v1388_v59  ;;  %v6833_v48 = vsub.f32 %v6701_v17, %v1387_v49  ;;  %v1464_v29 = vsel %vm582_vm0, %v1426_v8, 0.0  ;;  %v1461_v4 = vsel %vm582_vm0, %v1425_v60, 0.0 }
 0x47c   : > { %v1358_v28 = vpop.xlane.xlu1 %1357  ;;  %1465 = vadd.xlane.f32.xlu1 %v1464_v29  ;;  %1462 = vadd.xlane.f32.xlu0 %v1461_v4  ;;  %v1355_v51 = vpop.xlane.xlu0 %1354  ;;  %v1579_v4 = vsub.s32 4, %v6396_v43 }
 0x47d   : > { %v1390_v61 = vmul.f32 0.015625, %v1358_v28  ;;  %v1389_v21 = vmul.f32 0.015625, %v1355_v51  ;;  %v1428_v1 = vmul.f32 %v6830_v19, %v6830_v19  ;;  %v1427_v20 = vmul.f32 %v6833_v48, %v6833_v48 }
 0x47f   : > { %v6842_v7 = vsub.f32 %v6708_v58, %v1390_v61  ;;  %v6845_v6 = vsub.f32 %v6717_v3, %v1389_v21  ;;  %v1470_v22 = vsel %vm582_vm0, %v1428_v1, 0.0  ;;  %v1467_v27 = vsel %vm582_vm0, %v1427_v20, 0.0  ;;  %v1692_v61 = vld [vmem:[#allocation2 + $0x8] sm:$0x1] }
 0x480   : > { %v1364_v24 = vpop.xlane.xlu1 %1363  ;;  %1471 = vadd.xlane.f32.xlu1 %v1470_v22  ;;  %1468 = vadd.xlane.f32.xlu0 %v1467_v27  ;;  %v1361_v0 = vpop.xlane.xlu0 %1360  ;;  %v1693_v27 = vsel %vm6875_vm5, 0, %v1692_v61  ;;  %v1704_v61 = vld [vmem:[#allocation2 + $0x38] sm:$0x1] }
 0x481   : > { %v1392_v12 = vmul.f32 0.015625, %v1364_v24  ;;  %v1391_v26 = vmul.f32 0.015625, %v1361_v0  ;;  %v1430_v25 = vmul.f32 %v6842_v7, %v6842_v7  ;;  %v1429_v32 = vmul.f32 %v6845_v6, %v6845_v6  ;;  %1694 = vst [vmem:[#allocation2 + $0x8] sm:$0x1] %v1693_v27  ;;  %v1675_v27 = vld [vmem:[#allocation2 + $0x3c] sm:$0x1] }
 0x483   : > { %v6854_v33 = vsub.f32 %v6723_v5, %v1392_v12  ;;  %v6857_v41 = vsub.f32 %v6732_v57, %v1391_v26  ;;  %v1476_v38 = vsel %vm582_vm0, %v1430_v25, 0.0  ;;  %v1473_v34 = vsel %vm582_vm0, %v1429_v32, 0.0  ;;  %v1666_v25 = vld [vmem:[#allocation2 + $0x18] sm:$0x1] }
 0x484   : > { %v1370_v50 = vpop.xlane.xlu1 %1369  ;;  %1477 = vadd.xlane.f32.xlu1 %v1476_v38  ;;  %1474 = vadd.xlane.f32.xlu0 %v1473_v34  ;;  %v1367_v10 = vpop.xlane.xlu0 %1366  ;;  %v1667_v32 = vsel %vm6765_vm3, 0, %v1666_v25  ;;  %v1710_v25 = vld [vmem:[#allocation2 + $0x50] sm:$0x1] }
 0x485   : > { %v1394_v52 = vmul.f32 0.015625, %v1370_v50  ;;  %v1393_v56 = vmul.f32 0.015625, %v1367_v10  ;;  %v1432_v9 = vmul.f32 %v6854_v33, %v6854_v33  ;;  %v1431_v59 = vmul.f32 %v6857_v41, %v6857_v41  ;;  %1668 = vst [vmem:[#allocation2 + $0x18] sm:$0x1] %v1667_v32  ;;  %v1698_v50 = vld [vmem:[#allocation2 + $0x20] sm:$0x1] }
 0x486   : > { %v1699_v10 = vsel %vm6875_vm5, 0, %v1698_v50  ;;  %v1678_v32 = vld [vmem:[#allocation2 + $0x48] sm:$0x1]  ;;  %v1681_v50 = vld [vmem:[#allocation2 + $0x54] sm:$0x1] }
 0x487   : > { %v6866_v49 = vsub.f32 %v6737_v23, %v1394_v52  ;;  %v6869_v8 = vsub.f32 %v6746_v40, %v1393_v56  ;;  %v1482_v60 = vsel %vm582_vm0, %v1432_v9, 0.0  ;;  %v1479_v29 = vsel %vm582_vm0, %v1431_v59, 0.0  ;;  %1700 = vst [vmem:[#allocation2 + $0x20] sm:$0x1] %v1699_v10  ;;  %v1663_v52 = vld [vmem:[#allocation2 + $0xc] sm:$0x1] }
 0x488   : > { %v1376_v28 = vpop.xlane.xlu1 %1375  ;;  %1483 = vadd.xlane.f32.xlu1 %v1482_v60  ;;  %1480 = vadd.xlane.f32.xlu0 %v1479_v29  ;;  %v1373_v51 = vpop.xlane.xlu0 %1372  ;;  %v1664_v56 = vsel %vm6765_vm3, 0, %v1663_v52  ;;  %v1695_v9 = vld [vmem:[#allocation2 + $0x14] sm:$0x1]  ;;  %v1669_v60 = vld [vmem:[#allocation2 + $0x24] sm:$0x1]  ;;  %v1682_v10 = vsel %vm6765_vm3, 0, %v1681_v50 }
 0x489   : > { %v1396_v21 = vmul.f32 0.015625, %v1376_v28  ;;  %v1395_v1 = vmul.f32 0.015625, %v1373_v51  ;;  %v1434_v20 = vmul.f32 %v6866_v49, %v6866_v49  ;;  %v1433_v22 = vmul.f32 %v6869_v8, %v6869_v8  ;;  %1665 = vst [vmem:[#allocation2 + $0xc] sm:$0x1] %v1664_v56  ;;  %v1701_v28 = vld [vmem:[#allocation2 + $0x2c] sm:$0x1] }
 0x48a   : > { %v1696_v59 = vsel %vm6875_vm5, 0, %v1695_v9  ;;  %v1670_v29 = vsel %vm6765_vm3, 0, %v1669_v60  ;;  %v1702_v51 = vsel %vm6875_vm5, 0, %v1701_v28  ;;  %1683 = vst [vmem:[#allocation2 + $0x54] sm:$0x1] %v1682_v10 }
 0x48b   : > { %v6886_v24 = vsub.f32 %v6754_v15, %v1396_v21  ;;  %v6889_v0 = vsub.f32 %v6757_v14, %v1395_v1  ;;  %v1488_v12 = vsel %vm582_vm0, %v1434_v20, 0.0  ;;  %v1485_v26 = vsel %vm582_vm0, %v1433_v22, 0.0  ;;  %1697 = vst [vmem:[#allocation2 + $0x14] sm:$0x1] %v1696_v59  ;;  %1671 = vst [vmem:[#allocation2 + $0x24] sm:$0x1] %v1670_v29 }
 0x48c   : > { %1489 = vadd.xlane.f32.xlu1 %v1488_v12  ;;  %1486 = vadd.xlane.f32.xlu0 %v1485_v26  ;;  %1703 = vst [vmem:[#allocation2 + $0x2c] sm:$0x1] %v1702_v51  ;;  %v1672_v21 = vld [vmem:[#allocation2 + $0x30] sm:$0x1]  ;;  %v1705_v1 = vsel %vm6875_vm5, 0, %v1704_v61  ;;  %v1676_v26 = vsel %vm6765_vm3, 0, %v1675_v27 }
 0x48d   : > { %v1436_v38 = vmul.f32 %v6886_v24, %v6886_v24  ;;  %v1435_v15 = vmul.f32 %v6889_v0, %v6889_v0  ;;  %v1673_v20 = vsel %vm6765_vm3, 0, %v1672_v21  ;;  %1706 = vst [vmem:[#allocation2 + $0x38] sm:$0x1] %v1705_v1  ;;  %v1707_v22 = vld [vmem:[#allocation2 + $0x44] sm:$0x1] }
 0x48e   : > { %1674 = vst [vmem:[#allocation2 + $0x30] sm:$0x1] %v1673_v20  ;;  %v1708_v12 = vsel %vm6875_vm5, 0, %v1707_v22  ;;  %1677 = vst [vmem:[#allocation2 + $0x3c] sm:$0x1] %v1676_v26 }
 0x48f   : > { %v1494_v14 = vsel %vm582_vm0, %v1436_v38, 0.0  ;;  %v1491_v34 = vsel %vm582_vm0, %v1435_v15, 0.0  ;;  %1709 = vst [vmem:[#allocation2 + $0x44] sm:$0x1] %v1708_v12  ;;  %v1711_v38 = vsel %vm6875_vm5, 0, %v1710_v25  ;;  %v1679_v15 = vsel %vm6765_vm3, 0, %v1678_v32 }
 0x490   : > { %1495 = vadd.xlane.f32.xlu1 %v1494_v14  ;;  %1492 = vadd.xlane.f32.xlu0 %v1491_v34  ;;  %1712 = vst [vmem:[#allocation2 + $0x50] sm:$0x1] %v1711_v38  ;;  %1680 = vst [vmem:[#allocation2 + $0x48] sm:$0x1] %v1679_v15  ;;  %v1713_v14 = vld [vmem:[#allocation2 + $0x5c] sm:$0x1] }
 0x491   : > { %v1714_v34 = vsel %vm6875_vm5, 0, %v1713_v14  ;;  %v1716_v52 = vld [vmem:[#allocation2 + $0x68] sm:$0x1]  ;;  %v1684_v9 = vld [vmem:[#allocation2 + $0x60] sm:$0x1]  ;;  %v1603_v32 = vsub.s32 3, %v6396_v43  ;;  %v6939_v14 = vrot.slane %v6402_v55, %v1579_v4 }
 0x492   : > { %1715 = vst [vmem:[#allocation2 + $0x5c] sm:$0x1] %v1714_v34  ;;  %v1717_v56 = vsel %vm6875_vm5, 0, %v1716_v52  ;;  %v1685_v59 = vsel %vm6765_vm3, 0, %v1684_v9  ;;  %v1719_v60 = vld [vmem:[#allocation2 + $0x74] sm:$0x1] }
 0x493   : > { %1718 = vst [vmem:[#allocation2 + $0x68] sm:$0x1] %v1717_v56  ;;  %1686 = vst [vmem:[#allocation2 + $0x60] sm:$0x1] %v1685_v59  ;;  %v1720_v29 = vsel %vm6875_vm5, 0, %v1719_v60  ;;  %v1627_v56 = vstv %s1626_s8 }
 0x494   : > { %v1687_v28 = vld [vmem:[#allocation2 + $0x6c] sm:$0x1]  ;;  %1721 = vst [vmem:[#allocation2 + $0x74] sm:$0x1] %v1720_v29  ;;  %v5149_v10 = vld [vmem:[%s6164_s25] sm:$0x3f] }
 0x495   : > { %v1688_v51 = vsel %vm6765_vm3, 0, %v1687_v28  ;;  %v6942_v52 = vrot.slane %v5149_v10, %v1603_v32  ;;  %vm6946_vm6 = vcmp.eq.s32.totalorder %v1627_v56, 1 }
 0x496   : > { %1689 = vst [vmem:[#allocation2 + $0x6c] sm:$0x1] %v1688_v51 }
 0x4e9   : > { %v1439_v61 = vpop.xlane.xlu0 %1438 }
 0x4ea   : > { %v1497_v21 = vmul.f32 0.015625, %v1439_v61 }
 0x4ec   : > { %v1517_v1 = vadd.f32 1e-06, %v1497_v21 }
 0x4ed   : > { %v1442_v20 = vpop.xlane.xlu1 %1441 }
 0x4ee   : > { %5089 = vrsqrt.f32 %v1517_v1  ;;  %v1498_v22 = vmul.f32 0.015625, %v1442_v20 }
 0x4f0   : > { %v1518_v27 = vadd.f32 1e-06, %v1498_v22 }
 0x4f1   : > { %v1451_v12 = vpop.xlane.xlu0 %1450 }
 0x4f2   : > { %5091 = vrsqrt.f32 %v1518_v27  ;;  %v1501_v26 = vmul.f32 0.015625, %v1451_v12 }
 0x4f4   : > { %v1521_v25 = vadd.f32 1e-06, %v1501_v26 }
 0x4f5   : > { %v1454_v38 = vpop.xlane.xlu1 %1453 }
 0x4f6   : > { %5093 = vrsqrt.f32 %v1521_v25  ;;  %v1502_v15 = vmul.f32 0.015625, %v1454_v38 }
 0x4f8   : > { %v5090_v34 = vpop.eup %5089  ;;  %v1522_v50 = vadd.f32 1e-06, %v1502_v15 }
 0x4f9   : > { %v1557_v9 = vmul.f32 %v5090_v34, %v6772_v53  ;;  %v1445_v59 = vpop.xlane.xlu0 %1444 }
 0x4fa   : > { %5095 = vrsqrt.f32 %v1522_v50  ;;  %v1499_v60 = vmul.f32 0.015625, %v1445_v59 }
 0x4fb   : > { %v1581_v29 = vmul.f32 %v6939_v14, %v1557_v9 }
 0x4fc   : > { %v5092_v28 = vpop.eup %5091  ;;  %v1519_v55 = vadd.f32 1e-06, %v1499_v60 }
 0x4fd   : > { %v1605_v61 = vadd.f32 %v6942_v52, %v1581_v29  ;;  %v1558_v21 = vmul.f32 %v5092_v28, %v6777_v16  ;;  %v1448_v1 = vpop.xlane.xlu1 %1447 }
 0x4fe   : > { %5097 = vrsqrt.f32 %v1519_v55  ;;  %v1500_v20 = vmul.f32 0.015625, %v1448_v1 }
 0x4ff   : > { %v1637_v53 = vsel %vm6946_vm6, %v1605_v61, 0.0  ;;  %v1582_v22 = vmul.f32 %v6939_v14, %v1558_v21 }
 0x500   : > { %v5094_v27 = vpop.eup %5093  ;;  %v4515_v12 = vpack.c.bf16 %v1637_v53, %v1637_v53  ;;  %v1520_v26 = vadd.f32 1e-06, %v1500_v20 }
 0x501   : > { %v1606_v4 = vadd.f32 %v6942_v52, %v1582_v22  ;;  %v1561_v25 = vmul.f32 %v5094_v27, %v6783_v45  ;;  %v1457_v32 = vpop.xlane.xlu0 %1456  ;;  %v1986_v45 = vld [vmem:[#allocation2] sm:$0xf] }
 0x502   : > { %v1785_v38 = vshrl.u32 %v4515_v12, 16  ;;  %5099 = vrsqrt.f32 %v1520_v26  ;;  %v1503_v16 = vmul.f32 0.015625, %v1457_v32  ;;  %v1788_v56 = vshll.u32 %v4515_v12, 16 }
 0x503   : > { %v1638_v15 = vsel %vm6946_vm6, %v1606_v4, 0.0  ;;  %v1585_v34 = vmul.f32 %v6939_v14, %v1561_v25  ;;  %v1991_v4 = vld [vmem:[#allocation2 + $0x8] sm:$0x1] }
 0x504   : > { %v5096_v50 = vpop.eup %5095  ;;  %v1787_v10 = vrot.slane %v1785_v38, 7  ;;  %v4516_v9 = vpack.c.bf16 %v1638_v15, %v1638_v15  ;;  %v1523_v59 = vadd.f32 1e-06, %v1503_v16 }
 0x505   : > { %v1609_v29 = vadd.f32 %v6942_v52, %v1585_v34  ;;  %v1562_v28 = vmul.f32 %v5096_v50, %v6789_v37  ;;  %v1460_v51 = vpop.xlane.xlu1 %1459 }
 0x506   : > { %v1790_v55 = vor.u32 %v1788_v56, %v1787_v10  ;;  %v1793_v61 = vshrl.u32 %v4516_v9, 16  ;;  %5101 = vrsqrt.f32 %v1523_v59  ;;  %v1504_v20 = vmul.f32 0.015625, %v1460_v51 }
 0x507   : > { %v4519_v21 = vpack.c.bf16 %v1609_v29, %v1609_v29  ;;  %v1586_v1 = vmul.f32 %v6939_v14, %v1562_v28  ;;  %v1791_v22 = vrot.slane %v1787_v10, 4  ;;  %v1796_v26 = vshll.u32 %v4516_v9, 16 }
 0x508   : > { %v5098_v53 = vpop.eup %5097  ;;  %v1987_v27 = vsel %vm6962_vm8, %v1790_v55, %v1986_v45  ;;  %v1795_v12 = vrot.slane %v1793_v61, 7  ;;  %v1524_v56 = vadd.f32 1e-06, %v1504_v20 }
 0x509   : > { %1988 = vst [vmem:[#allocation2] sm:$0xf] %v1987_v27  ;;  %v1819_v25 = vshrl.u32 %v4519_v21, 16  ;;  %v1822_v32 = vshll.u32 %v4519_v21, 16  ;;  %v1610_v38 = vadd.f32 %v6942_v52, %v1586_v1  ;;  %v1559_v16 = vmul.f32 %v5098_v53, %v6795_v47  ;;  %v1466_v15 = vpop.xlane.xlu1 %1465  ;;  %v1463_v34 = vpop.xlane.xlu0 %1462  ;;  %v2001_v21 = vld [vmem:[#allocation2 + $0x18] sm:$0xf] }
 0x50a   : > { %v1798_v50 = vor.u32 %v1796_v26, %v1795_v12  ;;  %v1800_v10 = vrot.slane %v1795_v12, 4  ;;  %v1506_v59 = vmul.f32 0.015625, %v1466_v15  ;;  %v1505_v28 = vmul.f32 0.015625, %v1463_v34 }
 0x50b   : > { %v1821_v9 = vrot.slane %v1819_v25, 7  ;;  %v4520_v45 = vpack.c.bf16 %v1610_v38, %v1610_v38  ;;  %v1583_v29 = vmul.f32 %v6939_v14, %v1559_v16  ;;  %5103 = vrsqrt.f32 %v1524_v56 }
 0x50c   : > { %v5100_v51 = vpop.eup %5099  ;;  %v1799_v55 = vsel %vm6972_vm10, %v1791_v22, %v1798_v50  ;;  %v1992_v61 = vsel %vm6765_vm3, %v1800_v10, %v1991_v4  ;;  %v1526_v47 = vadd.f32 1e-06, %v1506_v59  ;;  %v1525_v22 = vadd.f32 1e-06, %v1505_v28  ;;  %v2005_v50 = vld [vmem:[#allocation2 + $0x20] sm:$0x1] }
 0x50d   : > { %1990 = vst.msk [vmem:[#allocation2 + $0x4] sm:$0xf] %vm1984_vm7, %v1799_v55  ;;  %1993 = vst [vmem:[#allocation2 + $0x8] sm:$0x1] %v1992_v61  ;;  %v1824_v1 = vor.u32 %v1822_v32, %v1821_v9  ;;  %v1827_v20 = vshrl.u32 %v4520_v45, 16  ;;  %v1830_v53 = vshll.u32 %v4520_v45, 16  ;;  %v1472_v27 = vpop.xlane.xlu1 %1471  ;;  %v1469_v12 = vpop.xlane.xlu0 %1468  ;;  %v1607_v26 = vadd.f32 %v6942_v52, %v1583_v29 }
 0x50e   : > { %v1560_v25 = vmul.f32 %v5100_v51, %v6801_v42  ;;  %5105 = vrsqrt.f32 %v1526_v47  ;;  %v1508_v16 = vmul.f32 0.015625, %v1472_v27  ;;  %v1507_v15 = vmul.f32 0.015625, %v1469_v12 }
 0x50f   : > { %v2002_v4 = vsel %vm6962_vm8, %v1824_v1, %v2001_v21  ;;  %v1829_v38 = vrot.slane %v1827_v20, 7  ;;  %v1825_v34 = vrot.slane %v1821_v9, 4  ;;  %v4517_v32 = vpack.c.bf16 %v1607_v26, %v1607_v26  ;;  %v1994_v26 = vld [vmem:[#allocation2 + $0xc] sm:$0xf] }
 0x510   : > { %2003 = vst [vmem:[#allocation2 + $0x18] sm:$0xf] %v2002_v4  ;;  %v1584_v10 = vmul.f32 %v6939_v14, %v1560_v25  ;;  %5107 = vrsqrt.f32 %v1525_v22  ;;  %v5102_v56 = vpop.eup %5101  ;;  %v1528_v29 = vadd.f32 1e-06, %v1508_v16  ;;  %v1527_v42 = vadd.f32 1e-06, %v1507_v15 }
 0x511   : > { %v1832_v59 = vor.u32 %v1830_v53, %v1829_v38  ;;  %v1834_v45 = vrot.slane %v1829_v38, 4  ;;  %v1478_v51 = vpop.xlane.xlu1 %1477  ;;  %v1475_v28 = vpop.xlane.xlu0 %1474  ;;  %v1802_v55 = vshrl.u32 %v4517_v32, 16  ;;  %v1805_v61 = vshll.u32 %v4517_v32, 16 }
 0x512   : > { %v1608_v21 = vadd.f32 %v6942_v52, %v1584_v10  ;;  %v1563_v47 = vmul.f32 %v5102_v56, %v6807_v63  ;;  %5109 = vrsqrt.f32 %v1528_v29  ;;  %v1510_v20 = vmul.f32 0.015625, %v1478_v51 }
 0x513   : > { %v1833_v9 = vsel %vm6972_vm10, %v1825_v34, %v1832_v59  ;;  %v2006_v1 = vsel %vm6765_vm3, %v1834_v45, %v2005_v50  ;;  %v1804_v53 = vrot.slane %v1802_v55, 7  ;;  %5111 = vrsqrt.f32 %v1527_v42 }
 0x514   : > { %2004 = vst.msk [vmem:[#allocation2 + $0x1c] sm:$0xf] %vm1984_vm7, %v1833_v9  ;;  %2007 = vst [vmem:[#allocation2 + $0x20] sm:$0x1] %v2006_v1  ;;  %v4518_v27 = vpack.c.bf16 %v1608_v21, %v1608_v21  ;;  %v1587_v12 = vmul.f32 %v6939_v14, %v1563_v47  ;;  %v1530_v25 = vadd.f32 1e-06, %v1510_v20 }
 0x515   : > { %v1509_v22 = vmul.f32 0.015625, %v1475_v28  ;;  %v1484_v63 = vpop.xlane.xlu1 %1483  ;;  %v1481_v4 = vpop.xlane.xlu0 %1480  ;;  %v1807_v16 = vor.u32 %v1805_v61, %v1804_v53  ;;  %v1808_v15 = vrot.slane %v1804_v53, 4  ;;  %v1998_v28 = vld [vmem:[#allocation2 + $0x14] sm:$0x1] }
 0x516   : > { %v5104_v38 = vpop.eup %5103  ;;  %v1810_v34 = vshrl.u32 %v4518_v27, 16  ;;  %v1813_v50 = vshll.u32 %v4518_v27, 16  ;;  %v1611_v32 = vadd.f32 %v6942_v52, %v1587_v12  ;;  %5113 = vrsqrt.f32 %v1530_v25 }
 0x517   : > { %v1564_v10 = vmul.f32 %v5104_v38, %v6813_v35  ;;  %v1529_v56 = vadd.f32 1e-06, %v1509_v22  ;;  %v1995_v45 = vsel %vm6962_vm8, %v1807_v16, %v1994_v26  ;;  %v1512_v42 = vmul.f32 0.015625, %v1484_v63 }
 0x518   : > { %v5106_v59 = vpop.eup %5105  ;;  %v1812_v29 = vrot.slane %v1810_v34, 7  ;;  %v1511_v51 = vmul.f32 0.015625, %v1481_v4  ;;  %1996 = vst [vmem:[#allocation2 + $0xc] sm:$0xf] %v1995_v45  ;;  %v4521_v55 = vpack.c.bf16 %v1611_v32, %v1611_v32 }
 0x519   : > { %v1588_v61 = vmul.f32 %v6939_v14, %v1564_v10  ;;  %v1566_v21 = vmul.f32 %v5106_v59, %v6819_v13  ;;  %5115 = vrsqrt.f32 %v1529_v56  ;;  %v1532_v1 = vadd.f32 1e-06, %v1512_v42  ;;  %v1490_v25 = vpop.xlane.xlu1 %1489  ;;  %v1487_v22 = vpop.xlane.xlu0 %1486  ;;  %v2008_v10 = vld [vmem:[#allocation2 + $0x24] sm:$0xf] }
 0x51a   : > { %v5108_v47 = vpop.eup %5107  ;;  %v1815_v9 = vor.u32 %v1813_v50, %v1812_v29  ;;  %v1817_v35 = vrot.slane %v1812_v29, 4  ;;  %v1531_v20 = vadd.f32 1e-06, %v1511_v51  ;;  %v1836_v53 = vshrl.u32 %v4521_v55, 16 }
 0x51b   : > { %v1839_v27 = vshll.u32 %v4521_v55, 16  ;;  %v1612_v12 = vadd.f32 %v6942_v52, %v1588_v61  ;;  %v1590_v26 = vmul.f32 %v6939_v14, %v1566_v21  ;;  %v1565_v4 = vmul.f32 %v5108_v47, %v6822_v2 }
 0x51c   : > { %v1816_v63 = vsel %vm6972_vm10, %v1808_v15, %v1815_v9  ;;  %v1999_v13 = vsel %vm6765_vm3, %v1817_v35, %v1998_v28  ;;  %5117 = vrsqrt.f32 %v1532_v1  ;;  %v5110_v38 = vpop.eup %5109  ;;  %v1838_v16 = vrot.slane %v1836_v53, 7 }
 0x51d   : > { %1997 = vst.msk [vmem:[#allocation2 + $0x10] sm:$0xf] %vm1984_vm7, %v1816_v63  ;;  %2000 = vst [vmem:[#allocation2 + $0x14] sm:$0x1] %v1999_v13  ;;  %v4522_v34 = vpack.c.bf16 %v1612_v12, %v1612_v12  ;;  %v1614_v50 = vadd.f32 %v6942_v52, %v1590_v26  ;;  %5119 = vrsqrt.f32 %v1531_v20  ;;  %v5112_v32 = vpop.eup %5111  ;;  %v1589_v56 = vmul.f32 %v6939_v14, %v1565_v4  ;;  %v2012_v20 = vld [vmem:[#allocation2 + $0x2c] sm:$0x1] }
 0x51e   : > { %v1568_v15 = vmul.f32 %v5110_v38, %v6830_v19  ;;  %v1514_v59 = vmul.f32 0.015625, %v1490_v25  ;;  %v1513_v45 = vmul.f32 0.015625, %v1487_v22  ;;  %v1841_v29 = vor.u32 %v1839_v27, %v1838_v16 }
 0x51f   : > { %v1842_v2 = vrot.slane %v1838_v16, 4  ;;  %v1844_v42 = vshrl.u32 %v4522_v34, 16  ;;  %v1847_v51 = vshll.u32 %v4522_v34, 16  ;;  %v4524_v28 = vpack.c.bf16 %v1614_v50, %v1614_v50 }
 0x520   : > { %v1613_v55 = vadd.f32 %v6942_v52, %v1589_v56  ;;  %v1592_v61 = vmul.f32 %v6939_v14, %v1568_v15  ;;  %v1567_v21 = vmul.f32 %v5112_v32, %v6833_v48  ;;  %v5114_v47 = vpop.eup %5113  ;;  %v2009_v9 = vsel %vm6962_vm8, %v1841_v29, %v2008_v10  ;;  %v2019_v10 = vld [vmem:[#allocation2 + $0x38] sm:$0x1]  ;;  %v2015_v29 = vld [vmem:[#allocation2 + $0x30] sm:$0xf] }
 0x521   : > { %v1846_v35 = vrot.slane %v1844_v42, 7  ;;  %v7019_v1 = vadd.f32 1e-06, %v1514_v59  ;;  %v7021_v19 = vadd.f32 1e-06, %v1513_v45  ;;  %v1861_v53 = vshrl.u32 %v4524_v28, 16 }
 0x522   : > { %2010 = vst [vmem:[#allocation2 + $0x24] sm:$0xf] %v2009_v9  ;;  %v1864_v27 = vshll.u32 %v4524_v28, 16  ;;  %v4523_v12 = vpack.c.bf16 %v1613_v55, %v1613_v55  ;;  %v1616_v26 = vadd.f32 %v6942_v52, %v1592_v61  ;;  %v1591_v48 = vmul.f32 %v6939_v14, %v1567_v21  ;;  %v4918_v9 = vld [vmem:[#allocation15 + $0xc0] sm:$0xff]  }
 0x523   : > { %v5116_v25 = vpop.eup %5115  ;;  %v1849_v22 = vor.u32 %v1847_v51, %v1846_v35  ;;  %v1851_v63 = vrot.slane %v1846_v35, 4  ;;  %v1570_v13 = vmul.f32 %v5114_v47, %v6842_v7  ;;  %v1863_v4 = vrot.slane %v1861_v53, 7  ;;  %v4917_v47 = vld [vmem:[#allocation15 + $0x40] sm:$0xff]   ;;  %4600 = vmatprep.subr.bf16.mxu1 %v4918_v9 }
 0x524   : > { %v1853_v38 = vshrl.u32 %v4523_v12, 16  ;;  %v1856_v16 = vshll.u32 %v4523_v12, 16  ;;  %v4526_v34 = vpack.c.bf16 %v1616_v26, %v1616_v26  ;;  %v1615_v56 = vadd.f32 %v6942_v52, %v1591_v48  ;;  %v4919_v35 = vld [vmem:[#allocation15] sm:$0xff]   ;;  %v2026_v48 = vld [vmem:[#allocation2 + $0x44] sm:$0x1]  ;;  %4536 = vmatprep.subr.bf16.mxu0 %v4917_v47 }
 0x525   : > { %v1850_v50 = vsel %vm6972_vm10, %v1842_v2, %v1849_v22  ;;  %v2013_v32 = vsel %vm6765_vm3, %v1851_v63, %v2012_v20  ;;  %v1594_v15 = vmul.f32 %v6939_v14, %v1570_v13  ;;  %v1866_v7 = vor.u32 %v1864_v27, %v1863_v4  ;;  %v4920_v26 = vld [vmem:[#allocation15 + $0x80] sm:$0xff]   ;;  %v4921_v22 = vld [vmem:[#allocation15 + $0x48] sm:$0xff]   ;;  %4537 = vmatpush3.bf16.msra.mxu0 %v4919_v35 }
 0x526   : > { %v5118_v59 = vpop.eup %5117  ;;  %2011 = vst.msk [vmem:[#allocation2 + $0x28] sm:$0xf] %vm1984_vm7, %v1850_v50  ;;  %2014 = vst [vmem:[#allocation2 + $0x2c] sm:$0x1] %v2013_v32  ;;  %v1868_v45 = vrot.slane %v1863_v4, 4  ;;  %v1855_v42 = vrot.slane %v1853_v38, 7  ;;  %v4525_v2 = vpack.c.bf16 %v1615_v56, %v1615_v56  ;;  %v1569_v21 = vmul.f32 %v5116_v25, %v6845_v6  ;;  %4601 = vmatpush3.bf16.msra.mxu1 %v4920_v26 }
 0x527   : > { %v1878_v51 = vshrl.u32 %v4526_v34, 16  ;;  %v5120_v28 = vpop.eup %5119  ;;  %v1881_v55 = vshll.u32 %v4526_v34, 16  ;;  %v1618_v61 = vadd.f32 %v6942_v52, %v1594_v15  ;;  %v4922_v63 = vld [vmem:[#allocation15 + $0xc8] sm:$0xff]   ;;  %4538 = vmatprep.subr.bf16.mxu0 %v4921_v22  ;;  %5121 = vrsqrt.f32 %v7019_v1  ;;  %v2033_v35 = vld [vmem:[#allocation2 + $0x50] sm:$0x1]  ;;  %v1493_v22 = vpop.xlane.xlu0 %1492  ;;  %v4928_v1 = vld [vmem:[#allocation15 + $0x90] sm:$0xff]  }
 0x528   : > { %v2020_v20 = vsel %vm6765_vm3, %v1868_v45, %v2019_v10  ;;  %v1858_v53 = vor.u32 %v1856_v16, %v1855_v42  ;;  %v1859_v12 = vrot.slane %v1855_v42, 4  ;;  %v1870_v13 = vshrl.u32 %v4525_v2, 16  ;;  %v4923_v32 = vld [vmem:[#allocation15 + $0x8] sm:$0xff]   ;;  %v1496_v42 = vpop.xlane.xlu1 %1495  ;;  %4602 = vmatprep.subr.bf16.mxu1 %v4922_v63 }
 0x529   : > { %v1880_v27 = vrot.slane %v1878_v51, 7  ;;  %2021 = vst [vmem:[#allocation2 + $0x38] sm:$0x1] %v2020_v20  ;;  %v1873_v4 = vshll.u32 %v4525_v2, 16  ;;  %v4528_v38 = vpack.c.bf16 %v1618_v61, %v1618_v61  ;;  %v1593_v6 = vmul.f32 %v6939_v14, %v1569_v21  ;;  %v4925_v51 = vld [vmem:[#allocation15 + $0x50] sm:$0xff]   ;;  %4539 = vmatpush3.bf16.msra.mxu0 %v4923_v32 }
 0x52a   : > { %v1867_v25 = vsel %vm6972_vm10, %v1859_v12, %v1866_v7  ;;  %v2016_v16 = vsel %vm6962_vm8, %v1858_v53, %v2015_v29  ;;  %v1872_v10 = vrot.slane %v1870_v13, 7  ;;  %v4924_v7 = vld [vmem:[#allocation15 + $0x88] sm:$0xff]   ;;  %v4926_v29 = vld [vmem:[#allocation15 + $0xd0] sm:$0xff]   ;;  %v1572_v61 = vmul.f32 %v5118_v59, %v6854_v33  ;;  %v7053_v33 = vld [vmem:[#allocation2 + $0x10] sm:$0xf]  ;;  %4540 = vmatprep.subr.bf16.mxu0 %v4925_v51 }
 0x52b   : > { %v1883_v34 = vor.u32 %v1881_v55, %v1880_v27  ;;  %v1885_v50 = vrot.slane %v1880_v27, 4  ;;  %2017 = vst [vmem:[#allocation2 + $0x30] sm:$0xf] %v2016_v16  ;;  %2018 = vst.msk [vmem:[#allocation2 + $0x34] sm:$0xf] %vm1984_vm7, %v1867_v25  ;;  %v1895_v56 = vshrl.u32 %v4528_v38, 16  ;;  %v1617_v45 = vadd.f32 %v6942_v52, %v1593_v6  ;;  %4603 = vmatpush3.bf16.msra.mxu1 %v4924_v7 }
 0x52c   : > { %v1898_v15 = vshll.u32 %v4528_v38, 16  ;;  %v2022_v2 = vld [vmem:[#allocation2 + $0x3c] sm:$0xf]  ;;  %v1571_v21 = vmul.f32 %v5120_v28, %v6857_v41  ;;  %v1875_v47 = vor.u32 %v1873_v4, %v1872_v10  ;;  %v1876_v9 = vrot.slane %v1872_v10, 4  ;;  %4604 = vmatprep.subr.bf16.mxu1 %v4926_v29  ;;  %v2368_v6 = vld [vmem:[#allocation2 + $0xc] sm:$0xf] }
 0x52d   : > { %v2027_v55 = vsel %vm6765_vm3, %v1885_v50, %v2026_v48  ;;  %v1897_v20 = vrot.slane %v1895_v56, 7  ;;  %v4527_v53 = vpack.c.bf16 %v1617_v45, %v1617_v45  ;;  %v1596_v12 = vmul.f32 %v6939_v14, %v1572_v61  ;;  %v4927_v41 = vld [vmem:[#allocation15 + $0x10] sm:$0xff]   ;;  %v7066_v25 = vld [vmem:[#allocation2 + $0x18] sm:$0xf]  ;;  %v4930_v16 = vld [vmem:[#allocation15 + $0xd8] sm:$0xff]  }
 0x52e   : > { %2028 = vst [vmem:[#allocation2 + $0x44] sm:$0x1] %v2027_v55  ;;  %v1595_v27 = vmul.f32 %v6939_v14, %v1571_v21  ;;  %5123 = vrsqrt.f32 %v7021_v19  ;;  %v1516_v26 = vmul.f32 0.015625, %v1496_v42  ;;  %v1884_v59 = vsel %vm6972_vm10, %v1876_v9, %v1883_v34  ;;  %v4929_v19 = vld [vmem:[#allocation15 + $0x58] sm:$0xff]   ;;  %v7071_v56 = vld [vmem:[#allocation2] sm:$0xf]  ;;  %4541 = vmatpush3.bf16.msra.mxu0 %v4927_v41 }
 0x52f   : > { %v2023_v28 = vsel %vm6962_vm8, %v1875_v47, %v2022_v2  ;;  %v1902_v63 = vrot.slane %v1897_v20, 4  ;;  %2025 = vst.msk [vmem:[#allocation2 + $0x40] sm:$0xf] %vm1984_vm7, %v1884_v59  ;;  %v1900_v48 = vor.u32 %v1898_v15, %v1897_v20  ;;  %v1887_v13 = vshrl.u32 %v4527_v53, 16  ;;  %4605 = vmatpush3.bf16.msra.mxu1 %v4928_v1  ;;  %v4931_v51 = vld [vmem:[#allocation15 + $0x18] sm:$0xff]   ;;  %4542 = vmatprep.subr.bf16.mxu0 %v4929_v19  ;;  %v4934_v41 = vld [vmem:[#allocation15 + $0xe0] sm:$0xff]  }
 0x530   : > { %2024 = vst [vmem:[#allocation2 + $0x3c] sm:$0xf] %v2023_v28  ;;  %v1620_v4 = vadd.f32 %v6942_v52, %v1596_v12  ;;  %v1619_v38 = vadd.f32 %v6942_v52, %v1595_v27  ;;  %v1536_v50 = vadd.f32 1e-06, %v1516_v26  ;;  %v1515_v32 = vmul.f32 0.015625, %v1493_v22  ;;  %v4932_v29 = vld [vmem:[#allocation15 + $0x98] sm:$0xff]   ;;  %4606 = vmatprep.subr.bf16.mxu1 %v4930_v16 }
 0x531   : > { %v2034_v34 = vsel %vm6765_vm3, %v1902_v63, %v2033_v35  ;;  %v4409_v10 = vcombine.low %v2368_v6, %v7053_v33  ;;  %v1889_v15 = vrot.slane %v1887_v13, 7  ;;  %v1890_v45 = vshll.u32 %v4527_v53, 16  ;;  %v2029_v55 = vld [vmem:[#allocation2 + $0x48] sm:$0xf]  ;;  %v4933_v53 = vld [vmem:[#allocation15 + $0x60] sm:$0xff]   ;;  %v5122_v1 = vpop.eup %5121 }
 0x532   : > { %2035 = vst [vmem:[#allocation2 + $0x50] sm:$0x1] %v2034_v34  ;;  %v4530_v42 = vpack.c.bf16 %v1620_v4, %v1620_v4  ;;  %v4529_v7 = vpack.c.bf16 %v1619_v38, %v1619_v38  ;;  %v1631_v2 = vstv %s7061_s19  ;;  %5125 = vrsqrt.f32 %v1536_v50  ;;  %v2674_v26 = vld [vmem:[#allocation2 + $0x1c] sm:$0xf]  ;;  %4543 = vmatpush3.bf16.msra.mxu0 %v4931_v51  ;;  %v2690_v37 = vld [vmem:[#allocation2 + $0x2c] sm:$0x1] }
 0x533   : > { %v1535_v61 = vadd.f32 1e-06, %v1515_v32  ;;  %3105 = vrot.lane.b32.xlu0 %v4409_v10, %s5585_s24  ;;  %v2698_v21 = vshrl.u32 %v7066_v25, 16  ;;  %v1892_v47 = vor.u32 %v1890_v45, %v1889_v15  ;;  %v1893_v9 = vrot.slane %v1889_v15, 4  ;;  %4607 = vmatpush3.bf16.msra.mxu1 %v4932_v29  ;;  %v2040_v13 = vld [vmem:[#allocation2 + $0x5c] sm:$0x1] }
 0x534   : > { %v1912_v35 = vshrl.u32 %v4530_v42, 16  ;;  %v2085_v20 = vshrl.u32 %v7071_v56, 16  ;;  %v1915_v12 = vshll.u32 %v4530_v42, 16  ;;  %v1904_v27 = vshrl.u32 %v4529_v7, 16  ;;  %4544 = vmatprep.subr.bf16.mxu0 %v4933_v53  ;;  %4608 = vmatprep.subr.bf16.mxu1 %v4934_v41  ;;  %v2036_v10 = vld [vmem:[#allocation2 + $0x54] sm:$0xf] }
 0x535   : > { %5127 = vrsqrt.f32 %v1535_v61  ;;  %v2088_v22 = vshll.u32 %v7071_v56, 16  ;;  %v1901_v59 = vsel %vm6972_vm10, %v1893_v9, %v1900_v48  ;;  %v2030_v28 = vsel %vm6962_vm8, %v1892_v47, %v2029_v55  ;;  %v4935_v48 = vld [vmem:[#allocation15 + $0x20] sm:$0xff]   ;;  %v4937_v55 = vld [vmem:[#allocation15 + $0x68] sm:$0xff]  }
 0x536   : > { %v1914_v63 = vrot.slane %v1912_v35, 7  ;;  %v1907_v19 = vshll.u32 %v4529_v7, 16  ;;  %2031 = vst [vmem:[#allocation2 + $0x48] sm:$0xf] %v2030_v28  ;;  %2032 = vst.msk [vmem:[#allocation2 + $0x4c] sm:$0xf] %vm1984_vm7, %v1901_v59  ;;  %v1574_v38 = vmul.f32 %v5122_v1, %v6866_v49  ;;  %4545 = vmatpush3.bf16.msra.mxu0 %v4935_v48 }
 0x537   : > { %v1906_v4 = vrot.slane %v1904_v27, 7  ;;  %v2700_v6 = vrot.slane %v2698_v21, 4  ;;  %v2701_v16 = vshll.u32 %v7066_v25, 16  ;;  %v2707_v56 = vshll.u32 %v2674_v26, 16  ;;  %v4936_v45 = vld [vmem:[#allocation15 + $0xa0] sm:$0xff]   ;;  %v4938_v9 = vld [vmem:[#allocation15 + $0xe8] sm:$0xff]   ;;  %4546 = vmatprep.subr.bf16.mxu0 %v4937_v55 }
 0x538   : > { %v5124_v34 = vpop.eup %5123  ;;  %v1917_v50 = vor.u32 %v1915_v12, %v1914_v63  ;;  %v1919_v32 = vrot.slane %v1914_v63, 4  ;;  %v2711_v15 = vshrl.u32 %v2674_v26, 16  ;;  %v1598_v51 = vmul.f32 %v6939_v14, %v1574_v38  ;;  %v2689_v49 = vld [vmem:[#allocation2 + $0x20] sm:$0x1]  ;;  %4609 = vmatpush3.bf16.msra.mxu1 %v4936_v45  ;;  %v7096_v1 = vld [vmem:[#allocation2 + $0x4] sm:$0xf] }
 0x539   : > { %v1909_v42 = vor.u32 %v1907_v19, %v1906_v4  ;;  %v1910_v7 = vrot.slane %v1906_v4, 4  ;;  %v1573_v29 = vmul.f32 %v5124_v34, %v6869_v8  ;;  %v2703_v61 = vrot.slane %v2701_v16, 5  ;;  %4610 = vmatprep.subr.bf16.mxu1 %v4938_v9  ;;  %v4939_v34 = vld [vmem:[#allocation15 + $0x28] sm:$0xff]   ;;  %v2587_v23 = vld [vmem:[#allocation2 + $0x30] sm:$0xe] }
 0x53a   : > { %v2041_v25 = vsel %vm6765_vm3, %v1919_v32, %v2040_v13  ;;  %v2709_v21 = vrot.slane %v2707_v56, 5  ;;  %v2713_v47 = vrot.slane %v2711_v15, 4  ;;  %v1622_v8 = vadd.f32 %v6942_v52, %v1598_v51  ;;  %4547 = vmatpush3.bf16.msra.mxu0 %v4939_v34  ;;  %v4940_v55 = vld [vmem:[#allocation15 + $0xa8] sm:$0xff]   ;;  %v7340_v54 = vld [vmem:[#allocation2 + $0x50] sm:$0x1] }
 0x53b   : > { %2042 = vst [vmem:[#allocation2 + $0x5c] sm:$0x1] %v2041_v25  ;;  %v1918_v35 = vsel %vm6972_vm10, %v1910_v7, %v1917_v50  ;;  %v2037_v53 = vsel %vm6962_vm8, %v1909_v42, %v2036_v10  ;;  %v1597_v12 = vmul.f32 %v6939_v14, %v1573_v29  ;;  %v2704_v27 = vor.u32 %v2703_v61, %v2700_v6  ;;  %v2047_v25 = vld [vmem:[#allocation2 + $0x68] sm:$0x1] }
 0x53c   : > { %2038 = vst [vmem:[#allocation2 + $0x54] sm:$0xf] %v2037_v53  ;;  %2039 = vst.msk [vmem:[#allocation2 + $0x58] sm:$0xf] %vm1984_vm7, %v1918_v35  ;;  %v2714_v26 = vor.u32 %v2713_v47, %v2709_v21  ;;  %v2717_v41 = vshll.u32 %v2689_v49, 16  ;;  %v2087_v59 = vrot.slane %v2085_v20, 4  ;;  %v5126_v28 = vpop.eup %5125  ;;  %v4532_v63 = vpack.c.bf16 %v1622_v8, %v1622_v8  ;;  %4611 = vmatpush3.bf16.msra.mxu1 %v4940_v55 }
 0x53d   : > { %v1621_v19 = vadd.f32 %v6942_v52, %v1597_v12  ;;  %vm7101_vm13 = vcmp.eq.s32.totalorder %v1631_v2, 1  ;;  %v2090_v4 = vrot.slane %v2088_v22, 5  ;;  %v1576_v38 = vmul.f32 %v5126_v28, %v6886_v24  ;;  %v7119_v49 = vld [vmem:[#allocation2 + $0x8] sm:$0x1]  ;;  %v4941_v12 = vld [vmem:[#allocation15 + $0x70] sm:$0xff]  }
 0x53e   : > { %v2705_v16 = vrot.slane %v2704_v27, 4  ;;  %v2715_v6 = vrot.slane %v2714_v26, 4  ;;  %v2719_v48 = vrot.slane %v2717_v41, 5  ;;  %v1929_v32 = vshrl.u32 %v4532_v63, 16  ;;  %v2043_v27 = vld [vmem:[#allocation2 + $0x60] sm:$0xf]  ;;  %4548 = vmatprep.subr.bf16.mxu0 %v4941_v12 }
 0x53f   : > { %v5128_v50 = vpop.eup %5127  ;;  %v4531_v20 = vpack.c.bf16 %v1621_v19, %v1621_v19  ;;  %v2091_v2 = vor.u32 %v2090_v4, %v2087_v59  ;;  %v2094_v56 = vshll.u32 %v7096_v1, 16  ;;  %v1600_v22 = vmul.f32 %v6939_v14, %v1576_v38  ;;  %v4942_v38 = vld [vmem:[#allocation15 + $0xf0] sm:$0xff]   ;;  %v4946_v55 = vld [vmem:[#allocation15 + $0xf8] sm:$0xff]  }
 0x540   : > { %v1575_v24 = vmul.f32 %v5128_v50, %v6889_v0  ;;  %v2710_v15 = vsel %vm7108_vm14, %v2705_v16, %v2709_v21  ;;  %v2720_v45 = vsel %vm7108_vm14, %v2715_v6, %v2719_v48  ;;  %v1931_v42 = vrot.slane %v1929_v32, 7  ;;  %v2584_v48 = vld [vmem:[#allocation2 + $0xc] sm:$0xe]  ;;  %v7139_v32 = vld [vmem:[#allocation2 + $0x14] sm:$0x1]  ;;  %4612 = vmatprep.subr.bf16.mxu1 %v4942_v38 }
 0x541   : > { %v1932_v7 = vshll.u32 %v4532_v63, 16  ;;  %v1921_v51 = vshrl.u32 %v4531_v20, 16  ;;  %v4441_v29 = vcombine.low %v2710_v15, %v2720_v45  ;;  %v1924_v61 = vshll.u32 %v4531_v20, 16  ;;  %v2054_v20 = vld [vmem:[#allocation2 + $0x74] sm:$0x1]  ;;  %v4944_v15 = vld [vmem:[#allocation15 + $0xb0] sm:$0xff]  }
 0x542   : > { %v1624_v47 = vadd.f32 %v6942_v52, %v1600_v22  ;;  %v1599_v0 = vmul.f32 %v6939_v14, %v1575_v24  ;;  %v7123_v9 = vrot.slane %v2091_v2, 4  ;;  %v1936_v35 = vrot.slane %v1931_v42, 4  ;;  %v7143_v22 = vld [vmem:[#allocation2 + $0xc] sm:$0xf]  ;;  %v4943_v24 = vld [vmem:[#allocation15 + $0x30] sm:$0xff]   ;;  %4613 = vmatpush3.bf16.msra.mxu1 %v4944_v15 }
 0x543   : > { %v1934_v21 = vor.u32 %v1932_v7, %v1931_v42  ;;  %v1923_v53 = vrot.slane %v1921_v51, 7  ;;  %3241 = vrot.lane.b32.xlu1 %v4441_v29, %s5585_s24  ;;  %v2098_v8 = vshrl.u32 %v7096_v1, 16  ;;  %v2096_v59 = vrot.slane %v2094_v56, 5  ;;  %v4945_v29 = vld [vmem:[#allocation15 + $0x78] sm:$0xff]   ;;  %4549 = vmatpush3.bf16.msra.mxu0 %v4943_v24 }
 0x544   : > { %v1656_v26 = vsel %vm7101_vm13, %v1624_v47, 0.0  ;;  %v1623_v41 = vadd.f32 %v6942_v52, %v1599_v0  ;;  %v2104_v14 = vshll.u32 %v7119_v49, 16  ;;  %v2048_v28 = vsel %vm6765_vm3, %v1936_v35, %v2047_v25  ;;  %v4949_v35 = vld [vmem:[#allocation15 + $0xb8] sm:$0xff]   ;;  %4550 = vmatprep.subr.bf16.mxu0 %v4945_v29  ;;  %4614 = vmatprep.subr.bf16.mxu1 %v4946_v55 }
 0x545   : > { %v1926_v63 = vor.u32 %v1924_v61, %v1923_v53  ;;  %v1927_v19 = vrot.slane %v1923_v53, 4  ;;  %v4534_v4 = vpack.c.bf16 %v1656_v26, %v1656_v26  ;;  %2049 = vst [vmem:[#allocation2 + $0x68] sm:$0x1] %v2048_v28  ;;  %v2100_v6 = vrot.slane %v2098_v8, 4  ;;  %v5170_v10 = vld [vmem:[#allocation2 + $0x48] sm:$0xf] }
 0x546   : > { %v1655_v16 = vsel %vm7101_vm13, %v1623_v41, 0.0  ;;  %v2618_v56 = vrot.slane %v7053_v33, 5  ;;  %v2097_v42 = vsel %vm7108_vm14, %v7123_v9, %v2096_v59  ;;  %v2106_v7 = vrot.slane %v2104_v14, 5  ;;  %v7161_v14 = vld [vmem:[#allocation2 + $0x10] sm:$0xf]  ;;  %4615 = vmatpush3.bf16.msra.mxu1 %v4949_v35 }
 0x547   : > { %v1935_v52 = vsel %vm6972_vm10, %v1927_v19, %v1934_v21  ;;  %v2044_v34 = vsel %vm6962_vm8, %v1926_v63, %v2043_v27  ;;  %v1946_v50 = vshrl.u32 %v4534_v4, 16  ;;  %v4533_v13 = vpack.c.bf16 %v1655_v16, %v1655_v16  ;;  %v4948_v21 = vld [vmem:[#allocation15 + $0x38] sm:$0xff]   ;;  %v7157_v27 = vld [vmem:[#allocation2 + $0x1c] sm:$0xf]  ;;  %v4951_v63 = vld [vmem:[#allocation15 + $0x100] sm:$0xff]  }
 0x548   : > { %2045 = vst [vmem:[#allocation2 + $0x60] sm:$0xf] %v2044_v34  ;;  %2046 = vst.msk [vmem:[#allocation2 + $0x64] sm:$0xf] %vm1984_vm7, %v1935_v52  ;;  %v2101_v2 = vor.u32 %v2100_v6, %v2096_v59  ;;  %v4369_v51 = vrot.slane %v2584_v48, 9  ;;  %v1949_v25 = vshll.u32 %v4534_v4, 16  ;;  %4551 = vmatpush3.bf16.msra.mxu0 %v4948_v21  ;;  %4700 = vmatprep.subr.bf16.mxu1 %v4951_v63 }
 0x549   : > { %v1948_v45 = vrot.slane %v1946_v50, 7  ;;  %v1938_v61 = vshrl.u32 %v4533_v13, 16  ;;  %v2621_v0 = vrot.slane %v7139_v32, 5  ;;  %v1941_v53 = vshll.u32 %v4533_v13, 16  ;;  %v2050_v4 = vld [vmem:[#allocation2 + $0x6c] sm:$0xf]  ;;  %4676 = vmatprep.subr.bf16.mxu0 %v4951_v63 }
 0x54a   : > { %v2102_v47 = vrot.slane %v2101_v2, 4  ;;  %v2619_v8 = vsel %vm7150_vm2, %v4369_v51, %v2618_v56  ;;  %v2620_v12 = vrot.slane %v2618_v56, 4  ;;  %v2109_v28 = vshrl.u32 %v7143_v22, 16  ;;  %v7169_v48 = vld [vmem:[#allocation2 + $0x24] sm:$0xf] }
 0x54b   : > { %v1953_v9 = vrot.slane %v1948_v45, 4  ;;  %v1951_v26 = vor.u32 %v1949_v25, %v1948_v45  ;;  %v1940_v41 = vrot.slane %v1938_v61, 7  ;;  %v2112_v6 = vshll.u32 %v7143_v22, 16  ;;  %v7171_v13 = vld [vmem:[#allocation2 + $0x18] sm:$0xf] }
 0x54c   : > { %v2107_v59 = vsel %vm7108_vm14, %v2102_v47, %v2106_v7  ;;  %v2622_v16 = vsel %vm7150_vm2, %v2620_v12, %v2621_v0  ;;  %v7173_v2 = vld [vmem:[#allocation2 + $0x14] sm:$0x1]  ;;  %v2111_v56 = vrot.slane %v2109_v28, 4  ;;  %v4410_v46 = vcombine.low %v7171_v13, %v7157_v27  ;;  %v7180_v45 = vld [vmem:[#allocation2 + $0x28] sm:$0xf] }
 0x54d   : > { %v2055_v19 = vsel %vm6765_vm3, %v1953_v9, %v2054_v20  ;;  %v4393_v38 = vcombine.low %v2097_v42, %v2107_v59  ;;  %v1943_v52 = vor.u32 %v1941_v53, %v1940_v41  ;;  %v1944_v34 = vrot.slane %v1940_v41, 4  ;;  %v7194_v63 = vld [vmem:[#allocation2 + $0x28] sm:$0xf] }
 0x54e   : > { %2056 = vst [vmem:[#allocation2 + $0x74] sm:$0x1] %v2055_v19  ;;  %v4425_v50 = vcombine.low %v2619_v8, %v2622_v16  ;;  %v2114_v20 = vrot.slane %v2112_v6, 5  ;;  %v2118_v24 = vshll.u32 %v7161_v14, 16  ;;  %v2122_v15 = vshrl.u32 %v7161_v14, 16 }
 0x54f   : > { %3033 = vrot.lane.b32.xlu1 %v4393_v38, %s5585_s24  ;;  %v1952_v42 = vsel %vm6972_vm10, %v1944_v34, %v1951_v26  ;;  %v2051_v7 = vsel %vm6962_vm8, %v1943_v52, %v2050_v4  ;;  %v2722_v51 = vshrl.u32 %v7169_v48, 16  ;;  %v2725_v29 = vshll.u32 %v7169_v48, 16  ;;  %v7196_v38 = vld [vmem:[#allocation2 + $0x20] sm:$0x1]  ;;  %v2061_v16 = vld [vmem:[#allocation2 + $0x18] sm:$0xf] }
 0x550   : > { %3169 = vrot.lane.b32.xlu0 %v4425_v50, %s5585_s24  ;;  %2052 = vst [vmem:[#allocation2 + $0x6c] sm:$0xf] %v2051_v7  ;;  %2053 = vst.msk [vmem:[#allocation2 + $0x70] sm:$0xf] %vm1984_vm7, %v1952_v42  ;;  %v2115_v55 = vor.u32 %v2114_v20, %v2111_v56  ;;  %v2120_v25 = vrot.slane %v2118_v24, 5  ;;  %v2124_v61 = vrot.slane %v2122_v15, 4 }
 0x551   : > { %v2128_v47 = vshll.u32 %v7173_v2, 16  ;;  %v2724_v0 = vrot.slane %v2722_v51, 4  ;;  %v2727_v21 = vrot.slane %v2725_v29, 5  ;;  %v2731_v60 = vshll.u32 %v7180_v45, 16  ;;  %8227 = vst [vmem:[#allocation61_spill] sm:$0xff] %v7196_v38 }
 0x552   : > { %v2735_v35 = vshrl.u32 %v7180_v45, 16  ;;  %v2116_v9 = vrot.slane %v2115_v55, 4  ;;  %v2125_v53 = vor.u32 %v2124_v61, %v2120_v25  ;;  %v2741_v41 = vshll.u32 %v2690_v37, 16  ;;  %v7202_v34 = vld [vmem:[#allocation2 + $0x24] sm:$0xf] }
 0x553   : > { %3107 = vrot.lane.b32.xlu1 %v4410_v46, %s5585_s24  ;;  %v2728_v8 = vor.u32 %v2727_v21, %v2724_v0  ;;  %v2733_v12 = vrot.slane %v2731_v60, 5  ;;  %v2130_v28 = vrot.slane %v2128_v47, 5  ;;  %v2625_v50 = vrot.slane %v7157_v27, 5  ;;  %v7205_v56 = vld [vmem:[#allocation2 + $0x1c] sm:$0xf] }
 0x554   : > { %v2737_v26 = vrot.slane %v2735_v35, 4  ;;  %v2126_v59 = vrot.slane %v2125_v53, 4  ;;  %v2121_v6 = vsel %vm7108_vm14, %v2116_v9, %v2120_v25  ;;  %v2743_v24 = vrot.slane %v2741_v41, 5  ;;  %v2585_v42 = vld [vmem:[#allocation2 + $0x18] sm:$0xe] }
 0x555   : > { %v2729_v19 = vrot.slane %v2728_v8, 4  ;;  %v4411_v15 = vcombine.low %v7202_v34, %v7194_v63  ;;  %v7209_v7 = vld [vmem:[#allocation2 + $0x20] sm:$0x1]  ;;  %v2627_v29 = vrot.slane %v2625_v50, 4  ;;  %v2628_v55 = vrot.slane %v7196_v38, 5 }
 0x556   : > { %v2738_v4 = vor.u32 %v2737_v26, %v2733_v12  ;;  %v2131_v52 = vsel %vm7108_vm14, %v2126_v59, %v2130_v28  ;;  %v2133_v25 = vshrl.u32 %v2061_v16, 16  ;;  %v2677_v61 = vld [vmem:[#allocation2 + $0x30] sm:$0xf]  ;;  %v2136_v37 = vshll.u32 %v2061_v16, 16  ;;  %v2678_v60 = vld [vmem:[#allocation2 + $0x34] sm:$0xf] }
 0x557   : > { %v4394_v46 = vcombine.low %v2121_v6, %v2131_v52  ;;  %v2734_v51 = vsel %vm7108_vm14, %v2729_v19, %v2733_v12  ;;  %v2142_v0 = vshll.u32 %v7205_v56, 16  ;;  %v2146_v21 = vshrl.u32 %v7205_v56, 16  ;;  %v2691_v28 = vld [vmem:[#allocation2 + $0x38] sm:$0x1] }
 0x558   : > { %v2739_v20 = vrot.slane %v2738_v4, 4  ;;  %v4370_v9 = vrot.slane %v2585_v42, 9  ;;  %v2629_v53 = vsel %vm7150_vm2, %v2627_v29, %v2628_v55  ;;  %v2135_v8 = vrot.slane %v2133_v25, 4 }
 0x559   : > { %3035 = vrot.lane.b32.xlu1 %v4394_v46, %s5585_s24  ;;  %v2138_v12 = vrot.slane %v2136_v37, 5  ;;  %v2144_v26 = vrot.slane %v2142_v0, 5  ;;  %v2148_v41 = vrot.slane %v2146_v21, 4  ;;  %v2152_v59 = vshll.u32 %v7209_v7, 16  ;;  %v2386_v21 = vld [vmem:[#allocation2 + $0x2c] sm:$0x1] }
 0x55a   : > { %v2744_v47 = vsel %vm7108_vm14, %v2739_v20, %v2743_v24  ;;  %v2626_v19 = vsel %vm7150_vm2, %v4370_v9, %v2625_v50  ;;  %v2746_v4 = vshrl.u32 %v2677_v61, 16  ;;  %v2749_v16 = vshll.u32 %v2677_v61, 16  ;;  %v2586_v61 = vld [vmem:[#allocation2 + $0x24] sm:$0xe] }
 0x55b   : > { %v4442_v35 = vcombine.low %v2734_v51, %v2744_v47  ;;  %v2755_v6 = vshll.u32 %v2678_v60, 16  ;;  %v4426_v52 = vcombine.low %v2626_v19, %v2629_v53  ;;  %v2139_v46 = vor.u32 %v2138_v12, %v2135_v8  ;;  %v2063_v53 = vld [vmem:[#allocation2 + $0x24] sm:$0xf]  ;;  %v7232_v8 = vld [vmem:[#allocation2 + $0x28] sm:$0xf] }
 0x55c   : > { %v2149_v20 = vor.u32 %v2148_v41, %v2144_v26  ;;  %v2759_v24 = vshrl.u32 %v2678_v60, 16  ;;  %v2748_v42 = vrot.slane %v2746_v4, 4  ;;  %v2751_v51 = vrot.slane %v2749_v16, 5  ;;  %8228 = vst [vmem:[#allocation62_spill] sm:$0xff] %v7232_v8  ;;  %v7236_v19 = vld [vmem:[#allocation2 + $0x34] sm:$0xf] }
 0x55d   : > { %3243 = vrot.lane.b32.xlu0 %v4442_v35, %s5585_s24  ;;  %3109 = vrot.lane.b32.xlu1 %v4411_v15, %s5585_s24  ;;  %v2757_v29 = vrot.slane %v2755_v6, 5  ;;  %v2765_v55 = vshll.u32 %v2691_v28, 16  ;;  %v2140_v25 = vrot.slane %v2139_v46, 4  ;;  %v2154_v37 = vrot.slane %v2152_v59, 5  ;;  %v7234_v28 = vld [vmem:[#allocation2 + $0x30] sm:$0xf] }
 0x55e   : > { %v2150_v47 = vrot.slane %v2149_v20, 4  ;;  %v2761_v0 = vrot.slane %v2759_v24, 4  ;;  %v2752_v50 = vor.u32 %v2751_v51, %v2748_v42  ;;  %v2632_v9 = vrot.slane %v7194_v63, 5  ;;  %8229 = vst [vmem:[#allocation63_spill] sm:$0xff] %v7234_v28  ;;  %v2679_v42 = vld [vmem:[#allocation2 + $0x3c] sm:$0xf] }
 0x55f   : > { %v2145_v15 = vsel %vm7108_vm14, %v2140_v25, %v2144_v26  ;;  %v2767_v59 = vrot.slane %v2765_v55, 5  ;;  %v4371_v16 = vrot.slane %v2586_v61, 9  ;;  %v2635_v26 = vrot.slane %v2386_v21, 5  ;;  %v2692_v61 = vld [vmem:[#allocation2 + $0x44] sm:$0x1] }
 0x560   : > { %v2155_v35 = vsel %vm7108_vm14, %v2150_v47, %v2154_v37  ;;  %v2762_v60 = vor.u32 %v2761_v0, %v2757_v29  ;;  %v2753_v41 = vrot.slane %v2752_v50, 4  ;;  %v2634_v6 = vrot.slane %v2632_v9, 4  ;;  %v2680_v37 = vld [vmem:[#allocation2 + $0x40] sm:$0xf] }
 0x561   : > { %3171 = vrot.lane.b32.xlu0 %v4426_v52, %s5585_s24  ;;  %v4395_v12 = vcombine.low %v2145_v15, %v2155_v35  ;;  %v7238_v52 = vld [vmem:[#allocation2 + $0x2c] sm:$0x1]  ;;  %v2157_v46 = vshrl.u32 %v2063_v53, 16  ;;  %v2160_v20 = vshll.u32 %v2063_v53, 16  ;;  %v2166_v24 = vshll.u32 %v7232_v8, 16 }
 0x562   : > { %v2763_v4 = vrot.slane %v2762_v60, 4  ;;  %8230 = vst [vmem:[#allocation64_spill] sm:$0xff] %v7238_v52  ;;  %v2758_v63 = vsel %vm7108_vm14, %v2753_v41, %v2757_v29  ;;  %v4412_v55 = vcombine.low %v7234_v28, %v7236_v19  ;;  %v2633_v25 = vsel %vm7150_vm2, %v4371_v16, %v2632_v9 }
 0x563   : > { %3037 = vrot.lane.b32.xlu1 %v4395_v12, %s5585_s24  ;;  %v2170_v47 = vshrl.u32 %v7232_v8, 16  ;;  %v2636_v29 = vsel %vm7150_vm2, %v2634_v6, %v2635_v26  ;;  %v2159_v50 = vrot.slane %v2157_v46, 4  ;;  %v2162_v21 = vrot.slane %v2160_v20, 5  ;;  %v7256_v26 = vld [vmem:[#allocation2 + $0x3c] sm:$0xf] }
 0x564   : > { %v2768_v51 = vsel %vm7108_vm14, %v2763_v4, %v2767_v59  ;;  %v2168_v15 = vrot.slane %v2166_v24, 5  ;;  %v2176_v60 = vshll.u32 %v7238_v52, 16  ;;  %v2770_v53 = vshrl.u32 %v2679_v42, 16  ;;  %v7258_v46 = vld [vmem:[#allocation2 + $0x40] sm:$0xf] }
 0x565   : > { %v4443_v0 = vcombine.low %v2758_v63, %v2768_v51  ;;  %v2172_v35 = vrot.slane %v2170_v47, 4  ;;  %v2163_v9 = vor.u32 %v2162_v21, %v2159_v50  ;;  %v2773_v12 = vshll.u32 %v2679_v42, 16 }
 0x566   : > { %v2779_v41 = vshll.u32 %v2680_v37, 16  ;;  %v2783_v59 = vshrl.u32 %v2680_v37, 16  ;;  %v4427_v4 = vcombine.low %v2633_v25, %v2636_v29  ;;  %v2772_v63 = vrot.slane %v2770_v53, 4  ;;  %v7263_v37 = vld [vmem:[#allocation2 + $0x38] sm:$0x1] }
 0x567   : > { %3245 = vrot.lane.b32.xlu0 %v4443_v0, %s5585_s24  ;;  %3111 = vrot.lane.b32.xlu1 %v4412_v55, %s5585_s24  ;;  %v2173_v16 = vor.u32 %v2172_v35, %v2168_v15  ;;  %v2789_v6 = vshll.u32 %v2692_v61, 16  ;;  %v2164_v20 = vrot.slane %v2163_v9, 4  ;;  %v2775_v24 = vrot.slane %v2773_v12, 5  ;;  %8231 = vst [vmem:[#allocation65_spill] sm:$0xff] %v7263_v37  ;;  %v2065_v29 = vld [vmem:[#allocation2 + $0x30] sm:$0xf] }
 0x568   : > { %v2781_v51 = vrot.slane %v2779_v41, 5  ;;  %v2785_v47 = vrot.slane %v2783_v59, 4  ;;  %v2178_v0 = vrot.slane %v2176_v60, 5  ;;  %v4413_v25 = vcombine.low %v7256_v26, %v7258_v46  ;;  %v7270_v60 = vld [vmem:[#allocation2 + $0x34] sm:$0xf] }
 0x569   : > { %v2174_v5 = vrot.slane %v2173_v16, 4  ;;  %v2776_v42 = vor.u32 %v2775_v24, %v2772_v63  ;;  %v2169_v50 = vsel %vm7108_vm14, %v2164_v20, %v2168_v15  ;;  %v2791_v61 = vrot.slane %v2789_v6, 5  ;;  %8232 = vst [vmem:[#allocation66_spill] sm:$0xff] %v7270_v60  ;;  %v7273_v16 = vld [vmem:[#allocation2 + $0x38] sm:$0x1] }
 0x56a   : > { %v2786_v55 = vor.u32 %v2785_v47, %v2781_v51  ;;  %v2639_v35 = vrot.slane %v7236_v19, 5  ;;  %v4372_v41 = vrot.slane %v2587_v23, 9  ;;  %8233 = vst [vmem:[#allocation67_spill] sm:$0xff] %v7273_v16  ;;  %v2181_v63 = vshrl.u32 %v2065_v29, 16  ;;  %v2681_v23 = vld [vmem:[#allocation2 + $0x48] sm:$0xf] }
 0x56b   : > { %3173 = vrot.lane.b32.xlu0 %v4427_v4, %s5585_s24  ;;  %v2179_v21 = vsel %vm7108_vm14, %v2174_v5, %v2178_v0  ;;  %v2777_v9 = vrot.slane %v2776_v42, 4  ;;  %v2642_v4 = vrot.slane %v7263_v37, 5  ;;  %v2184_v24 = vshll.u32 %v2065_v29, 16  ;;  %v2682_v20 = vld [vmem:[#allocation2 + $0x4c] sm:$0xf] }
 0x56c   : > { %v4396_v53 = vcombine.low %v2169_v50, %v2179_v21  ;;  %v2787_v12 = vrot.slane %v2786_v55, 4  ;;  %v2641_v59 = vrot.slane %v2639_v35, 4  ;;  %v2190_v15 = vshll.u32 %v7270_v60, 16 }
 0x56d   : > { %v2782_v5 = vsel %vm7108_vm14, %v2777_v9, %v2781_v51  ;;  %v2194_v6 = vshrl.u32 %v7270_v60, 16  ;;  %v2183_v42 = vrot.slane %v2181_v63, 4  ;;  %v2186_v55 = vrot.slane %v2184_v24, 5  ;;  %v7425_v60 = vld [vmem:[#allocation2 + $0x74] sm:$0x1] }
 0x56e   : > { %3039 = vrot.lane.b32.xlu1 %v4396_v53, %s5585_s24  ;;  %v2792_v19 = vsel %vm7108_vm14, %v2787_v12, %v2791_v61  ;;  %v2643_v0 = vsel %vm7150_vm2, %v2641_v59, %v2642_v4  ;;  %v2640_v29 = vsel %vm7150_vm2, %v4372_v41, %v2639_v35  ;;  %v2192_v50 = vrot.slane %v2190_v15, 5  ;;  %v2693_v53 = vld [vmem:[#allocation2 + $0x50] sm:$0x1]  ;;  %v2588_v41 = vld [vmem:[#allocation2 + $0x3c] sm:$0xe]  ;;  %8239 = vst [vmem:[#allocation73_spill] sm:$0xff] %v7425_v60 }
 0x56f   : > { %v4444_v47 = vcombine.low %v2782_v5, %v2792_v19  ;;  %v2196_v51 = vrot.slane %v2194_v6, 4  ;;  %v2200_v21 = vshll.u32 %v7273_v16, 16  ;;  %v2187_v61 = vor.u32 %v2186_v55, %v2183_v42  ;;  %v7292_v42 = vld [vmem:[#allocation2 + $0x44] sm:$0x1]  ;;  %v7297_v55 = vld [vmem:[#allocation2 + $0x3c] sm:$0xf] }
 0x570   : > { %v2794_v9 = vshrl.u32 %v2681_v23, 16  ;;  %v2797_v12 = vshll.u32 %v2681_v23, 16  ;;  %v2803_v57 = vshll.u32 %v2682_v20, 16  ;;  %v4428_v5 = vcombine.low %v2640_v29, %v2643_v0  ;;  %v7299_v29 = vld [vmem:[#allocation2 + $0x40] sm:$0xf] }
 0x571   : > { %3247 = vrot.lane.b32.xlu0 %v4444_v47, %s5585_s24  ;;  %v2197_v59 = vor.u32 %v2196_v51, %v2192_v50  ;;  %v2807_v4 = vshrl.u32 %v2682_v20, 16  ;;  %v2188_v63 = vrot.slane %v2187_v61, 4  ;;  %v2202_v6 = vrot.slane %v2200_v21, 5  ;;  %v7301_v61 = vld [vmem:[#allocation2 + $0x48] sm:$0xf] }
 0x572   : > { %3113 = vrot.lane.b32.xlu1 %v4413_v25, %s5585_s24  ;;  %v2796_v24 = vrot.slane %v2794_v9, 4  ;;  %v2799_v19 = vrot.slane %v2797_v12, 5  ;;  %v2805_v35 = vrot.slane %v2803_v57, 5  ;;  %v2813_v11 = vshll.u32 %v2693_v53, 16  ;;  %v7303_v53 = vld [vmem:[#allocation2 + $0x4c] sm:$0xf] }
 0x573   : > { %v2198_v15 = vrot.slane %v2197_v59, 4  ;;  %v2809_v40 = vrot.slane %v2807_v4, 4  ;;  %v2193_v23 = vsel %vm7108_vm14, %v2188_v63, %v2192_v50  ;;  %v4373_v0 = vrot.slane %v2588_v41, 9  ;;  %v7306_v59 = vld [vmem:[#allocation2 + $0x44] sm:$0x1] }
 0x574   : > { %v2800_v47 = vor.u32 %v2799_v19, %v2796_v24  ;;  %v2646_v57 = vrot.slane %v7258_v46, 5  ;;  %v2815_v9 = vrot.slane %v2813_v11, 5  ;;  %v2205_v4 = vshrl.u32 %v7297_v55, 16  ;;  %v7314_v19 = vld [vmem:[#allocation2 + $0x54] sm:$0xf] }
 0x575   : > { %3175 = vrot.lane.b32.xlu0 %v4428_v5, %s5585_s24  ;;  %v2203_v25 = vsel %vm7108_vm14, %v2198_v15, %v2202_v6  ;;  %v2810_v20 = vor.u32 %v2809_v40, %v2805_v35  ;;  %v2649_v5 = vrot.slane %v7292_v42, 5  ;;  %v2208_v63 = vshll.u32 %v7297_v55, 16 }
 0x576   : > { %v4397_v51 = vcombine.low %v2193_v23, %v2203_v25  ;;  %v2801_v21 = vrot.slane %v2800_v47, 4  ;;  %v2648_v12 = vrot.slane %v2646_v57, 4  ;;  %v2214_v24 = vshll.u32 %v7299_v29, 16 }
 0x577   : > { %v2811_v50 = vrot.slane %v2810_v20, 4  ;;  %v4414_v41 = vcombine.low %v7301_v61, %v7303_v53  ;;  %v2647_v15 = vsel %vm7150_vm2, %v4373_v0, %v2646_v57  ;;  %v2218_v6 = vshrl.u32 %v7299_v29, 16 }
 0x578   : > { %3041 = vrot.lane.b32.xlu1 %v4397_v51, %s5585_s24  ;;  %v2806_v40 = vsel %vm7108_vm14, %v2801_v21, %v2805_v35  ;;  %v7323_v35 = vld [vmem:[#allocation2 + $0x58] sm:$0xf]  ;;  %v2650_v47 = vsel %vm7150_vm2, %v2648_v12, %v2649_v5  ;;  %v2207_v25 = vrot.slane %v2205_v4, 4  ;;  %v2210_v20 = vrot.slane %v2208_v63, 5  ;;  %v7327_v51 = vld [vmem:[#allocation2 + $0x5c] sm:$0x1] }
 0x579   : > { %v2816_v11 = vsel %vm7108_vm14, %v2811_v50, %v2815_v9  ;;  %8234 = vst [vmem:[#allocation68_spill] sm:$0xff] %v7327_v51  ;;  %v2216_v21 = vrot.slane %v2214_v24, 5  ;;  %v2220_v50 = vrot.slane %v2218_v6, 4  ;;  %v2224_v9 = vshll.u32 %v7306_v59, 16 }
 0x57a   : > { %v4445_v23 = vcombine.low %v2806_v40, %v2816_v11  ;;  %v2818_v44 = vshrl.u32 %v7314_v19, 16  ;;  %v2211_v0 = vor.u32 %v2210_v20, %v2207_v25  ;;  %v2821_v57 = vshll.u32 %v7314_v19, 16 }
 0x57b   : > { %v2827_v40 = vshll.u32 %v7323_v35, 16  ;;  %v2831_v12 = vshrl.u32 %v7323_v35, 16  ;;  %v4429_v5 = vcombine.low %v2647_v15, %v2650_v47  ;;  %v2221_v4 = vor.u32 %v2220_v50, %v2216_v21  ;;  %v2589_v15 = vld [vmem:[#allocation2 + $0x48] sm:$0xe]  ;;  %v7346_v50 = vld [vmem:[#allocation2 + $0x54] sm:$0xf] }
 0x57c   : > { %3249 = vrot.lane.b32.xlu0 %v4445_v23, %s5585_s24  ;;  %3115 = vrot.lane.b32.xlu1 %v4414_v41, %s5585_s24  ;;  %v2820_v63 = vrot.slane %v2818_v44, 4  ;;  %v2837_v24 = vshll.u32 %v7327_v51, 16  ;;  %v2212_v11 = vrot.slane %v2211_v0, 4  ;;  %v2823_v6 = vrot.slane %v2821_v57, 5  ;;  %v7342_v47 = vld [vmem:[#allocation2 + $0x48] sm:$0xf] }
 0x57d   : > { %v2829_v58 = vrot.slane %v2827_v40, 5  ;;  %v2833_v30 = vrot.slane %v2831_v12, 4  ;;  %v2222_v17 = vrot.slane %v2221_v4, 4  ;;  %v2226_v23 = vrot.slane %v2224_v9, 5  ;;  %v7349_v9 = vld [vmem:[#allocation2 + $0x4c] sm:$0xf] }
 0x57e   : > { %v2217_v41 = vsel %vm7108_vm14, %v2212_v11, %v2216_v21  ;;  %v2824_v25 = vor.u32 %v2823_v6, %v2820_v63  ;;  %v2653_v0 = vrot.slane %v7303_v53, 5  ;;  %v2839_v21 = vrot.slane %v2837_v24, 5  ;;  %v7354_v11 = vld [vmem:[#allocation2 + $0x50] sm:$0x1] }
 0x57f   : > { %v2834_v20 = vor.u32 %v2833_v30, %v2829_v58  ;;  %v2227_v44 = vsel %vm7108_vm14, %v2222_v17, %v2226_v23  ;;  %v4374_v30 = vrot.slane %v2589_v15, 9  ;;  %v2656_v63 = vrot.slane %v7340_v54, 5 }
 0x580   : > { %3177 = vrot.lane.b32.xlu0 %v4429_v5, %s5585_s24  ;;  %v4398_v57 = vcombine.low %v2217_v41, %v2227_v44  ;;  %v2825_v40 = vrot.slane %v2824_v25, 4  ;;  %v7351_v5 = vld [vmem:[#allocation2 + $0x58] sm:$0xf]  ;;  %v2655_v4 = vrot.slane %v2653_v0, 4  ;;  %v2229_v23 = vshrl.u32 %v7342_v47, 16 }
 0x581   : > { %v2835_v12 = vrot.slane %v2834_v20, 4  ;;  %v2232_v24 = vshll.u32 %v7342_v47, 16  ;;  %v7363_v41 = vld [vmem:[#allocation2 + $0x60] sm:$0xf]  ;;  %v4415_v20 = vcombine.low %v7346_v50, %v7351_v5  ;;  %v2238_v15 = vshll.u32 %v7349_v9, 16 }
 0x582   : > { %3043 = vrot.lane.b32.xlu1 %v4398_v57, %s5585_s24  ;;  %v2830_v17 = vsel %vm7108_vm14, %v2825_v40, %v2829_v58  ;;  %8235 = vst [vmem:[#allocation69_spill] sm:$0xff] %v7363_v41  ;;  %v2242_v44 = vshrl.u32 %v7349_v9, 16  ;;  %v7369_v57 = vld [vmem:[#allocation2 + $0x64] sm:$0xf]  ;;  %v2657_v58 = vsel %vm7150_vm2, %v2655_v4, %v2656_v63  ;;  %v2231_v40 = vrot.slane %v2229_v23, 4 }
 0x583   : > { %v2840_v6 = vsel %vm7108_vm14, %v2835_v12, %v2839_v21  ;;  %8236 = vst [vmem:[#allocation70_spill] sm:$0xff] %v7369_v57  ;;  %v2234_v12 = vrot.slane %v2232_v24, 5  ;;  %v2248_v21 = vshll.u32 %v7354_v11, 16  ;;  %v2240_v3 = vrot.slane %v2238_v15, 5 }
 0x584   : > { %v4446_v25 = vcombine.low %v2830_v17, %v2840_v6  ;;  %v2244_v17 = vrot.slane %v2242_v44, 4  ;;  %v7375_v6 = vld [vmem:[#allocation2 + $0x68] sm:$0x1]  ;;  %v2842_v62 = vshrl.u32 %v7363_v41, 16  ;;  %v2845_v39 = vshll.u32 %v7363_v41, 16 }
 0x585   : > { %8237 = vst [vmem:[#allocation71_spill] sm:$0xff] %v7375_v6  ;;  %v2654_v31 = vsel %vm7150_vm2, %v4374_v30, %v2653_v0  ;;  %v2235_v4 = vor.u32 %v2234_v12, %v2231_v40  ;;  %v2851_v63 = vshll.u32 %v7369_v57, 16  ;;  %v2855_v23 = vshrl.u32 %v7369_v57, 16  ;;  %v2590_v0 = vld [vmem:[#allocation2 + $0x54] sm:$0xe] }
 0x586   : > { %3251 = vrot.lane.b32.xlu0 %v4446_v25, %s5585_s24  ;;  %3117 = vrot.lane.b32.xlu1 %v4415_v20, %s5585_s24  ;;  %v4430_v24 = vcombine.low %v2654_v31, %v2657_v58  ;;  %v2245_v25 = vor.u32 %v2244_v17, %v2240_v3  ;;  %v2844_v15 = vrot.slane %v2842_v62, 4  ;;  %v2847_v44 = vrot.slane %v2845_v39, 5  ;;  %v7388_v12 = vld [vmem:[#allocation2 + $0x5c] sm:$0x1]  ;;  %v7390_v31 = vld [vmem:[#allocation2 + $0x54] sm:$0xf] }
 0x587   : > { %v2236_v36 = vrot.slane %v2235_v4, 4  ;;  %v2853_v18 = vrot.slane %v2851_v63, 5  ;;  %v2857_v43 = vrot.slane %v2855_v23, 4  ;;  %v2861_v16 = vshll.u32 %v7375_v6, 16  ;;  %v7392_v39 = vld [vmem:[#allocation2 + $0x58] sm:$0xf] }
 0x588   : > { %v2246_v20 = vrot.slane %v2245_v25, 4  ;;  %v2250_v41 = vrot.slane %v2248_v21, 5  ;;  %v2848_v37 = vor.u32 %v2847_v44, %v2844_v15  ;;  %v7396_v17 = vld [vmem:[#allocation2 + $0x60] sm:$0xf]  ;;  %v2660_v21 = vrot.slane %v7351_v5, 5 }
 0x589   : > { %v2241_v30 = vsel %vm7108_vm14, %v2236_v36, %v2240_v3  ;;  %v2858_v40 = vor.u32 %v2857_v43, %v2853_v18  ;;  %v7399_v4 = vld [vmem:[#allocation2 + $0x5c] sm:$0x1]  ;;  %v2863_v36 = vrot.slane %v2861_v16, 5  ;;  %v7401_v43 = vld [vmem:[#allocation2 + $0x64] sm:$0xf]  ;;  %v4375_v3 = vrot.slane %v2590_v0, 9 }
 0x58a   : > { %3179 = vrot.lane.b32.xlu0 %v4430_v24, %s5585_s24  ;;  %v2251_v62 = vsel %vm7108_vm14, %v2246_v20, %v2250_v41  ;;  %v2849_v58 = vrot.slane %v2848_v37, 4  ;;  %v2662_v25 = vrot.slane %v2660_v21, 4  ;;  %v2663_v15 = vrot.slane %v7388_v12, 5  ;;  %v7407_v41 = vld [vmem:[#allocation2 + $0x6c] sm:$0xf] }
 0x58b   : > { %v4399_v63 = vcombine.low %v2241_v30, %v2251_v62  ;;  %v2859_v23 = vrot.slane %v2858_v40, 4  ;;  %v2253_v37 = vshrl.u32 %v7390_v31, 16  ;;  %8238 = vst [vmem:[#allocation72_spill] sm:$0xff] %v7407_v41  ;;  %v2256_v16 = vshll.u32 %v7390_v31, 16  ;;  %v7415_v30 = vld [vmem:[#allocation2 + $0x70] sm:$0xf] }
 0x58c   : > { %v2854_v24 = vsel %vm7108_vm14, %v2849_v58, %v2853_v18  ;;  %v2262_v20 = vshll.u32 %v7392_v39, 16  ;;  %v2266_v0 = vshrl.u32 %v7392_v39, 16  ;;  %v2664_v40 = vsel %vm7150_vm2, %v2662_v25, %v2663_v15 }
 0x58d   : > { %3045 = vrot.lane.b32.xlu1 %v4399_v63, %s5585_s24  ;;  %v2864_v44 = vsel %vm7108_vm14, %v2859_v23, %v2863_v36  ;;  %v2255_v62 = vrot.slane %v2253_v37, 4  ;;  %v2272_v58 = vshll.u32 %v7399_v4, 16  ;;  %v4416_v63 = vcombine.low %v7396_v17, %v7401_v43 }
 0x58e   : > { %v4447_v18 = vcombine.low %v2854_v24, %v2864_v44  ;;  %v2258_v6 = vrot.slane %v2256_v16, 5  ;;  %v2264_v23 = vrot.slane %v2262_v20, 5  ;;  %v2268_v36 = vrot.slane %v2266_v0, 4 }
 0x58f   : > { %v2661_v57 = vsel %vm7150_vm2, %v4375_v3, %v2660_v21  ;;  %v2866_v24 = vshrl.u32 %v7407_v41, 16  ;;  %v2869_v25 = vshll.u32 %v7407_v41, 16  ;;  %v2875_v15 = vshll.u32 %v7415_v30, 16 }
 0x590   : > { %3253 = vrot.lane.b32.xlu0 %v4447_v18, %s5585_s24  ;;  %v4431_v37 = vcombine.low %v2661_v57, %v2664_v40  ;;  %v2259_v44 = vor.u32 %v2258_v6, %v2255_v62  ;;  %v2269_v16 = vor.u32 %v2268_v36, %v2264_v23  ;;  %v2879_v20 = vshrl.u32 %v7415_v30, 16  ;;  %v7440_v36 = vld [vmem:[#allocation2 + $0x68] sm:$0x1] }
 0x591   : > { %3119 = vrot.lane.b32.xlu1 %v4416_v63, %s5585_s24  ;;  %v2274_v0 = vrot.slane %v2272_v58, 5  ;;  %v2868_v18 = vrot.slane %v2866_v24, 4  ;;  %v2871_v52 = vrot.slane %v2869_v25, 5  ;;  %v2877_v51 = vrot.slane %v2875_v15, 5  ;;  %v2591_v24 = vld [vmem:[#allocation2 + $0x60] sm:$0xe] }
 0x592   : > { %v2260_v21 = vrot.slane %v2259_v44, 4  ;;  %v2270_v3 = vrot.slane %v2269_v16, 4  ;;  %v2881_v28 = vrot.slane %v2879_v20, 4  ;;  %v2885_v8 = vshll.u32 %v7425_v60, 16 }
 0x593   : > { %v2872_v41 = vor.u32 %v2871_v52, %v2868_v18  ;;  %v2667_v38 = vrot.slane %v7401_v43, 5  ;;  %v2313_v62 = vrot.slane %v7096_v1, 5  ;;  %v2276_v52 = vld [vmem:[#allocation2] sm:$0xe]  ;;  %v2316_v16 = vrot.slane %v7119_v49, 5 }
 0x594   : > { %3181 = vrot.lane.b32.xlu0 %v4431_v37, %s5585_s24  ;;  %v2265_v57 = vsel %vm7108_vm14, %v2260_v21, %v2264_v23  ;;  %v2275_v6 = vsel %vm7108_vm14, %v2270_v3, %v2274_v0  ;;  %v2882_v40 = vor.u32 %v2881_v28, %v2877_v51  ;;  %v2887_v15 = vrot.slane %v2885_v8, 5 }
 0x595   : > { %v4400_v58 = vcombine.low %v2265_v57, %v2275_v6  ;;  %v2873_v63 = vrot.slane %v2872_v41, 4  ;;  %v2669_v37 = vrot.slane %v2667_v38, 4  ;;  %v2315_v44 = vrot.slane %v2313_v62, 4  ;;  %v5150_v6 = vld [vmem:[#allocation2 + $0xc] sm:$0xf] }
 0x596   : > { %v2883_v25 = vrot.slane %v2882_v40, 4  ;;  %v4376_v28 = vrot.slane %v2591_v24, 9  ;;  %v2670_v41 = vrot.slane %v7440_v36, 5  ;;  %v4361_v0 = vrot.slane %v2276_v52, 9  ;;  %v5151_v24 = vld [vmem:[#allocation2 + $0x10] sm:$0xf] }
 0x597   : > { %3047 = vrot.lane.b32.xlu1 %v4400_v58, %s5585_s24  ;;  %v2878_v23 = vsel %vm7108_vm14, %v2873_v63, %v2877_v51  ;;  %v2317_v8 = vsel %vm7150_vm2, %v2315_v44, %v2316_v16  ;;  %v2393_v40 = vshrl.u32 %v5150_v6, 16  ;;  %v2396_v58 = vshll.u32 %v5150_v6, 16 }
 0x598   : > { %v2888_v1 = vsel %vm7108_vm14, %v2883_v25, %v2887_v15  ;;  %v2671_v18 = vsel %vm7150_vm2, %v2669_v37, %v2670_v41  ;;  %v2314_v51 = vsel %vm7150_vm2, %v4361_v0, %v2313_v62  ;;  %v2668_v49 = vsel %vm7150_vm2, %v4376_v28, %v2667_v38 }
 0x599   : > { %v4448_v20 = vcombine.low %v2878_v23, %v2888_v1  ;;  %v4401_v21 = vcombine.low %v2314_v51, %v2317_v8  ;;  %v4432_v3 = vcombine.low %v2668_v49, %v2671_v18  ;;  %v2402_v25 = vshll.u32 %v5151_v24, 16 }
 0x59a   : > { %v2406_v15 = vshrl.u32 %v5151_v24, 16  ;;  %v2395_v37 = vrot.slane %v2393_v40, 4  ;;  %v2398_v52 = vrot.slane %v2396_v58, 5  ;;  %v2417_v62 = vshrl.u32 %v7171_v13, 16  ;;  %v2277_v40 = vld [vmem:[#allocation2 + $0xc] sm:$0xe] }
 0x59b   : > { %3255 = vrot.lane.b32.xlu0 %v4448_v20, %s5585_s24  ;;  %v2420_v38 = vshll.u32 %v7171_v13, 16  ;;  %v7462_v44 = vrot.slane %v2402_v25, 5  ;;  %v2489_v16 = vshrl.u32 %v7256_v26, 16  ;;  %v2320_v1 = vrot.slane %v7161_v14, 5 }
 0x59c   : > { %v2408_v23 = vrot.slane %v2406_v15, 4  ;;  %v2492_v28 = vshll.u32 %v7256_v26, 16  ;;  %v2513_v41 = vshrl.u32 %v7301_v61, 16  ;;  %v2516_v20 = vshll.u32 %v7301_v61, 16  ;;  %v7487_v15 = vld [vmem:[#allocation2 + $0x18] sm:$0xe] }
 0x59d   : > { %v2537_v0 = vshrl.u32 %v7346_v50, 16  ;;  %v7470_v8 = vrot.slane %v2417_v62, 4  ;;  %v2540_v18 = vshll.u32 %v7346_v50, 16  ;;  %v2561_v13 = vshrl.u32 %v7396_v17, 16 }
 0x59e   : > { %v2399_v51 = vor.u32 %v2398_v52, %v2395_v37  ;;  %v7474_v49 = vrot.slane %v2420_v38, 5  ;;  %v2409_v26 = vor.u32 %v2408_v23, %v7462_v44  ;;  %v2491_v61 = vrot.slane %v2489_v16, 4  ;;  %v2281_v38 = vld [vmem:[#allocation2 + $0x3c] sm:$0xe]  ;;  %v5152_v23 = vld [vmem:[#allocation2 + $0x18] sm:$0xf] }
 0x59f   : > { %3183 = vrot.lane.b32.xlu0 %v4432_v3, %s5585_s24  ;;  %v2564_v3 = vshll.u32 %v7396_v17, 16  ;;  %v2412_v6 = vshll.u32 %v7139_v32, 16  ;;  %v2322_v58 = vrot.slane %v2320_v1, 4  ;;  %v7481_v50 = vrot.slane %v2513_v41, 4  ;;  %v7496_v16 = vld [vmem:[#allocation2 + $0x1c] sm:$0xf] }
 0x5a0   : > { %v7483_v24 = vrot.slane %v2516_v20, 5  ;;  %v7485_v25 = vrot.slane %v2537_v0, 4  ;;  %v7489_v37 = vrot.slane %v2540_v18, 5  ;;  %v7491_v17 = vrot.slane %v2561_v13, 4  ;;  %8240 = vst [vmem:[#allocation74_spill] sm:$0xff] %v7496_v16 }
 0x5a1   : > { %v2400_v52 = vrot.slane %v2399_v51, 4  ;;  %v2323_v62 = vrot.slane %v7173_v2, 5  ;;  %v7494_v32 = vrot.slane %v2564_v3, 5  ;;  %v2410_v41 = vrot.slane %v2409_v26, 4  ;;  %v7499_v0 = vld [vmem:[#allocation2] sm:$0xf] }
 0x5a2   : > { %v4362_v20 = vrot.slane %v2277_v40, 9  ;;  %v2414_v13 = vrot.slane %v2412_v6, 5  ;;  %v2498_v40 = vshll.u32 %v7258_v46, 16  ;;  %v2282_v51 = vld [vmem:[#allocation2 + $0x48] sm:$0xe] }
 0x5a3   : > { %v7507_v2 = vsel %vm7150_vm2, %v2322_v58, %v2323_v62  ;;  %v2405_v6 = vsel %vm7108_vm14, %v2400_v52, %v7462_v44  ;;  %v2508_v62 = vshll.u32 %v7292_v42, 16  ;;  %v4367_v60 = vrot.slane %v2282_v51, 9 }
 0x5a4   : > { %v7513_v26 = vsel %vm7150_vm2, %v4362_v20, %v2320_v1  ;;  %v2415_v1 = vsel %vm7108_vm14, %v2410_v41, %v2414_v13  ;;  %v2426_v20 = vshll.u32 %v7157_v27, 16  ;;  %v2502_v13 = vshrl.u32 %v7258_v46, 16 }
 0x5a5   : > { %v3106_v57 = vpop.permute.xlu0 %3105  ;;  %v2500_v44 = vrot.slane %v2498_v40, 5  ;;  %v2510_v42 = vrot.slane %v2508_v62, 5  ;;  %v2522_v51 = vshll.u32 %v7303_v53, 16  ;;  %v2283_v62 = vld [vmem:[#allocation2 + $0x54] sm:$0xe] }
 0x5a6   : > { %v3315_v63 = vsel %vm582_vm0, %v4401_v21, %v3106_v57  ;;  %v7501_v57 = vld [vmem:[#allocation2 + $0x4] sm:$0xf]  ;;  %v2348_v21 = vrot.slane %v7299_v29, 5 }
 0x5a7   : > { %3753 = vmatprep.mubr.bf16.mxu0 %v3315_v63  ;;  %v2494_v63 = vrot.slane %v2492_v28, 5  ;;  %v4433_v28 = vcombine.low %v5152_v23, %v7496_v16  ;;  %v4366_v23 = vrot.slane %v2281_v38, 9  ;;  %v2504_v38 = vrot.slane %v2502_v13, 4 }
 0x5a9   : > { %v2495_v52 = vor.u32 %v2494_v63, %v2491_v61  ;;  %v7536_v41 = vsel %vm7150_vm2, %v4366_v23, %v2348_v21  ;;  %v2355_v61 = vrot.slane %v7349_v9, 5  ;;  %v4417_v63 = vcombine.low %v2405_v6, %v2415_v1  ;;  %v4956_v6 = vld [vmem:[#allocation15 + $0x108] sm:$0xff]  }
 0x5aa   : > { %v2505_v16 = vor.u32 %v2504_v38, %v2500_v44  ;;  %v2519_v1 = vor.u32 %v7483_v24, %v7481_v50 }
 0x5ab   : > { %v2496_v58 = vrot.slane %v2495_v52, 4  ;;  %v2357_v23 = vrot.slane %v2355_v61, 4  ;;  %v2524_v52 = vrot.slane %v2522_v51, 5 }
 0x5ac   : > { %v2520_v24 = vrot.slane %v2519_v1, 4 }
 0x5ad   : > { %v2501_v46 = vsel %vm7108_vm14, %v2496_v58, %v2500_v44  ;;  %v2532_v58 = vshll.u32 %v7340_v54, 16  ;;  %v2362_v44 = vrot.slane %v7392_v39, 5 }
 0x5af   : > { %v2534_v1 = vrot.slane %v2532_v58, 5  ;;  %v2550_v58 = vshrl.u32 %v7351_v5, 16 }
 0x5b5   : > { %v3242_v3 = vpop.permute.xlu1 %3241 }
 0x5b6   : > { %v3379_v18 = vsel %vm582_vm0, %v4433_v28, %v3242_v3  ;;  %v2351_v28 = vrot.slane %v7306_v59, 5  ;;  %v2350_v3 = vrot.slane %v2348_v21, 4  ;;  %v7547_v21 = vrot.slane %v2426_v20, 5 }
 0x5b7   : > { %3850 = vmatprep.mubr.bf16.mxu1 %v3379_v18  ;;  %v2430_v18 = vshrl.u32 %v7157_v27, 16  ;;  %v2526_v20 = vshrl.u32 %v7303_v53, 16 }
 0x5b8   : > { %v7542_v59 = vsel %vm7150_vm2, %v2350_v3, %v2351_v28  ;;  %v2358_v28 = vrot.slane %v7354_v11, 5  ;;  %v2506_v3 = vrot.slane %v2505_v16, 4  ;;  %v7563_v11 = vsel %vm7150_vm2, %v4367_v60, %v2355_v61 }
 0x5b9   : > { %v2528_v53 = vrot.slane %v2526_v20, 4  ;;  %v2432_v54 = vrot.slane %v2430_v18, 4  ;;  %v4368_v60 = vrot.slane %v2283_v62, 9  ;;  %v2364_v61 = vrot.slane %v2362_v44, 4  ;;  %v5156_v62 = vld [vmem:[#allocation15 + $0x100] sm:$0xff]  }
 0x5ba   : > { %v7567_v38 = vsel %vm7150_vm2, %v2357_v23, %v2358_v28  ;;  %v2511_v16 = vsel %vm7108_vm14, %v2506_v3, %v2510_v42  ;;  %v8241_v23 = vcombine.low %v7499_v0, %v7501_v57  ;;  %v2525_v18 = vsel %vm7108_vm14, %v2520_v24, %v2524_v52  ;;  %v4961_v3 = vld [vmem:[#allocation15 + $0x110] sm:$0xff]  }
 0x5bb   : > { %v7578_v27 = vcombine.low %v2501_v46, %v2511_v16  ;;  %v2529_v50 = vor.u32 %v2528_v53, %v2524_v52  ;;  %v2365_v42 = vrot.slane %v7399_v4, 5  ;;  %v4392_v20 = vcombine.low %v7390_v31, %v7392_v39  ;;  %v5176_v31 = vld [vmem:[#allocation2 + $0x50] sm:$0x1] }
 0x5bc   : > { %v2543_v0 = vor.u32 %v7489_v37, %v7485_v25  ;;  %v2546_v46 = vshll.u32 %v7351_v5, 16  ;;  %v2433_v4 = vor.u32 %v2432_v54, %v7547_v21  ;;  %v7594_v24 = vsel %vm7150_vm2, %v4368_v60, %v2362_v44  ;;  %v8244_v60 = vld [vmem:[#allocation61_spill] sm:$0xff] }
 0x5bd   : > { %v2530_v57 = vrot.slane %v2529_v50, 4  ;;  %v7598_v50 = vsel %vm7150_vm2, %v2364_v61, %v2365_v42  ;;  %v8242_v25 = vcombine.low %v7513_v26, %v7507_v2  ;;  %v2556_v52 = vshll.u32 %v7388_v12, 16 }
 0x5be   : > { %v4408_v37 = vcombine.low %v7594_v24, %v7598_v50  ;;  %v2544_v53 = vrot.slane %v2543_v0, 4  ;;  %v2552_v54 = vrot.slane %v2550_v58, 4  ;;  %v8243_v16 = vrot.slane %v7205_v56, 5 }
 0x5bf   : > { %v2423_v26 = vor.u32 %v7474_v49, %v7470_v8  ;;  %v2436_v61 = vshll.u32 %v8244_v60, 16  ;;  %v2567_v42 = vor.u32 %v7494_v32, %v7491_v17  ;;  %v2558_v8 = vrot.slane %v2556_v52, 5 }
 0x5c0   : > { %v2329_v2 = vrot.slane %v8243_v16, 4  ;;  %v2574_v49 = vshrl.u32 %v7401_v43, 16  ;;  %v2580_v32 = vshll.u32 %v7440_v36, 16  ;;  %v8250_v56 = vshrl.u32 %v7202_v34, 16 }
 0x5c1   : > { %v3034_v13 = vpop.permute.xlu1 %3033  ;;  %v2438_v52 = vrot.slane %v2436_v61, 5  ;;  %v2954_v39 = vrot.slane %v5176_v31, 5 }
 0x5c2   : > { %v3170_v40 = vpop.permute.xlu0 %3169  ;;  %v3283_v28 = vsel %vm582_vm0, %v8241_v23, %v3034_v13  ;;  %v2548_v13 = vrot.slane %v2546_v46, 5  ;;  %v8245_v23 = vld [vmem:[#allocation72_spill] sm:$0xff]  ;;  %v2576_v17 = vrot.slane %v2574_v49, 4  ;;  %v2582_v49 = vrot.slane %v2580_v32, 5 }
 0x5c3   : > { %3754 = vmatmul.mubr.bf16.vlgmr.msra.gmra.mrb[0].mxu0 %v3283_v28  ;;  %v3347_v51 = vsel %vm582_vm0, %v4417_v63, %v3170_v40  ;;  %v2330_v40 = vrot.slane %v7209_v7, 5  ;;  %v2535_v7 = vsel %vm7108_vm14, %v2530_v57, %v2534_v1  ;;  %v4440_v28 = vcombine.low %v8245_v23, %v7415_v30  ;;  %v5157_v1 = vld [vmem:[#allocation2 + $0x28] sm:$0xf] }
 0x5c4   : > { %3851 = vmatmul.mubr.bf16.vlgmr.msra.gmra.mrb[0].mxu1 %v3347_v51  ;;  %4677 = vmatpush3.bf16.msra.mxu0 %v5156_v62  ;;  %v7609_v44 = vcombine.low %v2525_v18, %v2535_v7  ;;  %v2450_v12 = vshll.u32 %v5157_v1, 16  ;;  %v4966_v51 = vld [vmem:[#allocation15 + $0x118] sm:$0xff]   ;;  %v2553_v18 = vor.u32 %v2552_v54, %v2548_v13  ;;  %v2434_v57 = vrot.slane %v2433_v4, 4 }
 0x5c5   : > { %v3108_v63 = vpop.permute.xlu1 %3107  ;;  %4704 = vmatpush3.bf16.msra.mxu1 %v5156_v62  ;;  %4678 = vmatprep.subr.bf16.mxu0 %v4956_v6  ;;  %v2570_v62 = vshll.u32 %v7401_v43, 16  ;;  %v2454_v0 = vshrl.u32 %v5157_v1, 16  ;;  %v2549_v46 = vsel %vm7108_vm14, %v2544_v53, %v2548_v13  ;;  %v2424_v7 = vrot.slane %v2423_v26, 4 }
 0x5c6   : > { %v3319_v5 = vsel %vm582_vm0, %v8242_v25, %v3108_v63  ;;  %4701 = vmatprep.subr.bf16.mxu1 %v4956_v6  ;;  %v2554_v58 = vrot.slane %v2553_v18, 4  ;;  %v2568_v63 = vrot.slane %v2567_v42, 4  ;;  %v8246_v4 = vcombine.low %v7143_v22, %v7161_v14  ;;  %v8249_v22 = vld [vmem:[#allocation62_spill] sm:$0xff] }
 0x5c7   : > { %3761 = vmatprep.mubr.bf16.mxu0 %v3319_v5  ;;  %v2331_v5 = vsel %vm7150_vm2, %v2329_v2, %v2330_v40  ;;  %v8247_v40 = vmov %v8243_v16  ;;  %v8248_v54 = vrot.slane %v7487_v15, 9  ;;  %v2334_v14 = vrot.slane %v8249_v22, 5 }
 0x5c8   : > { %4679 = vmatpush3.bf16.msra.mxu0 %v4956_v6  ;;  %v2559_v53 = vsel %vm7108_vm14, %v2554_v58, %v2558_v8  ;;  %v2439_v60 = vsel %vm7108_vm14, %v2434_v57, %v2438_v52  ;;  %v7646_v61 = vrot.slane %v2450_v12, 5  ;;  %v2456_v1 = vrot.slane %v2454_v0, 4  ;;  %v8254_v52 = vld [vmem:[#allocation68_spill] sm:$0xff] }
 0x5c9   : > { %4705 = vmatpush3.bf16.msra.mxu1 %v4956_v6  ;;  %4680 = vmatprep.subr.bf16.mxu0 %v4961_v3  ;;  %v2572_v6 = vrot.slane %v2570_v62, 5  ;;  %v2328_v36 = vsel %vm7150_vm2, %v8248_v54, %v8247_v40  ;;  %v7642_v16 = vcombine.low %v2549_v46, %v2559_v53  ;;  %v2443_v15 = vrot.slane %v8250_v56, 4  ;;  %v5158_v54 = vld [vmem:[#allocation2 + $0x2c] sm:$0x1] }
 0x5ca   : > { %4702 = vmatprep.subr.bf16.mxu1 %v4961_v3  ;;  %v4403_v26 = vcombine.low %v2328_v36, %v2331_v5  ;;  %v8251_v42 = vcombine.low %v7169_v48, %v7180_v45  ;;  %v8252_v46 = vshll.u32 %v7202_v34, 16  ;;  %v2958_v57 = vrot.slane %v7323_v35, 5  ;;  %v2279_v5 = vld [vmem:[#allocation2 + $0x24] sm:$0xe] }
 0x5cb   : > { %v3036_v25 = vpop.permute.xlu1 %3035  ;;  %v2573_v13 = vsel %vm7108_vm14, %v2568_v63, %v2572_v6  ;;  %v2429_v0 = vsel %vm7108_vm14, %v2424_v7, %v7547_v21  ;;  %v2894_v63 = vld [vmem:[#allocation2 + $0x54] sm:$0xe]  ;;  %v2457_v32 = vor.u32 %v2456_v1, %v7646_v61  ;;  %v2961_v21 = vrot.slane %v8254_v52, 5  ;;  %v8255_v7 = vld [vmem:[#allocation64_spill] sm:$0xff] }
 0x5cc   : > { %4681 = vmatpush3.bf16.msra.mxu0 %v4961_v3  ;;  %v3287_v43 = vsel %vm582_vm0, %v8246_v4, %v3036_v25  ;;  %v2446_v58 = vrot.slane %v8252_v46, 5  ;;  %v4418_v48 = vcombine.low %v2429_v0, %v2439_v60  ;;  %v2337_v53 = vrot.slane %v8255_v7, 5 }
 0x5cd   : > { %4706 = vmatpush3.bf16.msra.mxu1 %v4961_v3  ;;  %4682 = vmatprep.subr.bf16.mxu0 %v4966_v51  ;;  %v2577_v3 = vor.u32 %v2576_v17, %v2572_v6  ;;  %v8253_v6 = vld [vmem:[#allocation63_spill] sm:$0xff]  ;;  %v2336_v17 = vrot.slane %v2334_v14, 4  ;;  %v2460_v36 = vshll.u32 %v5158_v54, 16  ;;  %v4382_v22 = vrot.slane %v2894_v63, 9  ;;  %v2280_v54 = vld [vmem:[#allocation2 + $0x30] sm:$0xe] }
 0x5ce   : > { %3762 = vmatmul.mubr.bf16.gmra.mrb[4].mxu0 %v3287_v43  ;;  %4703 = vmatprep.subr.bf16.mxu1 %v4966_v51  ;;  %v2465_v25 = vshrl.u32 %v8253_v6, 16  ;;  %v2468_v43 = vshll.u32 %v8253_v6, 16  ;;  %v2447_v40 = vor.u32 %v2446_v58, %v2443_v15  ;;  %v4364_v1 = vrot.slane %v2279_v5, 9 }
 0x5cf   : > { %v3244_v2 = vpop.permute.xlu0 %3243  ;;  %v3110_v18 = vpop.permute.xlu1 %3109  ;;  %v2578_v8 = vrot.slane %v2577_v3, 4  ;;  %v2960_v3 = vrot.slane %v2958_v57, 4  ;;  %v2462_v63 = vrot.slane %v2460_v36, 5 }
 0x5d0   : > { %v3383_v62 = vsel %vm582_vm0, %v8251_v42, %v3244_v2  ;;  %4683 = vmatpush3.bf16.msra.mxu0 %v4966_v51  ;;  %v3323_v12 = vsel %vm582_vm0, %v4403_v26, %v3110_v18  ;;  %v5159_v2 = vld [vmem:[#allocation2 + $0x18] sm:$0xf]  ;;  %v5160_v26 = vld [vmem:[#allocation2 + $0x1c] sm:$0xf]  ;;  %v2467_v46 = vrot.slane %v2465_v25, 4  ;;  %v2470_v0 = vrot.slane %v2468_v43, 5 }
 0x5d1   : > { %3858 = vmatprep.mubr.bf16.mxu1 %v3383_v62  ;;  %4707 = vmatpush3.bf16.msra.mxu1 %v4966_v51  ;;  %v2583_v45 = vsel %vm7108_vm14, %v2578_v8, %v2582_v49  ;;  %v4387_v60 = vcombine.low %v5159_v2, %v5160_v26  ;;  %v2338_v62 = vsel %vm7150_vm2, %v2336_v17, %v2337_v53  ;;  %v2458_v8 = vrot.slane %v2457_v32, 4  ;;  %v8256_v43 = vld [vmem:[#allocation66_spill] sm:$0xff] }
 0x5d2   : > { %3769 = vmatprep.mubr.bf16.mxu0 %v3323_v12  ;;  %v7665_v4 = vcombine.low %v2573_v13, %v2583_v45  ;;  %v5161_v13 = vld [vmem:[#allocation2 + $0x34] sm:$0xf]  ;;  %v7675_v49 = vsel %vm7150_vm2, %v4382_v22, %v2958_v57  ;;  %v7679_v15 = vsel %vm7150_vm2, %v2960_v3, %v2961_v21  ;;  %v2448_v45 = vrot.slane %v2447_v40, 4  ;;  %v5162_v57 = vld [vmem:[#allocation2 + $0x30] sm:$0xf] }
 0x5d3   : > { %v3172_v34 = vpop.permute.xlu0 %3171  ;;  %v2474_v56 = vshll.u32 %v5161_v13, 16  ;;  %v2478_v18 = vshrl.u32 %v5161_v13, 16  ;;  %v4454_v12 = vcombine.low %v7675_v49, %v7679_v15  ;;  %v2463_v21 = vsel %vm7108_vm14, %v2458_v8, %v2462_v63 }
 0x5d4   : > { %v3351_v51 = vsel %vm582_vm0, %v4418_v48, %v3172_v34  ;;  %v2335_v48 = vsel %vm7150_vm2, %v4364_v1, %v2334_v14  ;;  %v7686_v34 = vld [vmem:[#allocation2 + $0x34] sm:$0xf]  ;;  %v2453_v53 = vsel %vm7108_vm14, %v2448_v45, %v7646_v61  ;;  %v2471_v36 = vor.u32 %v2470_v0, %v2467_v46 }
 0x5d5   : > { %3859 = vmatmul.mubr.bf16.gmra.mrb[4].mxu1 %v3351_v51  ;;  %v3038_v42 = vpop.permute.xlu1 %3037  ;;  %v4404_v6 = vcombine.low %v2335_v48, %v2338_v62  ;;  %v4435_v5 = vcombine.low %v5162_v57, %v7686_v34  ;;  %v2476_v17 = vrot.slane %v2474_v56, 5  ;;  %v2480_v25 = vrot.slane %v2478_v18, 4  ;;  %v8258_v56 = vld [vmem:[#allocation67_spill] sm:$0xff]  ;;  %v7705_v57 = vld [vmem:[#allocation2 + $0x40] sm:$0xf] }
 0x5d6   : > { %v3291_v58 = vsel %vm582_vm0, %v4387_v60, %v3038_v42  ;;  %v2341_v51 = vrot.slane %v8256_v43, 5  ;;  %v4419_v40 = vcombine.low %v2453_v53, %v2463_v21  ;;  %v8257_v60 = vld [vmem:[#allocation65_spill] sm:$0xff]  ;;  %v4365_v13 = vrot.slane %v2280_v54, 9  ;;  %v5164_v42 = vld [vmem:[#allocation2 + $0x24] sm:$0xf] }
 0x5d7   : > { %3770 = vmatmul.mubr.bf16.gmra.mrb[8].mxu0 %v3291_v58  ;;  %v2481_v22 = vor.u32 %v2480_v25, %v2476_v17  ;;  %v2484_v1 = vshll.u32 %v8257_v60, 16  ;;  %v2344_v18 = vrot.slane %v8258_v56, 5  ;;  %v5165_v62 = vld [vmem:[#allocation2 + $0x28] sm:$0xf]  ;;  %v2472_v58 = vrot.slane %v2471_v36, 4 }
 0x5d8   : > { %v2343_v2 = vrot.slane %v2341_v51, 4  ;;  %v4388_v8 = vcombine.low %v5164_v42, %v5165_v62  ;;  %v2342_v63 = vsel %vm7150_vm2, %v4365_v13, %v2341_v51  ;;  %v5168_v54 = vld [vmem:[#allocation2 + $0x30] sm:$0xf]  ;;  %v5169_v36 = vld [vmem:[#allocation2 + $0x34] sm:$0xf]  ;;  %v8259_v13 = vcombine.low %v7536_v41, %v7542_v59 }
 0x5d9   : > { %v3112_v32 = vpop.permute.xlu1 %3111  ;;  %v3246_v52 = vpop.permute.xlu0 %3245  ;;  %v2482_v48 = vrot.slane %v2481_v22, 4  ;;  %v2486_v45 = vrot.slane %v2484_v1, 5  ;;  %v4389_v22 = vcombine.low %v5168_v54, %v5169_v36  ;;  %v8261_v59 = vcombine.low %v7314_v19, %v7323_v35  ;;  %v8264_v35 = vld [vmem:[#allocation74_spill] sm:$0xff] }
 0x5da   : > { %v3327_v7 = vsel %vm582_vm0, %v4404_v6, %v3112_v32  ;;  %v3387_v14 = vsel %vm582_vm0, %v4435_v5, %v3246_v52  ;;  %v2345_v46 = vsel %vm7150_vm2, %v2343_v2, %v2344_v18  ;;  %v5166_v6 = vld [vmem:[#allocation2 + $0x3c] sm:$0xf]  ;;  %v2477_v52 = vsel %vm7108_vm14, %v2472_v58, %v2476_v17  ;;  %v7716_v2 = vld [vmem:[#allocation2 + $0x4c] sm:$0xf] }
 0x5db   : > { %3777 = vmatprep.mubr.bf16.mxu0 %v3327_v7  ;;  %3866 = vmatprep.mubr.bf16.mxu1 %v3387_v14  ;;  %v4436_v5 = vcombine.low %v5166_v6, %v7705_v57  ;;  %v4405_v32 = vcombine.low %v2342_v63, %v2345_v46  ;;  %v2487_v21 = vsel %vm7108_vm14, %v2482_v48, %v2486_v45  ;;  %v2923_v6 = vrot.slane %v8264_v35, 5 }
 0x5dc   : > { %v4420_v51 = vcombine.low %v2477_v52, %v2487_v21  ;;  %v8260_v58 = vcombine.low %v7297_v55, %v7299_v29  ;;  %v8263_v63 = vcombine.low %v7342_v47, %v7349_v9  ;;  %v2889_v47 = vld [vmem:[#allocation2 + $0x18] sm:$0xe]  ;;  %v2937_v24 = vrot.slane %v7686_v34, 5  ;;  %v5174_v34 = vld [vmem:[#allocation2 + $0x2c] sm:$0x1] }
 0x5dd   : > { %v3174_v3 = vpop.permute.xlu0 %3173  ;;  %v2925_v21 = vrot.slane %v2923_v6, 4  ;;  %v2951_v50 = vrot.slane %v7716_v2, 5 }
 0x5de   : > { %v3355_v26 = vsel %vm582_vm0, %v4419_v40, %v3174_v3 }
 0x5df   : > { %3867 = vmatmul.mubr.bf16.gmra.mrb[8].mxu1 %v3355_v26  ;;  %v4437_v26 = vcombine.low %v5170_v10, %v7716_v2  ;;  %v2893_v10 = vld [vmem:[#allocation2 + $0x48] sm:$0xe] }
 0x5e0   : > { %v3040_v61 = vpop.permute.xlu1 %3039 }
 0x5e1   : > { %v3295_v0 = vsel %vm582_vm0, %v4388_v8, %v3040_v61 }
 0x5e2   : > { %3778 = vmatmul.mubr.bf16.gmra.mrb[12].mxu0 %v3295_v0  ;;  %v8262_v0 = vcombine.low %v7563_v11, %v7567_v38  ;;  %v8266_v11 = vld [vmem:[#allocation69_spill] sm:$0xff] }
 0x5e3   : > { %v3248_v25 = vpop.permute.xlu0 %3247 }
 0x5e4   : > { %v3114_v43 = vpop.permute.xlu1 %3113  ;;  %v3391_v7 = vsel %vm582_vm0, %v4436_v5, %v3248_v25  ;;  %v8265_v5 = vld [vmem:[#allocation70_spill] sm:$0xff] }
 0x5e5   : > { %v3331_v14 = vsel %vm582_vm0, %v4405_v32, %v3114_v43  ;;  %3874 = vmatprep.mubr.bf16.mxu1 %v3391_v7  ;;  %v4439_v38 = vcombine.low %v8266_v11, %v8265_v5  ;;  %v5172_v43 = vld [vmem:[#allocation2 + $0x20] sm:$0x1] }
 0x5e6   : > { %3785 = vmatprep.mubr.bf16.mxu0 %v3331_v14  ;;  %v2926_v7 = vrot.slane %v5172_v43, 5  ;;  %v5173_v14 = vld [vmem:[#allocation2 + $0x28] sm:$0xf]  ;;  %v2896_v43 = vld [vmem:[#allocation2 + $0x6c] sm:$0xe] }
 0x5e7   : > { %v3176_v53 = vpop.permute.xlu0 %3175 }
 0x5e8   : > { %v3359_v40 = vsel %vm582_vm0, %v4420_v51, %v3176_v53  ;;  %v2930_v51 = vrot.slane %v5173_v14, 5  ;;  %v2927_v54 = vsel %vm7150_vm2, %v2925_v21, %v2926_v7 }
 0x5e9   : > { %3875 = vmatmul.mubr.bf16.gmra.mrb[12].mxu1 %v3359_v40  ;;  %v4377_v40 = vrot.slane %v2889_v47, 9 }
 0x5ea   : > { %v3042_v3 = vpop.permute.xlu1 %3041 }
 0x5eb   : > { %v3299_v17 = vsel %vm582_vm0, %v4389_v22, %v3042_v3  ;;  %v2924_v36 = vsel %vm7150_vm2, %v4377_v40, %v2923_v6 }
 0x5ec   : > { %3786 = vmatmul.mubr.bf16.gmra.mrb[16].mxu0 %v3299_v17  ;;  %v4449_v3 = vcombine.low %v2924_v36, %v2927_v54  ;;  %v2891_v17 = vld [vmem:[#allocation2 + $0x30] sm:$0xe] }
 0x5ee   : > { %v3116_v60 = vpop.permute.xlu1 %3115  ;;  %v3250_v1 = vpop.permute.xlu0 %3249 }
 0x5ef   : > { %v3335_v56 = vsel %vm582_vm0, %v8259_v13, %v3116_v60  ;;  %v3395_v18 = vsel %vm582_vm0, %v4437_v26, %v3250_v1  ;;  %v2890_v26 = vld [vmem:[#allocation2 + $0x24] sm:$0xe]  ;;  %v2939_v60 = vrot.slane %v2937_v24, 4  ;;  %v2953_v1 = vrot.slane %v2951_v50, 4 }
 0x5f0   : > { %3793 = vmatprep.mubr.bf16.mxu0 %v3335_v56  ;;  %3882 = vmatprep.mubr.bf16.mxu1 %v3395_v18  ;;  %v2933_v13 = vrot.slane %v5174_v34, 5  ;;  %v4379_v56 = vrot.slane %v2891_v17, 9  ;;  %v5175_v18 = vld [vmem:[#allocation2 + $0x38] sm:$0x1] }
 0x5f2   : > { %v3178_v42 = vpop.permute.xlu0 %3177 }
 0x5f3   : > { %v3363_v62 = vsel %vm582_vm0, %v7578_v27, %v3178_v42  ;;  %v2940_v42 = vrot.slane %v5175_v18, 5 }
 0x5f4   : > { %3883 = vmatmul.mubr.bf16.gmra.mrb[16].mxu1 %v3363_v62  ;;  %v3044_v8 = vpop.permute.xlu1 %3043  ;;  %v4381_v62 = vrot.slane %v2893_v10, 9 }
 0x5f5   : > { %v3303_v48 = vsel %vm582_vm0, %v8260_v58, %v3044_v8  ;;  %v4378_v8 = vrot.slane %v2890_v26, 9 }
 0x5f6   : > { %3794 = vmatmul.mubr.bf16.gmra.mrb[20].mxu0 %v3303_v48  ;;  %v2944_v48 = vrot.slane %v7705_v57, 5  ;;  %v2952_v57 = vsel %vm7150_vm2, %v4381_v62, %v2951_v50 }
 0x5f7   : > { %v2931_v23 = vsel %vm7150_vm2, %v4378_v8, %v2930_v51 }
 0x5f8   : > { %v3252_v61 = vpop.permute.xlu0 %3251  ;;  %v3118_v41 = vpop.permute.xlu1 %3117 }
 0x5f9   : > { %v3399_v46 = vsel %vm582_vm0, %v8261_v59, %v3252_v61  ;;  %v3339_v27 = vsel %vm582_vm0, %v8262_v0, %v3118_v41  ;;  %v2941_v61 = vsel %vm7150_vm2, %v2939_v60, %v2940_v42  ;;  %v2955_v41 = vsel %vm7150_vm2, %v2953_v1, %v2954_v39 }
 0x5fa   : > { %3890 = vmatprep.mubr.bf16.mxu1 %v3399_v46  ;;  %3801 = vmatprep.mubr.bf16.mxu0 %v3339_v27  ;;  %v2965_v59 = vrot.slane %v8265_v5, 5  ;;  %v2938_v0 = vsel %vm7150_vm2, %v4379_v56, %v2937_v24  ;;  %v2892_v27 = vld [vmem:[#allocation2 + $0x3c] sm:$0xe]  ;;  %v5177_v5 = vld [vmem:[#allocation2 + $0x44] sm:$0x1] }
 0x5fb   : > { %v4380_v6 = vrot.slane %v2892_v27, 9  ;;  %v2947_v11 = vrot.slane %v5177_v5, 5 }
 0x5fc   : > { %v3180_v45 = vpop.permute.xlu0 %3179  ;;  %v2967_v35 = vrot.slane %v2965_v59, 4 }
 0x5fd   : > { %v3367_v55 = vsel %vm582_vm0, %v7609_v44, %v3180_v45  ;;  %v2945_v21 = vsel %vm7150_vm2, %v4380_v6, %v2944_v48 }
 0x5fe   : > { %3891 = vmatmul.mubr.bf16.gmra.mrb[20].mxu1 %v3367_v55  ;;  %v4451_v55 = vcombine.low %v2938_v0, %v2941_v61 }
 0x5ff   : > { %v3046_v29 = vpop.permute.xlu1 %3045 }
 0x600   : > { %v3307_v19 = vsel %vm582_vm0, %v8263_v63, %v3046_v29  ;;  %v4453_v29 = vcombine.low %v2952_v57, %v2955_v41  ;;  %v2946_v63 = vrot.slane %v2944_v48, 4 }
 0x601   : > { %3802 = vmatmul.mubr.bf16.gmra.mrb[24].mxu0 %v3307_v19  ;;  %v2895_v19 = vld [vmem:[#allocation2 + $0x60] sm:$0xe] }
 0x602   : > { %v3254_v25 = vpop.permute.xlu0 %3253 }
 0x603   : > { %v3120_v32 = vpop.permute.xlu1 %3119  ;;  %v3403_v52 = vsel %vm582_vm0, %v4439_v38, %v3254_v25  ;;  %v4383_v38 = vrot.slane %v2895_v19, 9  ;;  %v8267_v25 = vld [vmem:[#allocation71_spill] sm:$0xff] }
 0x604   : > { %v3343_v44 = vsel %vm582_vm0, %v4408_v37, %v3120_v32  ;;  %3898 = vmatprep.mubr.bf16.mxu1 %v3403_v52  ;;  %v2968_v32 = vrot.slane %v8267_v25, 5  ;;  %v2972_v52 = vrot.slane %v7415_v30, 5  ;;  %v4384_v30 = vrot.slane %v2896_v43, 9 }
 0x605   : > { %3809 = vmatprep.mubr.bf16.mxu0 %v3343_v44 }
 0x606   : > { %v3182_v9 = vpop.permute.xlu0 %3181  ;;  %v2969_v44 = vsel %vm7150_vm2, %v2967_v35, %v2968_v32  ;;  %v2974_v14 = vrot.slane %v2972_v52, 4  ;;  %v2973_v54 = vsel %vm7150_vm2, %v4384_v30, %v2972_v52 }
 0x607   : > { %v3371_v53 = vsel %vm582_vm0, %v7642_v16, %v3182_v9  ;;  %v2932_v16 = vrot.slane %v2930_v51, 4  ;;  %v2966_v9 = vsel %vm7150_vm2, %v4383_v38, %v2965_v59  ;;  %v8268_v51 = vld [vmem:[#allocation73_spill] sm:$0xff] }
 0x608   : > { %3899 = vmatmul.mubr.bf16.gmra.mrb[24].mxu1 %v3371_v53  ;;  %v4455_v7 = vcombine.low %v2966_v9, %v2969_v44  ;;  %v2975_v53 = vrot.slane %v8268_v51, 5 }
 0x609   : > { %v3048_v37 = vpop.permute.xlu1 %3047  ;;  %v2934_v58 = vsel %vm7150_vm2, %v2932_v16, %v2933_v13 }
 0x60a   : > { %v3311_v22 = vsel %vm582_vm0, %v4392_v20, %v3048_v37  ;;  %v2976_v40 = vsel %vm7150_vm2, %v2974_v14, %v2975_v53 }
 0x60b   : > { %3810 = vmatmul.mubr.bf16.gmra.mrb[28].mxu0 %v3311_v22  ;;  %v4456_v24 = vcombine.low %v2973_v54, %v2976_v40 }
 0x60c   : > { %4684 = vmatprep.mubr.msk.bf16.mxu0 %vm582_vm0, %v4449_v3 }
 0x60d   : > { %v3256_v2 = vpop.permute.xlu0 %3255 }
 0x60e   : > { %v3407_v20 = vsel %vm582_vm0, %v4440_v28, %v3256_v2  ;;  %v4450_v28 = vcombine.low %v2931_v23, %v2934_v58 }
 0x60f   : > { %3906 = vmatprep.mubr.bf16.mxu1 %v3407_v20 }
 0x611   : > { %v3184_v46 = vpop.permute.xlu0 %3183 }
 0x612   : > { %v3375_v45 = vsel %vm582_vm0, %v7665_v4, %v3184_v46  ;;  %v2948_v4 = vsel %vm7150_vm2, %v2946_v63, %v2947_v11 }
 0x613   : > { %3907 = vmatmul.mubr.bf16.gmra.mrb[28].mxu1 %v3375_v45  ;;  %4685 = vmatmul.mubr.msk.bf16.vlgmr.msra.gmra.mrb[32].mxu0 %vm582_vm0, %v4450_v28  ;;  %v4452_v47 = vcombine.low %v2945_v21, %v2948_v4 }
 0x614   : > { %4688 = vmatprep.mubr.msk.bf16.mxu0 %vm582_vm0, %v4451_v55  ;;  %4692 = vmatprep.mubr.msk.bf16.mxu1 %vm582_vm0, %v4453_v29 }
 0x61b   : > { %4689 = vmatmul.mubr.msk.bf16.gmra.mrb[36].mxu0 %vm582_vm0, %v4452_v47  ;;  %4693 = vmatmul.mubr.msk.bf16.vlgmr.msra.gmra.mrb[32].mxu1 %vm582_vm0, %v4454_v12 }
 0x61c   : > { %4696 = vmatprep.mubr.msk.bf16.mxu1 %vm582_vm0, %v4455_v7 }
 0x623   : > { %4697 = vmatmul.mubr.msk.bf16.gmra.mrb[36].mxu1 %vm582_vm0, %v4456_v24 }
 0x696   : > { %v4552_v50 = vpop.f32.mrb[0].mxu0 }
 0x697   : > { %v4616_v37 = vpop.f32.mrb[0].mxu1  ;;  %v4553_v36 = vpop.f32.mrb[1].mxu0 }
 0x698   : > { %v4554_v49 = vadd.f32 %v4553_v36, %v4552_v50  ;;  %v4617_v15 = vpop.f32.mrb[1].mxu1  ;;  %v4555_v12 = vpop.f32.mrb[2].mxu0 }
 0x699   : > { %v4618_v22 = vadd.f32 %v4617_v15, %v4616_v37  ;;  %v4619_v3 = vpop.f32.mrb[2].mxu1  ;;  %v4556_v16 = vpop.f32.mrb[3].mxu0 }
 0x69a   : > { %v4557_v17 = vadd.f32 %v4556_v16, %v4555_v12  ;;  %v4620_v10 = vpop.f32.mrb[3].mxu1 }
 0x69b   : > { %v4621_v26 = vadd.f32 %v4620_v10, %v4619_v3  ;;  %v7810_v60 = vadd.f32 %v4618_v22, %v4554_v49 }
 0x69d   : > { %v7812_v1 = vadd.f32 %v4621_v26, %v4557_v17 }
 0x6a1   : > { %v4558_v33 = vpop.f32.mrb[4].mxu0 }
 0x6a2   : > { %v4559_v34 = vpop.f32.mrb[5].mxu0 }
 0x6a3   : > { %v4560_v13 = vadd.f32 %v4559_v34, %v4558_v33  ;;  %v4561_v2 = vpop.f32.mrb[6].mxu0 }
 0x6a4   : > { %v4562_v56 = vpop.f32.mrb[7].mxu0 }
 0x6a5   : > { %v4563_v18 = vadd.f32 %v4562_v56, %v4561_v2 }
 0x6a8   : > { %v4622_v42 = vpop.f32.mrb[4].mxu1 }
 0x6a9   : > { %v4623_v62 = vpop.f32.mrb[5].mxu1 }
 0x6aa   : > { %v4624_v31 = vadd.f32 %v4623_v62, %v4622_v42  ;;  %v4625_v39 = vpop.f32.mrb[6].mxu1  ;;  %v4564_v8 = vpop.f32.mrb[8].mxu0 }
 0x6ab   : > { %v4626_v20 = vpop.f32.mrb[7].mxu1  ;;  %v4565_v61 = vpop.f32.mrb[9].mxu0 }
 0x6ac   : > { %v4627_v58 = vadd.f32 %v4626_v20, %v4625_v39  ;;  %v7814_v48 = vadd.f32 %v4624_v31, %v4560_v13  ;;  %v4566_v41 = vadd.f32 %v4565_v61, %v4564_v8  ;;  %v4567_v59 = vpop.f32.mrb[10].mxu0 }
 0x6ad   : > { %v4568_v46 = vpop.f32.mrb[11].mxu0 }
 0x6ae   : > { %v7816_v23 = vadd.f32 %v4627_v58, %v4563_v18  ;;  %v4569_v28 = vadd.f32 %v4568_v46, %v4567_v59 }
 0x6b2   : > { %v4628_v0 = vpop.f32.mrb[8].mxu1 }
 0x6b3   : > { %v4629_v57 = vpop.f32.mrb[9].mxu1 }
 0x6b4   : > { %v4630_v27 = vadd.f32 %v4629_v57, %v4628_v0  ;;  %v4631_v45 = vpop.f32.mrb[10].mxu1 }
 0x6b5   : > { %v4632_v55 = vpop.f32.mrb[11].mxu1  ;;  %v4570_v29 = vpop.f32.mrb[12].mxu0 }
 0x6b6   : > { %v4633_v63 = vadd.f32 %v4632_v55, %v4631_v45  ;;  %v7818_v19 = vadd.f32 %v4630_v27, %v4566_v41  ;;  %v4571_v35 = vpop.f32.mrb[13].mxu0 }
 0x6b7   : > { %v4572_v6 = vadd.f32 %v4571_v35, %v4570_v29  ;;  %v4573_v5 = vpop.f32.mrb[14].mxu0 }
 0x6b8   : > { %v7820_v11 = vadd.f32 %v4633_v63, %v4569_v28  ;;  %v4574_v38 = vpop.f32.mrb[15].mxu0 }
 0x6b9   : > { %v4575_v25 = vadd.f32 %v4574_v38, %v4573_v5  ;;  %v8269_v5 = vld [vmem:[#allocation44_spill] sm:$0xff] }
 0x6ba   : > { %v4014_v38 = vsub.s32 5, %v8269_v5 }
 0x6bc   : > { %v4634_v32 = vpop.f32.mrb[12].mxu1 }
 0x6bd   : > { %v4635_v4 = vpop.f32.mrb[13].mxu1 }
 0x6be   : > { %v4636_v52 = vadd.f32 %v4635_v4, %v4634_v32  ;;  %v4637_v44 = vpop.f32.mrb[14].mxu1  ;;  %v5178_v32 = vld [vmem:[%s6164_s25] sm:$0x3f]  ;;  %s5391_s25 = scalar_lea.vmem %s5390_s5, 4096 }
 0x6bf   : > { %v4638_v21 = vpop.f32.mrb[15].mxu1  ;;  %v4576_v47 = vpop.f32.mrb[16].mxu0  ;;  %v7838_v4 = vrot.slane %v5178_v32, %v4014_v38  ;;  %v8278_v38 = vld [vmem:[#allocation54_spill] sm:$0xff]  ;;  %p5393_p2 = scmp.lt.s32.totalorder %s5391_s25, %s5385_s2 }
 0x6c0   : > { %v4639_v9 = vadd.f32 %v4638_v21, %v4637_v44  ;;  %v7822_v43 = vadd.f32 %v4636_v52, %v4572_v6  ;;  %v4577_v7 = vpop.f32.mrb[17].mxu0 }
 0x6c1   : > { %v4578_v14 = vadd.f32 %v4577_v7, %v4576_v47  ;;  %v4579_v30 = vpop.f32.mrb[18].mxu0  ;;  %p5394_p6 = por %p5393_p2, %p5392_p11 }
 0x6c2   : > { %v7824_v51 = vadd.f32 %v4639_v9, %v4575_v25  ;;  %v4580_v53 = vpop.f32.mrb[19].mxu0 }
 0x6c3   : > { %v4581_v40 = vadd.f32 %v4580_v53, %v4579_v30  ;;  %p5395_p10 = pnand %p5394_p6, %p5388_p3 }
 0x6c7   : > { %v4640_v54 = vpop.f32.mrb[16].mxu1 }
 0x6c8   : > { %v4641_v24 = vpop.f32.mrb[17].mxu1 }
 0x6c9   : > { %v4642_v50 = vadd.f32 %v4641_v24, %v4640_v54  ;;  %v4643_v37 = vpop.f32.mrb[18].mxu1  ;;  %v4582_v49 = vpop.f32.mrb[20].mxu0 }
 0x6ca   : > { %v4644_v36 = vpop.f32.mrb[19].mxu1  ;;  %v4583_v22 = vpop.f32.mrb[21].mxu0 }
 0x6cb   : > { %v4645_v15 = vadd.f32 %v4644_v36, %v4643_v37  ;;  %v7826_v12 = vadd.f32 %v4642_v50, %v4578_v14  ;;  %v4584_v3 = vadd.f32 %v4583_v22, %v4582_v49  ;;  %v4585_v16 = vpop.f32.mrb[22].mxu0 }
 0x6cc   : > { %v4586_v10 = vpop.f32.mrb[23].mxu0 }
 0x6cd   : > { %v7828_v17 = vadd.f32 %v4645_v15, %v4581_v40  ;;  %v4587_v26 = vadd.f32 %v4586_v10, %v4585_v16  ;;  %v8270_v15 = vld [vmem:[#allocation45_spill] sm:$0xff] }
 0x6d1   : > { %v4646_v33 = vpop.f32.mrb[20].mxu1 }
 0x6d2   : > { %v4647_v34 = vpop.f32.mrb[21].mxu1 }
 0x6d3   : > { %v4648_v13 = vadd.f32 %v4647_v34, %v4646_v33  ;;  %v4649_v2 = vpop.f32.mrb[22].mxu1  ;;  %v8273_v33 = vld [vmem:[#allocation48_spill] sm:$0xff] }
 0x6d4   : > { %v4650_v56 = vpop.f32.mrb[23].mxu1  ;;  %v4588_v62 = vpop.f32.mrb[24].mxu0 }
 0x6d5   : > { %v4651_v18 = vadd.f32 %v4650_v56, %v4649_v2  ;;  %v3893_v42 = vadd.f32 %v4648_v13, %v4584_v3  ;;  %v4589_v31 = vpop.f32.mrb[25].mxu0 }
 0x6d6   : > { %v4590_v20 = vadd.f32 %v4589_v31, %v4588_v62  ;;  %v4591_v8 = vpop.f32.mrb[26].mxu0 }
 0x6d7   : > { %v7830_v39 = vadd.f32 %v4651_v18, %v4587_v26  ;;  %v4592_v58 = vpop.f32.mrb[27].mxu0 }
 0x6d8   : > { %v4593_v61 = vadd.f32 %v4592_v58, %v4591_v8 }
 0x6db   : > { %v4652_v41 = vpop.f32.mrb[24].mxu1 }
 0x6dc   : > { %v4653_v59 = vpop.f32.mrb[25].mxu1 }
 0x6dd   : > { %v4654_v46 = vadd.f32 %v4653_v59, %v4652_v41  ;;  %v4655_v28 = vpop.f32.mrb[26].mxu1 }
 0x6de   : > { %v4656_v0 = vpop.f32.mrb[27].mxu1  ;;  %v4594_v57 = vpop.f32.mrb[28].mxu0 }
 0x6df   : > { %v4657_v27 = vadd.f32 %v4656_v0, %v4655_v28  ;;  %v7832_v45 = vadd.f32 %v4654_v46, %v4590_v20  ;;  %v4595_v55 = vpop.f32.mrb[29].mxu0 }
 0x6e0   : > { %v4596_v29 = vadd.f32 %v4595_v55, %v4594_v57  ;;  %v4597_v63 = vpop.f32.mrb[30].mxu0  ;;  %v8276_v55 = vld [vmem:[#allocation56_spill] sm:$0xff] }
 0x6e1   : > { %v7834_v35 = vadd.f32 %v4657_v27, %v4593_v61  ;;  %v4598_v6 = vpop.f32.mrb[31].mxu0  ;;  %v8275_v27 = vld [vmem:[#allocation52_spill] sm:$0xff] }
 0x6e2   : > { %v4599_v25 = vadd.f32 %v4598_v6, %v4597_v63  ;;  %v8277_v6 = vld [vmem:[#allocation49_spill] sm:$0xff] }
 0x6e6   : > { %v4658_v52 = vpop.f32.mrb[28].mxu1  ;;  %v4686_v44 = vpop.f32.mrb[32].mxu0 }
 0x6e7   : > { %v3958_v21 = vadd.f32 %v4686_v44, %v7814_v48  ;;  %v4659_v47 = vpop.f32.mrb[29].mxu1  ;;  %v3949_v9 = vpop.f32.mrb[33].mxu0  ;;  %v8280_v44 = vld [vmem:[#allocation55_spill] sm:$0xff] }
 0x6e8   : > { %v4660_v7 = vadd.f32 %v4659_v47, %v4658_v52  ;;  %v3950_v14 = vadd.f32 %v3949_v9, %v7810_v60  ;;  %v4661_v30 = vpop.f32.mrb[30].mxu1  ;;  %v4687_v53 = vpop.f32.mrb[34].mxu0  ;;  %v8271_v60 = vld [vmem:[#allocation47_spill] sm:$0xff]  ;;  %v8281_v47 = vld [vmem:[#allocation50_spill] sm:$0xff] }
 0x6e9   : > { %v4018_v40 = vmul.f32 %v7838_v4, %v3958_v21  ;;  %v3961_v54 = vadd.f32 %v4687_v53, %v7816_v23  ;;  %v4662_v24 = vpop.f32.mrb[31].mxu1  ;;  %v3952_v50 = vpop.f32.mrb[35].mxu0 }
 0x6ea   : > { %v4016_v37 = vmul.f32 %v7838_v4, %v3950_v14  ;;  %v4663_v36 = vadd.f32 %v4662_v24, %v4661_v30  ;;  %v3953_v49 = vadd.f32 %v3952_v50, %v7812_v1  ;;  %v3909_v48 = vadd.f32 %v4660_v7, %v4596_v29  ;;  %v8272_v1 = vld [vmem:[#allocation46_spill] sm:$0xff]  ;;  %v8282_v7 = vld [vmem:[#allocation53_spill] sm:$0xff] }
 0x6eb   : > { %v4034_v22 = vadd.f32 %v4018_v40, %v8270_v15  ;;  %v4019_v3 = vmul.f32 %v7838_v4, %v3961_v54  ;;  %v8283_v15 = vld [vmem:[#allocation60_spill] sm:$0xff] }
 0x6ec   : > { %v4032_v16 = vadd.f32 %v4016_v37, %v8271_v60  ;;  %v4017_v10 = vmul.f32 %v7838_v4, %v3953_v49  ;;  %v3912_v26 = vadd.f32 %v4663_v36, %v4599_v25 }
 0x6ed   : > { %4050 = vst.msk [vmem:[%s7852_s0 + $0x10] sm:$0xff] %vm582_vm0, %v4034_v22  ;;  %v4035_v23 = vadd.f32 %v4019_v3, %v8272_v1  ;;  %v8284_v3 = vld [vmem:[#allocation58_spill] sm:$0xff] }
 0x6ee   : > { %4048 = vst.msk [vmem:[%s7852_s0] sm:$0xff] %vm582_vm0, %v4032_v16  ;;  %v4033_v34 = vadd.f32 %v4017_v10, %v8273_v33  ;;  %v4690_v13 = vpop.f32.mrb[36].mxu0  ;;  %v4694_v2 = vpop.f32.mrb[32].mxu1  ;;  %v8285_v10 = vld [vmem:[#allocation59_spill] sm:$0xff] }
 0x6ef   : > { %4051 = vst.msk [vmem:[%s7852_s0 + $0x18] sm:$0xff] %vm582_vm0, %v4035_v23  ;;  %v3974_v56 = vadd.f32 %v4690_v13, %v7822_v43  ;;  %v3990_v18 = vadd.f32 %v4694_v2, %v3893_v42  ;;  %v3965_v62 = vpop.f32.mrb[37].mxu0  ;;  %v3981_v31 = vpop.f32.mrb[33].mxu1 }
 0x6f0   : > { %4049 = vst.msk [vmem:[%s7852_s0 + $0x8] sm:$0xff] %vm582_vm0, %v4033_v34  ;;  %v3966_v20 = vadd.f32 %v3965_v62, %v7818_v19  ;;  %v3982_v8 = vadd.f32 %v3981_v31, %v7826_v12  ;;  %v4691_v58 = vpop.f32.mrb[38].mxu0  ;;  %v4695_v61 = vpop.f32.mrb[34].mxu1 }
 0x6f1   : > { %v4022_v41 = vmul.f32 %v7838_v4, %v3974_v56  ;;  %v4026_v59 = vmul.f32 %v7838_v4, %v3990_v18  ;;  %v3977_v46 = vadd.f32 %v4691_v58, %v7824_v51  ;;  %v3993_v43 = vadd.f32 %v4695_v61, %v7830_v39  ;;  %v3968_v42 = vpop.f32.mrb[39].mxu0  ;;  %v3984_v28 = vpop.f32.mrb[35].mxu1 }
 0x6f2   : > { %v4020_v0 = vmul.f32 %v7838_v4, %v3966_v20  ;;  %v4024_v19 = vmul.f32 %v7838_v4, %v3982_v8  ;;  %v3969_v12 = vadd.f32 %v3968_v42, %v7820_v11  ;;  %v3985_v57 = vadd.f32 %v3984_v28, %v7828_v17  ;;  %v8279_v17 = vld [vmem:[#allocation51_spill] sm:$0xff] }
 0x6f3   : > { %v4038_v51 = vadd.f32 %v4022_v41, %v8275_v27  ;;  %v4042_v29 = vadd.f32 %v4026_v59, %v8276_v55  ;;  %v4023_v39 = vmul.f32 %v7838_v4, %v3977_v46  ;;  %v4027_v63 = vmul.f32 %v7838_v4, %v3993_v43 }
 0x6f4   : > { %v4036_v5 = vadd.f32 %v4020_v0, %v8277_v6  ;;  %v4040_v25 = vadd.f32 %v4024_v19, %v8278_v38  ;;  %v4021_v11 = vmul.f32 %v7838_v4, %v3969_v12  ;;  %v4025_v32 = vmul.f32 %v7838_v4, %v3985_v57 }
 0x6f5   : > { %4054 = vst.msk [vmem:[%s7852_s0 + $0x30] sm:$0xff] %vm582_vm0, %v4038_v51  ;;  %4058 = vst.msk [vmem:[%s7852_s0 + $0x50] sm:$0xff] %vm582_vm0, %v4042_v29  ;;  %v4039_v52 = vadd.f32 %v4023_v39, %v8279_v17  ;;  %v4043_v21 = vadd.f32 %v4027_v63, %v8280_v44 }
 0x6f6   : > { %4052 = vst.msk [vmem:[%s7852_s0 + $0x20] sm:$0xff] %vm582_vm0, %v4036_v5  ;;  %4056 = vst.msk [vmem:[%s7852_s0 + $0x40] sm:$0xff] %vm582_vm0, %v4040_v25  ;;  %v4037_v9 = vadd.f32 %v4021_v11, %v8281_v47  ;;  %v4041_v14 = vadd.f32 %v4025_v32, %v8282_v7  ;;  %v4698_v30 = vpop.f32.mrb[36].mxu1 }
 0x6f7   : > { %4055 = vst.msk [vmem:[%s7852_s0 + $0x38] sm:$0xff] %vm582_vm0, %v4039_v52  ;;  %4059 = vst.msk [vmem:[%s7852_s0 + $0x58] sm:$0xff] %vm582_vm0, %v4043_v21  ;;  %v4006_v53 = vadd.f32 %v4698_v30, %v3909_v48  ;;  %v3997_v40 = vpop.f32.mrb[37].mxu1 }
 0x6f8   : > { %4053 = vst.msk [vmem:[%s7852_s0 + $0x28] sm:$0xff] %vm582_vm0, %v4037_v9  ;;  %4057 = vst.msk [vmem:[%s7852_s0 + $0x48] sm:$0xff] %vm582_vm0, %v4041_v14  ;;  %v3998_v54 = vadd.f32 %v3997_v40, %v7832_v45  ;;  %v4699_v24 = vpop.f32.mrb[38].mxu1 }
 0x6f9   : > { %v4030_v50 = vmul.f32 %v7838_v4, %v4006_v53  ;;  %v4009_v37 = vadd.f32 %v4699_v24, %v3912_v26  ;;  %v4000_v36 = vpop.f32.mrb[39].mxu1 }
 0x6fa   : > { %v4028_v49 = vmul.f32 %v7838_v4, %v3998_v54  ;;  %v4001_v48 = vadd.f32 %v4000_v36, %v7834_v35  ;;  %v8286_v35 = vld [vmem:[#allocation57_spill] sm:$0xff] }
 0x6fb   : > { %v4046_v22 = vadd.f32 %v4030_v50, %v8283_v15  ;;  %v4031_v45 = vmul.f32 %v7838_v4, %v4009_v37 }
 0x6fc   : > { %v4044_v60 = vadd.f32 %v4028_v49, %v8284_v3  ;;  %v4029_v16 = vmul.f32 %v7838_v4, %v4001_v48 }
 0x6fd   : > { %4062 = vst.msk [vmem:[%s7852_s0 + $0x70] sm:$0xff] %vm582_vm0, %v4046_v22  ;;  %v4047_v26 = vadd.f32 %v4031_v45, %v8285_v10 }
 0x6fe   : > { %4060 = vst.msk [vmem:[%s7852_s0 + $0x60] sm:$0xff] %vm582_vm0, %v4044_v60  ;;  %v4045_v1 = vadd.f32 %v4029_v16, %v8286_v35 }
 0x6ff   : > { %4063 = vst.msk [vmem:[%s7852_s0 + $0x78] sm:$0xff] %vm582_vm0, %v4047_v26 }
 0x700   : > { %4061 = vst.msk [vmem:[%s7852_s0 + $0x68] sm:$0xff] %vm582_vm0, %v4045_v1 }
 0x701   : > { %5398 = shalt.err (!%p5395_p10)
}
 0x702   : > { %s5399_s13 = scalar_lea.hbm %s7925_s6, 2048  ;;  %s5403_s19 = scalar_lea.hbm %s8288_s27, 8192 }
 0x703   : > { %p5400_p5 = scmp.ne.s32.totalorder %s7925_s6, %s5399_s13  ;;  %p5404_p9 = scmp.lt.u32.totalorder %s7925_s6, %s8288_s27 }
 0x704   : > { %p5405_p13 = scmp.lt.u32.totalorder %s5403_s19, %s5399_s13  ;;  %p5407_p0 = scmp.lt.u32.totalorder %s5399_s13, %s7925_s6 }
 0x705   : > { %p5401_p4 = pnand %p5400_p5, %p8289_p8 }
 0x706   : > { %p5406_p7 = por %p5405_p13, %p5404_p9 }
 0x707   : > { %p5402_p1 = pneg %p5401_p4 }
 0x708   : > { %p5408_p12 = por %p5407_p0, %p5406_p7 }
 0x70a   : > { %p5409_p3 = pnand %p5408_p12, %p5402_p1 }
 0x70c   : > { %5412 = shalt.err (!%p5409_p3)
}
 0x70d   : > { %s5587_s15 = smov 128   ;;  %s5588_s10 = smov 8  }
 0x70e   : > { %4726 = dma.vmem_to_hbm [thread:$0]  (%p8289_p8), %s7917_s20, 2048, %s7925_s6, %s4065_s14, %s5587_s15, %s5587_s15, %s5588_s10  }
 0x70f PF: > { %s8290_s18 = sld [smem:[#allocation28_spill]]  ;;  %p4760_p11 = scmp.ge.s32.totalorder %s5571_s22, 2 }
 0x710   : > { %p8291_p2 = scmp.ne.s32.totalorder %s8154_s26, 0 }
 0x712   : > { %p4752_p6 = pnand %p4760_p11, %p8291_p2 }
 0x715   : > { %s4096_s11 = sand.u32 1, %s8290_s18  }
 0x716   : > { %s4097_s17 = scalar_lea.sflag [#allocation6], %s4096_s11 }
 0x717   : > { %5502 = dma.done.wait (!%p4752_p6), %s4097_s17, 2048  }
 0x718   : > { %5504 = vsyncadd (!%p4752_p6), %s4097_s17, 4294965248  ;;  %s33_s22 = sadd.s32 1, %s5571_s22   ;;  %s8293_s4 = sld [smem:[#allocation41_spill]] }
 0x719   : > { %p7960_p10 = scmp.ge.s32.totalorder %s33_s22, 6   ;;  %s8294_s10 = sld [smem:[#allocation24_spill]] }
 0x71a   : > { %s8295_s11 = sld [smem:[#allocation25_spill]]  ;;  %s8296_s6 = sld [smem:[#allocation43_spill]] }
 0x71b   : > { %s8297_s12 = sld [smem:[#allocation26_spill]]  ;;  %s8298_s13 = sld [smem:[#allocation27_spill]] }
 0x71c   : > { %s8299_s14 = sld [smem:[#allocation40_spill]]  ;;  %s8300_s15 = sld [smem:[#allocation29_spill]] }
 0x71d   : > { %s8301_s16 = sld [smem:[#allocation30_spill]]  ;;  %s8302_s17 = sld [smem:[#allocation42_spill]] }
 0x71e   : > { %s8303_s18 = sld [smem:[#allocation33_spill]]  ;;  %s8304_s20 = sld [smem:[#allocation35_spill]] }
 0x71f   : > { %s8305_s26 = sld [smem:[#allocation36_spill]]  ;;  %s8306_s29 = smov %s5511_s30 }
 0x720   : > { %s8307_s30 = smov %s5515_s9  ;;  %s8308_s9 = smov %s8293_s4 }
 0x721   : > { %s8309_s19 = smov %s5567_s21  ;;  %32 = sbr.rel (!%p7960_p10) target bundleno = 26 (0x1a), region = 155 }
 0x725   : > { %s8310_s21 = smov %s8305_s26 }
 0x728   :  { %4102 = vsyncpa [#allocation5], 1 }
 0x729   :  { %4104 = vsyncpa [#allocation5 + $0x1], 1 }
 0x72a   :  { %4105 = vsyncpa [#allocation8], 1 }
 0x72b   :  { %4107 = vsyncpa [#allocation8 + $0x1], 1 }
 0x72c   :  { %4108 = vsyncpa [#allocation11], 1 }
 0x72d   :  { %4110 = vsyncpa [#allocation11 + $0x1], 1 }
 0x72e   :  { %4111 = vsyncpa [#allocation14], 1 }
 0x72f   :  { %4112 = vsyncpa [#allocation6], 1 }
 0x730   :  { %4114 = vsyncpa [#allocation6 + $0x1], 1 }

// kernel: tpu_custom_call.1
= control target key start
LH: loop header
LB: loop body
LE: loop exit
PB: predicated region body
PF: predicated region fallthrough
CT: control target
= control target key end

     0   :  { %s8016_s0 = inlined_call_operand.hbm [shape: f32[2,16,16,64], index: 0, kind: input, shape index: {}]   ;;  %s8017_s1 = inlined_call_operand.hbm [shape: f32[2,16,16,64], index: 1, kind: input, shape index: {}]   ;;  %s8018_s2 = inlined_call_operand.hbm [shape: f32[2,16,16,64], index: 2, kind: input, shape index: {}]   ;;  %s8019_s3 = inlined_call_operand.hbm [shape: f32[2,6,64], index: 3, kind: input, shape index: {}]   ;;  %s8020_s4 = inlined_call_operand.hbm [shape: f32[2,1,64], index: 4, kind: input, shape index: {}]   ;;  %s8021_s5 = inlined_call_operand.hbm [shape: f32[1,64], index: 5, kind: input, shape index: {}]   ;;  %s8022_s6 = inlined_call_operand.<no memory space> [shape: f32[1,1], index: 6, kind: input, shape index: {}]   ;;  %s8023_s7 = inlined_call_operand.hbm [shape: bf16[576,64], index: 7, kind: input, shape index: {}]   ;;  %s8024_s8 = inlined_call_operand.hbm [shape: f32[2,16,16,64], index: 8, kind: output, shape index: {}]  }
   0x1   :  { %8099 = sst [smem:[#allocation75_spill]] %s8016_s0  ;;  %v13_v0 = vstv %s8022_s6 }
   0x2   :  { %8100 = sst [smem:[#allocation76_spill]] %s8017_s1  ;;  %14 = vst [vmem:[#allocation3] sm:$0x1] %v13_v0 }
   0x3   :  { %8101 = sst [smem:[#allocation77_spill]] %s8018_s2 }
   0x4   :  { %8102 = sst [smem:[#allocation78_spill]] %s8019_s3 }
   0x5   :  { %8103 = sst [smem:[#allocation79_spill]] %s8020_s4 }
   0x6   :  { %8104 = sst [smem:[#allocation80_spill]] %s8021_s5 }
   0x7   :  { %8105 = sst [smem:[#allocation81_spill]] %s8023_s7 }
   0x8   :  { %8106 = sst [smem:[#allocation82_spill]] %s8024_s8 }
   0x9   :  { %15 = vsyncpa [#allocation5], 0 }
   0xa   :  { %17 = vsyncpa [#allocation5 + $0x1], 0 }
   0xb   :  { %18 = vsyncpa [#allocation8], 0 }
   0xc   :  { %20 = vsyncpa [#allocation8 + $0x1], 0 }
   0xd   :  { %21 = vsyncpa [#allocation11], 0 }
   0xe   :  { %23 = vsyncpa [#allocation11 + $0x1], 0 }
   0xf   :  { %24 = vsyncpa [#allocation14], 0 }
  0x10   :  { %25 = vsyncpa [#allocation6], 0 }
  0x11   :  { %27 = vsyncpa [#allocation6 + $0x1], 0  ;;  %s5637_s29 = smov 0   ;;  %s5639_s30 = smov 0  }
  0x12   :  { %s5641_s9 = smov 0   ;;  %s5643_s10 = smov 0  }
  0x13   :  { %s5645_s11 = smov 0   ;;  %s5647_s6 = smov 0  }
  0x14   :  { %s5649_s12 = smov 0   ;;  %s5651_s13 = smov 0  }
  0x15   :  { %s5653_s14 = smov 0   ;;  %s5655_s15 = smov 0  }
  0x16   :  { %s5657_s16 = smov 0   ;;  %s5659_s17 = smov 0  }
  0x17   :  { %s5661_s18 = smov 0   ;;  %s5663_s19 = smov 0  }
  0x18   :  { %s5665_s20 = smov 0   ;;  %s5667_s21 = smov 0  }
  0x19   :  { %s5669_s22 = smov 0  }
  0x1a LB: > { %8107 = sst [smem:[#allocation23_spill]] %s5519_s10  ;;  %s5723_s23 = sadd.s32 4294967295, %s5571_s22   ;;  %s5571_s22 = sphi %s5669_s22, %s33_s22   ;;  %s5567_s21 = sphi %s5667_s21, %s8310_s21   ;;  %s5563_s20 = sphi %s5665_s20, %s8304_s20   ;;  %s5559_s19 = sphi %s5663_s19, %s8309_s19   ;;  %s5555_s18 = sphi %s5661_s18, %s8303_s18   ;;  %s5551_s17 = sphi %s5659_s17, %s8302_s17   ;;  %s5547_s16 = sphi %s5657_s16, %s8301_s16   ;;  %s5543_s15 = sphi %s5655_s15, %s8300_s15   ;;  %s5539_s14 = sphi %s5653_s14, %s8299_s14   ;;  %s5535_s13 = sphi %s5651_s13, %s8298_s13   ;;  %s5531_s12 = sphi %s5649_s12, %s8297_s12   ;;  %s5527_s6 = sphi %s5647_s6, %s8296_s6   ;;  %s5523_s11 = sphi %s5645_s11, %s8295_s11   ;;  %s5519_s10 = sphi %s5643_s10, %s8294_s10   ;;  %s5515_s9 = sphi %s5641_s9, %s8308_s9   ;;  %s5511_s30 = sphi %s5639_s30, %s8307_s30   ;;  %s5507_s29 = sphi %s5637_s29, %s8306_s29  }
  0x1b   : > { %8108 = sst [smem:[#allocation24_spill]] %s5523_s11  ;;  %p4287_p0 = scmp.ge.s32.totalorder %s5571_s22, 1 }
  0x1c   : > { %8109 = sst [smem:[#allocation25_spill]] %s5527_s6  ;;  %p8029_p1 = scmp.eq.s32.totalorder %s5723_s23, 0 }
  0x1d   : > { %8110 = sst [smem:[#allocation26_spill]] %s5535_s13  ;;  %p293_p3 = scmp.lt.s32.totalorder %s5571_s22, 5 }
  0x1e   : > { %8111 = sst [smem:[#allocation27_spill]] %s5539_s14  ;;  %s5573_s25 = smov [#allocation13]  }
  0x1f   : > { %8112 = sst [smem:[#allocation28_spill]] %s5543_s15  ;;  %p5729_p4 = pnand %p4287_p0, %p293_p3 }
  0x20   : > { %8113 = sst [smem:[#allocation29_spill]] %s5547_s16  ;;  %s306_s26 = sshll.u32 %s5573_s25, 4  ;;  %s307_s26 = int_to_ptr.vmem [resolvable:$true] %s306_s26 }
  0x21   : > { %8114 = sst [smem:[#allocation30_spill]] %s5551_s17  ;;  %p4728_p5 = pneg %p5729_p4 }
  0x22   : > { %8115 = sst [smem:[#allocation31_spill]] %s5555_s18  ;;  %s8121_s5 = sld [smem:[#allocation80_spill]] }
  0x23   : > { %8116 = sst [smem:[#allocation32_spill]] %s5559_s19  ;;  %p5737_p6 = pnand %p4728_p5, %p8029_p1 }
  0x24   : > { %8117 = sst [smem:[#allocation33_spill]] %s5563_s20 }
  0x25   : > { %s8118_s24 = scalar_select %p5729_p4, 1, 0 }
  0x26   : > { %p8045_p8 = pneg %p5737_p6 }
  0x27   : > { %8119 = sst [smem:[#allocation34_spill]] %s8118_s24 }
  0x28   : > { %s5179_s19 = scalar_lea.hbm %s8121_s5, 16 }
  0x29   : > { %p5180_p7 = scmp.ne.s32.totalorder %s8121_s5, %s5179_s19  ;;  %p5186_p11 = scmp.lt.u32.totalorder %s5179_s19, %s8121_s5 }
  0x2b   : > { %p5182_p9 = pnand %p8045_p8, %p5180_p7 }
  0x2d   : > { %p5183_p10 = pneg %p5182_p9 }
  0x2f   : > { %p5188_p12 = pnand %p5186_p11, %p5183_p10 }
  0x31   : > { %5191 = shalt.err (!%p5188_p12)
}
  0x32   : > { %s5192_s8 = scalar_lea.vmem %s307_s26, 16  ;;  %s5199_s4 = scalar_lea.vmem %s307_s26, 32 }
  0x33   : > { %p5193_p13 = scmp.ne.s32.totalorder %s307_s26, %s5192_s8  ;;  %p5200_p5 = scmp.lt.s32.totalorder %s307_s26, %s307_s26 }
  0x34   : > { %p5201_p2 = scmp.lt.s32.totalorder %s5199_s4, %s5192_s8 }
  0x35   : > { %p5195_p0 = pnand %p5193_p13, %p8045_p8 }
  0x36   : > { %p5202_p1 = por %p5201_p2, %p5200_p5 }
  0x37   : > { %p5196_p3 = pneg %p5195_p0 }
  0x39   : > { %p5203_p4 = pnand %p5202_p1, %p5196_p3 }
  0x3b   : > { %5206 = shalt.err (!%p5203_p4)
}
  0x3c   : > { %4731 = dma.hbm_to_vmem [thread:$0]  (!%p5737_p6), %s8121_s5, 16, %s307_s26, [#allocation14]  }
  0x3d   : > { %s42_s19 = sadd.s32 1, %s5563_s20  ;;  %s45_s28 = sadd.s32 1, %s5567_s21 }
  0x3e   : > { %p43_p1 = scmp.ge.s32.totalorder %s42_s19, 2  ;;  %p8047_p2 = scmp.eq.s32.totalorder %s5571_s22, 0 }
  0x3f   : > { %s4281_s25 = sshll.u32 %s5563_s20, 3  ;;  %s90_s8 = sadd.s32 1, %s5539_s14 }
  0x40   : > { %s8312_s19 = smov (%p43_p1, %s42_s19), 0  ;;  %s8314_s28 = smov (!%p43_p1, %s45_s28), %s5567_s21 }
  0x41   : > { %8122 = sst [smem:[#allocation35_spill]] %s8312_s19  ;;  %s4282_s18 = sadd.s32 4294967295, %s4281_s25 }
  0x42   : > { %p47_p4 = scmp.ge.s32.totalorder %s8314_s28, 2  ;;  %p79_p7 = scmp.gt.s32.totalorder %s4282_s18, 0 }
  0x43   : > { %s4283_s26 = sshll.u32 %s8312_s19, 3  ;;  %p97_p9 = scmp.ne.s32.totalorder %s5539_s14, %s5535_s13 }
  0x44   : > { %s8316_s28 = smov (%p47_p4, %s8314_s28), 0  ;;  %s8318_s18 = smov (!%p79_p7, %s4282_s18), 0 }
  0x45   : > { %8123 = sst [smem:[#allocation36_spill]] %s8316_s28  ;;  %s5780_s24 = ssub.s32 %s5567_s21, %s8316_s28 }
  0x46   : > { %s4284_s5 = sadd.s32 4294967295, %s4283_s26  ;;  %p5784_p11 = por %p97_p9, %p8047_p2 }
  0x47   : > { %p83_p10 = scmp.gt.s32.totalorder %s4284_s5, 0  ;;  %p103_p12 = scmp.ne.s32.totalorder %s5535_s13, %s5531_s12 }
  0x48   : > { %s5790_s2 = sadd.s32 8, %s4281_s25  ;;  %p8126_p13 = scmp.eq.s32.totalorder %s5723_s23, 0 }
  0x49   : > { %8125 = sst [smem:[#allocation37_spill]] %s5790_s2  ;;  %s8320_s5 = smov (!%p83_p10, %s4284_s5), 0 }
  0x4a   : > { %p5794_p0 = por %p103_p12, %p8126_p13  ;;  %s86_s10 = ssub.s32 %s8318_s18, %s8320_s5 }
  0x4b   : > { %s5799_s11 = sadd.s32 8, %s4283_s26  ;;  %s87_s6 = sor.u32 %s86_s10, %s5780_s24 }
  0x4c   : > { %s8127_s28 = scalar_select %p5794_p0, 1, 0 }
  0x4d   : > { %8129 = sst [smem:[#allocation39_spill]] %s5799_s11  ;;  %p88_p1 = scmp.eq.s32.totalorder %s87_s6, 0 }
  0x4e   : > { %8128 = sst [smem:[#allocation38_spill]] %s8127_s28  ;;  %p8046_p4 = scmp.lt.s32.totalorder %s5571_s22, 4 }
  0x4f   : > { %s5805_s12 = sshll.u32 %s5567_s21, 5  ;;  %s357_s13 = sand.u32 1, %s5571_s22  }
  0x50   : > { %s5808_s25 = scalar_select %p88_p1, %s5539_s14, %s90_s8  }
  0x51   : > { %s359_s0 = sand.u32 1, %s5539_s14   ;;  %s4299_s2 = sshll.u32 %s8318_s18, 1 }
  0x52   : > { %8130 = sst [smem:[#allocation40_spill]] %s5808_s25  ;;  %s4296_s28 = sshll.u32 %s359_s0, 4 }
  0x53   : > { %s371_s5 = sadd.s32 %s4299_s2, %s5805_s12  ;;  %s361_s15 = scalar_lea.vmem [#allocation7], %s4296_s28 }
  0x54   : > { %s4301_s26 = sshll.u32 %s371_s5, 7  ;;  %s374_s16 = sshll.u32 %s361_s15, 4  ;;  %s5818_s16 = int_to_ptr.vmem [resolvable:$true] %s374_s16 }
  0x55   : > { %s8131_s1 = sld [smem:[#allocation76_spill]]  ;;  %p5824_p7 = pnand %p8046_p4, %p5784_p11 }
  0x56   : > { %s5830_s2 = scalar_lea.sflag [#allocation8], %s357_s13 }
  0x57   : > { %p5209_p10 = pneg %p5824_p7 }
  0x5b   : > { %s5816_s11 = scalar_lea.hbm %s8131_s1, %s4301_s26  ;;  %s5212_s28 = scalar_lea.hbm %s8131_s1, 8192 }
  0x5c   : > { %s5207_s6 = scalar_lea.hbm %s5816_s11, 256  ;;  %p5213_p11 = scmp.lt.u32.totalorder %s5816_s11, %s8131_s1 }
  0x5d   : > { %p5208_p9 = scmp.ne.s32.totalorder %s5816_s11, %s5207_s6  ;;  %p5214_p1 = scmp.lt.u32.totalorder %s5212_s28, %s5207_s6 }
  0x5e   : > { %p5216_p3 = scmp.lt.u32.totalorder %s5207_s6, %s5816_s11 }
  0x5f   : > { %p5210_p12 = pnand %p5209_p10, %p5208_p9  ;;  %p5215_p5 = por %p5214_p1, %p5213_p11 }
  0x61   : > { %p5211_p13 = pneg %p5210_p12  ;;  %p5217_p8 = por %p5216_p3, %p5215_p5 }
  0x63   : > { %p5218_p4 = pnand %p5217_p8, %p5211_p13 }
  0x65   : > { %5221 = shalt.err (!%p5218_p4)
}
  0x66   : > { %s5222_s18 = scalar_lea.vmem %s5818_s16, 256  ;;  %s5574_s5 = smov [#allocation7]  }
  0x67   : > { %p5223_p9 = scmp.ne.s32.totalorder %s5818_s16, %s5222_s18  ;;  %s5227_s26 = sshll.u32 %s5574_s5, 4  ;;  %s5228_s26 = int_to_ptr.vmem [resolvable:$false] %s5227_s26 }
  0x68   : > { %s5229_s10 = scalar_lea.vmem %s5228_s26, 512  ;;  %p5230_p0 = scmp.lt.s32.totalorder %s5818_s16, %s5228_s26 }
  0x69   : > { %p5225_p12 = pnand %p5223_p9, %p5209_p10  ;;  %p5231_p11 = scmp.lt.s32.totalorder %s5229_s10, %s5222_s18 }
  0x6b   : > { %p5226_p2 = pneg %p5225_p12  ;;  %p5232_p1 = por %p5231_p11, %p5230_p0 }
  0x6d   : > { %p5233_p3 = pnand %p5232_p1, %p5226_p2 }
  0x6f   : > { %5236 = shalt.err (!%p5233_p3)
}
  0x70   : > { %s8050_s6 = smov 128   ;;  %s8052_s15 = smov 8  }
  0x71   : > { %4741 = dma.hbm_to_vmem [thread:$0]  (!%p5824_p7), %s5816_s11, 256, %s5818_s16, %s5830_s2, %s8050_s6, %s8050_s6, %s8052_s15  }
  0x72   : > { %p150_p8 = scmp.eq.s32.totalorder %s5780_s24, 0  ;;  %s152_s17 = sadd.s32 1, %s5515_s9 }
  0x73   : > { %p159_p2 = scmp.ne.s32.totalorder %s5515_s9, %s5511_s30  ;;  %p165_p0 = scmp.ne.s32.totalorder %s5511_s30, %s5507_s29 }
  0x74   : > { %s5868_s28 = scalar_select %p150_p8, %s5515_s9, %s152_s17  }
  0x75   : > { %p8134_p5 = scmp.eq.s32.totalorder %s5571_s22, 0  ;;  %p8135_p10 = scmp.eq.s32.totalorder %s5723_s23, 0 }
  0x76   : > { %8133 = sst [smem:[#allocation41_spill]] %s5868_s28  ;;  %s8049_s4 = sand.u32 1, %s5515_s9  }
  0x77   : > { %p161_p4 = por %p159_p2, %p8134_p5  ;;  %p5874_p13 = por %p165_p0, %p8135_p10 }
  0x78   : > { %s4307_s0 = sshll.u32 %s8049_s4, 3  ;;  %s4308_s18 = sshll.u32 %s5567_s21, 7 }
  0x79   : > { %s8136_s8 = scalar_select %p5874_p13, 1, 0 }
  0x7a   : > { %s8137_s3 = sld [smem:[#allocation78_spill]]  ;;  %s415_s29 = scalar_lea.vmem [#allocation10], %s4307_s0 }
  0x7b   : > { %s422_s26 = sshll.u32 %s415_s29, 4  ;;  %p8138_p7 = scmp.lt.s32.totalorder %s5571_s22, 4  ;;  %s5893_s26 = int_to_ptr.vmem [resolvable:$true] %s422_s26 }
  0x7c   : > { %s5577_s17 = smov [#allocation15]  }
  0x7d   : > { %p5889_p9 = pnand %p8138_p7, %p161_p4  ;;  %s5895_s4 = sshll.u32 %s5577_s17, 4  ;;  %s320_s4 = int_to_ptr.vmem [resolvable:$true] %s5895_s4 }
  0x7f   : > { %s8139_s10 = scalar_select %p5889_p9, 1, 0 }
  0x80   : > { %s5885_s16 = scalar_lea.hbm %s8137_s3, %s4308_s18  ;;  %s5899_s18 = scalar_lea.sflag [#allocation11], %s357_s13 }
  0x81   : > { %s5237_s5 = scalar_lea.hbm %s5885_s16, 128  ;;  %p8055_p11 = pneg %p5889_p9 }
  0x82   : > { %p5238_p12 = scmp.ne.s32.totalorder %s5885_s16, %s5237_s5  ;;  %s5242_s29 = scalar_lea.hbm %s8137_s3, 256 }
  0x83   : > { %p5243_p8 = scmp.lt.u32.totalorder %s5885_s16, %s8137_s3  ;;  %p5244_p2 = scmp.lt.u32.totalorder %s5242_s29, %s5237_s5 }
  0x84   : > { %p5240_p1 = pnand %p8055_p11, %p5238_p12  ;;  %p5246_p5 = scmp.lt.u32.totalorder %s5237_s5, %s5885_s16 }
  0x85   : > { %p5245_p0 = por %p5244_p2, %p5243_p8 }
  0x86   : > { %p5241_p3 = pneg %p5240_p1 }
  0x87   : > { %p5247_p4 = por %p5246_p5, %p5245_p0 }
  0x89   : > { %p5248_p10 = pnand %p5247_p4, %p5241_p3 }
  0x8b   : > { %5251 = shalt.err (!%p5248_p10)
}
  0x8c   : > { %s5252_s13 = scalar_lea.vmem %s5893_s26, 128  ;;  %s5578_s17 = smov [#allocation10]  }
  0x8d   : > { %p5253_p7 = scmp.ne.s32.totalorder %s5893_s26, %s5252_s13  ;;  %s5257_s0 = sshll.u32 %s5578_s17, 4  ;;  %s5258_s0 = int_to_ptr.vmem [resolvable:$false] %s5257_s0 }
  0x8e   : > { %s5259_s6 = scalar_lea.vmem %s5258_s0, 256  ;;  %p5260_p13 = scmp.lt.s32.totalorder %s5893_s26, %s5258_s0 }
  0x8f   : > { %p5255_p12 = pnand %p5253_p7, %p8055_p11  ;;  %p5261_p8 = scmp.lt.s32.totalorder %s5259_s6, %s5252_s13 }
  0x91   : > { %p5256_p1 = pneg %p5255_p12  ;;  %p5262_p2 = por %p5261_p8, %p5260_p13 }
  0x93   : > { %p5263_p0 = pnand %p5262_p2, %p5256_p1 }
  0x95   : > { %5266 = shalt.err (!%p5263_p0)
}
  0x96   : > { %4747 = dma.hbm_to_vmem [thread:$0]  (!%p5889_p9), %s5885_s16, 128, %s5893_s26, %s5899_s18  }
  0x97   : > { %s8140_s7 = sld [smem:[#allocation81_spill]]  ;;  %p8141_p13 = pneg %p5737_p6 }
  0x9d   : > { %s5267_s11 = scalar_lea.hbm %s8140_s7, 4608 }
  0x9e   : > { %p5268_p3 = scmp.ne.s32.totalorder %s8140_s7, %s5267_s11  ;;  %p5274_p10 = scmp.lt.u32.totalorder %s5267_s11, %s8140_s7 }
  0xa0   : > { %p5270_p5 = pnand %p5268_p3, %p8141_p13 }
  0xa2   : > { %p5271_p4 = pneg %p5270_p5 }
  0xa4   : > { %p5276_p7 = pnand %p5274_p10, %p5271_p4 }
  0xa6   : > { %5279 = shalt.err (!%p5276_p7)
}
  0xa7   : > { %s5280_s16 = scalar_lea.vmem %s320_s4, 4608  ;;  %p8142_p1 = pmov %p8141_p13 }
  0xa8   : > { %p5281_p12 = scmp.ne.s32.totalorder %s320_s4, %s5280_s16  ;;  %p5288_p0 = scmp.lt.s32.totalorder %s320_s4, %s320_s4 }
  0xa9   : > { %p5289_p11 = scmp.lt.s32.totalorder %s5280_s16, %s5280_s16 }
  0xaa   : > { %p5283_p8 = pnand %p5281_p12, %p8142_p1 }
  0xab   : > { %p5290_p9 = por %p5289_p11, %p5288_p0 }
  0xac   : > { %p5284_p2 = pneg %p5283_p8 }
  0xae   : > { %p5291_p3 = pnand %p5290_p9, %p5284_p2 }
  0xb0   : > { %5294 = shalt.err (!%p5291_p3)
}
  0xb1   : > { %s5579_s26 = smov 64   ;;  %s8143_s6 = sld [smem:[#allocation30_spill]] }
  0xb2   : > { %s8144_s15 = sld [smem:[#allocation29_spill]]  ;;  %s8145_s5 = sld [smem:[#allocation28_spill]] }
  0xb3   : > { %s5580_s11 = smov 4   ;;  %s4280_s13 = sadd.s32 4294967294, %s5571_s22  }
  0xb4   : > { %4734 = dma.hbm_to_vmem [thread:$0]  (!%p5737_p6), %s8140_s7, 4608, %s320_s4, [#allocation14], %s5579_s26, %s5579_s26, %s5580_s11  }
  0xb5   : > { %s8146_s0 = ssub.s32 %s5563_s20, %s8312_s19  ;;  %p286_p5 = scmp.eq.s32.totalorder %s4280_s13, 3 }
  0xb6   : > { %s51_s16 = sor.u32 %s8146_s0, %s5780_s24  ;;  %p8148_p4 = scmp.eq.s32.totalorder %s5571_s22, 0 }
  0xb7   : > { %s54_s1 = sadd.s32 1, %s8143_s6  ;;  %p52_p9 = scmp.eq.s32.totalorder %s51_s16, 0 }
  0xb8   : > { %p61_p11 = scmp.ne.s32.totalorder %s8143_s6, %s8144_s15  ;;  %p67_p13 = scmp.ne.s32.totalorder %s8144_s15, %s8145_s5 }
  0xb9   : > { %s5959_s3 = scalar_select %p52_p9, %s8143_s6, %s54_s1  }
  0xba   : > { %p5963_p10 = por %p8148_p4, %p61_p11  ;;  %p8150_p7 = scmp.eq.s32.totalorder %s5723_s23, 0 }
  0xbb   : > { %8147 = sst [smem:[#allocation42_spill]] %s5959_s3  ;;  %p8152_p12 = scmp.eq.s32.totalorder %s5723_s23, 3 }
  0xbc   : > { %p5969_p6 = por %p8150_p7, %p67_p13  ;;  %p5979_p8 = por %p286_p5, %p67_p13 }
  0xbd   : > { %p5975_p1 = por %p8152_p12, %p61_p11  ;;  %s333_s1 = sand.u32 1, %s8143_s6  }
  0xbe   : > { %s8151_s27 = scalar_select %p5969_p6, 1, 0 }
  0xbf   : > { %s8153_s4 = scalar_select %p5975_p1, 1, 0 }
  0xc0   : > { %s8154_s26 = scalar_select %p5979_p8, 1, 0 }
  0xc1   : > { %s4512_s15 = sshll.u32 %s5563_s20, 4  ;;  %s4291_s5 = sshll.u32 %s333_s1, 7 }
  0xc2   : > { %s344_s11 = sadd.s32 %s4512_s15, %s5805_s12  ;;  %s337_s17 = scalar_lea.vmem [#allocation4], %s4291_s5 }
  0xc3   : > { %s4295_s29 = sshll.u32 %s344_s11, 7  ;;  %s347_s13 = sshll.u32 %s337_s17, 4  ;;  %s5991_s13 = int_to_ptr.vmem [resolvable:$true] %s347_s13 }
  0xc4   : > { %s8155_s7 = sld [smem:[#allocation75_spill]]  ;;  %p8156_p2 = scmp.lt.s32.totalorder %s5571_s22, 4 }
  0xc5   : > { %s6001_s15 = scalar_lea.sflag [#allocation5], %s333_s1 }
  0xc6   : > { %p5997_p0 = pnand %p8156_p2, %p5963_p10 }
  0xc8   : > { %p5297_p9 = pneg %p5997_p0 }
  0xca   : > { %s5989_s19 = scalar_lea.hbm %s8155_s7, %s4295_s29  ;;  %s5300_s25 = scalar_lea.hbm %s8155_s7, 8192 }
  0xcb   : > { %s5295_s5 = scalar_lea.hbm %s5989_s19, 2048  ;;  %p5301_p5 = scmp.lt.u32.totalorder %s5989_s19, %s8155_s7 }
  0xcc   : > { %p5296_p3 = scmp.ne.s32.totalorder %s5989_s19, %s5295_s5  ;;  %p5302_p4 = scmp.lt.u32.totalorder %s5300_s25, %s5295_s5 }
  0xcd   : > { %p5304_p7 = scmp.lt.u32.totalorder %s5295_s5, %s5989_s19 }
  0xce   : > { %p5298_p11 = pnand %p5297_p9, %p5296_p3  ;;  %p5303_p10 = por %p5302_p4, %p5301_p5 }
  0xd0   : > { %p5299_p13 = pneg %p5298_p11  ;;  %p5305_p12 = por %p5304_p7, %p5303_p10 }
  0xd2   : > { %p5306_p2 = pnand %p5305_p12, %p5299_p13 }
  0xd4   : > { %5309 = shalt.err (!%p5306_p2)
}
  0xd5   : > { %s5310_s1 = scalar_lea.vmem %s5991_s13, 2048  ;;  %s5581_s16 = smov [#allocation4]  }
  0xd6   : > { %p5311_p3 = scmp.ne.s32.totalorder %s5991_s13, %s5310_s1  ;;  %s5315_s11 = sshll.u32 %s5581_s16, 4  ;;  %s5316_s11 = int_to_ptr.vmem [resolvable:$false] %s5315_s11 }
  0xd7   : > { %s5317_s29 = scalar_lea.vmem %s5316_s11, 4096  ;;  %p5318_p1 = scmp.lt.s32.totalorder %s5991_s13, %s5316_s11 }
  0xd8   : > { %p5313_p11 = pnand %p5311_p3, %p5297_p9  ;;  %p5319_p5 = scmp.lt.s32.totalorder %s5317_s29, %s5310_s1 }
  0xda   : > { %p5314_p8 = pneg %p5313_p11  ;;  %p5320_p4 = por %p5319_p5, %p5318_p1 }
  0xdc   : > { %p5321_p10 = pnand %p5320_p4, %p5314_p8 }
  0xde   : > { %5324 = shalt.err (!%p5321_p10)
}
  0xdf   : > { %s8158_s5 = smov 8   ;;  %s8159_s25 = smov 128  }
  0xe0   : > { %s8160_s17 = sld [smem:[#allocation37_spill]]  ;;  %s8161_s0 = sld [smem:[#allocation39_spill]] }
  0xe1   : > { %s8162_s16 = sld [smem:[#allocation25_spill]]  ;;  %s8163_s7 = sld [smem:[#allocation24_spill]] }
  0xe2   : > { %s8164_s11 = sld [smem:[#allocation23_spill]]  ;;  %p8167_p7 = scmp.eq.s32.totalorder %s5571_s22, 0 }
  0xe3   : > { %4738 = dma.hbm_to_vmem [thread:$0]  (!%p5997_p0), %s5989_s19, 2048, %s5991_s13, %s6001_s15, %s8159_s25, %s8159_s25, %s8158_s5  }
  0xe4   : > { %p8169_p3 = scmp.eq.s32.totalorder %s5723_s23, 0  ;;  %s8172_s3 = sld [smem:[#allocation77_spill]] }
  0xe5   : > { %p8173_p11 = scmp.lt.s32.totalorder %s5571_s22, 4 }
  0xe6   : > { %p8165_p1 = scmp.lt.s32.totalorder %s8160_s17, 15  ;;  %p8166_p8 = scmp.lt.s32.totalorder %s8161_s0, 15 }
  0xe7   : > { %s126_s6 = sadd.s32 1, %s8162_s16  ;;  %p133_p9 = scmp.ne.s32.totalorder %s8162_s16, %s8163_s7 }
  0xe8   : > { %s8322_s17 = smov (!%p8165_p1, %s8160_s17), 15  ;;  %s8324_s0 = smov (!%p8166_p8, %s8161_s0), 15 }
  0xe9   : > { %s122_s1 = ssub.s32 %s8322_s17, %s8324_s0  ;;  %p139_p13 = scmp.ne.s32.totalorder %s8163_s7, %s8164_s11 }
  0xea   : > { %s123_s29 = sor.u32 %s122_s1, %s5780_s24  ;;  %p6046_p12 = por %p133_p9, %p8167_p7 }
  0xeb   : > { %p124_p2 = scmp.eq.s32.totalorder %s123_s29, 0  ;;  %p6052_p0 = por %p139_p13, %p8169_p3 }
  0xec   : > { %s386_s13 = sand.u32 1, %s8162_s16   ;;  %s4304_s15 = sshll.u32 %s8322_s17, 1 }
  0xed   : > { %s8170_s19 = scalar_select %p6052_p0, 1, 0 }
  0xee   : > { %s8326_s16 = smov (!%p124_p2, %s8162_s16), %s126_s6  ;;  %s4302_s0 = sshll.u32 %s386_s13, 4 }
  0xef   : > { %8171 = sst [smem:[#allocation43_spill]] %s8326_s16  ;;  %s398_s7 = sadd.s32 %s4304_s15, %s5805_s12 }
  0xf0   : > { %s4306_s11 = sshll.u32 %s398_s7, 7  ;;  %s388_s29 = scalar_lea.vmem [#allocation9], %s4302_s0 }
  0xf1   : > { %s6064_s14 = scalar_lea.hbm %s8172_s3, %s4306_s11  ;;  %s401_s28 = sshll.u32 %s388_s29, 4  ;;  %s6066_s28 = int_to_ptr.vmem [resolvable:$true] %s401_s28 }
  0xf2   : > { %p6072_p5 = pnand %p8173_p11, %p6046_p12  ;;  %s4309_s12 = sshll.u32 %s5567_s21, 4 }
  0xf3   : > { %s8175_s15 = sld [smem:[#allocation79_spill]]  ;;  %s5325_s24 = scalar_lea.hbm %s6064_s14, 256 }
  0xf4   : > { %p5326_p4 = scmp.ne.s32.totalorder %s6064_s14, %s5325_s24  ;;  %p5327_p10 = pneg %p6072_p5 }
  0xf5   : > { %s5330_s1 = scalar_lea.hbm %s8172_s3, 8192  ;;  %p5331_p9 = scmp.lt.u32.totalorder %s6064_s14, %s8172_s3 }
  0xf6   : > { %p5328_p1 = pnand %p5327_p10, %p5326_p4  ;;  %p5332_p13 = scmp.lt.u32.totalorder %s5330_s1, %s5325_s24 }
  0xf7   : > { %p5334_p12 = scmp.lt.u32.totalorder %s5325_s24, %s6064_s14 }
  0xf8   : > { %p5329_p8 = pneg %p5328_p1  ;;  %p5333_p7 = por %p5332_p13, %p5331_p9 }
  0xf9   : > { %s8176_s7 = smov %s8175_s15  ;;  %s6080_s11 = scalar_lea.hbm %s8175_s15, %s4309_s12 }
  0xfa   : > { %p5335_p2 = por %p5334_p12, %p5333_p7 }
  0xfc   : > { %p5336_p3 = pnand %p5335_p2, %p5329_p8 }
  0xfe   : > { %5339 = shalt.err (!%p5336_p3)
}
  0xff   : > { %s5340_s12 = scalar_lea.vmem %s6066_s28, 256  ;;  %s5582_s6 = smov [#allocation9]  }
 0x100   : > { %p5341_p11 = scmp.ne.s32.totalorder %s6066_s28, %s5340_s12  ;;  %s5345_s13 = sshll.u32 %s5582_s6, 4  ;;  %s5346_s13 = int_to_ptr.vmem [resolvable:$false] %s5345_s13 }
 0x101   : > { %s5347_s16 = scalar_lea.vmem %s5346_s13, 512  ;;  %p5348_p0 = scmp.lt.s32.totalorder %s6066_s28, %s5346_s13 }
 0x102   : > { %p5343_p4 = pnand %p5341_p11, %p5327_p10  ;;  %p5349_p9 = scmp.lt.s32.totalorder %s5347_s16, %s5340_s12 }
 0x104   : > { %p5344_p1 = pneg %p5343_p4  ;;  %p5350_p13 = por %p5349_p9, %p5348_p0 }
 0x106   : > { %p5351_p7 = pnand %p5350_p13, %p5344_p1 }
 0x108   : > { %5354 = shalt.err (!%p5351_p7)
}
 0x109   : > { %4744 = dma.hbm_to_vmem [thread:$0]  (!%p6072_p5), %s6064_s14, 256, %s6066_s28, %s5830_s2, %s8159_s25, %s8159_s25, %s8158_s5  }
 0x10a   : > { %s8177_s15 = sand.u32 1, %s5515_s9   ;;  %s5355_s0 = scalar_lea.hbm %s6080_s11, 16 }
 0x10b   : > { %s432_s24 = scalar_lea.vmem [#allocation12], %s8177_s15  ;;  %p5356_p0 = scmp.ne.s32.totalorder %s6080_s11, %s5355_s0 }
 0x10c   : > { %s439_s20 = sshll.u32 %s432_s24, 4  ;;  %p8178_p10 = scmp.ne.s32.totalorder %s8139_s10, 0  ;;  %s440_s20 = int_to_ptr.vmem [resolvable:$true] %s439_s20 }
 0x10d   : > { %s5360_s29 = scalar_lea.hbm %s8176_s7, 32  ;;  %p5361_p3 = scmp.lt.u32.totalorder %s6080_s11, %s8176_s7 }
 0x10e   : > { %p8179_p8 = pneg %p8178_p10  ;;  %p5362_p11 = scmp.lt.u32.totalorder %s5360_s29, %s5355_s0 }
 0x10f   : > { %p5364_p4 = scmp.lt.u32.totalorder %s5355_s0, %s6080_s11 }
 0x110   : > { %p5358_p12 = pnand %p5356_p0, %p8179_p8  ;;  %p5363_p5 = por %p5362_p11, %p5361_p3 }
 0x112   : > { %p5359_p2 = pneg %p5358_p12  ;;  %p5365_p1 = por %p5364_p4, %p5363_p5 }
 0x114   : > { %p5366_p9 = pnand %p5365_p1, %p5359_p2 }
 0x116   : > { %5369 = shalt.err (!%p5366_p9)
}
 0x117   : > { %s5370_s14 = scalar_lea.vmem %s440_s20, 16  ;;  %p8180_p7 = pmov %p8179_p8 }
 0x118   : > { %p5371_p13 = scmp.ne.s32.totalorder %s440_s20, %s5370_s14  ;;  %s5583_s2 = smov [#allocation12]  }
 0x119   : > { %s5375_s28 = sshll.u32 %s5583_s2, 4  ;;  %s5376_s28 = int_to_ptr.vmem [resolvable:$false] %s5375_s28 }
 0x11a   : > { %p5373_p0 = pnand %p5371_p13, %p8180_p7  ;;  %s5377_s5 = scalar_lea.vmem %s5376_s28, 32 }
 0x11b   : > { %p5378_p12 = scmp.lt.s32.totalorder %s440_s20, %s5376_s28  ;;  %p5379_p6 = scmp.lt.s32.totalorder %s5377_s5, %s5370_s14 }
 0x11c   : > { %p5374_p8 = pneg %p5373_p0 }
 0x11d   : > { %p5380_p3 = por %p5379_p6, %p5378_p12 }
 0x11f   : > { %p5381_p11 = pnand %p5380_p3, %p5374_p8 }
 0x121   : > { %5384 = shalt.err (!%p5381_p11)
}
 0x122   : > { %4750 = dma.hbm_to_vmem [thread:$0]  (!%p8178_p10), %s6080_s11, 16, %s440_s20, %s5899_s18  }
 0x123   : > { %s8181_s25 = sld [smem:[#allocation34_spill]] }
 0x129   : > { %p8182_p2 = scmp.ne.s32.totalorder %s8181_s25, 0 }
 0x12b   : > { %448 = sbr.rel (%p8182_p2) target bundleno = 1807 (0x70f), region = 52 }
 0x132   : > { %s8183_s13 = sld [smem:[#allocation29_spill]]  ;;  %p8184_p6 = scmp.ne.s32.totalorder %s8151_s27, 0 }
 0x138   : > { %s6136_s16 = sand.u32 1, %s8183_s13  }
 0x139   : > { %s4311_s15 = sshll.u32 %s6136_s16, 7  ;;  %s451_s24 = scalar_lea.sflag [#allocation5], %s6136_s16 }
 0x13a   : > { %s6142_s0 = scalar_lea.vmem [#allocation4], %s4311_s15 }
 0x13b   : > { %5482 = dma.done.wait (%p8184_p6), %s451_s24, 2048  }
 0x13c   : > { %5484 = vsyncadd (%p8184_p6), %s451_s24, 4294965248  ;;  %s8185_s10 = sld [smem:[#allocation26_spill]]  ;;  %s8186_s18 = sld [smem:[#allocation38_spill]] }
 0x13d   : > { %s459_s11 = sand.u32 1, %s5723_s23  }
 0x13e   : > { %s460_s1 = scalar_lea.sflag [#allocation8], %s459_s11 }
 0x142   : > { %s461_s20 = sand.u32 1, %s8185_s10   ;;  %p8187_p10 = scmp.ne.s32.totalorder %s8186_s18, 0 }
 0x143   : > { %s4312_s17 = sshll.u32 %s461_s20, 4 }
 0x144   : > { %s6150_s29 = scalar_lea.vmem [#allocation7], %s4312_s17 }
 0x145   : > { %5486 = dma.done.wait (%p8187_p10), %s460_s1, 256  }
 0x146   : > { %5488 = vsyncadd (%p8187_p10), %s460_s1, 4294967040  ;;  %s8188_s12 = sld [smem:[#allocation24_spill]]  ;;  %p8189_p5 = scmp.ne.s32.totalorder %s8170_s19, 0 }
 0x14c   : > { %s470_s6 = sand.u32 1, %s8188_s12  }
 0x14d   : > { %s4313_s14 = sshll.u32 %s470_s6, 4 }
 0x14e   : > { %s6157_s27 = scalar_lea.vmem [#allocation9], %s4313_s14 }
 0x14f   : > { %5490 = dma.done.wait (%p8189_p5), %s460_s1, 256  }
 0x150   : > { %5492 = vsyncadd (%p8189_p5), %s460_s1, 4294967040  ;;  %s479_s2 = sand.u32 1, %s5511_s30   ;;  %s478_s5 = scalar_lea.sflag [#allocation11], %s459_s11 }
 0x151   : > { %s4314_s28 = sshll.u32 %s479_s2, 3  ;;  %p8190_p4 = scmp.ne.s32.totalorder %s8136_s8, 0 }
 0x152   : > { %s6164_s25 = scalar_lea.vmem [#allocation10], %s4314_s28 }
 0x153   : > { %5494 = dma.done.wait (%p8190_p4), %s478_s5, 144  }
 0x154   : > { %5496 = vsyncadd (%p8190_p4), %s478_s5, 4294967152  ;;  %s6170_s13 = scalar_lea.vmem [#allocation12], %s479_s2  ;;  %p8191_p1 = scmp.eq.s32.totalorder %s5723_s23, 0 }
 0x156   : > { %5498 = dma.done.wait (%p8191_p1), [#allocation14], 4624   ;;  %p8192_p9 = pmov %p8191_p1 }
 0x157   : > { %vm582_vm0 = vcmask 523264   ;;  %v6177_v1 = vld [vmem:[%s6150_s29] sm:$0xff]  ;;  %v6183_v3 = vld [vmem:[%s6150_s29 + $0x8] sm:$0xff]  ;;  %vm1657_vm1 = vcmask 516096   ;;  %vm1658_vm2 = vsmask.f32 256 }
 0x158   : > { %5500 = vsyncadd (%p8192_p9), [#allocation14], 4294962672  ;;  %v6180_v2 = vld [vmem:[%s6142_s0 + $0x10] sm:$0xff]  ;;  %v583_v4 = vsel %vm582_vm0, %v6177_v1, 0.0  ;;  %v6190_v6 = vld [vmem:[%s6142_s0 + $0x18] sm:$0xff]  ;;  %v586_v12 = vsel %vm582_vm0, %v6183_v3, 0.0 }
 0x159   : > { %v595_v5 = vsel %vm582_vm0, %v6180_v2, 0.0  ;;  %v6193_v7 = vld [vmem:[%s6142_s0] sm:$0xff]  ;;  %v6196_v8 = vld [vmem:[%s6142_s0 + $0x8] sm:$0xff]  ;;  %584 = vadd.xlane.f32.xlu0 %v583_v4  ;;  %v6205_v11 = vld [vmem:[%s6142_s0 + $0x30] sm:$0xff]  ;;  %v598_v13 = vsel %vm582_vm0, %v6190_v6, 0.0  ;;  %s8214_s23 = sld [smem:[#allocation31_spill]] }
 0x15a   : > { %596 = vadd.xlane.f32.xlu1 %v595_v5  ;;  %v6199_v9 = vld [vmem:[%s6142_s0 + $0x20] sm:$0xff]  ;;  %v6202_v10 = vld [vmem:[%s6142_s0 + $0x28] sm:$0xff]  ;;  %v6212_v14 = vld [vmem:[%s6142_s0 + $0x38] sm:$0xff]  ;;  %v589_v17 = vsel %vm582_vm0, %v6193_v7, 0.0  ;;  %v592_v18 = vsel %vm582_vm0, %v6196_v8, 0.0  ;;  %v607_v24 = vsel %vm582_vm0, %v6205_v11, 0.0 }
 0x15b   : > { %v6215_v15 = vld [vmem:[%s6142_s0 + $0x40] sm:$0xff]  ;;  %v6218_v16 = vld [vmem:[%s6142_s0 + $0x48] sm:$0xff]  ;;  %v6225_v19 = vld [vmem:[%s6142_s0 + $0x50] sm:$0xff]  ;;  %v601_v22 = vsel %vm582_vm0, %v6199_v9, 0.0  ;;  %v604_v23 = vsel %vm582_vm0, %v6202_v10, 0.0  ;;  %v610_v25 = vsel %vm582_vm0, %v6212_v14, 0.0 }
 0x15c   : > { %v6228_v20 = vld [vmem:[%s6142_s0 + $0x58] sm:$0xff]  ;;  %v6231_v21 = vld [vmem:[%s6142_s0 + $0x60] sm:$0xff]  ;;  %v6242_v26 = vld [vmem:[%s6142_s0 + $0x68] sm:$0xff]  ;;  %v613_v27 = vsel %vm582_vm0, %v6215_v15, 0.0  ;;  %v616_v28 = vsel %vm582_vm0, %v6218_v16, 0.0  ;;  %v619_v29 = vsel %vm582_vm0, %v6225_v19, 0.0 }
 0x15d   : > { %587 = vadd.xlane.f32.xlu0 %v586_v12  ;;  %v622_v30 = vsel %vm582_vm0, %v6228_v20, 0.0  ;;  %v625_v31 = vsel %vm582_vm0, %v6231_v21, 0.0  ;;  %v628_v32 = vsel %vm582_vm0, %v6242_v26, 0.0  ;;  %v6257_v33 = vld [vmem:[%s6142_s0 + $0x70] sm:$0xff]  ;;  %v6260_v34 = vld [vmem:[%s6142_s0 + $0x78] sm:$0xff]  ;;  %vm6765_vm3 = vmand %vm1657_vm1, %vm1658_vm2  ;;  %vm1984_vm7 = vcmask 519168  }
 0x15e   : > { %599 = vadd.xlane.f32.xlu1 %v598_v13  ;;  %v631_v35 = vsel %vm582_vm0, %v6257_v33, 0.0  ;;  %v634_v36 = vsel %vm582_vm0, %v6260_v34, 0.0  ;;  %v6267_v37 = vld [vmem:[%s6157_s27] sm:$0xff]  ;;  %v6270_v38 = vld [vmem:[%s6157_s27 + $0x8] sm:$0xff]  ;;  %vm1690_vm4 = vsmask.f32 7938 }
 0x15f   : > { %v637_v39 = vsel %vm582_vm0, %v6267_v37, 0.0  ;;  %v640_v40 = vsel %vm582_vm0, %v6270_v38, 0.0  ;;  %vm6875_vm5 = vmand %vm1657_vm1, %vm1690_vm4  ;;  %p1625_p13 = scmp.gt.s32.totalorder %s8214_s23, 0  ;;  %vm1782_vm9 = vsmask.f32 4368  ;;  %p1629_p7 = scmp.lt.s32.totalorder %s8214_s23, 1 }
 0x160   : > { %vm6962_vm8 = vmand %vm1984_vm7, %vm1690_vm4  ;;  %s5585_s24 = smov 64   ;;  %vm2081_vm11 = vsmask.f32 3328  ;;  %vm2082_vm12 = vsmask.f32 7440  ;;  %vm2308_vm15 = vcmask 1042432  }
 0x161   : > { %590 = vadd.xlane.f32.xlu0 %v589_v17  ;;  %s1626_s8 = scalar_select %p1625_p13, 1, 0  ;;  %vm6972_vm10 = vmor %vm1658_vm2, %vm1782_vm9  ;;  %vm2309_vm1 = vcmask 1046532  }
 0x162   : > { %593 = vadd.xlane.f32.xlu1 %v592_v18  ;;  %s7061_s19 = scalar_select %p1629_p7, 1, 0  ;;  %vm7108_vm14 = vmor %vm2081_vm11, %vm2082_vm12 }
 0x163   : > { %vm7150_vm2 = vmor %vm2308_vm15, %vm2309_vm1  ;;  %s4535_s10 = sshll.u32 %s8214_s23, 4  ;;  %s8287_s12 = sld [smem:[#allocation82_spill]] }
 0x164   : > { %s4065_s14 = scalar_lea.sflag [#allocation6], %s6136_s16  ;;  %p8289_p8 = scmp.ne.s32.totalorder %s8153_s4, 0 }
 0x165   : > { %602 = vadd.xlane.f32.xlu0 %v601_v22  ;;  %s5586_s28 = smov [#allocation16]  }
 0x166   : > { %605 = vadd.xlane.f32.xlu1 %v604_v23  ;;  %s5389_s5 = sshll.u32 %s5586_s28, 4  ;;  %s5390_s5 = int_to_ptr.vmem [resolvable:$false] %s5389_s5 }
 0x169   : > { %608 = vadd.xlane.f32.xlu0 %v607_v24 }
 0x16a   : > { %611 = vadd.xlane.f32.xlu1 %v610_v25 }
 0x16d   : > { %614 = vadd.xlane.f32.xlu0 %v613_v27 }
 0x16e   : > { %617 = vadd.xlane.f32.xlu1 %v616_v28 }
 0x171   : > { %620 = vadd.xlane.f32.xlu0 %v619_v29 }
 0x172   : > { %623 = vadd.xlane.f32.xlu1 %v622_v30 }
 0x175   : > { %626 = vadd.xlane.f32.xlu0 %v625_v31 }
 0x176   : > { %629 = vadd.xlane.f32.xlu1 %v628_v32 }
 0x179   : > { %632 = vadd.xlane.f32.xlu0 %v631_v35 }
 0x17a   : > { %635 = vadd.xlane.f32.xlu1 %v634_v36 }
 0x17d   : > { %638 = vadd.xlane.f32.xlu0 %v637_v39 }
 0x17e   : > { %641 = vadd.xlane.f32.xlu1 %v640_v40 }
 0x1e6   : > { %v585_v41 = vpop.xlane.xlu0 %584 }
 0x1e7   : > { %v597_v42 = vpop.xlane.xlu1 %596  ;;  %v644_v43 = vmul.f32 0.015625, %v585_v41 }
 0x1e8   : > { %v648_v44 = vmul.f32 0.015625, %v597_v42 }
 0x1e9   : > { %v6277_v45 = vsub.f32 %v6177_v1, %v644_v43 }
 0x1ea   : > { %v6280_v46 = vsub.f32 %v6180_v2, %v648_v44  ;;  %v588_v47 = vpop.xlane.xlu0 %587 }
 0x1eb   : > { %v600_v48 = vpop.xlane.xlu1 %599  ;;  %v645_v49 = vmul.f32 0.015625, %v588_v47  ;;  %v684_v51 = vmul.f32 %v6277_v45, %v6277_v45 }
 0x1ec   : > { %v649_v50 = vmul.f32 0.015625, %v600_v48  ;;  %v688_v52 = vmul.f32 %v6280_v46, %v6280_v46 }
 0x1ed   : > { %v6287_v53 = vsub.f32 %v6183_v3, %v645_v49  ;;  %v704_v55 = vsel %vm582_vm0, %v684_v51, 0.0 }
 0x1ee   : > { %v6290_v54 = vsub.f32 %v6190_v6, %v649_v50  ;;  %705 = vadd.xlane.f32.xlu0 %v704_v55  ;;  %v591_v56 = vpop.xlane.xlu0 %590  ;;  %v716_v58 = vsel %vm582_vm0, %v688_v52, 0.0 }
 0x1ef   : > { %v594_v57 = vpop.xlane.xlu1 %593  ;;  %v646_v59 = vmul.f32 0.015625, %v591_v56  ;;  %v685_v61 = vmul.f32 %v6287_v53, %v6287_v53 }
 0x1f0   : > { %v647_v60 = vmul.f32 0.015625, %v594_v57  ;;  %v689_v62 = vmul.f32 %v6290_v54, %v6290_v54 }
 0x1f1   : > { %v6299_v63 = vsub.f32 %v6193_v7, %v646_v59  ;;  %v707_v1 = vsel %vm582_vm0, %v685_v61, 0.0 }
 0x1f2   : > { %v6302_v0 = vsub.f32 %v6196_v8, %v647_v60  ;;  %717 = vadd.xlane.f32.xlu0 %v716_v58  ;;  %708 = vadd.xlane.f32.xlu1 %v707_v1  ;;  %v603_v2 = vpop.xlane.xlu0 %602  ;;  %v719_v4 = vsel %vm582_vm0, %v689_v62, 0.0 }
 0x1f3   : > { %v606_v3 = vpop.xlane.xlu1 %605  ;;  %v650_v5 = vmul.f32 0.015625, %v603_v2  ;;  %v686_v12 = vmul.f32 %v6299_v63, %v6299_v63 }
 0x1f4   : > { %v651_v6 = vmul.f32 0.015625, %v606_v3  ;;  %v687_v7 = vmul.f32 %v6302_v0, %v6302_v0 }
 0x1f5   : > { %v6311_v13 = vsub.f32 %v6199_v9, %v650_v5  ;;  %v710_v17 = vsel %vm582_vm0, %v686_v12, 0.0 }
 0x1f6   : > { %v6314_v8 = vsub.f32 %v6202_v10, %v651_v6  ;;  %720 = vadd.xlane.f32.xlu1 %v719_v4  ;;  %711 = vadd.xlane.f32.xlu0 %v710_v17  ;;  %v609_v18 = vpop.xlane.xlu0 %608  ;;  %v713_v23 = vsel %vm582_vm0, %v687_v7, 0.0 }
 0x1f7   : > { %v612_v22 = vpop.xlane.xlu1 %611  ;;  %v652_v24 = vmul.f32 0.015625, %v609_v18  ;;  %v690_v27 = vmul.f32 %v6311_v13, %v6311_v13 }
 0x1f8   : > { %v653_v25 = vmul.f32 0.015625, %v612_v22  ;;  %v691_v9 = vmul.f32 %v6314_v8, %v6314_v8 }
 0x1f9   : > { %v6323_v28 = vsub.f32 %v6205_v11, %v652_v24  ;;  %v722_v29 = vsel %vm582_vm0, %v690_v27, 0.0 }
 0x1fa   : > { %v6326_v10 = vsub.f32 %v6212_v14, %v653_v25  ;;  %714 = vadd.xlane.f32.xlu1 %v713_v23  ;;  %723 = vadd.xlane.f32.xlu0 %v722_v29  ;;  %v615_v30 = vpop.xlane.xlu0 %614  ;;  %v725_v32 = vsel %vm582_vm0, %v691_v9, 0.0 }
 0x1fb   : > { %v618_v31 = vpop.xlane.xlu1 %617  ;;  %v654_v35 = vmul.f32 0.015625, %v615_v30  ;;  %v692_v39 = vmul.f32 %v6323_v28, %v6323_v28 }
 0x1fc   : > { %v655_v36 = vmul.f32 0.015625, %v618_v31  ;;  %v693_v11 = vmul.f32 %v6326_v10, %v6326_v10 }
 0x1fd   : > { %v6335_v40 = vsub.f32 %v6215_v15, %v654_v35  ;;  %v728_v41 = vsel %vm582_vm0, %v692_v39, 0.0  ;;  %v845_v35 = vlaneseq }
 0x1fe   : > { %v6338_v14 = vsub.f32 %v6218_v16, %v655_v36  ;;  %726 = vadd.xlane.f32.xlu1 %v725_v32  ;;  %729 = vadd.xlane.f32.xlu0 %v728_v41  ;;  %v621_v42 = vpop.xlane.xlu0 %620  ;;  %v731_v44 = vsel %vm582_vm0, %v693_v11, 0.0 }
 0x1ff   : > { %v624_v43 = vpop.xlane.xlu1 %623  ;;  %v656_v47 = vmul.f32 0.015625, %v621_v42  ;;  %v694_v49 = vmul.f32 %v6335_v40, %v6335_v40 }
 0x200   : > { %v657_v48 = vmul.f32 0.015625, %v624_v43  ;;  %v695_v15 = vmul.f32 %v6338_v14, %v6338_v14  ;;  %v6396_v43 = vshrl.u32 %v845_v35, 7 }
 0x201   : > { %v6347_v50 = vsub.f32 %v6225_v19, %v656_v47  ;;  %v734_v51 = vsel %vm582_vm0, %v694_v49, 0.0 }
 0x202   : > { %v6350_v16 = vsub.f32 %v6228_v20, %v657_v48  ;;  %732 = vadd.xlane.f32.xlu1 %v731_v44  ;;  %735 = vadd.xlane.f32.xlu0 %v734_v51  ;;  %v627_v52 = vpop.xlane.xlu0 %626  ;;  %v737_v56 = vsel %vm582_vm0, %v695_v15, 0.0  ;;  %8193 = vst [vmem:[#allocation44_spill] sm:$0xff] %v6396_v43  ;;  %v6399_v48 = vld [vmem:[%s6164_s25] sm:$0x3f] }
 0x203   : > { %v630_v55 = vpop.xlane.xlu1 %629  ;;  %v658_v57 = vmul.f32 0.015625, %v627_v52  ;;  %v696_v59 = vmul.f32 %v6347_v50, %v6347_v50 }
 0x204   : > { %v659_v58 = vmul.f32 0.015625, %v630_v55  ;;  %v697_v19 = vmul.f32 %v6350_v16, %v6350_v16  ;;  %v6402_v55 = vadd.f32 1.0, %v6399_v48 }
 0x205   : > { %v6359_v60 = vsub.f32 %v6231_v21, %v658_v57  ;;  %v740_v61 = vsel %vm582_vm0, %v696_v59, 0.0 }
 0x206   : > { %v6362_v20 = vsub.f32 %v6242_v26, %v659_v58  ;;  %738 = vadd.xlane.f32.xlu1 %v737_v56  ;;  %741 = vadd.xlane.f32.xlu0 %v740_v61  ;;  %v633_v62 = vpop.xlane.xlu0 %632  ;;  %v743_v2 = vsel %vm582_vm0, %v697_v19, 0.0  ;;  %v847_v56 = vsub.s32 1, %v6396_v43  ;;  %v871_v61 = vsub.s32 0, %v6396_v43 }
 0x207   : > { %v636_v1 = vpop.xlane.xlu1 %635  ;;  %v660_v3 = vmul.f32 0.015625, %v633_v62  ;;  %v698_v5 = vmul.f32 %v6359_v60, %v6359_v60 }
 0x208   : > { %v661_v4 = vmul.f32 0.015625, %v636_v1  ;;  %v699_v21 = vmul.f32 %v6362_v20, %v6362_v20 }
 0x209   : > { %v6371_v6 = vsub.f32 %v6257_v33, %v660_v3  ;;  %v746_v12 = vsel %vm582_vm0, %v698_v5, 0.0 }
 0x20a   : > { %v6374_v26 = vsub.f32 %v6260_v34, %v661_v4  ;;  %744 = vadd.xlane.f32.xlu1 %v743_v2  ;;  %747 = vadd.xlane.f32.xlu0 %v746_v12  ;;  %v639_v7 = vpop.xlane.xlu0 %638  ;;  %v749_v18 = vsel %vm582_vm0, %v699_v21, 0.0  ;;  %v6407_v2 = vrot.slane %v6402_v55, %v847_v56 }
 0x20b   : > { %v642_v17 = vpop.xlane.xlu1 %641  ;;  %v662_v22 = vmul.f32 0.015625, %v639_v7  ;;  %v700_v24 = vmul.f32 %v6371_v6, %v6371_v6 }
 0x20c   : > { %v663_v23 = vmul.f32 0.015625, %v642_v17  ;;  %v701_v33 = vmul.f32 %v6374_v26, %v6374_v26  ;;  %v6411_v17 = vrot.slane %v6399_v48, %v871_v61 }
 0x20d   : > { %v6383_v25 = vsub.f32 %v6267_v37, %v662_v22  ;;  %v752_v27 = vsel %vm582_vm0, %v700_v24, 0.0 }
 0x20e   : > { %v6386_v34 = vsub.f32 %v6270_v38, %v663_v23  ;;  %750 = vadd.xlane.f32.xlu1 %v749_v18  ;;  %753 = vadd.xlane.f32.xlu0 %v752_v27  ;;  %v755_v9 = vsel %vm582_vm0, %v701_v33, 0.0 }
 0x20f   : > { %v702_v29 = vmul.f32 %v6383_v25, %v6383_v25 }
 0x210   : > { %v703_v30 = vmul.f32 %v6386_v34, %v6386_v34 }
 0x211   : > { %v758_v31 = vsel %vm582_vm0, %v702_v29, 0.0 }
 0x212   : > { %756 = vadd.xlane.f32.xlu1 %v755_v9  ;;  %759 = vadd.xlane.f32.xlu0 %v758_v31  ;;  %v761_v37 = vsel %vm582_vm0, %v703_v30, 0.0  ;;  %v6414_v9 = vld [vmem:[#allocation13] ss:$0 sm:$0xff] }
 0x216   : > { %762 = vadd.xlane.f32.xlu1 %v761_v37 }
 0x27b   : > { %v706_v38 = vpop.xlane.xlu0 %705 }
 0x27c   : > { %v764_v32 = vmul.f32 0.015625, %v706_v38 }
 0x27e   : > { %v784_v36 = vadd.f32 1e-06, %v764_v32 }
 0x27f   : > { %v709_v39 = vpop.xlane.xlu1 %708  ;;  %v718_v11 = vpop.xlane.xlu0 %717 }
 0x280   : > { %4969 = vrsqrt.f32 %v784_v36  ;;  %v765_v41 = vmul.f32 0.015625, %v709_v39  ;;  %v768_v42 = vmul.f32 0.015625, %v718_v11 }
 0x282   : > { %v785_v44 = vadd.f32 1e-06, %v765_v41  ;;  %v788_v47 = vadd.f32 1e-06, %v768_v42 }
 0x283   : > { %v721_v49 = vpop.xlane.xlu1 %720  ;;  %v712_v15 = vpop.xlane.xlu0 %711 }
 0x284   : > { %4971 = vrsqrt.f32 %v785_v44  ;;  %v769_v51 = vmul.f32 0.015625, %v721_v49  ;;  %v766_v52 = vmul.f32 0.015625, %v712_v15 }
 0x285   : > { %4973 = vrsqrt.f32 %v788_v47 }
 0x286   : > { %v789_v57 = vadd.f32 1e-06, %v769_v51  ;;  %v786_v58 = vadd.f32 1e-06, %v766_v52 }
 0x287   : > { %v715_v59 = vpop.xlane.xlu1 %714  ;;  %v724_v19 = vpop.xlane.xlu0 %723 }
 0x288   : > { %4975 = vrsqrt.f32 %v789_v57  ;;  %v767_v62 = vmul.f32 0.015625, %v715_v59  ;;  %v770_v1 = vmul.f32 0.015625, %v724_v19 }
 0x289   : > { %4977 = vrsqrt.f32 %v786_v58 }
 0x28a   : > { %v4970_v3 = vpop.eup %4969  ;;  %v787_v4 = vadd.f32 1e-06, %v767_v62  ;;  %v790_v5 = vadd.f32 1e-06, %v770_v1 }
 0x28b   : > { %v727_v21 = vpop.xlane.xlu1 %726  ;;  %v730_v12 = vpop.xlane.xlu0 %729  ;;  %v824_v7 = vmul.f32 %v4970_v3, %v6277_v45 }
 0x28c   : > { %4979 = vrsqrt.f32 %v787_v4  ;;  %v771_v18 = vmul.f32 0.015625, %v727_v21  ;;  %v772_v22 = vmul.f32 0.015625, %v730_v12 }
 0x28d   : > { %4981 = vrsqrt.f32 %v790_v5  ;;  %v849_v23 = vmul.f32 %v6407_v2, %v824_v7 }
 0x28e   : > { %v4972_v24 = vpop.eup %4971  ;;  %v791_v33 = vadd.f32 1e-06, %v771_v18  ;;  %v792_v27 = vadd.f32 1e-06, %v772_v22 }
 0x28f   : > { %v4974_v29 = vpop.eup %4973  ;;  %v733_v30 = vpop.xlane.xlu1 %732  ;;  %v6417_v37 = vadd.f32 %v6411_v17, %v849_v23  ;;  %v825_v45 = vmul.f32 %v4972_v24, %v6287_v53 }
 0x290   : > { %v736_v31 = vpop.xlane.xlu0 %735  ;;  %4983 = vrsqrt.f32 %v791_v33  ;;  %v773_v38 = vmul.f32 0.015625, %v733_v30  ;;  %v828_v35 = vmul.f32 %v4974_v29, %v6280_v46 }
 0x291   : > { %v774_v32 = vmul.f32 0.015625, %v736_v31  ;;  %4985 = vrsqrt.f32 %v792_v27  ;;  %v900_v36 = vmul.f32 %v6414_v9, %v6417_v37  ;;  %v850_v39 = vmul.f32 %v6407_v2, %v825_v45 }
 0x292   : > { %v4976_v11 = vpop.eup %4975  ;;  %v793_v41 = vadd.f32 1e-06, %v773_v38  ;;  %v853_v44 = vmul.f32 %v6407_v2, %v828_v35 }
 0x293   : > { %v794_v42 = vadd.f32 1e-06, %v774_v32  ;;  %v4978_v47 = vpop.eup %4977  ;;  %v739_v49 = vpop.xlane.xlu1 %738  ;;  %v920_v53 = vsel %vm582_vm0, %v900_v36, 0.0  ;;  %v6427_v51 = vadd.f32 %v6411_v17, %v850_v39  ;;  %v829_v46 = vmul.f32 %v4976_v11, %v6290_v54 }
 0x294   : > { %v742_v15 = vpop.xlane.xlu0 %741  ;;  %4987 = vrsqrt.f32 %v793_v41  ;;  %v775_v52 = vmul.f32 0.015625, %v739_v49  ;;  %921 = vadd.xlane.f32.xlu0 %v920_v53  ;;  %v6431_v57 = vadd.f32 %v6411_v17, %v853_v44  ;;  %v826_v19 = vmul.f32 %v4978_v47, %v6299_v63 }
 0x295   : > { %v776_v56 = vmul.f32 0.015625, %v742_v15  ;;  %4989 = vrsqrt.f32 %v794_v42  ;;  %v901_v58 = vmul.f32 %v6414_v9, %v6427_v51  ;;  %v854_v59 = vmul.f32 %v6407_v2, %v829_v46 }
 0x296   : > { %v4980_v61 = vpop.eup %4979  ;;  %v795_v62 = vadd.f32 1e-06, %v775_v52  ;;  %v904_v54 = vmul.f32 %v6414_v9, %v6431_v57  ;;  %v851_v7 = vmul.f32 %v6407_v2, %v826_v19 }
 0x297   : > { %v796_v1 = vadd.f32 1e-06, %v776_v56  ;;  %v4982_v3 = vpop.eup %4981  ;;  %v745_v4 = vpop.xlane.xlu1 %744  ;;  %v923_v21 = vsel %vm582_vm0, %v901_v58, 0.0  ;;  %v6441_v12 = vadd.f32 %v6411_v17, %v854_v59  ;;  %v827_v18 = vmul.f32 %v4980_v61, %v6302_v0 }
 0x298   : > { %v748_v5 = vpop.xlane.xlu0 %747  ;;  %4991 = vrsqrt.f32 %v795_v62  ;;  %v777_v63 = vmul.f32 0.015625, %v745_v4  ;;  %924 = vadd.xlane.f32.xlu1 %v923_v21  ;;  %v932_v23 = vsel %vm582_vm0, %v904_v54, 0.0  ;;  %v6449_v33 = vadd.f32 %v6411_v17, %v851_v7 }
 0x299   : > { %v778_v22 = vmul.f32 0.015625, %v748_v5  ;;  %4993 = vrsqrt.f32 %v796_v1  ;;  %933 = vadd.xlane.f32.xlu0 %v932_v23  ;;  %v905_v24 = vmul.f32 %v6414_v9, %v6441_v12  ;;  %v852_v27 = vmul.f32 %v6407_v2, %v827_v18 }
 0x29a   : > { %v4984_v29 = vpop.eup %4983  ;;  %v797_v30 = vadd.f32 1e-06, %v777_v63  ;;  %v830_v0 = vmul.f32 %v4982_v3, %v6311_v13  ;;  %v902_v36 = vmul.f32 %v6414_v9, %v6449_v33 }
 0x29b   : > { %v798_v31 = vadd.f32 1e-06, %v778_v22  ;;  %v4986_v45 = vpop.eup %4985  ;;  %v751_v38 = vpop.xlane.xlu1 %750  ;;  %v935_v35 = vsel %vm582_vm0, %v905_v24, 0.0  ;;  %v6457_v39 = vadd.f32 %v6411_v17, %v852_v27  ;;  %v831_v11 = vmul.f32 %v4984_v29, %v6314_v8 }
 0x29c   : > { %v754_v32 = vpop.xlane.xlu0 %753  ;;  %4995 = vrsqrt.f32 %v797_v30  ;;  %v779_v41 = vmul.f32 0.015625, %v751_v38  ;;  %936 = vadd.xlane.f32.xlu1 %v935_v35  ;;  %v855_v44 = vmul.f32 %v6407_v2, %v830_v0  ;;  %v926_v13 = vsel %vm582_vm0, %v902_v36, 0.0 }
 0x29d   : > { %v780_v42 = vmul.f32 0.015625, %v754_v32  ;;  %4997 = vrsqrt.f32 %v798_v31  ;;  %v903_v47 = vmul.f32 %v6414_v9, %v6457_v39  ;;  %v856_v49 = vmul.f32 %v6407_v2, %v831_v11  ;;  %927 = vadd.xlane.f32.xlu0 %v926_v13 }
 0x29e   : > { %v4988_v15 = vpop.eup %4987  ;;  %v799_v53 = vadd.f32 1e-06, %v779_v41  ;;  %v6466_v8 = vadd.f32 %v6411_v17, %v855_v44  ;;  %v832_v52 = vmul.f32 %v4986_v45, %v6323_v28 }
 0x29f   : > { %v800_v46 = vadd.f32 1e-06, %v780_v42  ;;  %v4990_v56 = vpop.eup %4989  ;;  %v757_v58 = vpop.xlane.xlu1 %756  ;;  %v929_v19 = vsel %vm582_vm0, %v903_v47, 0.0  ;;  %v6471_v61 = vadd.f32 %v6411_v17, %v856_v49  ;;  %v833_v62 = vmul.f32 %v4988_v15, %v6326_v10 }
 0x2a0   : > { %v760_v59 = vpop.xlane.xlu0 %759  ;;  %4999 = vrsqrt.f32 %v799_v53  ;;  %v781_v1 = vmul.f32 0.015625, %v757_v58  ;;  %930 = vadd.xlane.f32.xlu1 %v929_v19  ;;  %v906_v3 = vmul.f32 %v6414_v9, %v6466_v8  ;;  %v857_v4 = vmul.f32 %v6407_v2, %v832_v52 }
 0x2a1   : > { %v782_v54 = vmul.f32 0.015625, %v760_v59  ;;  %5001 = vrsqrt.f32 %v800_v46  ;;  %v907_v28 = vmul.f32 %v6414_v9, %v6471_v61  ;;  %v858_v5 = vmul.f32 %v6407_v2, %v833_v62 }
 0x2a2   : > { %v4992_v21 = vpop.eup %4991  ;;  %v801_v7 = vadd.f32 1e-06, %v781_v1  ;;  %v938_v10 = vsel %vm582_vm0, %v906_v3, 0.0  ;;  %v834_v63 = vmul.f32 %v4990_v56, %v6335_v40  ;;  %v6484_v27 = vadd.f32 %v6411_v17, %v857_v4 }
 0x2a3   : > { %v802_v18 = vadd.f32 1e-06, %v782_v54  ;;  %v4994_v22 = vpop.eup %4993  ;;  %939 = vadd.xlane.f32.xlu0 %v938_v10  ;;  %v763_v23 = vpop.xlane.xlu1 %762  ;;  %v941_v24 = vsel %vm582_vm0, %v907_v28, 0.0  ;;  %v6487_v29 = vadd.f32 %v6411_v17, %v858_v5  ;;  %v835_v30 = vmul.f32 %v4992_v21, %v6338_v14 }
 0x2a4   : > { %5003 = vrsqrt.f32 %v801_v7  ;;  %v783_v31 = vmul.f32 0.015625, %v763_v23  ;;  %942 = vadd.xlane.f32.xlu1 %v941_v24  ;;  %v859_v0 = vmul.f32 %v6407_v2, %v834_v63  ;;  %v836_v40 = vmul.f32 %v4994_v22, %v6347_v50 }
 0x2a5   : > { %5005 = vrsqrt.f32 %v802_v18  ;;  %v908_v45 = vmul.f32 %v6414_v9, %v6484_v27  ;;  %v909_v38 = vmul.f32 %v6414_v9, %v6487_v29  ;;  %v860_v32 = vmul.f32 %v6407_v2, %v835_v30 }
 0x2a6   : > { %v4996_v35 = vpop.eup %4995  ;;  %v803_v36 = vadd.f32 1e-06, %v783_v31  ;;  %v6498_v14 = vadd.f32 %v6411_v17, %v859_v0  ;;  %v861_v11 = vmul.f32 %v6407_v2, %v836_v40 }
 0x2a7   : > { %v4998_v41 = vpop.eup %4997  ;;  %v944_v42 = vsel %vm582_vm0, %v908_v45, 0.0  ;;  %v947_v50 = vsel %vm582_vm0, %v909_v38, 0.0  ;;  %v6504_v44 = vadd.f32 %v6411_v17, %v860_v32  ;;  %v837_v13 = vmul.f32 %v4996_v35, %v6350_v16 }
 0x2a8   : > { %5007 = vrsqrt.f32 %v803_v36  ;;  %945 = vadd.xlane.f32.xlu0 %v944_v42  ;;  %948 = vadd.xlane.f32.xlu1 %v947_v50  ;;  %v910_v47 = vmul.f32 %v6414_v9, %v6498_v14  ;;  %v6510_v49 = vadd.f32 %v6411_v17, %v861_v11  ;;  %v838_v15 = vmul.f32 %v4998_v41, %v6359_v60 }
 0x2a9   : > { %v911_v53 = vmul.f32 %v6414_v9, %v6504_v44  ;;  %v862_v46 = vmul.f32 %v6407_v2, %v837_v13 }
 0x2aa   : > { %v5000_v52 = vpop.eup %4999  ;;  %v950_v56 = vsel %vm582_vm0, %v910_v47, 0.0  ;;  %v912_v16 = vmul.f32 %v6414_v9, %v6510_v49  ;;  %v863_v58 = vmul.f32 %v6407_v2, %v838_v15  ;;  %v6574_v47 = vld [vmem:[#allocation3] ss:$0 sm:$0xff] }
 0x2ab   : > { %v5002_v59 = vpop.eup %5001  ;;  %v953_v19 = vsel %vm582_vm0, %v911_v53, 0.0  ;;  %v6522_v62 = vadd.f32 %v6411_v17, %v862_v46  ;;  %v839_v60 = vmul.f32 %v5000_v52, %v6362_v20 }
 0x2ac   : > { %951 = vadd.xlane.f32.xlu0 %v950_v56  ;;  %954 = vadd.xlane.f32.xlu1 %v953_v19  ;;  %v6526_v1 = vadd.f32 %v6411_v17, %v863_v58  ;;  %v840_v54 = vmul.f32 %v5002_v59, %v6371_v6  ;;  %v956_v3 = vsel %vm582_vm0, %v912_v16, 0.0 }
 0x2ad   : > { %v913_v28 = vmul.f32 %v6414_v9, %v6522_v62  ;;  %v864_v4 = vmul.f32 %v6407_v2, %v839_v60 }
 0x2ae   : > { %v5004_v5 = vpop.eup %5003  ;;  %v914_v21 = vmul.f32 %v6414_v9, %v6526_v1  ;;  %v865_v20 = vmul.f32 %v6407_v2, %v840_v54 }
 0x2af   : > { %v5006_v7 = vpop.eup %5005  ;;  %v959_v18 = vsel %vm582_vm0, %v913_v28, 0.0  ;;  %v6538_v10 = vadd.f32 %v6411_v17, %v864_v4  ;;  %v841_v6 = vmul.f32 %v5004_v5, %v6374_v26 }
 0x2b0   : > { %957 = vadd.xlane.f32.xlu0 %v956_v3  ;;  %960 = vadd.xlane.f32.xlu1 %v959_v18  ;;  %v6542_v63 = vadd.f32 %v6411_v17, %v865_v20  ;;  %v842_v22 = vmul.f32 %v5006_v7, %v6383_v25  ;;  %v962_v23 = vsel %vm582_vm0, %v914_v21, 0.0 }
 0x2b1   : > { %v915_v24 = vmul.f32 %v6414_v9, %v6538_v10  ;;  %v866_v30 = vmul.f32 %v6407_v2, %v841_v6 }
 0x2b2   : > { %v5008_v31 = vpop.eup %5007  ;;  %v916_v0 = vmul.f32 %v6414_v9, %v6542_v63  ;;  %v867_v26 = vmul.f32 %v6407_v2, %v842_v22 }
 0x2b3   : > { %v965_v40 = vsel %vm582_vm0, %v915_v24, 0.0  ;;  %v6554_v45 = vadd.f32 %v6411_v17, %v866_v30  ;;  %v843_v25 = vmul.f32 %v5008_v31, %v6386_v34 }
 0x2b4   : > { %963 = vadd.xlane.f32.xlu0 %v962_v23  ;;  %966 = vadd.xlane.f32.xlu1 %v965_v40  ;;  %v6558_v38 = vadd.f32 %v6411_v17, %v867_v26  ;;  %v968_v32 = vsel %vm582_vm0, %v916_v0, 0.0 }
 0x2b5   : > { %v917_v35 = vmul.f32 %v6414_v9, %v6554_v45  ;;  %v868_v36 = vmul.f32 %v6407_v2, %v843_v25  ;;  %v5584_v2 = vmov 0  }
 0x2b6   : > { %v918_v11 = vmul.f32 %v6414_v9, %v6558_v38  ;;  %4907 = vset.pattern.permute.xlu0 %v5584_v2  ;;  %4908 = vset.pattern.permute.xlu1 %v5584_v2 }
 0x2b7   : > { %v971_v41 = vsel %vm582_vm0, %v917_v35, 0.0  ;;  %v6568_v42 = vadd.f32 %v6411_v17, %v868_v36 }
 0x2b8   : > { %969 = vadd.xlane.f32.xlu0 %v968_v32  ;;  %972 = vadd.xlane.f32.xlu1 %v971_v41  ;;  %v974_v34 = vsel %vm582_vm0, %v918_v11, 0.0 }
 0x2b9   : > { %v919_v50 = vmul.f32 %v6414_v9, %v6568_v42 }
 0x2bb   : > { %v977_v13 = vsel %vm582_vm0, %v919_v50, 0.0 }
 0x2bc   : > { %975 = vadd.xlane.f32.xlu0 %v974_v34  ;;  %978 = vadd.xlane.f32.xlu1 %v977_v13 }
 0x321   : > { %v922_v15 = vpop.xlane.xlu0 %921 }
 0x322   : > { %v987_v17 = vadd.f32 %v6574_v47, %v922_v15 }
 0x324   : > { %v4320_v53 = vmul.f32 -1.442695, %v987_v17 }
 0x325   : > { %v925_v46 = vpop.xlane.xlu1 %924 }
 0x326   : > { %5009 = vpow2.f32 %v4320_v53  ;;  %v988_v52 = vadd.f32 %v6574_v47, %v925_v46  ;;  %v934_v56 = vpop.xlane.xlu0 %933 }
 0x327   : > { %v991_v9 = vadd.f32 %v6574_v47, %v934_v56 }
 0x328   : > { %v4321_v16 = vmul.f32 -1.442695, %v988_v52 }
 0x329   : > { %v4324_v58 = vmul.f32 -1.442695, %v991_v9  ;;  %v937_v59 = vpop.xlane.xlu1 %936 }
 0x32a   : > { %5011 = vpow2.f32 %v4321_v16  ;;  %v992_v19 = vadd.f32 %v6574_v47, %v937_v59  ;;  %v928_v60 = vpop.xlane.xlu0 %927 }
 0x32b   : > { %5013 = vpow2.f32 %v4324_v58  ;;  %v989_v3 = vadd.f32 %v6574_v47, %v928_v60 }
 0x32c   : > { %v4325_v54 = vmul.f32 -1.442695, %v992_v19 }
 0x32d   : > { %v931_v28 = vpop.xlane.xlu1 %930  ;;  %v4322_v4 = vmul.f32 -1.442695, %v989_v3 }
 0x32e   : > { %5015 = vpow2.f32 %v4325_v54  ;;  %v990_v5 = vadd.f32 %v6574_v47, %v931_v28 }
 0x32f   : > { %5017 = vpow2.f32 %v4322_v4 }
 0x330   : > { %v5010_v21 = vpop.eup %5009  ;;  %v940_v20 = vpop.xlane.xlu0 %939  ;;  %v4323_v18 = vmul.f32 -1.442695, %v990_v5 }
 0x331   : > { %v1067_v7 = vadd.f32 1.0, %v5010_v21  ;;  %v993_v6 = vadd.f32 %v6574_v47, %v940_v20  ;;  %v943_v22 = vpop.xlane.xlu1 %942 }
 0x332   : > { %v994_v23 = vadd.f32 %v6574_v47, %v943_v22 }
 0x333   : > { %5019 = vrcp.f32 %v1067_v7  ;;  %v4326_v24 = vmul.f32 -1.442695, %v993_v6 }
 0x334   : > { %v5012_v30 = vpop.eup %5011  ;;  %5021 = vpow2.f32 %v4323_v18  ;;  %v4327_v25 = vmul.f32 -1.442695, %v994_v23 }
 0x335   : > { %v5014_v31 = vpop.eup %5013  ;;  %v1068_v0 = vadd.f32 1.0, %v5012_v30  ;;  %v946_v26 = vpop.xlane.xlu0 %945  ;;  %5023 = vpow2.f32 %v4326_v24 }
 0x336   : > { %v949_v40 = vpop.xlane.xlu1 %948  ;;  %v1071_v35 = vadd.f32 1.0, %v5014_v31  ;;  %v995_v50 = vadd.f32 %v6574_v47, %v946_v26 }
 0x337   : > { %v996_v32 = vadd.f32 %v6574_v47, %v949_v40  ;;  %5025 = vrcp.f32 %v1068_v0 }
 0x338   : > { %v5016_v36 = vpop.eup %5015  ;;  %5027 = vpow2.f32 %v4327_v25  ;;  %v4328_v9 = vmul.f32 -1.442695, %v995_v50 }
 0x339   : > { %v4329_v11 = vmul.f32 -1.442695, %v996_v32  ;;  %v952_v41 = vpop.xlane.xlu0 %951  ;;  %5029 = vrcp.f32 %v1071_v35  ;;  %v1072_v2 = vadd.f32 1.0, %v5016_v36  ;;  %v5018_v15 = vpop.eup %5017 }
 0x33a   : > { %v955_v34 = vpop.xlane.xlu1 %954  ;;  %v997_v17 = vadd.f32 %v6574_v47, %v952_v41  ;;  %v1069_v59 = vadd.f32 1.0, %v5018_v15 }
 0x33b   : > { %v998_v13 = vadd.f32 %v6574_v47, %v955_v34  ;;  %5031 = vpow2.f32 %v4329_v11 }
 0x33c   : > { %5033 = vrcp.f32 %v1072_v2  ;;  %v4330_v60 = vmul.f32 -1.442695, %v997_v17 }
 0x33d   : > { %v4331_v53 = vmul.f32 -1.442695, %v998_v13  ;;  %v5020_v46 = vpop.eup %5019  ;;  %v958_v52 = vpop.xlane.xlu0 %957 }
 0x33e   : > { %v961_v56 = vpop.xlane.xlu1 %960  ;;  %1135 = vperm.xlu0 %4907, %v5020_v46   ;;  %v5022_v58 = vpop.eup %5021  ;;  %v999_v21 = vadd.f32 %v6574_v47, %v958_v52 }
 0x33f   : > { %v1000_v16 = vadd.f32 %v6574_v47, %v961_v56  ;;  %v5024_v19 = vpop.eup %5023  ;;  %5035 = vpow2.f32 %v4331_v53  ;;  %v1070_v5 = vadd.f32 1.0, %v5022_v58 }
 0x340   : > { %5037 = vpow2.f32 %v4328_v9  ;;  %v1073_v7 = vadd.f32 1.0, %v5024_v19  ;;  %v4332_v31 = vmul.f32 -1.442695, %v999_v21 }
 0x341   : > { %v5026_v54 = vpop.eup %5025  ;;  %v4333_v3 = vmul.f32 -1.442695, %v1000_v16  ;;  %v964_v28 = vpop.xlane.xlu0 %963  ;;  %5039 = vrcp.f32 %v1069_v59 }
 0x342   : > { %v967_v4 = vpop.xlane.xlu1 %966  ;;  %1140 = vperm.xlu1 %4908, %v5026_v54   ;;  %v5028_v18 = vpop.eup %5027  ;;  %5041 = vpow2.f32 %v4330_v60  ;;  %v1001_v0 = vadd.f32 %v6574_v47, %v964_v28 }
 0x343   : > { %v1002_v20 = vadd.f32 %v6574_v47, %v967_v4  ;;  %v5030_v22 = vpop.eup %5029  ;;  %5043 = vpow2.f32 %v4333_v3  ;;  %v1074_v40 = vadd.f32 1.0, %v5028_v18 }
 0x344   : > { %5045 = vrcp.f32 %v1070_v5  ;;  %v4334_v34 = vmul.f32 -1.442695, %v1001_v0 }
 0x345   : > { %v4335_v6 = vmul.f32 -1.442695, %v1002_v20  ;;  %v970_v23 = vpop.xlane.xlu0 %969  ;;  %v5032_v30 = vpop.eup %5031  ;;  %5047 = vrcp.f32 %v1073_v7 }
 0x346   : > { %v973_v24 = vpop.xlane.xlu1 %972  ;;  %1155 = vperm.xlu1 %4908, %v5030_v22   ;;  %v1076_v25 = vadd.f32 1.0, %v5032_v30  ;;  %v5034_v35 = vpop.eup %5033  ;;  %v1003_v36 = vadd.f32 %v6574_v47, %v970_v23 }
 0x347   : > { %v1004_v26 = vadd.f32 %v6574_v47, %v973_v24  ;;  %5049 = vpow2.f32 %v4335_v6 }
 0x348   : > { %5051 = vrcp.f32 %v1076_v25  ;;  %v4336_v46 = vmul.f32 -1.442695, %v1003_v36 }
 0x349   : > { %v4337_v32 = vmul.f32 -1.442695, %v1004_v26  ;;  %v5036_v41 = vpop.eup %5035  ;;  %5053 = vpow2.f32 %v4332_v31  ;;  %v976_v2 = vpop.xlane.xlu0 %975 }
 0x34a   : > { %v979_v11 = vpop.xlane.xlu1 %978  ;;  %1160 = vperm.xlu1 %4908, %v5034_v35   ;;  %5055 = vrcp.f32 %v1074_v40  ;;  %v1078_v13 = vadd.f32 1.0, %v5036_v41  ;;  %v5038_v15 = vpop.eup %5037  ;;  %v1005_v56 = vadd.f32 %v6574_v47, %v976_v2  ;;  %v1275_v2 = vsub.s32 2, %v6396_v43 }
 0x34b   : > { %v1006_v50 = vadd.f32 %v6574_v47, %v979_v11  ;;  %5057 = vpow2.f32 %v4337_v32  ;;  %v5040_v53 = vpop.eup %5039  ;;  %v1075_v16 = vadd.f32 1.0, %v5038_v15  ;;  %v6598_v15 = vld [vmem:[%s6170_s13] ss:$0 sm:$0xff] }
 0x34c   : > { %5059 = vrcp.f32 %v1078_v13  ;;  %v5042_v52 = vpop.eup %5041  ;;  %v4338_v54 = vmul.f32 -1.442695, %v1005_v56 }
 0x34d   : > { %v4339_v17 = vmul.f32 -1.442695, %v1006_v50  ;;  %5061 = vpow2.f32 %v4334_v34  ;;  %v5044_v9 = vpop.eup %5043  ;;  %v1077_v28 = vadd.f32 1.0, %v5042_v52 }
 0x34e   : > { %1145 = vperm.xlu1 %4908, %v5040_v53   ;;  %v5046_v58 = vpop.eup %5045  ;;  %v1080_v59 = vadd.f32 1.0, %v5044_v9 }
 0x34f   : > { %5063 = vpow2.f32 %v4339_v17  ;;  %v5048_v19 = vpop.eup %5047 }
 0x350   : > { %5065 = vpow2.f32 %v4336_v46  ;;  %v6602_v46 = vrot.slane %v6399_v48, %v1275_v2 }
 0x351   : > { %v5050_v60 = vpop.eup %5049  ;;  %5067 = vrcp.f32 %v1080_v59  ;;  %v5129_v59 = vld [vmem:[%s6150_s29] sm:$0xff] }
 0x352   : > { %1150 = vperm.xlu1 %4908, %v5046_v58   ;;  %v5052_v3 = vpop.eup %5051  ;;  %5069 = vrcp.f32 %v1075_v16  ;;  %v1082_v4 = vadd.f32 1.0, %v5050_v60 }
 0x353   : > { %v5054_v5 = vpop.eup %5053  ;;  %1180 = vperm.xlu0 %4907, %v5052_v3  }
 0x354   : > { %v5056_v21 = vpop.eup %5055  ;;  %5071 = vrcp.f32 %v1082_v4  ;;  %v1079_v7 = vadd.f32 1.0, %v5054_v5 }
 0x355   : > { %v5058_v47 = vpop.eup %5057  ;;  %5073 = vpow2.f32 %v4338_v54 }
 0x356   : > { %1165 = vperm.xlu1 %4908, %v5048_v19   ;;  %v5060_v20 = vpop.eup %5059  ;;  %5075 = vrcp.f32 %v1077_v28  ;;  %v1084_v18 = vadd.f32 1.0, %v5058_v47  ;;  %v5130_v28 = vld [vmem:[%s6150_s29 + $0x8] sm:$0xff] }
 0x357   : > { %v5062_v6 = vpop.eup %5061  ;;  %1190 = vperm.xlu0 %4907, %v5060_v20  }
 0x358   : > { %5077 = vrcp.f32 %v1084_v18  ;;  %v1081_v30 = vadd.f32 1.0, %v5062_v6 }
 0x359   : > { %v5064_v22 = vpop.eup %5063  ;;  %5079 = vrcp.f32 %v1079_v7  ;;  %v5131_v7 = vld [vmem:[%s6142_s0 + $0x10] sm:$0xff] }
 0x35a   : > { %v1086_v23 = vadd.f32 1.0, %v5064_v22  ;;  %1170 = vperm.xlu1 %4908, %v5056_v21   ;;  %v5066_v24 = vpop.eup %5065 }
 0x35b   : > { %v5068_v31 = vpop.eup %5067  ;;  %v1083_v40 = vadd.f32 1.0, %v5066_v24 }
 0x35c   : > { %5081 = vrcp.f32 %v1086_v23  ;;  %v5070_v0 = vpop.eup %5069  ;;  %1200 = vperm.xlu0 %4907, %v5068_v31  }
 0x35d   : > { %5083 = vrcp.f32 %v1081_v30  ;;  %v5132_v30 = vld [vmem:[%s6142_s0 + $0x18] sm:$0xff] }
 0x35e   : > { %1175 = vperm.xlu1 %4908, %v5070_v0   ;;  %v5072_v26 = vpop.eup %5071  ;;  %5085 = vrcp.f32 %v1083_v40 }
 0x35f   : > { %v5074_v25 = vpop.eup %5073 }
 0x360   : > { %v5076_v32 = vpop.eup %5075  ;;  %1210 = vperm.xlu0 %4907, %v5072_v26   ;;  %v1085_v36 = vadd.f32 1.0, %v5074_v25 }
 0x362   : > { %1185 = vperm.xlu1 %4908, %v5076_v32   ;;  %v5078_v35 = vpop.eup %5077  ;;  %5087 = vrcp.f32 %v1085_v36 }
 0x363   : > { %v5080_v11 = vpop.eup %5079 }
 0x364   : > { %1220 = vperm.xlu0 %4907, %v5078_v35   ;;  %v5133_v35 = vld [vmem:[%s6142_s0] sm:$0xff] }
 0x366   : > { %v5082_v41 = vpop.eup %5081  ;;  %1195 = vperm.xlu1 %4908, %v5080_v11  }
 0x367   : > { %v5084_v34 = vpop.eup %5083 }
 0x368   : > { %1230 = vperm.xlu0 %4907, %v5082_v41   ;;  %v5086_v50 = vpop.eup %5085 }
 0x36a   : > { %1205 = vperm.xlu1 %4908, %v5084_v34  }
 0x36c   : > { %v5088_v13 = vpop.eup %5087 }
 0x36e   : > { %1215 = vperm.xlu1 %4908, %v5086_v50  }
 0x372   : > { %1225 = vperm.xlu1 %4908, %v5088_v13  }
 0x3bd   : > { %v1136_v17 = vpop.permute.xlu0 %1135 }
 0x3be   : > { %v1233_v53 = vadd.f32 %v6598_v15, %v1136_v17  ;;  %v5134_v17 = vld [vmem:[%s6142_s0 + $0x8] sm:$0xff] }
 0x3c0   : > { %v1253_v52 = vmul.f32 %v1233_v53, %v6417_v37 }
 0x3c1   : > { %v1141_v56 = vpop.permute.xlu1 %1140 }
 0x3c2   : > { %v1234_v9 = vadd.f32 %v6598_v15, %v1141_v56  ;;  %v1277_v16 = vmul.f32 %v6602_v46, %v1253_v52 }
 0x3c4   : > { %v1254_v58 = vmul.f32 %v1234_v9, %v6427_v51  ;;  %v6609_v19 = vadd.f32 %v5129_v59, %v1277_v16 }
 0x3c5   : > { %v1156_v60 = vpop.permute.xlu1 %1155 }
 0x3c6   : > { %v1237_v54 = vadd.f32 %v6598_v15, %v1156_v60  ;;  %v1317_v48 = vsel %vm582_vm0, %v6609_v19, 0.0  ;;  %v1278_v3 = vmul.f32 %v6602_v46, %v1254_v58  ;;  %v5135_v60 = vld [vmem:[%s6142_s0 + $0x20] sm:$0xff] }
 0x3c7   : > { %1318 = vadd.xlane.f32.xlu1 %v1317_v48 }
 0x3c8   : > { %v1257_v37 = vmul.f32 %v1237_v54, %v6431_v57  ;;  %v6617_v4 = vadd.f32 %v5130_v28, %v1278_v3 }
 0x3c9   : > { %v1161_v51 = vpop.permute.xlu1 %1160 }
 0x3ca   : > { %v1281_v5 = vmul.f32 %v6602_v46, %v1257_v37  ;;  %v1238_v21 = vadd.f32 %v6598_v15, %v1161_v51  ;;  %v1320_v47 = vsel %vm582_vm0, %v6617_v4, 0.0 }
 0x3cb   : > { %1321 = vadd.xlane.f32.xlu0 %v1320_v47  ;;  %v5136_v47 = vld [vmem:[%s6142_s0 + $0x28] sm:$0xff] }
 0x3cc   : > { %v1258_v20 = vmul.f32 %v1238_v21, %v6441_v12  ;;  %v6625_v18 = vadd.f32 %v5131_v7, %v1281_v5 }
 0x3cd   : > { %v1146_v57 = vpop.permute.xlu1 %1145 }
 0x3ce   : > { %8194 = vst [vmem:[#allocation45_spill] sm:$0xff] %v6625_v18  ;;  %v1282_v6 = vmul.f32 %v6602_v46, %v1258_v20  ;;  %v1235_v22 = vadd.f32 %v6598_v15, %v1146_v57  ;;  %v1329_v23 = vsel %vm582_vm0, %v6625_v18, 0.0 }
 0x3cf   : > { %1330 = vadd.xlane.f32.xlu0 %v1329_v23 }
 0x3d0   : > { %v1255_v24 = vmul.f32 %v1235_v22, %v6449_v33  ;;  %v6633_v31 = vadd.f32 %v5132_v30, %v1282_v6 }
 0x3d1   : > { %v1151_v0 = vpop.permute.xlu1 %1150 }
 0x3d2   : > { %8195 = vst [vmem:[#allocation46_spill] sm:$0xff] %v6633_v31  ;;  %v1279_v12 = vmul.f32 %v6602_v46, %v1255_v24  ;;  %v1236_v26 = vadd.f32 %v6598_v15, %v1151_v0  ;;  %v1332_v40 = vsel %vm582_vm0, %v6633_v31, 0.0  ;;  %v1181_v25 = vpop.permute.xlu0 %1180  ;;  %v5137_v24 = vld [vmem:[%s6142_s0 + $0x38] sm:$0xff] }
 0x3d3   : > { %1333 = vadd.xlane.f32.xlu1 %v1332_v40  ;;  %v1242_v41 = vadd.f32 %v6598_v15, %v1181_v25 }
 0x3d4   : > { %v1256_v32 = vmul.f32 %v1236_v26, %v6457_v39  ;;  %v6641_v36 = vadd.f32 %v5133_v35, %v1279_v12  ;;  %v5138_v26 = vld [vmem:[%s6142_s0 + $0x30] sm:$0xff] }
 0x3d5   : > { %v1166_v33 = vpop.permute.xlu1 %1165  ;;  %v1262_v56 = vmul.f32 %v1242_v41, %v6487_v29 }
 0x3d6   : > { %8196 = vst [vmem:[#allocation47_spill] sm:$0xff] %v6641_v36  ;;  %v1280_v11 = vmul.f32 %v6602_v46, %v1256_v32  ;;  %v1239_v34 = vadd.f32 %v6598_v15, %v1166_v33  ;;  %v1323_v50 = vsel %vm582_vm0, %v6641_v36, 0.0  ;;  %v1191_v13 = vpop.permute.xlu0 %1190  ;;  %v5139_v33 = vld [vmem:[%s6142_s0 + $0x48] sm:$0xff] }
 0x3d7   : > { %1324 = vadd.xlane.f32.xlu0 %v1323_v50  ;;  %v1244_v53 = vadd.f32 %v6598_v15, %v1191_v13  ;;  %v1286_v37 = vmul.f32 %v6602_v46, %v1262_v56 }
 0x3d8   : > { %v1259_v2 = vmul.f32 %v1239_v34, %v6466_v8  ;;  %v6650_v39 = vadd.f32 %v5134_v17, %v1280_v11 }
 0x3d9   : > { %v1171_v52 = vpop.permute.xlu1 %1170  ;;  %v1264_v48 = vmul.f32 %v1244_v53, %v6504_v44  ;;  %v6681_v30 = vadd.f32 %v5137_v24, %v1286_v37 }
 0x3da   : > { %8197 = vst [vmem:[#allocation48_spill] sm:$0xff] %v6650_v39  ;;  %v1283_v9 = vmul.f32 %v6602_v46, %v1259_v2  ;;  %v1240_v16 = vadd.f32 %v6598_v15, %v1171_v52  ;;  %v1326_v58 = vsel %vm582_vm0, %v6650_v39, 0.0  ;;  %v5140_v2 = vld [vmem:[%s6142_s0 + $0x40] sm:$0xff] }
 0x3db   : > { %1327 = vadd.xlane.f32.xlu1 %v1326_v58  ;;  %v1201_v8 = vpop.permute.xlu0 %1200  ;;  %v1288_v20 = vmul.f32 %v6602_v46, %v1264_v48  ;;  %8200 = vst [vmem:[#allocation51_spill] sm:$0xff] %v6681_v30  ;;  %v1344_v50 = vsel %vm582_vm0, %v6681_v30, 0.0  ;;  %v5142_v48 = vld [vmem:[%s6142_s0 + $0x50] sm:$0xff] }
 0x3dc   : > { %v1260_v59 = vmul.f32 %v1240_v16, %v6471_v61  ;;  %v6660_v54 = vadd.f32 %v5135_v60, %v1283_v9  ;;  %v1246_v3 = vadd.f32 %v6598_v15, %v1201_v8  ;;  %v5141_v16 = vld [vmem:[%s6142_s0 + $0x58] sm:$0xff] }
 0x3dd   : > { %v1176_v29 = vpop.permute.xlu1 %1175  ;;  %v6691_v11 = vadd.f32 %v5139_v33, %v1288_v20  ;;  %v5147_v33 = vld [vmem:[%s6157_s27 + $0x8] sm:$0xff] }
 0x3de   : > { %8198 = vst [vmem:[#allocation49_spill] sm:$0xff] %v6660_v54  ;;  %v1284_v28 = vmul.f32 %v6602_v46, %v1260_v59  ;;  %v1241_v51 = vadd.f32 %v6598_v15, %v1176_v29  ;;  %v1335_v5 = vsel %vm582_vm0, %v6660_v54, 0.0  ;;  %v1266_v7 = vmul.f32 %v1246_v3, %v6522_v62 }
 0x3df   : > { %1336 = vadd.xlane.f32.xlu0 %v1335_v5  ;;  %v1211_v21 = vpop.permute.xlu0 %1210  ;;  %8202 = vst [vmem:[#allocation53_spill] sm:$0xff] %v6691_v11  ;;  %v1350_v9 = vsel %vm582_vm0, %v6691_v11, 0.0 }
 0x3e0   : > { %v1261_v61 = vmul.f32 %v1241_v51, %v6484_v27  ;;  %v6671_v44 = vadd.f32 %v5136_v47, %v1284_v28  ;;  %v1248_v57 = vadd.f32 %v6598_v15, %v1211_v21  ;;  %v1290_v40 = vmul.f32 %v6602_v46, %v1266_v7  ;;  %v5143_v51 = vld [vmem:[%s6142_s0 + $0x68] sm:$0xff]  ;;  %v5144_v7 = vld [vmem:[%s6142_s0 + $0x60] sm:$0xff] }
 0x3e1   : > { %v1186_v6 = vpop.permute.xlu1 %1185 }
 0x3e2   : > { %8199 = vst [vmem:[#allocation50_spill] sm:$0xff] %v6671_v44  ;;  %v1285_v22 = vmul.f32 %v6602_v46, %v1261_v61  ;;  %v1243_v23 = vadd.f32 %v6598_v15, %v1186_v6  ;;  %v1338_v27 = vsel %vm582_vm0, %v6671_v44, 0.0  ;;  %v1268_v25 = vmul.f32 %v1248_v57, %v6538_v10 }
 0x3e3   : > { %1339 = vadd.xlane.f32.xlu1 %v1338_v27  ;;  %v1221_v12 = vpop.permute.xlu0 %1220  ;;  %v6708_v58 = vadd.f32 %v5141_v16, %v1290_v40 }
 0x3e4   : > { %v1263_v0 = vmul.f32 %v1243_v23, %v6498_v14  ;;  %v6685_v62 = vadd.f32 %v5138_v26, %v1285_v22  ;;  %v1250_v32 = vadd.f32 %v6598_v15, %v1221_v12  ;;  %v1292_v53 = vmul.f32 %v6602_v46, %v1268_v25  ;;  %v5145_v22 = vld [vmem:[%s6142_s0 + $0x78] sm:$0xff]  ;;  %v5146_v26 = vld [vmem:[%s6142_s0 + $0x70] sm:$0xff]  ;;  %s7852_s0 = scalar_lea.vmem [#allocation16], %s4311_s15  ;;  %s8274_s15 = sld [smem:[#allocation32_spill]] }
 0x3e5   : > { %v1196_v35 = vpop.permute.xlu1 %1195  ;;  %8204 = vst [vmem:[#allocation55_spill] sm:$0xff] %v6708_v58  ;;  %v1356_v28 = vsel %vm582_vm0, %v6708_v58, 0.0  ;;  %s4081_s20 = sshll.u32 %s7852_s0, 4  ;;  %s7917_s20 = int_to_ptr.vmem [resolvable:$true] %s4081_s20 }
 0x3e6   : > { %8201 = vst [vmem:[#allocation52_spill] sm:$0xff] %v6685_v62  ;;  %v1287_v41 = vmul.f32 %v6602_v46, %v1263_v0  ;;  %v1245_v14 = vadd.f32 %v6598_v15, %v1196_v35  ;;  %v1341_v34 = vsel %vm582_vm0, %v6685_v62, 0.0  ;;  %v1270_v52 = vmul.f32 %v1250_v32, %v6554_v45  ;;  %s5385_s2 = scalar_lea.vmem %s7917_s20, 2048  ;;  %p5392_p11 = scmp.lt.s32.totalorder %s7917_s20, %s5390_s5 }
 0x3e7   : > { %1342 = vadd.xlane.f32.xlu0 %v1341_v34  ;;  %1345 = vadd.xlane.f32.xlu1 %v1344_v50  ;;  %v1231_v13 = vpop.permute.xlu0 %1230  ;;  %v6723_v5 = vadd.f32 %v5143_v51, %v1292_v53  ;;  %v1660_v50 = vld [vmem:[#allocation2] sm:$0x1]  ;;  %p5386_p0 = scmp.ne.s32.totalorder %s7917_s20, %s5385_s2 }
 0x3e8   : > { %v1265_v10 = vmul.f32 %v1245_v14, %v6510_v49  ;;  %v6701_v17 = vadd.f32 %v5140_v2, %v1287_v41  ;;  %v1252_v49 = vadd.f32 %v6598_v15, %v1231_v13  ;;  %v1294_v29 = vmul.f32 %v6602_v46, %v1270_v52  ;;  %v5148_v41 = vld [vmem:[%s6157_s27] sm:$0xff]  ;;  %s8288_s27 = smov %s8287_s12 }
 0x3e9   : > { %v1206_v56 = vpop.permute.xlu1 %1205  ;;  %8206 = vst [vmem:[#allocation57_spill] sm:$0xff] %v6723_v5  ;;  %p5387_p12 = pnand %p5386_p0, %p8289_p8 }
 0x3ea   : > { %8203 = vst [vmem:[#allocation54_spill] sm:$0xff] %v6701_v17  ;;  %v1289_v59 = vmul.f32 %v6602_v46, %v1265_v10  ;;  %v1247_v8 = vadd.f32 %v6598_v15, %v1206_v56  ;;  %v1347_v60 = vsel %vm582_vm0, %v6701_v17, 0.0  ;;  %v1272_v61 = vmul.f32 %v1252_v49, %v6568_v42  ;;  %s4504_s18 = sshll.u32 %s8274_s15, 5 }
 0x3eb   : > { %1348 = vadd.xlane.f32.xlu0 %v1347_v60  ;;  %1351 = vadd.xlane.f32.xlu1 %v1350_v9  ;;  %v1362_v42 = vsel %vm582_vm0, %v6723_v5, 0.0  ;;  %v6737_v23 = vadd.f32 %v5145_v22, %v1294_v29  ;;  %v1661_v10 = vsel %vm6765_vm3, 0, %v1660_v50  ;;  %s4078_s11 = sadd.s32 %s4535_s10, %s4504_s18  ;;  %p5388_p3 = pneg %p5387_p12 }
 0x3ec   : > { %v1267_v45 = vmul.f32 %v1247_v8, %v6526_v1  ;;  %v6717_v3 = vadd.f32 %v5142_v48, %v1289_v59  ;;  %v1296_v27 = vmul.f32 %v6602_v46, %v1272_v61  ;;  %1662 = vst [vmem:[#allocation2] sm:$0x1] %v1661_v10  ;;  %s4505_s17 = sshll.u32 %s4078_s11, 7 }
 0x3ed   : > { %v1216_v37 = vpop.permute.xlu1 %1215  ;;  %8208 = vst [vmem:[#allocation59_spill] sm:$0xff] %v6737_v23  ;;  %v1368_v32 = vsel %vm582_vm0, %v6737_v23, 0.0  ;;  %s7925_s6 = scalar_lea.hbm %s8287_s12, %s4505_s17 }
 0x3ee   : > { %8205 = vst [vmem:[#allocation56_spill] sm:$0xff] %v6717_v3  ;;  %v1291_v21 = vmul.f32 %v6602_v46, %v1267_v45  ;;  %v1249_v47 = vadd.f32 %v6598_v15, %v1216_v37  ;;  %v1353_v1 = vsel %vm582_vm0, %v6717_v3, 0.0 }
 0x3ef   : > { %1354 = vadd.xlane.f32.xlu0 %v1353_v1  ;;  %1357 = vadd.xlane.f32.xlu1 %v1356_v28 }
 0x3f0   : > { %v1269_v20 = vmul.f32 %v1249_v47, %v6542_v63  ;;  %v6732_v57 = vadd.f32 %v5144_v7, %v1291_v21 }
 0x3f1   : > { %v1226_v6 = vpop.permute.xlu1 %1225 }
 0x3f2   : > { %8207 = vst [vmem:[#allocation58_spill] sm:$0xff] %v6732_v57  ;;  %v1293_v24 = vmul.f32 %v6602_v46, %v1269_v20  ;;  %v1251_v0 = vadd.f32 %v6598_v15, %v1226_v6  ;;  %v1359_v63 = vsel %vm582_vm0, %v6732_v57, 0.0  ;;  %v6754_v15 = vadd.f32 %v5147_v33, %v1296_v27 }
 0x3f3   : > { %1360 = vadd.xlane.f32.xlu0 %v1359_v63  ;;  %1363 = vadd.xlane.f32.xlu1 %v1362_v42 }
 0x3f4   : > { %v1271_v12 = vmul.f32 %v1251_v0, %v6558_v38  ;;  %v6746_v40 = vadd.f32 %v5146_v26, %v1293_v24  ;;  %v1374_v34 = vsel %vm582_vm0, %v6754_v15, 0.0 }
 0x3f6   : > { %8209 = vst [vmem:[#allocation60_spill] sm:$0xff] %v6746_v40  ;;  %v1365_v25 = vsel %vm582_vm0, %v6746_v40, 0.0  ;;  %v1295_v35 = vmul.f32 %v6602_v46, %v1271_v12 }
 0x3f7   : > { %1366 = vadd.xlane.f32.xlu0 %v1365_v25  ;;  %1369 = vadd.xlane.f32.xlu1 %v1368_v32 }
 0x3f8   : > { %v6757_v14 = vadd.f32 %v5148_v41, %v1295_v35 }
 0x3fa   : > { %v1371_v38 = vsel %vm582_vm0, %v6757_v14, 0.0 }
 0x3fb   : > { %1372 = vadd.xlane.f32.xlu0 %v1371_v38  ;;  %1375 = vadd.xlane.f32.xlu1 %v1374_v34 }
 0x454   : > { %v1319_v13 = vpop.xlane.xlu1 %1318 }
 0x455   : > { %v1377_v2 = vmul.f32 0.015625, %v1319_v13 }
 0x457   : > { %v6772_v53 = vsub.f32 %v6609_v19, %v1377_v2 }
 0x458   : > { %v1322_v52 = vpop.xlane.xlu0 %1321 }
 0x459   : > { %v1378_v56 = vmul.f32 0.015625, %v1322_v52  ;;  %v1417_v9 = vmul.f32 %v6772_v53, %v6772_v53 }
 0x45b   : > { %v6777_v16 = vsub.f32 %v6617_v4, %v1378_v56  ;;  %v1437_v59 = vsel %vm582_vm0, %v1417_v9, 0.0 }
 0x45c   : > { %1438 = vadd.xlane.f32.xlu0 %v1437_v59  ;;  %v1331_v49 = vpop.xlane.xlu0 %1330 }
 0x45d   : > { %v1381_v8 = vmul.f32 0.015625, %v1331_v49  ;;  %v1418_v60 = vmul.f32 %v6777_v16, %v6777_v16 }
 0x45f   : > { %v6783_v45 = vsub.f32 %v6625_v18, %v1381_v8  ;;  %v1440_v19 = vsel %vm582_vm0, %v1418_v60, 0.0 }
 0x460   : > { %v1334_v48 = vpop.xlane.xlu1 %1333  ;;  %1441 = vadd.xlane.f32.xlu1 %v1440_v19 }
 0x461   : > { %v1382_v29 = vmul.f32 0.015625, %v1334_v48  ;;  %v1421_v4 = vmul.f32 %v6783_v45, %v6783_v45 }
 0x463   : > { %v6789_v37 = vsub.f32 %v6633_v31, %v1382_v29  ;;  %v1449_v28 = vsel %vm582_vm0, %v1421_v4, 0.0 }
 0x464   : > { %1450 = vadd.xlane.f32.xlu0 %v1449_v28  ;;  %v1325_v51 = vpop.xlane.xlu0 %1324 }
 0x465   : > { %v1379_v61 = vmul.f32 0.015625, %v1325_v51  ;;  %v1422_v21 = vmul.f32 %v6789_v37, %v6789_v37 }
 0x467   : > { %v6795_v47 = vsub.f32 %v6641_v36, %v1379_v61  ;;  %v1452_v1 = vsel %vm582_vm0, %v1422_v21, 0.0 }
 0x468   : > { %v1328_v20 = vpop.xlane.xlu1 %1327  ;;  %1453 = vadd.xlane.f32.xlu1 %v1452_v1 }
 0x469   : > { %v1380_v7 = vmul.f32 0.015625, %v1328_v20  ;;  %v1419_v6 = vmul.f32 %v6795_v47, %v6795_v47 }
 0x46b   : > { %v6801_v42 = vsub.f32 %v6650_v39, %v1380_v7  ;;  %v1443_v22 = vsel %vm582_vm0, %v1419_v6, 0.0 }
 0x46c   : > { %1444 = vadd.xlane.f32.xlu0 %v1443_v22  ;;  %v1337_v27 = vpop.xlane.xlu0 %1336 }
 0x46d   : > { %v1383_v24 = vmul.f32 0.015625, %v1337_v27  ;;  %v1420_v0 = vmul.f32 %v6801_v42, %v6801_v42 }
 0x46f   : > { %v6807_v63 = vsub.f32 %v6660_v54, %v1383_v24  ;;  %v1446_v12 = vsel %vm582_vm0, %v1420_v0, 0.0 }
 0x470   : > { %v1340_v26 = vpop.xlane.xlu1 %1339  ;;  %1447 = vadd.xlane.f32.xlu1 %v1446_v12 }
 0x471   : > { %v1384_v25 = vmul.f32 0.015625, %v1340_v26  ;;  %v1423_v32 = vmul.f32 %v6807_v63, %v6807_v63 }
 0x473   : > { %v6813_v35 = vsub.f32 %v6671_v44, %v1384_v25  ;;  %v1455_v33 = vsel %vm582_vm0, %v1423_v32, 0.0 }
 0x474   : > { %v1346_v41 = vpop.xlane.xlu1 %1345  ;;  %1456 = vadd.xlane.f32.xlu0 %v1455_v33  ;;  %v1343_v38 = vpop.xlane.xlu0 %1342 }
 0x475   : > { %v1386_v34 = vmul.f32 0.015625, %v1346_v41  ;;  %v1385_v50 = vmul.f32 0.015625, %v1343_v38  ;;  %v1424_v10 = vmul.f32 %v6813_v35, %v6813_v35 }
 0x477   : > { %v6819_v13 = vsub.f32 %v6681_v30, %v1386_v34  ;;  %v6822_v2 = vsub.f32 %v6685_v62, %v1385_v50  ;;  %v1458_v52 = vsel %vm582_vm0, %v1424_v10, 0.0 }
 0x478   : > { %v1352_v56 = vpop.xlane.xlu1 %1351  ;;  %1459 = vadd.xlane.f32.xlu1 %v1458_v52  ;;  %v1349_v9 = vpop.xlane.xlu0 %1348 }
 0x479   : > { %v1388_v59 = vmul.f32 0.015625, %v1352_v56  ;;  %v1387_v49 = vmul.f32 0.015625, %v1349_v9  ;;  %v1426_v8 = vmul.f32 %v6819_v13, %v6819_v13  ;;  %v1425_v60 = vmul.f32 %v6822_v2, %v6822_v2 }
 0x47b   : > { %v6830_v19 = vsub.f32 %v6691_v11, %v1388_v59  ;;  %v6833_v48 = vsub.f32 %v6701_v17, %v1387_v49  ;;  %v1464_v29 = vsel %vm582_vm0, %v1426_v8, 0.0  ;;  %v1461_v4 = vsel %vm582_vm0, %v1425_v60, 0.0 }
 0x47c   : > { %v1358_v28 = vpop.xlane.xlu1 %1357  ;;  %1465 = vadd.xlane.f32.xlu1 %v1464_v29  ;;  %1462 = vadd.xlane.f32.xlu0 %v1461_v4  ;;  %v1355_v51 = vpop.xlane.xlu0 %1354  ;;  %v1579_v4 = vsub.s32 4, %v6396_v43 }
 0x47d   : > { %v1390_v61 = vmul.f32 0.015625, %v1358_v28  ;;  %v1389_v21 = vmul.f32 0.015625, %v1355_v51  ;;  %v1428_v1 = vmul.f32 %v6830_v19, %v6830_v19  ;;  %v1427_v20 = vmul.f32 %v6833_v48, %v6833_v48 }
 0x47f   : > { %v6842_v7 = vsub.f32 %v6708_v58, %v1390_v61  ;;  %v6845_v6 = vsub.f32 %v6717_v3, %v1389_v21  ;;  %v1470_v22 = vsel %vm582_vm0, %v1428_v1, 0.0  ;;  %v1467_v27 = vsel %vm582_vm0, %v1427_v20, 0.0  ;;  %v1692_v61 = vld [vmem:[#allocation2 + $0x8] sm:$0x1] }
 0x480   : > { %v1364_v24 = vpop.xlane.xlu1 %1363  ;;  %1471 = vadd.xlane.f32.xlu1 %v1470_v22  ;;  %1468 = vadd.xlane.f32.xlu0 %v1467_v27  ;;  %v1361_v0 = vpop.xlane.xlu0 %1360  ;;  %v1693_v27 = vsel %vm6875_vm5, 0, %v1692_v61  ;;  %v1704_v61 = vld [vmem:[#allocation2 + $0x38] sm:$0x1] }
 0x481   : > { %v1392_v12 = vmul.f32 0.015625, %v1364_v24  ;;  %v1391_v26 = vmul.f32 0.015625, %v1361_v0  ;;  %v1430_v25 = vmul.f32 %v6842_v7, %v6842_v7  ;;  %v1429_v32 = vmul.f32 %v6845_v6, %v6845_v6  ;;  %1694 = vst [vmem:[#allocation2 + $0x8] sm:$0x1] %v1693_v27  ;;  %v1675_v27 = vld [vmem:[#allocation2 + $0x3c] sm:$0x1] }
 0x483   : > { %v6854_v33 = vsub.f32 %v6723_v5, %v1392_v12  ;;  %v6857_v41 = vsub.f32 %v6732_v57, %v1391_v26  ;;  %v1476_v38 = vsel %vm582_vm0, %v1430_v25, 0.0  ;;  %v1473_v34 = vsel %vm582_vm0, %v1429_v32, 0.0  ;;  %v1666_v25 = vld [vmem:[#allocation2 + $0x18] sm:$0x1] }
 0x484   : > { %v1370_v50 = vpop.xlane.xlu1 %1369  ;;  %1477 = vadd.xlane.f32.xlu1 %v1476_v38  ;;  %1474 = vadd.xlane.f32.xlu0 %v1473_v34  ;;  %v1367_v10 = vpop.xlane.xlu0 %1366  ;;  %v1667_v32 = vsel %vm6765_vm3, 0, %v1666_v25  ;;  %v1710_v25 = vld [vmem:[#allocation2 + $0x50] sm:$0x1] }
 0x485   : > { %v1394_v52 = vmul.f32 0.015625, %v1370_v50  ;;  %v1393_v56 = vmul.f32 0.015625, %v1367_v10  ;;  %v1432_v9 = vmul.f32 %v6854_v33, %v6854_v33  ;;  %v1431_v59 = vmul.f32 %v6857_v41, %v6857_v41  ;;  %1668 = vst [vmem:[#allocation2 + $0x18] sm:$0x1] %v1667_v32  ;;  %v1698_v50 = vld [vmem:[#allocation2 + $0x20] sm:$0x1] }
 0x486   : > { %v1699_v10 = vsel %vm6875_vm5, 0, %v1698_v50  ;;  %v1678_v32 = vld [vmem:[#allocation2 + $0x48] sm:$0x1]  ;;  %v1681_v50 = vld [vmem:[#allocation2 + $0x54] sm:$0x1] }
 0x487   : > { %v6866_v49 = vsub.f32 %v6737_v23, %v1394_v52  ;;  %v6869_v8 = vsub.f32 %v6746_v40, %v1393_v56  ;;  %v1482_v60 = vsel %vm582_vm0, %v1432_v9, 0.0  ;;  %v1479_v29 = vsel %vm582_vm0, %v1431_v59, 0.0  ;;  %1700 = vst [vmem:[#allocation2 + $0x20] sm:$0x1] %v1699_v10  ;;  %v1663_v52 = vld [vmem:[#allocation2 + $0xc] sm:$0x1] }
 0x488   : > { %v1376_v28 = vpop.xlane.xlu1 %1375  ;;  %1483 = vadd.xlane.f32.xlu1 %v1482_v60  ;;  %1480 = vadd.xlane.f32.xlu0 %v1479_v29  ;;  %v1373_v51 = vpop.xlane.xlu0 %1372  ;;  %v1664_v56 = vsel %vm6765_vm3, 0, %v1663_v52  ;;  %v1695_v9 = vld [vmem:[#allocation2 + $0x14] sm:$0x1]  ;;  %v1669_v60 = vld [vmem:[#allocation2 + $0x24] sm:$0x1]  ;;  %v1682_v10 = vsel %vm6765_vm3, 0, %v1681_v50 }
 0x489   : > { %v1396_v21 = vmul.f32 0.015625, %v1376_v28  ;;  %v1395_v1 = vmul.f32 0.015625, %v1373_v51  ;;  %v1434_v20 = vmul.f32 %v6866_v49, %v6866_v49  ;;  %v1433_v22 = vmul.f32 %v6869_v8, %v6869_v8  ;;  %1665 = vst [vmem:[#allocation2 + $0xc] sm:$0x1] %v1664_v56  ;;  %v1701_v28 = vld [vmem:[#allocation2 + $0x2c] sm:$0x1] }
 0x48a   : > { %v1696_v59 = vsel %vm6875_vm5, 0, %v1695_v9  ;;  %v1670_v29 = vsel %vm6765_vm3, 0, %v1669_v60  ;;  %v1702_v51 = vsel %vm6875_vm5, 0, %v1701_v28  ;;  %1683 = vst [vmem:[#allocation2 + $0x54] sm:$0x1] %v1682_v10 }
 0x48b   : > { %v6886_v24 = vsub.f32 %v6754_v15, %v1396_v21  ;;  %v6889_v0 = vsub.f32 %v6757_v14, %v1395_v1  ;;  %v1488_v12 = vsel %vm582_vm0, %v1434_v20, 0.0  ;;  %v1485_v26 = vsel %vm582_vm0, %v1433_v22, 0.0  ;;  %1697 = vst [vmem:[#allocation2 + $0x14] sm:$0x1] %v1696_v59  ;;  %1671 = vst [vmem:[#allocation2 + $0x24] sm:$0x1] %v1670_v29 }
 0x48c   : > { %1489 = vadd.xlane.f32.xlu1 %v1488_v12  ;;  %1486 = vadd.xlane.f32.xlu0 %v1485_v26  ;;  %1703 = vst [vmem:[#allocation2 + $0x2c] sm:$0x1] %v1702_v51  ;;  %v1672_v21 = vld [vmem:[#allocation2 + $0x30] sm:$0x1]  ;;  %v1705_v1 = vsel %vm6875_vm5, 0, %v1704_v61  ;;  %v1676_v26 = vsel %vm6765_vm3, 0, %v1675_v27 }
 0x48d   : > { %v1436_v38 = vmul.f32 %v6886_v24, %v6886_v24  ;;  %v1435_v15 = vmul.f32 %v6889_v0, %v6889_v0  ;;  %v1673_v20 = vsel %vm6765_vm3, 0, %v1672_v21  ;;  %1706 = vst [vmem:[#allocation2 + $0x38] sm:$0x1] %v1705_v1  ;;  %v1707_v22 = vld [vmem:[#allocation2 + $0x44] sm:$0x1] }
 0x48e   : > { %1674 = vst [vmem:[#allocation2 + $0x30] sm:$0x1] %v1673_v20  ;;  %v1708_v12 = vsel %vm6875_vm5, 0, %v1707_v22  ;;  %1677 = vst [vmem:[#allocation2 + $0x3c] sm:$0x1] %v1676_v26 }
 0x48f   : > { %v1494_v14 = vsel %vm582_vm0, %v1436_v38, 0.0  ;;  %v1491_v34 = vsel %vm582_vm0, %v1435_v15, 0.0  ;;  %1709 = vst [vmem:[#allocation2 + $0x44] sm:$0x1] %v1708_v12  ;;  %v1711_v38 = vsel %vm6875_vm5, 0, %v1710_v25  ;;  %v1679_v15 = vsel %vm6765_vm3, 0, %v1678_v32 }
 0x490   : > { %1495 = vadd.xlane.f32.xlu1 %v1494_v14  ;;  %1492 = vadd.xlane.f32.xlu0 %v1491_v34  ;;  %1712 = vst [vmem:[#allocation2 + $0x50] sm:$0x1] %v1711_v38  ;;  %1680 = vst [vmem:[#allocation2 + $0x48] sm:$0x1] %v1679_v15  ;;  %v1713_v14 = vld [vmem:[#allocation2 + $0x5c] sm:$0x1] }
 0x491   : > { %v1714_v34 = vsel %vm6875_vm5, 0, %v1713_v14  ;;  %v1716_v52 = vld [vmem:[#allocation2 + $0x68] sm:$0x1]  ;;  %v1684_v9 = vld [vmem:[#allocation2 + $0x60] sm:$0x1]  ;;  %v1603_v32 = vsub.s32 3, %v6396_v43  ;;  %v6939_v14 = vrot.slane %v6402_v55, %v1579_v4 }
 0x492   : > { %1715 = vst [vmem:[#allocation2 + $0x5c] sm:$0x1] %v1714_v34  ;;  %v1717_v56 = vsel %vm6875_vm5, 0, %v1716_v52  ;;  %v1685_v59 = vsel %vm6765_vm3, 0, %v1684_v9  ;;  %v1719_v60 = vld [vmem:[#allocation2 + $0x74] sm:$0x1] }
 0x493   : > { %1718 = vst [vmem:[#allocation2 + $0x68] sm:$0x1] %v1717_v56  ;;  %1686 = vst [vmem:[#allocation2 + $0x60] sm:$0x1] %v1685_v59  ;;  %v1720_v29 = vsel %vm6875_vm5, 0, %v1719_v60  ;;  %v1627_v56 = vstv %s1626_s8 }
 0x494   : > { %v1687_v28 = vld [vmem:[#allocation2 + $0x6c] sm:$0x1]  ;;  %1721 = vst [vmem:[#allocation2 + $0x74] sm:$0x1] %v1720_v29  ;;  %v5149_v10 = vld [vmem:[%s6164_s25] sm:$0x3f] }
 0x495   : > { %v1688_v51 = vsel %vm6765_vm3, 0, %v1687_v28  ;;  %v6942_v52 = vrot.slane %v5149_v10, %v1603_v32  ;;  %vm6946_vm6 = vcmp.eq.s32.totalorder %v1627_v56, 1 }
 0x496   : > { %1689 = vst [vmem:[#allocation2 + $0x6c] sm:$0x1] %v1688_v51 }
 0x4e9   : > { %v1439_v61 = vpop.xlane.xlu0 %1438 }
 0x4ea   : > { %v1497_v21 = vmul.f32 0.015625, %v1439_v61 }
 0x4ec   : > { %v1517_v1 = vadd.f32 1e-06, %v1497_v21 }
 0x4ed   : > { %v1442_v20 = vpop.xlane.xlu1 %1441 }
 0x4ee   : > { %5089 = vrsqrt.f32 %v1517_v1  ;;  %v1498_v22 = vmul.f32 0.015625, %v1442_v20 }
 0x4f0   : > { %v1518_v27 = vadd.f32 1e-06, %v1498_v22 }
 0x4f1   : > { %v1451_v12 = vpop.xlane.xlu0 %1450 }
 0x4f2   : > { %5091 = vrsqrt.f32 %v1518_v27  ;;  %v1501_v26 = vmul.f32 0.015625, %v1451_v12 }
 0x4f4   : > { %v1521_v25 = vadd.f32 1e-06, %v1501_v26 }
 0x4f5   : > { %v1454_v38 = vpop.xlane.xlu1 %1453 }
 0x4f6   : > { %5093 = vrsqrt.f32 %v1521_v25  ;;  %v1502_v15 = vmul.f32 0.015625, %v1454_v38 }
 0x4f8   : > { %v5090_v34 = vpop.eup %5089  ;;  %v1522_v50 = vadd.f32 1e-06, %v1502_v15 }
 0x4f9   : > { %v1557_v9 = vmul.f32 %v5090_v34, %v6772_v53  ;;  %v1445_v59 = vpop.xlane.xlu0 %1444 }
 0x4fa   : > { %5095 = vrsqrt.f32 %v1522_v50  ;;  %v1499_v60 = vmul.f32 0.015625, %v1445_v59 }
 0x4fb   : > { %v1581_v29 = vmul.f32 %v6939_v14, %v1557_v9 }
 0x4fc   : > { %v5092_v28 = vpop.eup %5091  ;;  %v1519_v55 = vadd.f32 1e-06, %v1499_v60 }
 0x4fd   : > { %v1605_v61 = vadd.f32 %v6942_v52, %v1581_v29  ;;  %v1558_v21 = vmul.f32 %v5092_v28, %v6777_v16  ;;  %v1448_v1 = vpop.xlane.xlu1 %1447 }
 0x4fe   : > { %5097 = vrsqrt.f32 %v1519_v55  ;;  %v1500_v20 = vmul.f32 0.015625, %v1448_v1 }
 0x4ff   : > { %v1637_v53 = vsel %vm6946_vm6, %v1605_v61, 0.0  ;;  %v1582_v22 = vmul.f32 %v6939_v14, %v1558_v21 }
 0x500   : > { %v5094_v27 = vpop.eup %5093  ;;  %v4515_v12 = vpack.c.bf16 %v1637_v53, %v1637_v53  ;;  %v1520_v26 = vadd.f32 1e-06, %v1500_v20 }
 0x501   : > { %v1606_v4 = vadd.f32 %v6942_v52, %v1582_v22  ;;  %v1561_v25 = vmul.f32 %v5094_v27, %v6783_v45  ;;  %v1457_v32 = vpop.xlane.xlu0 %1456  ;;  %v1986_v45 = vld [vmem:[#allocation2] sm:$0xf] }
 0x502   : > { %v1785_v38 = vshrl.u32 %v4515_v12, 16  ;;  %5099 = vrsqrt.f32 %v1520_v26  ;;  %v1503_v16 = vmul.f32 0.015625, %v1457_v32  ;;  %v1788_v56 = vshll.u32 %v4515_v12, 16 }
 0x503   : > { %v1638_v15 = vsel %vm6946_vm6, %v1606_v4, 0.0  ;;  %v1585_v34 = vmul.f32 %v6939_v14, %v1561_v25  ;;  %v1991_v4 = vld [vmem:[#allocation2 + $0x8] sm:$0x1] }
 0x504   : > { %v5096_v50 = vpop.eup %5095  ;;  %v1787_v10 = vrot.slane %v1785_v38, 7  ;;  %v4516_v9 = vpack.c.bf16 %v1638_v15, %v1638_v15  ;;  %v1523_v59 = vadd.f32 1e-06, %v1503_v16 }
 0x505   : > { %v1609_v29 = vadd.f32 %v6942_v52, %v1585_v34  ;;  %v1562_v28 = vmul.f32 %v5096_v50, %v6789_v37  ;;  %v1460_v51 = vpop.xlane.xlu1 %1459 }
 0x506   : > { %v1790_v55 = vor.u32 %v1788_v56, %v1787_v10  ;;  %v1793_v61 = vshrl.u32 %v4516_v9, 16  ;;  %5101 = vrsqrt.f32 %v1523_v59  ;;  %v1504_v20 = vmul.f32 0.015625, %v1460_v51 }
 0x507   : > { %v4519_v21 = vpack.c.bf16 %v1609_v29, %v1609_v29  ;;  %v1586_v1 = vmul.f32 %v6939_v14, %v1562_v28  ;;  %v1791_v22 = vrot.slane %v1787_v10, 4  ;;  %v1796_v26 = vshll.u32 %v4516_v9, 16 }
 0x508   : > { %v5098_v53 = vpop.eup %5097  ;;  %v1987_v27 = vsel %vm6962_vm8, %v1790_v55, %v1986_v45  ;;  %v1795_v12 = vrot.slane %v1793_v61, 7  ;;  %v1524_v56 = vadd.f32 1e-06, %v1504_v20 }
 0x509   : > { %1988 = vst [vmem:[#allocation2] sm:$0xf] %v1987_v27  ;;  %v1819_v25 = vshrl.u32 %v4519_v21, 16  ;;  %v1822_v32 = vshll.u32 %v4519_v21, 16  ;;  %v1610_v38 = vadd.f32 %v6942_v52, %v1586_v1  ;;  %v1559_v16 = vmul.f32 %v5098_v53, %v6795_v47  ;;  %v1466_v15 = vpop.xlane.xlu1 %1465  ;;  %v1463_v34 = vpop.xlane.xlu0 %1462  ;;  %v2001_v21 = vld [vmem:[#allocation2 + $0x18] sm:$0xf] }
 0x50a   : > { %v1798_v50 = vor.u32 %v1796_v26, %v1795_v12  ;;  %v1800_v10 = vrot.slane %v1795_v12, 4  ;;  %v1506_v59 = vmul.f32 0.015625, %v1466_v15  ;;  %v1505_v28 = vmul.f32 0.015625, %v1463_v34 }
 0x50b   : > { %v1821_v9 = vrot.slane %v1819_v25, 7  ;;  %v4520_v45 = vpack.c.bf16 %v1610_v38, %v1610_v38  ;;  %v1583_v29 = vmul.f32 %v6939_v14, %v1559_v16  ;;  %5103 = vrsqrt.f32 %v1524_v56 }
 0x50c   : > { %v5100_v51 = vpop.eup %5099  ;;  %v1799_v55 = vsel %vm6972_vm10, %v1791_v22, %v1798_v50  ;;  %v1992_v61 = vsel %vm6765_vm3, %v1800_v10, %v1991_v4  ;;  %v1526_v47 = vadd.f32 1e-06, %v1506_v59  ;;  %v1525_v22 = vadd.f32 1e-06, %v1505_v28  ;;  %v2005_v50 = vld [vmem:[#allocation2 + $0x20] sm:$0x1] }
 0x50d   : > { %1990 = vst.msk [vmem:[#allocation2 + $0x4] sm:$0xf] %vm1984_vm7, %v1799_v55  ;;  %1993 = vst [vmem:[#allocation2 + $0x8] sm:$0x1] %v1992_v61  ;;  %v1824_v1 = vor.u32 %v1822_v32, %v1821_v9  ;;  %v1827_v20 = vshrl.u32 %v4520_v45, 16  ;;  %v1830_v53 = vshll.u32 %v4520_v45, 16  ;;  %v1472_v27 = vpop.xlane.xlu1 %1471  ;;  %v1469_v12 = vpop.xlane.xlu0 %1468  ;;  %v1607_v26 = vadd.f32 %v6942_v52, %v1583_v29 }
 0x50e   : > { %v1560_v25 = vmul.f32 %v5100_v51, %v6801_v42  ;;  %5105 = vrsqrt.f32 %v1526_v47  ;;  %v1508_v16 = vmul.f32 0.015625, %v1472_v27  ;;  %v1507_v15 = vmul.f32 0.015625, %v1469_v12 }
 0x50f   : > { %v2002_v4 = vsel %vm6962_vm8, %v1824_v1, %v2001_v21  ;;  %v1829_v38 = vrot.slane %v1827_v20, 7  ;;  %v1825_v34 = vrot.slane %v1821_v9, 4  ;;  %v4517_v32 = vpack.c.bf16 %v1607_v26, %v1607_v26  ;;  %v1994_v26 = vld [vmem:[#allocation2 + $0xc] sm:$0xf] }
 0x510   : > { %2003 = vst [vmem:[#allocation2 + $0x18] sm:$0xf] %v2002_v4  ;;  %v1584_v10 = vmul.f32 %v6939_v14, %v1560_v25  ;;  %5107 = vrsqrt.f32 %v1525_v22  ;;  %v5102_v56 = vpop.eup %5101  ;;  %v1528_v29 = vadd.f32 1e-06, %v1508_v16  ;;  %v1527_v42 = vadd.f32 1e-06, %v1507_v15 }
 0x511   : > { %v1832_v59 = vor.u32 %v1830_v53, %v1829_v38  ;;  %v1834_v45 = vrot.slane %v1829_v38, 4  ;;  %v1478_v51 = vpop.xlane.xlu1 %1477  ;;  %v1475_v28 = vpop.xlane.xlu0 %1474  ;;  %v1802_v55 = vshrl.u32 %v4517_v32, 16  ;;  %v1805_v61 = vshll.u32 %v4517_v32, 16 }
 0x512   : > { %v1608_v21 = vadd.f32 %v6942_v52, %v1584_v10  ;;  %v1563_v47 = vmul.f32 %v5102_v56, %v6807_v63  ;;  %5109 = vrsqrt.f32 %v1528_v29  ;;  %v1510_v20 = vmul.f32 0.015625, %v1478_v51 }
 0x513   : > { %v1833_v9 = vsel %vm6972_vm10, %v1825_v34, %v1832_v59  ;;  %v2006_v1 = vsel %vm6765_vm3, %v1834_v45, %v2005_v50  ;;  %v1804_v53 = vrot.slane %v1802_v55, 7  ;;  %5111 = vrsqrt.f32 %v1527_v42 }
 0x514   : > { %2004 = vst.msk [vmem:[#allocation2 + $0x1c] sm:$0xf] %vm1984_vm7, %v1833_v9  ;;  %2007 = vst [vmem:[#allocation2 + $0x20] sm:$0x1] %v2006_v1  ;;  %v4518_v27 = vpack.c.bf16 %v1608_v21, %v1608_v21  ;;  %v1587_v12 = vmul.f32 %v6939_v14, %v1563_v47  ;;  %v1530_v25 = vadd.f32 1e-06, %v1510_v20 }
 0x515   : > { %v1509_v22 = vmul.f32 0.015625, %v1475_v28  ;;  %v1484_v63 = vpop.xlane.xlu1 %1483  ;;  %v1481_v4 = vpop.xlane.xlu0 %1480  ;;  %v1807_v16 = vor.u32 %v1805_v61, %v1804_v53  ;;  %v1808_v15 = vrot.slane %v1804_v53, 4  ;;  %v1998_v28 = vld [vmem:[#allocation2 + $0x14] sm:$0x1] }
 0x516   : > { %v5104_v38 = vpop.eup %5103  ;;  %v1810_v34 = vshrl.u32 %v4518_v27, 16  ;;  %v1813_v50 = vshll.u32 %v4518_v27, 16  ;;  %v1611_v32 = vadd.f32 %v6942_v52, %v1587_v12  ;;  %5113 = vrsqrt.f32 %v1530_v25 }
 0x517   : > { %v1564_v10 = vmul.f32 %v5104_v38, %v6813_v35  ;;  %v1529_v56 = vadd.f32 1e-06, %v1509_v22  ;;  %v1995_v45 = vsel %vm6962_vm8, %v1807_v16, %v1994_v26  ;;  %v1512_v42 = vmul.f32 0.015625, %v1484_v63 }
 0x518   : > { %v5106_v59 = vpop.eup %5105  ;;  %v1812_v29 = vrot.slane %v1810_v34, 7  ;;  %v1511_v51 = vmul.f32 0.015625, %v1481_v4  ;;  %1996 = vst [vmem:[#allocation2 + $0xc] sm:$0xf] %v1995_v45  ;;  %v4521_v55 = vpack.c.bf16 %v1611_v32, %v1611_v32 }
 0x519   : > { %v1588_v61 = vmul.f32 %v6939_v14, %v1564_v10  ;;  %v1566_v21 = vmul.f32 %v5106_v59, %v6819_v13  ;;  %5115 = vrsqrt.f32 %v1529_v56  ;;  %v1532_v1 = vadd.f32 1e-06, %v1512_v42  ;;  %v1490_v25 = vpop.xlane.xlu1 %1489  ;;  %v1487_v22 = vpop.xlane.xlu0 %1486  ;;  %v2008_v10 = vld [vmem:[#allocation2 + $0x24] sm:$0xf] }
 0x51a   : > { %v5108_v47 = vpop.eup %5107  ;;  %v1815_v9 = vor.u32 %v1813_v50, %v1812_v29  ;;  %v1817_v35 = vrot.slane %v1812_v29, 4  ;;  %v1531_v20 = vadd.f32 1e-06, %v1511_v51  ;;  %v1836_v53 = vshrl.u32 %v4521_v55, 16 }
 0x51b   : > { %v1839_v27 = vshll.u32 %v4521_v55, 16  ;;  %v1612_v12 = vadd.f32 %v6942_v52, %v1588_v61  ;;  %v1590_v26 = vmul.f32 %v6939_v14, %v1566_v21  ;;  %v1565_v4 = vmul.f32 %v5108_v47, %v6822_v2 }
 0x51c   : > { %v1816_v63 = vsel %vm6972_vm10, %v1808_v15, %v1815_v9  ;;  %v1999_v13 = vsel %vm6765_vm3, %v1817_v35, %v1998_v28  ;;  %5117 = vrsqrt.f32 %v1532_v1  ;;  %v5110_v38 = vpop.eup %5109  ;;  %v1838_v16 = vrot.slane %v1836_v53, 7 }
 0x51d   : > { %1997 = vst.msk [vmem:[#allocation2 + $0x10] sm:$0xf] %vm1984_vm7, %v1816_v63  ;;  %2000 = vst [vmem:[#allocation2 + $0x14] sm:$0x1] %v1999_v13  ;;  %v4522_v34 = vpack.c.bf16 %v1612_v12, %v1612_v12  ;;  %v1614_v50 = vadd.f32 %v6942_v52, %v1590_v26  ;;  %5119 = vrsqrt.f32 %v1531_v20  ;;  %v5112_v32 = vpop.eup %5111  ;;  %v1589_v56 = vmul.f32 %v6939_v14, %v1565_v4  ;;  %v2012_v20 = vld [vmem:[#allocation2 + $0x2c] sm:$0x1] }
 0x51e   : > { %v1568_v15 = vmul.f32 %v5110_v38, %v6830_v19  ;;  %v1514_v59 = vmul.f32 0.015625, %v1490_v25  ;;  %v1513_v45 = vmul.f32 0.015625, %v1487_v22  ;;  %v1841_v29 = vor.u32 %v1839_v27, %v1838_v16 }
 0x51f   : > { %v1842_v2 = vrot.slane %v1838_v16, 4  ;;  %v1844_v42 = vshrl.u32 %v4522_v34, 16  ;;  %v1847_v51 = vshll.u32 %v4522_v34, 16  ;;  %v4524_v28 = vpack.c.bf16 %v1614_v50, %v1614_v50 }
 0x520   : > { %v1613_v55 = vadd.f32 %v6942_v52, %v1589_v56  ;;  %v1592_v61 = vmul.f32 %v6939_v14, %v1568_v15  ;;  %v1567_v21 = vmul.f32 %v5112_v32, %v6833_v48  ;;  %v5114_v47 = vpop.eup %5113  ;;  %v2009_v9 = vsel %vm6962_vm8, %v1841_v29, %v2008_v10  ;;  %v2019_v10 = vld [vmem:[#allocation2 + $0x38] sm:$0x1]  ;;  %v2015_v29 = vld [vmem:[#allocation2 + $0x30] sm:$0xf] }
 0x521   : > { %v1846_v35 = vrot.slane %v1844_v42, 7  ;;  %v7019_v1 = vadd.f32 1e-06, %v1514_v59  ;;  %v7021_v19 = vadd.f32 1e-06, %v1513_v45  ;;  %v1861_v53 = vshrl.u32 %v4524_v28, 16 }
 0x522   : > { %2010 = vst [vmem:[#allocation2 + $0x24] sm:$0xf] %v2009_v9  ;;  %v1864_v27 = vshll.u32 %v4524_v28, 16  ;;  %v4523_v12 = vpack.c.bf16 %v1613_v55, %v1613_v55  ;;  %v1616_v26 = vadd.f32 %v6942_v52, %v1592_v61  ;;  %v1591_v48 = vmul.f32 %v6939_v14, %v1567_v21  ;;  %v4918_v9 = vld [vmem:[#allocation15 + $0xc0] sm:$0xff]  }
 0x523   : > { %v5116_v25 = vpop.eup %5115  ;;  %v1849_v22 = vor.u32 %v1847_v51, %v1846_v35  ;;  %v1851_v63 = vrot.slane %v1846_v35, 4  ;;  %v1570_v13 = vmul.f32 %v5114_v47, %v6842_v7  ;;  %v1863_v4 = vrot.slane %v1861_v53, 7  ;;  %v4917_v47 = vld [vmem:[#allocation15 + $0x40] sm:$0xff]   ;;  %4600 = vmatprep.subr.bf16.mxu1 %v4918_v9 }
 0x524   : > { %v1853_v38 = vshrl.u32 %v4523_v12, 16  ;;  %v1856_v16 = vshll.u32 %v4523_v12, 16  ;;  %v4526_v34 = vpack.c.bf16 %v1616_v26, %v1616_v26  ;;  %v1615_v56 = vadd.f32 %v6942_v52, %v1591_v48  ;;  %v4919_v35 = vld [vmem:[#allocation15] sm:$0xff]   ;;  %v2026_v48 = vld [vmem:[#allocation2 + $0x44] sm:$0x1]  ;;  %4536 = vmatprep.subr.bf16.mxu0 %v4917_v47 }
 0x525   : > { %v1850_v50 = vsel %vm6972_vm10, %v1842_v2, %v1849_v22  ;;  %v2013_v32 = vsel %vm6765_vm3, %v1851_v63, %v2012_v20  ;;  %v1594_v15 = vmul.f32 %v6939_v14, %v1570_v13  ;;  %v1866_v7 = vor.u32 %v1864_v27, %v1863_v4  ;;  %v4920_v26 = vld [vmem:[#allocation15 + $0x80] sm:$0xff]   ;;  %v4921_v22 = vld [vmem:[#allocation15 + $0x48] sm:$0xff]   ;;  %4537 = vmatpush3.bf16.msra.mxu0 %v4919_v35 }
 0x526   : > { %v5118_v59 = vpop.eup %5117  ;;  %2011 = vst.msk [vmem:[#allocation2 + $0x28] sm:$0xf] %vm1984_vm7, %v1850_v50  ;;  %2014 = vst [vmem:[#allocation2 + $0x2c] sm:$0x1] %v2013_v32  ;;  %v1868_v45 = vrot.slane %v1863_v4, 4  ;;  %v1855_v42 = vrot.slane %v1853_v38, 7  ;;  %v4525_v2 = vpack.c.bf16 %v1615_v56, %v1615_v56  ;;  %v1569_v21 = vmul.f32 %v5116_v25, %v6845_v6  ;;  %4601 = vmatpush3.bf16.msra.mxu1 %v4920_v26 }
 0x527   : > { %v1878_v51 = vshrl.u32 %v4526_v34, 16  ;;  %v5120_v28 = vpop.eup %5119  ;;  %v1881_v55 = vshll.u32 %v4526_v34, 16  ;;  %v1618_v61 = vadd.f32 %v6942_v52, %v1594_v15  ;;  %v4922_v63 = vld [vmem:[#allocation15 + $0xc8] sm:$0xff]   ;;  %4538 = vmatprep.subr.bf16.mxu0 %v4921_v22  ;;  %5121 = vrsqrt.f32 %v7019_v1  ;;  %v2033_v35 = vld [vmem:[#allocation2 + $0x50] sm:$0x1]  ;;  %v1493_v22 = vpop.xlane.xlu0 %1492  ;;  %v4928_v1 = vld [vmem:[#allocation15 + $0x90] sm:$0xff]  }
 0x528   : > { %v2020_v20 = vsel %vm6765_vm3, %v1868_v45, %v2019_v10  ;;  %v1858_v53 = vor.u32 %v1856_v16, %v1855_v42  ;;  %v1859_v12 = vrot.slane %v1855_v42, 4  ;;  %v1870_v13 = vshrl.u32 %v4525_v2, 16  ;;  %v4923_v32 = vld [vmem:[#allocation15 + $0x8] sm:$0xff]   ;;  %v1496_v42 = vpop.xlane.xlu1 %1495  ;;  %4602 = vmatprep.subr.bf16.mxu1 %v4922_v63 }
 0x529   : > { %v1880_v27 = vrot.slane %v1878_v51, 7  ;;  %2021 = vst [vmem:[#allocation2 + $0x38] sm:$0x1] %v2020_v20  ;;  %v1873_v4 = vshll.u32 %v4525_v2, 16  ;;  %v4528_v38 = vpack.c.bf16 %v1618_v61, %v1618_v61  ;;  %v1593_v6 = vmul.f32 %v6939_v14, %v1569_v21  ;;  %v4925_v51 = vld [vmem:[#allocation15 + $0x50] sm:$0xff]   ;;  %4539 = vmatpush3.bf16.msra.mxu0 %v4923_v32 }
 0x52a   : > { %v1867_v25 = vsel %vm6972_vm10, %v1859_v12, %v1866_v7  ;;  %v2016_v16 = vsel %vm6962_vm8, %v1858_v53, %v2015_v29  ;;  %v1872_v10 = vrot.slane %v1870_v13, 7  ;;  %v4924_v7 = vld [vmem:[#allocation15 + $0x88] sm:$0xff]   ;;  %v4926_v29 = vld [vmem:[#allocation15 + $0xd0] sm:$0xff]   ;;  %v1572_v61 = vmul.f32 %v5118_v59, %v6854_v33  ;;  %v7053_v33 = vld [vmem:[#allocation2 + $0x10] sm:$0xf]  ;;  %4540 = vmatprep.subr.bf16.mxu0 %v4925_v51 }
 0x52b   : > { %v1883_v34 = vor.u32 %v1881_v55, %v1880_v27  ;;  %v1885_v50 = vrot.slane %v1880_v27, 4  ;;  %2017 = vst [vmem:[#allocation2 + $0x30] sm:$0xf] %v2016_v16  ;;  %2018 = vst.msk [vmem:[#allocation2 + $0x34] sm:$0xf] %vm1984_vm7, %v1867_v25  ;;  %v1895_v56 = vshrl.u32 %v4528_v38, 16  ;;  %v1617_v45 = vadd.f32 %v6942_v52, %v1593_v6  ;;  %4603 = vmatpush3.bf16.msra.mxu1 %v4924_v7 }
 0x52c   : > { %v1898_v15 = vshll.u32 %v4528_v38, 16  ;;  %v2022_v2 = vld [vmem:[#allocation2 + $0x3c] sm:$0xf]  ;;  %v1571_v21 = vmul.f32 %v5120_v28, %v6857_v41  ;;  %v1875_v47 = vor.u32 %v1873_v4, %v1872_v10  ;;  %v1876_v9 = vrot.slane %v1872_v10, 4  ;;  %4604 = vmatprep.subr.bf16.mxu1 %v4926_v29  ;;  %v2368_v6 = vld [vmem:[#allocation2 + $0xc] sm:$0xf] }
 0x52d   : > { %v2027_v55 = vsel %vm6765_vm3, %v1885_v50, %v2026_v48  ;;  %v1897_v20 = vrot.slane %v1895_v56, 7  ;;  %v4527_v53 = vpack.c.bf16 %v1617_v45, %v1617_v45  ;;  %v1596_v12 = vmul.f32 %v6939_v14, %v1572_v61  ;;  %v4927_v41 = vld [vmem:[#allocation15 + $0x10] sm:$0xff]   ;;  %v7066_v25 = vld [vmem:[#allocation2 + $0x18] sm:$0xf]  ;;  %v4930_v16 = vld [vmem:[#allocation15 + $0xd8] sm:$0xff]  }
 0x52e   : > { %2028 = vst [vmem:[#allocation2 + $0x44] sm:$0x1] %v2027_v55  ;;  %v1595_v27 = vmul.f32 %v6939_v14, %v1571_v21  ;;  %5123 = vrsqrt.f32 %v7021_v19  ;;  %v1516_v26 = vmul.f32 0.015625, %v1496_v42  ;;  %v1884_v59 = vsel %vm6972_vm10, %v1876_v9, %v1883_v34  ;;  %v4929_v19 = vld [vmem:[#allocation15 + $0x58] sm:$0xff]   ;;  %v7071_v56 = vld [vmem:[#allocation2] sm:$0xf]  ;;  %4541 = vmatpush3.bf16.msra.mxu0 %v4927_v41 }
 0x52f   : > { %v2023_v28 = vsel %vm6962_vm8, %v1875_v47, %v2022_v2  ;;  %v1902_v63 = vrot.slane %v1897_v20, 4  ;;  %2025 = vst.msk [vmem:[#allocation2 + $0x40] sm:$0xf] %vm1984_vm7, %v1884_v59  ;;  %v1900_v48 = vor.u32 %v1898_v15, %v1897_v20  ;;  %v1887_v13 = vshrl.u32 %v4527_v53, 16  ;;  %4605 = vmatpush3.bf16.msra.mxu1 %v4928_v1  ;;  %v4931_v51 = vld [vmem:[#allocation15 + $0x18] sm:$0xff]   ;;  %4542 = vmatprep.subr.bf16.mxu0 %v4929_v19  ;;  %v4934_v41 = vld [vmem:[#allocation15 + $0xe0] sm:$0xff]  }
 0x530   : > { %2024 = vst [vmem:[#allocation2 + $0x3c] sm:$0xf] %v2023_v28  ;;  %v1620_v4 = vadd.f32 %v6942_v52, %v1596_v12  ;;  %v1619_v38 = vadd.f32 %v6942_v52, %v1595_v27  ;;  %v1536_v50 = vadd.f32 1e-06, %v1516_v26  ;;  %v1515_v32 = vmul.f32 0.015625, %v1493_v22  ;;  %v4932_v29 = vld [vmem:[#allocation15 + $0x98] sm:$0xff]   ;;  %4606 = vmatprep.subr.bf16.mxu1 %v4930_v16 }
 0x531   : > { %v2034_v34 = vsel %vm6765_vm3, %v1902_v63, %v2033_v35  ;;  %v4409_v10 = vcombine.low %v2368_v6, %v7053_v33  ;;  %v1889_v15 = vrot.slane %v1887_v13, 7  ;;  %v1890_v45 = vshll.u32 %v4527_v53, 16  ;;  %v2029_v55 = vld [vmem:[#allocation2 + $0x48] sm:$0xf]  ;;  %v4933_v53 = vld [vmem:[#allocation15 + $0x60] sm:$0xff]   ;;  %v5122_v1 = vpop.eup %5121 }
 0x532   : > { %2035 = vst [vmem:[#allocation2 + $0x50] sm:$0x1] %v2034_v34  ;;  %v4530_v42 = vpack.c.bf16 %v1620_v4, %v1620_v4  ;;  %v4529_v7 = vpack.c.bf16 %v1619_v38, %v1619_v38  ;;  %v1631_v2 = vstv %s7061_s19  ;;  %5125 = vrsqrt.f32 %v1536_v50  ;;  %v2674_v26 = vld [vmem:[#allocation2 + $0x1c] sm:$0xf]  ;;  %4543 = vmatpush3.bf16.msra.mxu0 %v4931_v51  ;;  %v2690_v37 = vld [vmem:[#allocation2 + $0x2c] sm:$0x1] }
 0x533   : > { %v1535_v61 = vadd.f32 1e-06, %v1515_v32  ;;  %3105 = vrot.lane.b32.xlu0 %v4409_v10, %s5585_s24  ;;  %v2698_v21 = vshrl.u32 %v7066_v25, 16  ;;  %v1892_v47 = vor.u32 %v1890_v45, %v1889_v15  ;;  %v1893_v9 = vrot.slane %v1889_v15, 4  ;;  %4607 = vmatpush3.bf16.msra.mxu1 %v4932_v29  ;;  %v2040_v13 = vld [vmem:[#allocation2 + $0x5c] sm:$0x1] }
 0x534   : > { %v1912_v35 = vshrl.u32 %v4530_v42, 16  ;;  %v2085_v20 = vshrl.u32 %v7071_v56, 16  ;;  %v1915_v12 = vshll.u32 %v4530_v42, 16  ;;  %v1904_v27 = vshrl.u32 %v4529_v7, 16  ;;  %4544 = vmatprep.subr.bf16.mxu0 %v4933_v53  ;;  %4608 = vmatprep.subr.bf16.mxu1 %v4934_v41  ;;  %v2036_v10 = vld [vmem:[#allocation2 + $0x54] sm:$0xf] }
 0x535   : > { %5127 = vrsqrt.f32 %v1535_v61  ;;  %v2088_v22 = vshll.u32 %v7071_v56, 16  ;;  %v1901_v59 = vsel %vm6972_vm10, %v1893_v9, %v1900_v48  ;;  %v2030_v28 = vsel %vm6962_vm8, %v1892_v47, %v2029_v55  ;;  %v4935_v48 = vld [vmem:[#allocation15 + $0x20] sm:$0xff]   ;;  %v4937_v55 = vld [vmem:[#allocation15 + $0x68] sm:$0xff]  }
 0x536   : > { %v1914_v63 = vrot.slane %v1912_v35, 7  ;;  %v1907_v19 = vshll.u32 %v4529_v7, 16  ;;  %2031 = vst [vmem:[#allocation2 + $0x48] sm:$0xf] %v2030_v28  ;;  %2032 = vst.msk [vmem:[#allocation2 + $0x4c] sm:$0xf] %vm1984_vm7, %v1901_v59  ;;  %v1574_v38 = vmul.f32 %v5122_v1, %v6866_v49  ;;  %4545 = vmatpush3.bf16.msra.mxu0 %v4935_v48 }
 0x537   : > { %v1906_v4 = vrot.slane %v1904_v27, 7  ;;  %v2700_v6 = vrot.slane %v2698_v21, 4  ;;  %v2701_v16 = vshll.u32 %v7066_v25, 16  ;;  %v2707_v56 = vshll.u32 %v2674_v26, 16  ;;  %v4936_v45 = vld [vmem:[#allocation15 + $0xa0] sm:$0xff]   ;;  %v4938_v9 = vld [vmem:[#allocation15 + $0xe8] sm:$0xff]   ;;  %4546 = vmatprep.subr.bf16.mxu0 %v4937_v55 }
 0x538   : > { %v5124_v34 = vpop.eup %5123  ;;  %v1917_v50 = vor.u32 %v1915_v12, %v1914_v63  ;;  %v1919_v32 = vrot.slane %v1914_v63, 4  ;;  %v2711_v15 = vshrl.u32 %v2674_v26, 16  ;;  %v1598_v51 = vmul.f32 %v6939_v14, %v1574_v38  ;;  %v2689_v49 = vld [vmem:[#allocation2 + $0x20] sm:$0x1]  ;;  %4609 = vmatpush3.bf16.msra.mxu1 %v4936_v45  ;;  %v7096_v1 = vld [vmem:[#allocation2 + $0x4] sm:$0xf] }
 0x539   : > { %v1909_v42 = vor.u32 %v1907_v19, %v1906_v4  ;;  %v1910_v7 = vrot.slane %v1906_v4, 4  ;;  %v1573_v29 = vmul.f32 %v5124_v34, %v6869_v8  ;;  %v2703_v61 = vrot.slane %v2701_v16, 5  ;;  %4610 = vmatprep.subr.bf16.mxu1 %v4938_v9  ;;  %v4939_v34 = vld [vmem:[#allocation15 + $0x28] sm:$0xff]   ;;  %v2587_v23 = vld [vmem:[#allocation2 + $0x30] sm:$0xe] }
 0x53a   : > { %v2041_v25 = vsel %vm6765_vm3, %v1919_v32, %v2040_v13  ;;  %v2709_v21 = vrot.slane %v2707_v56, 5  ;;  %v2713_v47 = vrot.slane %v2711_v15, 4  ;;  %v1622_v8 = vadd.f32 %v6942_v52, %v1598_v51  ;;  %4547 = vmatpush3.bf16.msra.mxu0 %v4939_v34  ;;  %v4940_v55 = vld [vmem:[#allocation15 + $0xa8] sm:$0xff]   ;;  %v7340_v54 = vld [vmem:[#allocation2 + $0x50] sm:$0x1] }
 0x53b   : > { %2042 = vst [vmem:[#allocation2 + $0x5c] sm:$0x1] %v2041_v25  ;;  %v1918_v35 = vsel %vm6972_vm10, %v1910_v7, %v1917_v50  ;;  %v2037_v53 = vsel %vm6962_vm8, %v1909_v42, %v2036_v10  ;;  %v1597_v12 = vmul.f32 %v6939_v14, %v1573_v29  ;;  %v2704_v27 = vor.u32 %v2703_v61, %v2700_v6  ;;  %v2047_v25 = vld [vmem:[#allocation2 + $0x68] sm:$0x1] }
 0x53c   : > { %2038 = vst [vmem:[#allocation2 + $0x54] sm:$0xf] %v2037_v53  ;;  %2039 = vst.msk [vmem:[#allocation2 + $0x58] sm:$0xf] %vm1984_vm7, %v1918_v35  ;;  %v2714_v26 = vor.u32 %v2713_v47, %v2709_v21  ;;  %v2717_v41 = vshll.u32 %v2689_v49, 16  ;;  %v2087_v59 = vrot.slane %v2085_v20, 4  ;;  %v5126_v28 = vpop.eup %5125  ;;  %v4532_v63 = vpack.c.bf16 %v1622_v8, %v1622_v8  ;;  %4611 = vmatpush3.bf16.msra.mxu1 %v4940_v55 }
 0x53d   : > { %v1621_v19 = vadd.f32 %v6942_v52, %v1597_v12  ;;  %vm7101_vm13 = vcmp.eq.s32.totalorder %v1631_v2, 1  ;;  %v2090_v4 = vrot.slane %v2088_v22, 5  ;;  %v1576_v38 = vmul.f32 %v5126_v28, %v6886_v24  ;;  %v7119_v49 = vld [vmem:[#allocation2 + $0x8] sm:$0x1]  ;;  %v4941_v12 = vld [vmem:[#allocation15 + $0x70] sm:$0xff]  }
 0x53e   : > { %v2705_v16 = vrot.slane %v2704_v27, 4  ;;  %v2715_v6 = vrot.slane %v2714_v26, 4  ;;  %v2719_v48 = vrot.slane %v2717_v41, 5  ;;  %v1929_v32 = vshrl.u32 %v4532_v63, 16  ;;  %v2043_v27 = vld [vmem:[#allocation2 + $0x60] sm:$0xf]  ;;  %4548 = vmatprep.subr.bf16.mxu0 %v4941_v12 }
 0x53f   : > { %v5128_v50 = vpop.eup %5127  ;;  %v4531_v20 = vpack.c.bf16 %v1621_v19, %v1621_v19  ;;  %v2091_v2 = vor.u32 %v2090_v4, %v2087_v59  ;;  %v2094_v56 = vshll.u32 %v7096_v1, 16  ;;  %v1600_v22 = vmul.f32 %v6939_v14, %v1576_v38  ;;  %v4942_v38 = vld [vmem:[#allocation15 + $0xf0] sm:$0xff]   ;;  %v4946_v55 = vld [vmem:[#allocation15 + $0xf8] sm:$0xff]  }
 0x540   : > { %v1575_v24 = vmul.f32 %v5128_v50, %v6889_v0  ;;  %v2710_v15 = vsel %vm7108_vm14, %v2705_v16, %v2709_v21  ;;  %v2720_v45 = vsel %vm7108_vm14, %v2715_v6, %v2719_v48  ;;  %v1931_v42 = vrot.slane %v1929_v32, 7  ;;  %v2584_v48 = vld [vmem:[#allocation2 + $0xc] sm:$0xe]  ;;  %v7139_v32 = vld [vmem:[#allocation2 + $0x14] sm:$0x1]  ;;  %4612 = vmatprep.subr.bf16.mxu1 %v4942_v38 }
 0x541   : > { %v1932_v7 = vshll.u32 %v4532_v63, 16  ;;  %v1921_v51 = vshrl.u32 %v4531_v20, 16  ;;  %v4441_v29 = vcombine.low %v2710_v15, %v2720_v45  ;;  %v1924_v61 = vshll.u32 %v4531_v20, 16  ;;  %v2054_v20 = vld [vmem:[#allocation2 + $0x74] sm:$0x1]  ;;  %v4944_v15 = vld [vmem:[#allocation15 + $0xb0] sm:$0xff]  }
 0x542   : > { %v1624_v47 = vadd.f32 %v6942_v52, %v1600_v22  ;;  %v1599_v0 = vmul.f32 %v6939_v14, %v1575_v24  ;;  %v7123_v9 = vrot.slane %v2091_v2, 4  ;;  %v1936_v35 = vrot.slane %v1931_v42, 4  ;;  %v7143_v22 = vld [vmem:[#allocation2 + $0xc] sm:$0xf]  ;;  %v4943_v24 = vld [vmem:[#allocation15 + $0x30] sm:$0xff]   ;;  %4613 = vmatpush3.bf16.msra.mxu1 %v4944_v15 }
 0x543   : > { %v1934_v21 = vor.u32 %v1932_v7, %v1931_v42  ;;  %v1923_v53 = vrot.slane %v1921_v51, 7  ;;  %3241 = vrot.lane.b32.xlu1 %v4441_v29, %s5585_s24  ;;  %v2098_v8 = vshrl.u32 %v7096_v1, 16  ;;  %v2096_v59 = vrot.slane %v2094_v56, 5  ;;  %v4945_v29 = vld [vmem:[#allocation15 + $0x78] sm:$0xff]   ;;  %4549 = vmatpush3.bf16.msra.mxu0 %v4943_v24 }
 0x544   : > { %v1656_v26 = vsel %vm7101_vm13, %v1624_v47, 0.0  ;;  %v1623_v41 = vadd.f32 %v6942_v52, %v1599_v0  ;;  %v2104_v14 = vshll.u32 %v7119_v49, 16  ;;  %v2048_v28 = vsel %vm6765_vm3, %v1936_v35, %v2047_v25  ;;  %v4949_v35 = vld [vmem:[#allocation15 + $0xb8] sm:$0xff]   ;;  %4550 = vmatprep.subr.bf16.mxu0 %v4945_v29  ;;  %4614 = vmatprep.subr.bf16.mxu1 %v4946_v55 }
 0x545   : > { %v1926_v63 = vor.u32 %v1924_v61, %v1923_v53  ;;  %v1927_v19 = vrot.slane %v1923_v53, 4  ;;  %v4534_v4 = vpack.c.bf16 %v1656_v26, %v1656_v26  ;;  %2049 = vst [vmem:[#allocation2 + $0x68] sm:$0x1] %v2048_v28  ;;  %v2100_v6 = vrot.slane %v2098_v8, 4  ;;  %v5170_v10 = vld [vmem:[#allocation2 + $0x48] sm:$0xf] }
 0x546   : > { %v1655_v16 = vsel %vm7101_vm13, %v1623_v41, 0.0  ;;  %v2618_v56 = vrot.slane %v7053_v33, 5  ;;  %v2097_v42 = vsel %vm7108_vm14, %v7123_v9, %v2096_v59  ;;  %v2106_v7 = vrot.slane %v2104_v14, 5  ;;  %v7161_v14 = vld [vmem:[#allocation2 + $0x10] sm:$0xf]  ;;  %4615 = vmatpush3.bf16.msra.mxu1 %v4949_v35 }
 0x547   : > { %v1935_v52 = vsel %vm6972_vm10, %v1927_v19, %v1934_v21  ;;  %v2044_v34 = vsel %vm6962_vm8, %v1926_v63, %v2043_v27  ;;  %v1946_v50 = vshrl.u32 %v4534_v4, 16  ;;  %v4533_v13 = vpack.c.bf16 %v1655_v16, %v1655_v16  ;;  %v4948_v21 = vld [vmem:[#allocation15 + $0x38] sm:$0xff]   ;;  %v7157_v27 = vld [vmem:[#allocation2 + $0x1c] sm:$0xf]  ;;  %v4951_v63 = vld [vmem:[#allocation15 + $0x100] sm:$0xff]  }
 0x548   : > { %2045 = vst [vmem:[#allocation2 + $0x60] sm:$0xf] %v2044_v34  ;;  %2046 = vst.msk [vmem:[#allocation2 + $0x64] sm:$0xf] %vm1984_vm7, %v1935_v52  ;;  %v2101_v2 = vor.u32 %v2100_v6, %v2096_v59  ;;  %v4369_v51 = vrot.slane %v2584_v48, 9  ;;  %v1949_v25 = vshll.u32 %v4534_v4, 16  ;;  %4551 = vmatpush3.bf16.msra.mxu0 %v4948_v21  ;;  %4700 = vmatprep.subr.bf16.mxu1 %v4951_v63 }
 0x549   : > { %v1948_v45 = vrot.slane %v1946_v50, 7  ;;  %v1938_v61 = vshrl.u32 %v4533_v13, 16  ;;  %v2621_v0 = vrot.slane %v7139_v32, 5  ;;  %v1941_v53 = vshll.u32 %v4533_v13, 16  ;;  %v2050_v4 = vld [vmem:[#allocation2 + $0x6c] sm:$0xf]  ;;  %4676 = vmatprep.subr.bf16.mxu0 %v4951_v63 }
 0x54a   : > { %v2102_v47 = vrot.slane %v2101_v2, 4  ;;  %v2619_v8 = vsel %vm7150_vm2, %v4369_v51, %v2618_v56  ;;  %v2620_v12 = vrot.slane %v2618_v56, 4  ;;  %v2109_v28 = vshrl.u32 %v7143_v22, 16  ;;  %v7169_v48 = vld [vmem:[#allocation2 + $0x24] sm:$0xf] }
 0x54b   : > { %v1953_v9 = vrot.slane %v1948_v45, 4  ;;  %v1951_v26 = vor.u32 %v1949_v25, %v1948_v45  ;;  %v1940_v41 = vrot.slane %v1938_v61, 7  ;;  %v2112_v6 = vshll.u32 %v7143_v22, 16  ;;  %v7171_v13 = vld [vmem:[#allocation2 + $0x18] sm:$0xf] }
 0x54c   : > { %v2107_v59 = vsel %vm7108_vm14, %v2102_v47, %v2106_v7  ;;  %v2622_v16 = vsel %vm7150_vm2, %v2620_v12, %v2621_v0  ;;  %v7173_v2 = vld [vmem:[#allocation2 + $0x14] sm:$0x1]  ;;  %v2111_v56 = vrot.slane %v2109_v28, 4  ;;  %v4410_v46 = vcombine.low %v7171_v13, %v7157_v27  ;;  %v7180_v45 = vld [vmem:[#allocation2 + $0x28] sm:$0xf] }
 0x54d   : > { %v2055_v19 = vsel %vm6765_vm3, %v1953_v9, %v2054_v20  ;;  %v4393_v38 = vcombine.low %v2097_v42, %v2107_v59  ;;  %v1943_v52 = vor.u32 %v1941_v53, %v1940_v41  ;;  %v1944_v34 = vrot.slane %v1940_v41, 4  ;;  %v7194_v63 = vld [vmem:[#allocation2 + $0x28] sm:$0xf] }
 0x54e   : > { %2056 = vst [vmem:[#allocation2 + $0x74] sm:$0x1] %v2055_v19  ;;  %v4425_v50 = vcombine.low %v2619_v8, %v2622_v16  ;;  %v2114_v20 = vrot.slane %v2112_v6, 5  ;;  %v2118_v24 = vshll.u32 %v7161_v14, 16  ;;  %v2122_v15 = vshrl.u32 %v7161_v14, 16 }
 0x54f   : > { %3033 = vrot.lane.b32.xlu1 %v4393_v38, %s5585_s24  ;;  %v1952_v42 = vsel %vm6972_vm10, %v1944_v34, %v1951_v26  ;;  %v2051_v7 = vsel %vm6962_vm8, %v1943_v52, %v2050_v4  ;;  %v2722_v51 = vshrl.u32 %v7169_v48, 16  ;;  %v2725_v29 = vshll.u32 %v7169_v48, 16  ;;  %v7196_v38 = vld [vmem:[#allocation2 + $0x20] sm:$0x1]  ;;  %v2061_v16 = vld [vmem:[#allocation2 + $0x18] sm:$0xf] }
 0x550   : > { %3169 = vrot.lane.b32.xlu0 %v4425_v50, %s5585_s24  ;;  %2052 = vst [vmem:[#allocation2 + $0x6c] sm:$0xf] %v2051_v7  ;;  %2053 = vst.msk [vmem:[#allocation2 + $0x70] sm:$0xf] %vm1984_vm7, %v1952_v42  ;;  %v2115_v55 = vor.u32 %v2114_v20, %v2111_v56  ;;  %v2120_v25 = vrot.slane %v2118_v24, 5  ;;  %v2124_v61 = vrot.slane %v2122_v15, 4 }
 0x551   : > { %v2128_v47 = vshll.u32 %v7173_v2, 16  ;;  %v2724_v0 = vrot.slane %v2722_v51, 4  ;;  %v2727_v21 = vrot.slane %v2725_v29, 5  ;;  %v2731_v60 = vshll.u32 %v7180_v45, 16  ;;  %8227 = vst [vmem:[#allocation61_spill] sm:$0xff] %v7196_v38 }
 0x552   : > { %v2735_v35 = vshrl.u32 %v7180_v45, 16  ;;  %v2116_v9 = vrot.slane %v2115_v55, 4  ;;  %v2125_v53 = vor.u32 %v2124_v61, %v2120_v25  ;;  %v2741_v41 = vshll.u32 %v2690_v37, 16  ;;  %v7202_v34 = vld [vmem:[#allocation2 + $0x24] sm:$0xf] }
 0x553   : > { %3107 = vrot.lane.b32.xlu1 %v4410_v46, %s5585_s24  ;;  %v2728_v8 = vor.u32 %v2727_v21, %v2724_v0  ;;  %v2733_v12 = vrot.slane %v2731_v60, 5  ;;  %v2130_v28 = vrot.slane %v2128_v47, 5  ;;  %v2625_v50 = vrot.slane %v7157_v27, 5  ;;  %v7205_v56 = vld [vmem:[#allocation2 + $0x1c] sm:$0xf] }
 0x554   : > { %v2737_v26 = vrot.slane %v2735_v35, 4  ;;  %v2126_v59 = vrot.slane %v2125_v53, 4  ;;  %v2121_v6 = vsel %vm7108_vm14, %v2116_v9, %v2120_v25  ;;  %v2743_v24 = vrot.slane %v2741_v41, 5  ;;  %v2585_v42 = vld [vmem:[#allocation2 + $0x18] sm:$0xe] }
 0x555   : > { %v2729_v19 = vrot.slane %v2728_v8, 4  ;;  %v4411_v15 = vcombine.low %v7202_v34, %v7194_v63  ;;  %v7209_v7 = vld [vmem:[#allocation2 + $0x20] sm:$0x1]  ;;  %v2627_v29 = vrot.slane %v2625_v50, 4  ;;  %v2628_v55 = vrot.slane %v7196_v38, 5 }
 0x556   : > { %v2738_v4 = vor.u32 %v2737_v26, %v2733_v12  ;;  %v2131_v52 = vsel %vm7108_vm14, %v2126_v59, %v2130_v28  ;;  %v2133_v25 = vshrl.u32 %v2061_v16, 16  ;;  %v2677_v61 = vld [vmem:[#allocation2 + $0x30] sm:$0xf]  ;;  %v2136_v37 = vshll.u32 %v2061_v16, 16  ;;  %v2678_v60 = vld [vmem:[#allocation2 + $0x34] sm:$0xf] }
 0x557   : > { %v4394_v46 = vcombine.low %v2121_v6, %v2131_v52  ;;  %v2734_v51 = vsel %vm7108_vm14, %v2729_v19, %v2733_v12  ;;  %v2142_v0 = vshll.u32 %v7205_v56, 16  ;;  %v2146_v21 = vshrl.u32 %v7205_v56, 16  ;;  %v2691_v28 = vld [vmem:[#allocation2 + $0x38] sm:$0x1] }
 0x558   : > { %v2739_v20 = vrot.slane %v2738_v4, 4  ;;  %v4370_v9 = vrot.slane %v2585_v42, 9  ;;  %v2629_v53 = vsel %vm7150_vm2, %v2627_v29, %v2628_v55  ;;  %v2135_v8 = vrot.slane %v2133_v25, 4 }
 0x559   : > { %3035 = vrot.lane.b32.xlu1 %v4394_v46, %s5585_s24  ;;  %v2138_v12 = vrot.slane %v2136_v37, 5  ;;  %v2144_v26 = vrot.slane %v2142_v0, 5  ;;  %v2148_v41 = vrot.slane %v2146_v21, 4  ;;  %v2152_v59 = vshll.u32 %v7209_v7, 16  ;;  %v2386_v21 = vld [vmem:[#allocation2 + $0x2c] sm:$0x1] }
 0x55a   : > { %v2744_v47 = vsel %vm7108_vm14, %v2739_v20, %v2743_v24  ;;  %v2626_v19 = vsel %vm7150_vm2, %v4370_v9, %v2625_v50  ;;  %v2746_v4 = vshrl.u32 %v2677_v61, 16  ;;  %v2749_v16 = vshll.u32 %v2677_v61, 16  ;;  %v2586_v61 = vld [vmem:[#allocation2 + $0x24] sm:$0xe] }
 0x55b   : > { %v4442_v35 = vcombine.low %v2734_v51, %v2744_v47  ;;  %v2755_v6 = vshll.u32 %v2678_v60, 16  ;;  %v4426_v52 = vcombine.low %v2626_v19, %v2629_v53  ;;  %v2139_v46 = vor.u32 %v2138_v12, %v2135_v8  ;;  %v2063_v53 = vld [vmem:[#allocation2 + $0x24] sm:$0xf]  ;;  %v7232_v8 = vld [vmem:[#allocation2 + $0x28] sm:$0xf] }
 0x55c   : > { %v2149_v20 = vor.u32 %v2148_v41, %v2144_v26  ;;  %v2759_v24 = vshrl.u32 %v2678_v60, 16  ;;  %v2748_v42 = vrot.slane %v2746_v4, 4  ;;  %v2751_v51 = vrot.slane %v2749_v16, 5  ;;  %8228 = vst [vmem:[#allocation62_spill] sm:$0xff] %v7232_v8  ;;  %v7236_v19 = vld [vmem:[#allocation2 + $0x34] sm:$0xf] }
 0x55d   : > { %3243 = vrot.lane.b32.xlu0 %v4442_v35, %s5585_s24  ;;  %3109 = vrot.lane.b32.xlu1 %v4411_v15, %s5585_s24  ;;  %v2757_v29 = vrot.slane %v2755_v6, 5  ;;  %v2765_v55 = vshll.u32 %v2691_v28, 16  ;;  %v2140_v25 = vrot.slane %v2139_v46, 4  ;;  %v2154_v37 = vrot.slane %v2152_v59, 5  ;;  %v7234_v28 = vld [vmem:[#allocation2 + $0x30] sm:$0xf] }
 0x55e   : > { %v2150_v47 = vrot.slane %v2149_v20, 4  ;;  %v2761_v0 = vrot.slane %v2759_v24, 4  ;;  %v2752_v50 = vor.u32 %v2751_v51, %v2748_v42  ;;  %v2632_v9 = vrot.slane %v7194_v63, 5  ;;  %8229 = vst [vmem:[#allocation63_spill] sm:$0xff] %v7234_v28  ;;  %v2679_v42 = vld [vmem:[#allocation2 + $0x3c] sm:$0xf] }
 0x55f   : > { %v2145_v15 = vsel %vm7108_vm14, %v2140_v25, %v2144_v26  ;;  %v2767_v59 = vrot.slane %v2765_v55, 5  ;;  %v4371_v16 = vrot.slane %v2586_v61, 9  ;;  %v2635_v26 = vrot.slane %v2386_v21, 5  ;;  %v2692_v61 = vld [vmem:[#allocation2 + $0x44] sm:$0x1] }
 0x560   : > { %v2155_v35 = vsel %vm7108_vm14, %v2150_v47, %v2154_v37  ;;  %v2762_v60 = vor.u32 %v2761_v0, %v2757_v29  ;;  %v2753_v41 = vrot.slane %v2752_v50, 4  ;;  %v2634_v6 = vrot.slane %v2632_v9, 4  ;;  %v2680_v37 = vld [vmem:[#allocation2 + $0x40] sm:$0xf] }
 0x561   : > { %3171 = vrot.lane.b32.xlu0 %v4426_v52, %s5585_s24  ;;  %v4395_v12 = vcombine.low %v2145_v15, %v2155_v35  ;;  %v7238_v52 = vld [vmem:[#allocation2 + $0x2c] sm:$0x1]  ;;  %v2157_v46 = vshrl.u32 %v2063_v53, 16  ;;  %v2160_v20 = vshll.u32 %v2063_v53, 16  ;;  %v2166_v24 = vshll.u32 %v7232_v8, 16 }
 0x562   : > { %v2763_v4 = vrot.slane %v2762_v60, 4  ;;  %8230 = vst [vmem:[#allocation64_spill] sm:$0xff] %v7238_v52  ;;  %v2758_v63 = vsel %vm7108_vm14, %v2753_v41, %v2757_v29  ;;  %v4412_v55 = vcombine.low %v7234_v28, %v7236_v19  ;;  %v2633_v25 = vsel %vm7150_vm2, %v4371_v16, %v2632_v9 }
 0x563   : > { %3037 = vrot.lane.b32.xlu1 %v4395_v12, %s5585_s24  ;;  %v2170_v47 = vshrl.u32 %v7232_v8, 16  ;;  %v2636_v29 = vsel %vm7150_vm2, %v2634_v6, %v2635_v26  ;;  %v2159_v50 = vrot.slane %v2157_v46, 4  ;;  %v2162_v21 = vrot.slane %v2160_v20, 5  ;;  %v7256_v26 = vld [vmem:[#allocation2 + $0x3c] sm:$0xf] }
 0x564   : > { %v2768_v51 = vsel %vm7108_vm14, %v2763_v4, %v2767_v59  ;;  %v2168_v15 = vrot.slane %v2166_v24, 5  ;;  %v2176_v60 = vshll.u32 %v7238_v52, 16  ;;  %v2770_v53 = vshrl.u32 %v2679_v42, 16  ;;  %v7258_v46 = vld [vmem:[#allocation2 + $0x40] sm:$0xf] }
 0x565   : > { %v4443_v0 = vcombine.low %v2758_v63, %v2768_v51  ;;  %v2172_v35 = vrot.slane %v2170_v47, 4  ;;  %v2163_v9 = vor.u32 %v2162_v21, %v2159_v50  ;;  %v2773_v12 = vshll.u32 %v2679_v42, 16 }
 0x566   : > { %v2779_v41 = vshll.u32 %v2680_v37, 16  ;;  %v2783_v59 = vshrl.u32 %v2680_v37, 16  ;;  %v4427_v4 = vcombine.low %v2633_v25, %v2636_v29  ;;  %v2772_v63 = vrot.slane %v2770_v53, 4  ;;  %v7263_v37 = vld [vmem:[#allocation2 + $0x38] sm:$0x1] }
 0x567   : > { %3245 = vrot.lane.b32.xlu0 %v4443_v0, %s5585_s24  ;;  %3111 = vrot.lane.b32.xlu1 %v4412_v55, %s5585_s24  ;;  %v2173_v16 = vor.u32 %v2172_v35, %v2168_v15  ;;  %v2789_v6 = vshll.u32 %v2692_v61, 16  ;;  %v2164_v20 = vrot.slane %v2163_v9, 4  ;;  %v2775_v24 = vrot.slane %v2773_v12, 5  ;;  %8231 = vst [vmem:[#allocation65_spill] sm:$0xff] %v7263_v37  ;;  %v2065_v29 = vld [vmem:[#allocation2 + $0x30] sm:$0xf] }
 0x568   : > { %v2781_v51 = vrot.slane %v2779_v41, 5  ;;  %v2785_v47 = vrot.slane %v2783_v59, 4  ;;  %v2178_v0 = vrot.slane %v2176_v60, 5  ;;  %v4413_v25 = vcombine.low %v7256_v26, %v7258_v46  ;;  %v7270_v60 = vld [vmem:[#allocation2 + $0x34] sm:$0xf] }
 0x569   : > { %v2174_v5 = vrot.slane %v2173_v16, 4  ;;  %v2776_v42 = vor.u32 %v2775_v24, %v2772_v63  ;;  %v2169_v50 = vsel %vm7108_vm14, %v2164_v20, %v2168_v15  ;;  %v2791_v61 = vrot.slane %v2789_v6, 5  ;;  %8232 = vst [vmem:[#allocation66_spill] sm:$0xff] %v7270_v60  ;;  %v7273_v16 = vld [vmem:[#allocation2 + $0x38] sm:$0x1] }
 0x56a   : > { %v2786_v55 = vor.u32 %v2785_v47, %v2781_v51  ;;  %v2639_v35 = vrot.slane %v7236_v19, 5  ;;  %v4372_v41 = vrot.slane %v2587_v23, 9  ;;  %8233 = vst [vmem:[#allocation67_spill] sm:$0xff] %v7273_v16  ;;  %v2181_v63 = vshrl.u32 %v2065_v29, 16  ;;  %v2681_v23 = vld [vmem:[#allocation2 + $0x48] sm:$0xf] }
 0x56b   : > { %3173 = vrot.lane.b32.xlu0 %v4427_v4, %s5585_s24  ;;  %v2179_v21 = vsel %vm7108_vm14, %v2174_v5, %v2178_v0  ;;  %v2777_v9 = vrot.slane %v2776_v42, 4  ;;  %v2642_v4 = vrot.slane %v7263_v37, 5  ;;  %v2184_v24 = vshll.u32 %v2065_v29, 16  ;;  %v2682_v20 = vld [vmem:[#allocation2 + $0x4c] sm:$0xf] }
 0x56c   : > { %v4396_v53 = vcombine.low %v2169_v50, %v2179_v21  ;;  %v2787_v12 = vrot.slane %v2786_v55, 4  ;;  %v2641_v59 = vrot.slane %v2639_v35, 4  ;;  %v2190_v15 = vshll.u32 %v7270_v60, 16 }
 0x56d   : > { %v2782_v5 = vsel %vm7108_vm14, %v2777_v9, %v2781_v51  ;;  %v2194_v6 = vshrl.u32 %v7270_v60, 16  ;;  %v2183_v42 = vrot.slane %v2181_v63, 4  ;;  %v2186_v55 = vrot.slane %v2184_v24, 5  ;;  %v7425_v60 = vld [vmem:[#allocation2 + $0x74] sm:$0x1] }
 0x56e   : > { %3039 = vrot.lane.b32.xlu1 %v4396_v53, %s5585_s24  ;;  %v2792_v19 = vsel %vm7108_vm14, %v2787_v12, %v2791_v61  ;;  %v2643_v0 = vsel %vm7150_vm2, %v2641_v59, %v2642_v4  ;;  %v2640_v29 = vsel %vm7150_vm2, %v4372_v41, %v2639_v35  ;;  %v2192_v50 = vrot.slane %v2190_v15, 5  ;;  %v2693_v53 = vld [vmem:[#allocation2 + $0x50] sm:$0x1]  ;;  %v2588_v41 = vld [vmem:[#allocation2 + $0x3c] sm:$0xe]  ;;  %8239 = vst [vmem:[#allocation73_spill] sm:$0xff] %v7425_v60 }
 0x56f   : > { %v4444_v47 = vcombine.low %v2782_v5, %v2792_v19  ;;  %v2196_v51 = vrot.slane %v2194_v6, 4  ;;  %v2200_v21 = vshll.u32 %v7273_v16, 16  ;;  %v2187_v61 = vor.u32 %v2186_v55, %v2183_v42  ;;  %v7292_v42 = vld [vmem:[#allocation2 + $0x44] sm:$0x1]  ;;  %v7297_v55 = vld [vmem:[#allocation2 + $0x3c] sm:$0xf] }
 0x570   : > { %v2794_v9 = vshrl.u32 %v2681_v23, 16  ;;  %v2797_v12 = vshll.u32 %v2681_v23, 16  ;;  %v2803_v57 = vshll.u32 %v2682_v20, 16  ;;  %v4428_v5 = vcombine.low %v2640_v29, %v2643_v0  ;;  %v7299_v29 = vld [vmem:[#allocation2 + $0x40] sm:$0xf] }
 0x571   : > { %3247 = vrot.lane.b32.xlu0 %v4444_v47, %s5585_s24  ;;  %v2197_v59 = vor.u32 %v2196_v51, %v2192_v50  ;;  %v2807_v4 = vshrl.u32 %v2682_v20, 16  ;;  %v2188_v63 = vrot.slane %v2187_v61, 4  ;;  %v2202_v6 = vrot.slane %v2200_v21, 5  ;;  %v7301_v61 = vld [vmem:[#allocation2 + $0x48] sm:$0xf] }
 0x572   : > { %3113 = vrot.lane.b32.xlu1 %v4413_v25, %s5585_s24  ;;  %v2796_v24 = vrot.slane %v2794_v9, 4  ;;  %v2799_v19 = vrot.slane %v2797_v12, 5  ;;  %v2805_v35 = vrot.slane %v2803_v57, 5  ;;  %v2813_v11 = vshll.u32 %v2693_v53, 16  ;;  %v7303_v53 = vld [vmem:[#allocation2 + $0x4c] sm:$0xf] }
 0x573   : > { %v2198_v15 = vrot.slane %v2197_v59, 4  ;;  %v2809_v40 = vrot.slane %v2807_v4, 4  ;;  %v2193_v23 = vsel %vm7108_vm14, %v2188_v63, %v2192_v50  ;;  %v4373_v0 = vrot.slane %v2588_v41, 9  ;;  %v7306_v59 = vld [vmem:[#allocation2 + $0x44] sm:$0x1] }
 0x574   : > { %v2800_v47 = vor.u32 %v2799_v19, %v2796_v24  ;;  %v2646_v57 = vrot.slane %v7258_v46, 5  ;;  %v2815_v9 = vrot.slane %v2813_v11, 5  ;;  %v2205_v4 = vshrl.u32 %v7297_v55, 16  ;;  %v7314_v19 = vld [vmem:[#allocation2 + $0x54] sm:$0xf] }
 0x575   : > { %3175 = vrot.lane.b32.xlu0 %v4428_v5, %s5585_s24  ;;  %v2203_v25 = vsel %vm7108_vm14, %v2198_v15, %v2202_v6  ;;  %v2810_v20 = vor.u32 %v2809_v40, %v2805_v35  ;;  %v2649_v5 = vrot.slane %v7292_v42, 5  ;;  %v2208_v63 = vshll.u32 %v7297_v55, 16 }
 0x576   : > { %v4397_v51 = vcombine.low %v2193_v23, %v2203_v25  ;;  %v2801_v21 = vrot.slane %v2800_v47, 4  ;;  %v2648_v12 = vrot.slane %v2646_v57, 4  ;;  %v2214_v24 = vshll.u32 %v7299_v29, 16 }
 0x577   : > { %v2811_v50 = vrot.slane %v2810_v20, 4  ;;  %v4414_v41 = vcombine.low %v7301_v61, %v7303_v53  ;;  %v2647_v15 = vsel %vm7150_vm2, %v4373_v0, %v2646_v57  ;;  %v2218_v6 = vshrl.u32 %v7299_v29, 16 }
 0x578   : > { %3041 = vrot.lane.b32.xlu1 %v4397_v51, %s5585_s24  ;;  %v2806_v40 = vsel %vm7108_vm14, %v2801_v21, %v2805_v35  ;;  %v7323_v35 = vld [vmem:[#allocation2 + $0x58] sm:$0xf]  ;;  %v2650_v47 = vsel %vm7150_vm2, %v2648_v12, %v2649_v5  ;;  %v2207_v25 = vrot.slane %v2205_v4, 4  ;;  %v2210_v20 = vrot.slane %v2208_v63, 5  ;;  %v7327_v51 = vld [vmem:[#allocation2 + $0x5c] sm:$0x1] }
 0x579   : > { %v2816_v11 = vsel %vm7108_vm14, %v2811_v50, %v2815_v9  ;;  %8234 = vst [vmem:[#allocation68_spill] sm:$0xff] %v7327_v51  ;;  %v2216_v21 = vrot.slane %v2214_v24, 5  ;;  %v2220_v50 = vrot.slane %v2218_v6, 4  ;;  %v2224_v9 = vshll.u32 %v7306_v59, 16 }
 0x57a   : > { %v4445_v23 = vcombine.low %v2806_v40, %v2816_v11  ;;  %v2818_v44 = vshrl.u32 %v7314_v19, 16  ;;  %v2211_v0 = vor.u32 %v2210_v20, %v2207_v25  ;;  %v2821_v57 = vshll.u32 %v7314_v19, 16 }
 0x57b   : > { %v2827_v40 = vshll.u32 %v7323_v35, 16  ;;  %v2831_v12 = vshrl.u32 %v7323_v35, 16  ;;  %v4429_v5 = vcombine.low %v2647_v15, %v2650_v47  ;;  %v2221_v4 = vor.u32 %v2220_v50, %v2216_v21  ;;  %v2589_v15 = vld [vmem:[#allocation2 + $0x48] sm:$0xe]  ;;  %v7346_v50 = vld [vmem:[#allocation2 + $0x54] sm:$0xf] }
 0x57c   : > { %3249 = vrot.lane.b32.xlu0 %v4445_v23, %s5585_s24  ;;  %3115 = vrot.lane.b32.xlu1 %v4414_v41, %s5585_s24  ;;  %v2820_v63 = vrot.slane %v2818_v44, 4  ;;  %v2837_v24 = vshll.u32 %v7327_v51, 16  ;;  %v2212_v11 = vrot.slane %v2211_v0, 4  ;;  %v2823_v6 = vrot.slane %v2821_v57, 5  ;;  %v7342_v47 = vld [vmem:[#allocation2 + $0x48] sm:$0xf] }
 0x57d   : > { %v2829_v58 = vrot.slane %v2827_v40, 5  ;;  %v2833_v30 = vrot.slane %v2831_v12, 4  ;;  %v2222_v17 = vrot.slane %v2221_v4, 4  ;;  %v2226_v23 = vrot.slane %v2224_v9, 5  ;;  %v7349_v9 = vld [vmem:[#allocation2 + $0x4c] sm:$0xf] }
 0x57e   : > { %v2217_v41 = vsel %vm7108_vm14, %v2212_v11, %v2216_v21  ;;  %v2824_v25 = vor.u32 %v2823_v6, %v2820_v63  ;;  %v2653_v0 = vrot.slane %v7303_v53, 5  ;;  %v2839_v21 = vrot.slane %v2837_v24, 5  ;;  %v7354_v11 = vld [vmem:[#allocation2 + $0x50] sm:$0x1] }
 0x57f   : > { %v2834_v20 = vor.u32 %v2833_v30, %v2829_v58  ;;  %v2227_v44 = vsel %vm7108_vm14, %v2222_v17, %v2226_v23  ;;  %v4374_v30 = vrot.slane %v2589_v15, 9  ;;  %v2656_v63 = vrot.slane %v7340_v54, 5 }
 0x580   : > { %3177 = vrot.lane.b32.xlu0 %v4429_v5, %s5585_s24  ;;  %v4398_v57 = vcombine.low %v2217_v41, %v2227_v44  ;;  %v2825_v40 = vrot.slane %v2824_v25, 4  ;;  %v7351_v5 = vld [vmem:[#allocation2 + $0x58] sm:$0xf]  ;;  %v2655_v4 = vrot.slane %v2653_v0, 4  ;;  %v2229_v23 = vshrl.u32 %v7342_v47, 16 }
 0x581   : > { %v2835_v12 = vrot.slane %v2834_v20, 4  ;;  %v2232_v24 = vshll.u32 %v7342_v47, 16  ;;  %v7363_v41 = vld [vmem:[#allocation2 + $0x60] sm:$0xf]  ;;  %v4415_v20 = vcombine.low %v7346_v50, %v7351_v5  ;;  %v2238_v15 = vshll.u32 %v7349_v9, 16 }
 0x582   : > { %3043 = vrot.lane.b32.xlu1 %v4398_v57, %s5585_s24  ;;  %v2830_v17 = vsel %vm7108_vm14, %v2825_v40, %v2829_v58  ;;  %8235 = vst [vmem:[#allocation69_spill] sm:$0xff] %v7363_v41  ;;  %v2242_v44 = vshrl.u32 %v7349_v9, 16  ;;  %v7369_v57 = vld [vmem:[#allocation2 + $0x64] sm:$0xf]  ;;  %v2657_v58 = vsel %vm7150_vm2, %v2655_v4, %v2656_v63  ;;  %v2231_v40 = vrot.slane %v2229_v23, 4 }
 0x583   : > { %v2840_v6 = vsel %vm7108_vm14, %v2835_v12, %v2839_v21  ;;  %8236 = vst [vmem:[#allocation70_spill] sm:$0xff] %v7369_v57  ;;  %v2234_v12 = vrot.slane %v2232_v24, 5  ;;  %v2248_v21 = vshll.u32 %v7354_v11, 16  ;;  %v2240_v3 = vrot.slane %v2238_v15, 5 }
 0x584   : > { %v4446_v25 = vcombine.low %v2830_v17, %v2840_v6  ;;  %v2244_v17 = vrot.slane %v2242_v44, 4  ;;  %v7375_v6 = vld [vmem:[#allocation2 + $0x68] sm:$0x1]  ;;  %v2842_v62 = vshrl.u32 %v7363_v41, 16  ;;  %v2845_v39 = vshll.u32 %v7363_v41, 16 }
 0x585   : > { %8237 = vst [vmem:[#allocation71_spill] sm:$0xff] %v7375_v6  ;;  %v2654_v31 = vsel %vm7150_vm2, %v4374_v30, %v2653_v0  ;;  %v2235_v4 = vor.u32 %v2234_v12, %v2231_v40  ;;  %v2851_v63 = vshll.u32 %v7369_v57, 16  ;;  %v2855_v23 = vshrl.u32 %v7369_v57, 16  ;;  %v2590_v0 = vld [vmem:[#allocation2 + $0x54] sm:$0xe] }
 0x586   : > { %3251 = vrot.lane.b32.xlu0 %v4446_v25, %s5585_s24  ;;  %3117 = vrot.lane.b32.xlu1 %v4415_v20, %s5585_s24  ;;  %v4430_v24 = vcombine.low %v2654_v31, %v2657_v58  ;;  %v2245_v25 = vor.u32 %v2244_v17, %v2240_v3  ;;  %v2844_v15 = vrot.slane %v2842_v62, 4  ;;  %v2847_v44 = vrot.slane %v2845_v39, 5  ;;  %v7388_v12 = vld [vmem:[#allocation2 + $0x5c] sm:$0x1]  ;;  %v7390_v31 = vld [vmem:[#allocation2 + $0x54] sm:$0xf] }
 0x587   : > { %v2236_v36 = vrot.slane %v2235_v4, 4  ;;  %v2853_v18 = vrot.slane %v2851_v63, 5  ;;  %v2857_v43 = vrot.slane %v2855_v23, 4  ;;  %v2861_v16 = vshll.u32 %v7375_v6, 16  ;;  %v7392_v39 = vld [vmem:[#allocation2 + $0x58] sm:$0xf] }
 0x588   : > { %v2246_v20 = vrot.slane %v2245_v25, 4  ;;  %v2250_v41 = vrot.slane %v2248_v21, 5  ;;  %v2848_v37 = vor.u32 %v2847_v44, %v2844_v15  ;;  %v7396_v17 = vld [vmem:[#allocation2 + $0x60] sm:$0xf]  ;;  %v2660_v21 = vrot.slane %v7351_v5, 5 }
 0x589   : > { %v2241_v30 = vsel %vm7108_vm14, %v2236_v36, %v2240_v3  ;;  %v2858_v40 = vor.u32 %v2857_v43, %v2853_v18  ;;  %v7399_v4 = vld [vmem:[#allocation2 + $0x5c] sm:$0x1]  ;;  %v2863_v36 = vrot.slane %v2861_v16, 5  ;;  %v7401_v43 = vld [vmem:[#allocation2 + $0x64] sm:$0xf]  ;;  %v4375_v3 = vrot.slane %v2590_v0, 9 }
 0x58a   : > { %3179 = vrot.lane.b32.xlu0 %v4430_v24, %s5585_s24  ;;  %v2251_v62 = vsel %vm7108_vm14, %v2246_v20, %v2250_v41  ;;  %v2849_v58 = vrot.slane %v2848_v37, 4  ;;  %v2662_v25 = vrot.slane %v2660_v21, 4  ;;  %v2663_v15 = vrot.slane %v7388_v12, 5  ;;  %v7407_v41 = vld [vmem:[#allocation2 + $0x6c] sm:$0xf] }
 0x58b   : > { %v4399_v63 = vcombine.low %v2241_v30, %v2251_v62  ;;  %v2859_v23 = vrot.slane %v2858_v40, 4  ;;  %v2253_v37 = vshrl.u32 %v7390_v31, 16  ;;  %8238 = vst [vmem:[#allocation72_spill] sm:$0xff] %v7407_v41  ;;  %v2256_v16 = vshll.u32 %v7390_v31, 16  ;;  %v7415_v30 = vld [vmem:[#allocation2 + $0x70] sm:$0xf] }
 0x58c   : > { %v2854_v24 = vsel %vm7108_vm14, %v2849_v58, %v2853_v18  ;;  %v2262_v20 = vshll.u32 %v7392_v39, 16  ;;  %v2266_v0 = vshrl.u32 %v7392_v39, 16  ;;  %v2664_v40 = vsel %vm7150_vm2, %v2662_v25, %v2663_v15 }
 0x58d   : > { %3045 = vrot.lane.b32.xlu1 %v4399_v63, %s5585_s24  ;;  %v2864_v44 = vsel %vm7108_vm14, %v2859_v23, %v2863_v36  ;;  %v2255_v62 = vrot.slane %v2253_v37, 4  ;;  %v2272_v58 = vshll.u32 %v7399_v4, 16  ;;  %v4416_v63 = vcombine.low %v7396_v17, %v7401_v43 }
 0x58e   : > { %v4447_v18 = vcombine.low %v2854_v24, %v2864_v44  ;;  %v2258_v6 = vrot.slane %v2256_v16, 5  ;;  %v2264_v23 = vrot.slane %v2262_v20, 5  ;;  %v2268_v36 = vrot.slane %v2266_v0, 4 }
 0x58f   : > { %v2661_v57 = vsel %vm7150_vm2, %v4375_v3, %v2660_v21  ;;  %v2866_v24 = vshrl.u32 %v7407_v41, 16  ;;  %v2869_v25 = vshll.u32 %v7407_v41, 16  ;;  %v2875_v15 = vshll.u32 %v7415_v30, 16 }
 0x590   : > { %3253 = vrot.lane.b32.xlu0 %v4447_v18, %s5585_s24  ;;  %v4431_v37 = vcombine.low %v2661_v57, %v2664_v40  ;;  %v2259_v44 = vor.u32 %v2258_v6, %v2255_v62  ;;  %v2269_v16 = vor.u32 %v2268_v36, %v2264_v23  ;;  %v2879_v20 = vshrl.u32 %v7415_v30, 16  ;;  %v7440_v36 = vld [vmem:[#allocation2 + $0x68] sm:$0x1] }
 0x591   : > { %3119 = vrot.lane.b32.xlu1 %v4416_v63, %s5585_s24  ;;  %v2274_v0 = vrot.slane %v2272_v58, 5  ;;  %v2868_v18 = vrot.slane %v2866_v24, 4  ;;  %v2871_v52 = vrot.slane %v2869_v25, 5  ;;  %v2877_v51 = vrot.slane %v2875_v15, 5  ;;  %v2591_v24 = vld [vmem:[#allocation2 + $0x60] sm:$0xe] }
 0x592   : > { %v2260_v21 = vrot.slane %v2259_v44, 4  ;;  %v2270_v3 = vrot.slane %v2269_v16, 4  ;;  %v2881_v28 = vrot.slane %v2879_v20, 4  ;;  %v2885_v8 = vshll.u32 %v7425_v60, 16 }
 0x593   : > { %v2872_v41 = vor.u32 %v2871_v52, %v2868_v18  ;;  %v2667_v38 = vrot.slane %v7401_v43, 5  ;;  %v2313_v62 = vrot.slane %v7096_v1, 5  ;;  %v2276_v52 = vld [vmem:[#allocation2] sm:$0xe]  ;;  %v2316_v16 = vrot.slane %v7119_v49, 5 }
 0x594   : > { %3181 = vrot.lane.b32.xlu0 %v4431_v37, %s5585_s24  ;;  %v2265_v57 = vsel %vm7108_vm14, %v2260_v21, %v2264_v23  ;;  %v2275_v6 = vsel %vm7108_vm14, %v2270_v3, %v2274_v0  ;;  %v2882_v40 = vor.u32 %v2881_v28, %v2877_v51  ;;  %v2887_v15 = vrot.slane %v2885_v8, 5 }
 0x595   : > { %v4400_v58 = vcombine.low %v2265_v57, %v2275_v6  ;;  %v2873_v63 = vrot.slane %v2872_v41, 4  ;;  %v2669_v37 = vrot.slane %v2667_v38, 4  ;;  %v2315_v44 = vrot.slane %v2313_v62, 4  ;;  %v5150_v6 = vld [vmem:[#allocation2 + $0xc] sm:$0xf] }
 0x596   : > { %v2883_v25 = vrot.slane %v2882_v40, 4  ;;  %v4376_v28 = vrot.slane %v2591_v24, 9  ;;  %v2670_v41 = vrot.slane %v7440_v36, 5  ;;  %v4361_v0 = vrot.slane %v2276_v52, 9  ;;  %v5151_v24 = vld [vmem:[#allocation2 + $0x10] sm:$0xf] }
 0x597   : > { %3047 = vrot.lane.b32.xlu1 %v4400_v58, %s5585_s24  ;;  %v2878_v23 = vsel %vm7108_vm14, %v2873_v63, %v2877_v51  ;;  %v2317_v8 = vsel %vm7150_vm2, %v2315_v44, %v2316_v16  ;;  %v2393_v40 = vshrl.u32 %v5150_v6, 16  ;;  %v2396_v58 = vshll.u32 %v5150_v6, 16 }
 0x598   : > { %v2888_v1 = vsel %vm7108_vm14, %v2883_v25, %v2887_v15  ;;  %v2671_v18 = vsel %vm7150_vm2, %v2669_v37, %v2670_v41  ;;  %v2314_v51 = vsel %vm7150_vm2, %v4361_v0, %v2313_v62  ;;  %v2668_v49 = vsel %vm7150_vm2, %v4376_v28, %v2667_v38 }
 0x599   : > { %v4448_v20 = vcombine.low %v2878_v23, %v2888_v1  ;;  %v4401_v21 = vcombine.low %v2314_v51, %v2317_v8  ;;  %v4432_v3 = vcombine.low %v2668_v49, %v2671_v18  ;;  %v2402_v25 = vshll.u32 %v5151_v24, 16 }
 0x59a   : > { %v2406_v15 = vshrl.u32 %v5151_v24, 16  ;;  %v2395_v37 = vrot.slane %v2393_v40, 4  ;;  %v2398_v52 = vrot.slane %v2396_v58, 5  ;;  %v2417_v62 = vshrl.u32 %v7171_v13, 16  ;;  %v2277_v40 = vld [vmem:[#allocation2 + $0xc] sm:$0xe] }
 0x59b   : > { %3255 = vrot.lane.b32.xlu0 %v4448_v20, %s5585_s24  ;;  %v2420_v38 = vshll.u32 %v7171_v13, 16  ;;  %v7462_v44 = vrot.slane %v2402_v25, 5  ;;  %v2489_v16 = vshrl.u32 %v7256_v26, 16  ;;  %v2320_v1 = vrot.slane %v7161_v14, 5 }
 0x59c   : > { %v2408_v23 = vrot.slane %v2406_v15, 4  ;;  %v2492_v28 = vshll.u32 %v7256_v26, 16  ;;  %v2513_v41 = vshrl.u32 %v7301_v61, 16  ;;  %v2516_v20 = vshll.u32 %v7301_v61, 16  ;;  %v7487_v15 = vld [vmem:[#allocation2 + $0x18] sm:$0xe] }
 0x59d   : > { %v2537_v0 = vshrl.u32 %v7346_v50, 16  ;;  %v7470_v8 = vrot.slane %v2417_v62, 4  ;;  %v2540_v18 = vshll.u32 %v7346_v50, 16  ;;  %v2561_v13 = vshrl.u32 %v7396_v17, 16 }
 0x59e   : > { %v2399_v51 = vor.u32 %v2398_v52, %v2395_v37  ;;  %v7474_v49 = vrot.slane %v2420_v38, 5  ;;  %v2409_v26 = vor.u32 %v2408_v23, %v7462_v44  ;;  %v2491_v61 = vrot.slane %v2489_v16, 4  ;;  %v2281_v38 = vld [vmem:[#allocation2 + $0x3c] sm:$0xe]  ;;  %v5152_v23 = vld [vmem:[#allocation2 + $0x18] sm:$0xf] }
 0x59f   : > { %3183 = vrot.lane.b32.xlu0 %v4432_v3, %s5585_s24  ;;  %v2564_v3 = vshll.u32 %v7396_v17, 16  ;;  %v2412_v6 = vshll.u32 %v7139_v32, 16  ;;  %v2322_v58 = vrot.slane %v2320_v1, 4  ;;  %v7481_v50 = vrot.slane %v2513_v41, 4  ;;  %v7496_v16 = vld [vmem:[#allocation2 + $0x1c] sm:$0xf] }
 0x5a0   : > { %v7483_v24 = vrot.slane %v2516_v20, 5  ;;  %v7485_v25 = vrot.slane %v2537_v0, 4  ;;  %v7489_v37 = vrot.slane %v2540_v18, 5  ;;  %v7491_v17 = vrot.slane %v2561_v13, 4  ;;  %8240 = vst [vmem:[#allocation74_spill] sm:$0xff] %v7496_v16 }
 0x5a1   : > { %v2400_v52 = vrot.slane %v2399_v51, 4  ;;  %v2323_v62 = vrot.slane %v7173_v2, 5  ;;  %v7494_v32 = vrot.slane %v2564_v3, 5  ;;  %v2410_v41 = vrot.slane %v2409_v26, 4  ;;  %v7499_v0 = vld [vmem:[#allocation2] sm:$0xf] }
 0x5a2   : > { %v4362_v20 = vrot.slane %v2277_v40, 9  ;;  %v2414_v13 = vrot.slane %v2412_v6, 5  ;;  %v2498_v40 = vshll.u32 %v7258_v46, 16  ;;  %v2282_v51 = vld [vmem:[#allocation2 + $0x48] sm:$0xe] }
 0x5a3   : > { %v7507_v2 = vsel %vm7150_vm2, %v2322_v58, %v2323_v62  ;;  %v2405_v6 = vsel %vm7108_vm14, %v2400_v52, %v7462_v44  ;;  %v2508_v62 = vshll.u32 %v7292_v42, 16  ;;  %v4367_v60 = vrot.slane %v2282_v51, 9 }
 0x5a4   : > { %v7513_v26 = vsel %vm7150_vm2, %v4362_v20, %v2320_v1  ;;  %v2415_v1 = vsel %vm7108_vm14, %v2410_v41, %v2414_v13  ;;  %v2426_v20 = vshll.u32 %v7157_v27, 16  ;;  %v2502_v13 = vshrl.u32 %v7258_v46, 16 }
 0x5a5   : > { %v3106_v57 = vpop.permute.xlu0 %3105  ;;  %v2500_v44 = vrot.slane %v2498_v40, 5  ;;  %v2510_v42 = vrot.slane %v2508_v62, 5  ;;  %v2522_v51 = vshll.u32 %v7303_v53, 16  ;;  %v2283_v62 = vld [vmem:[#allocation2 + $0x54] sm:$0xe] }
 0x5a6   : > { %v3315_v63 = vsel %vm582_vm0, %v4401_v21, %v3106_v57  ;;  %v7501_v57 = vld [vmem:[#allocation2 + $0x4] sm:$0xf]  ;;  %v2348_v21 = vrot.slane %v7299_v29, 5 }
 0x5a7   : > { %3753 = vmatprep.mubr.bf16.mxu0 %v3315_v63  ;;  %v2494_v63 = vrot.slane %v2492_v28, 5  ;;  %v4433_v28 = vcombine.low %v5152_v23, %v7496_v16  ;;  %v4366_v23 = vrot.slane %v2281_v38, 9  ;;  %v2504_v38 = vrot.slane %v2502_v13, 4 }
 0x5a9   : > { %v2495_v52 = vor.u32 %v2494_v63, %v2491_v61  ;;  %v7536_v41 = vsel %vm7150_vm2, %v4366_v23, %v2348_v21  ;;  %v2355_v61 = vrot.slane %v7349_v9, 5  ;;  %v4417_v63 = vcombine.low %v2405_v6, %v2415_v1  ;;  %v4956_v6 = vld [vmem:[#allocation15 + $0x108] sm:$0xff]  }
 0x5aa   : > { %v2505_v16 = vor.u32 %v2504_v38, %v2500_v44  ;;  %v2519_v1 = vor.u32 %v7483_v24, %v7481_v50 }
 0x5ab   : > { %v2496_v58 = vrot.slane %v2495_v52, 4  ;;  %v2357_v23 = vrot.slane %v2355_v61, 4  ;;  %v2524_v52 = vrot.slane %v2522_v51, 5 }
 0x5ac   : > { %v2520_v24 = vrot.slane %v2519_v1, 4 }
 0x5ad   : > { %v2501_v46 = vsel %vm7108_vm14, %v2496_v58, %v2500_v44  ;;  %v2532_v58 = vshll.u32 %v7340_v54, 16  ;;  %v2362_v44 = vrot.slane %v7392_v39, 5 }
 0x5af   : > { %v2534_v1 = vrot.slane %v2532_v58, 5  ;;  %v2550_v58 = vshrl.u32 %v7351_v5, 16 }
 0x5b5   : > { %v3242_v3 = vpop.permute.xlu1 %3241 }
 0x5b6   : > { %v3379_v18 = vsel %vm582_vm0, %v4433_v28, %v3242_v3  ;;  %v2351_v28 = vrot.slane %v7306_v59, 5  ;;  %v2350_v3 = vrot.slane %v2348_v21, 4  ;;  %v7547_v21 = vrot.slane %v2426_v20, 5 }
 0x5b7   : > { %3850 = vmatprep.mubr.bf16.mxu1 %v3379_v18  ;;  %v2430_v18 = vshrl.u32 %v7157_v27, 16  ;;  %v2526_v20 = vshrl.u32 %v7303_v53, 16 }
 0x5b8   : > { %v7542_v59 = vsel %vm7150_vm2, %v2350_v3, %v2351_v28  ;;  %v2358_v28 = vrot.slane %v7354_v11, 5  ;;  %v2506_v3 = vrot.slane %v2505_v16, 4  ;;  %v7563_v11 = vsel %vm7150_vm2, %v4367_v60, %v2355_v61 }
 0x5b9   : > { %v2528_v53 = vrot.slane %v2526_v20, 4  ;;  %v2432_v54 = vrot.slane %v2430_v18, 4  ;;  %v4368_v60 = vrot.slane %v2283_v62, 9  ;;  %v2364_v61 = vrot.slane %v2362_v44, 4  ;;  %v5156_v62 = vld [vmem:[#allocation15 + $0x100] sm:$0xff]  }
 0x5ba   : > { %v7567_v38 = vsel %vm7150_vm2, %v2357_v23, %v2358_v28  ;;  %v2511_v16 = vsel %vm7108_vm14, %v2506_v3, %v2510_v42  ;;  %v8241_v23 = vcombine.low %v7499_v0, %v7501_v57  ;;  %v2525_v18 = vsel %vm7108_vm14, %v2520_v24, %v2524_v52  ;;  %v4961_v3 = vld [vmem:[#allocation15 + $0x110] sm:$0xff]  }
 0x5bb   : > { %v7578_v27 = vcombine.low %v2501_v46, %v2511_v16  ;;  %v2529_v50 = vor.u32 %v2528_v53, %v2524_v52  ;;  %v2365_v42 = vrot.slane %v7399_v4, 5  ;;  %v4392_v20 = vcombine.low %v7390_v31, %v7392_v39  ;;  %v5176_v31 = vld [vmem:[#allocation2 + $0x50] sm:$0x1] }
 0x5bc   : > { %v2543_v0 = vor.u32 %v7489_v37, %v7485_v25  ;;  %v2546_v46 = vshll.u32 %v7351_v5, 16  ;;  %v2433_v4 = vor.u32 %v2432_v54, %v7547_v21  ;;  %v7594_v24 = vsel %vm7150_vm2, %v4368_v60, %v2362_v44  ;;  %v8244_v60 = vld [vmem:[#allocation61_spill] sm:$0xff] }
 0x5bd   : > { %v2530_v57 = vrot.slane %v2529_v50, 4  ;;  %v7598_v50 = vsel %vm7150_vm2, %v2364_v61, %v2365_v42  ;;  %v8242_v25 = vcombine.low %v7513_v26, %v7507_v2  ;;  %v2556_v52 = vshll.u32 %v7388_v12, 16 }
 0x5be   : > { %v4408_v37 = vcombine.low %v7594_v24, %v7598_v50  ;;  %v2544_v53 = vrot.slane %v2543_v0, 4  ;;  %v2552_v54 = vrot.slane %v2550_v58, 4  ;;  %v8243_v16 = vrot.slane %v7205_v56, 5 }
 0x5bf   : > { %v2423_v26 = vor.u32 %v7474_v49, %v7470_v8  ;;  %v2436_v61 = vshll.u32 %v8244_v60, 16  ;;  %v2567_v42 = vor.u32 %v7494_v32, %v7491_v17  ;;  %v2558_v8 = vrot.slane %v2556_v52, 5 }
 0x5c0   : > { %v2329_v2 = vrot.slane %v8243_v16, 4  ;;  %v2574_v49 = vshrl.u32 %v7401_v43, 16  ;;  %v2580_v32 = vshll.u32 %v7440_v36, 16  ;;  %v8250_v56 = vshrl.u32 %v7202_v34, 16 }
 0x5c1   : > { %v3034_v13 = vpop.permute.xlu1 %3033  ;;  %v2438_v52 = vrot.slane %v2436_v61, 5  ;;  %v2954_v39 = vrot.slane %v5176_v31, 5 }
 0x5c2   : > { %v3170_v40 = vpop.permute.xlu0 %3169  ;;  %v3283_v28 = vsel %vm582_vm0, %v8241_v23, %v3034_v13  ;;  %v2548_v13 = vrot.slane %v2546_v46, 5  ;;  %v8245_v23 = vld [vmem:[#allocation72_spill] sm:$0xff]  ;;  %v2576_v17 = vrot.slane %v2574_v49, 4  ;;  %v2582_v49 = vrot.slane %v2580_v32, 5 }
 0x5c3   : > { %3754 = vmatmul.mubr.bf16.vlgmr.msra.gmra.mrb[0].mxu0 %v3283_v28  ;;  %v3347_v51 = vsel %vm582_vm0, %v4417_v63, %v3170_v40  ;;  %v2330_v40 = vrot.slane %v7209_v7, 5  ;;  %v2535_v7 = vsel %vm7108_vm14, %v2530_v57, %v2534_v1  ;;  %v4440_v28 = vcombine.low %v8245_v23, %v7415_v30  ;;  %v5157_v1 = vld [vmem:[#allocation2 + $0x28] sm:$0xf] }
 0x5c4   : > { %3851 = vmatmul.mubr.bf16.vlgmr.msra.gmra.mrb[0].mxu1 %v3347_v51  ;;  %4677 = vmatpush3.bf16.msra.mxu0 %v5156_v62  ;;  %v7609_v44 = vcombine.low %v2525_v18, %v2535_v7  ;;  %v2450_v12 = vshll.u32 %v5157_v1, 16  ;;  %v4966_v51 = vld [vmem:[#allocation15 + $0x118] sm:$0xff]   ;;  %v2553_v18 = vor.u32 %v2552_v54, %v2548_v13  ;;  %v2434_v57 = vrot.slane %v2433_v4, 4 }
 0x5c5   : > { %v3108_v63 = vpop.permute.xlu1 %3107  ;;  %4704 = vmatpush3.bf16.msra.mxu1 %v5156_v62  ;;  %4678 = vmatprep.subr.bf16.mxu0 %v4956_v6  ;;  %v2570_v62 = vshll.u32 %v7401_v43, 16  ;;  %v2454_v0 = vshrl.u32 %v5157_v1, 16  ;;  %v2549_v46 = vsel %vm7108_vm14, %v2544_v53, %v2548_v13  ;;  %v2424_v7 = vrot.slane %v2423_v26, 4 }
 0x5c6   : > { %v3319_v5 = vsel %vm582_vm0, %v8242_v25, %v3108_v63  ;;  %4701 = vmatprep.subr.bf16.mxu1 %v4956_v6  ;;  %v2554_v58 = vrot.slane %v2553_v18, 4  ;;  %v2568_v63 = vrot.slane %v2567_v42, 4  ;;  %v8246_v4 = vcombine.low %v7143_v22, %v7161_v14  ;;  %v8249_v22 = vld [vmem:[#allocation62_spill] sm:$0xff] }
 0x5c7   : > { %3761 = vmatprep.mubr.bf16.mxu0 %v3319_v5  ;;  %v2331_v5 = vsel %vm7150_vm2, %v2329_v2, %v2330_v40  ;;  %v8247_v40 = vmov %v8243_v16  ;;  %v8248_v54 = vrot.slane %v7487_v15, 9  ;;  %v2334_v14 = vrot.slane %v8249_v22, 5 }
 0x5c8   : > { %4679 = vmatpush3.bf16.msra.mxu0 %v4956_v6  ;;  %v2559_v53 = vsel %vm7108_vm14, %v2554_v58, %v2558_v8  ;;  %v2439_v60 = vsel %vm7108_vm14, %v2434_v57, %v2438_v52  ;;  %v7646_v61 = vrot.slane %v2450_v12, 5  ;;  %v2456_v1 = vrot.slane %v2454_v0, 4  ;;  %v8254_v52 = vld [vmem:[#allocation68_spill] sm:$0xff] }
 0x5c9   : > { %4705 = vmatpush3.bf16.msra.mxu1 %v4956_v6  ;;  %4680 = vmatprep.subr.bf16.mxu0 %v4961_v3  ;;  %v2572_v6 = vrot.slane %v2570_v62, 5  ;;  %v2328_v36 = vsel %vm7150_vm2, %v8248_v54, %v8247_v40  ;;  %v7642_v16 = vcombine.low %v2549_v46, %v2559_v53  ;;  %v2443_v15 = vrot.slane %v8250_v56, 4  ;;  %v5158_v54 = vld [vmem:[#allocation2 + $0x2c] sm:$0x1] }
 0x5ca   : > { %4702 = vmatprep.subr.bf16.mxu1 %v4961_v3  ;;  %v4403_v26 = vcombine.low %v2328_v36, %v2331_v5  ;;  %v8251_v42 = vcombine.low %v7169_v48, %v7180_v45  ;;  %v8252_v46 = vshll.u32 %v7202_v34, 16  ;;  %v2958_v57 = vrot.slane %v7323_v35, 5  ;;  %v2279_v5 = vld [vmem:[#allocation2 + $0x24] sm:$0xe] }
 0x5cb   : > { %v3036_v25 = vpop.permute.xlu1 %3035  ;;  %v2573_v13 = vsel %vm7108_vm14, %v2568_v63, %v2572_v6  ;;  %v2429_v0 = vsel %vm7108_vm14, %v2424_v7, %v7547_v21  ;;  %v2894_v63 = vld [vmem:[#allocation2 + $0x54] sm:$0xe]  ;;  %v2457_v32 = vor.u32 %v2456_v1, %v7646_v61  ;;  %v2961_v21 = vrot.slane %v8254_v52, 5  ;;  %v8255_v7 = vld [vmem:[#allocation64_spill] sm:$0xff] }
 0x5cc   : > { %4681 = vmatpush3.bf16.msra.mxu0 %v4961_v3  ;;  %v3287_v43 = vsel %vm582_vm0, %v8246_v4, %v3036_v25  ;;  %v2446_v58 = vrot.slane %v8252_v46, 5  ;;  %v4418_v48 = vcombine.low %v2429_v0, %v2439_v60  ;;  %v2337_v53 = vrot.slane %v8255_v7, 5 }
 0x5cd   : > { %4706 = vmatpush3.bf16.msra.mxu1 %v4961_v3  ;;  %4682 = vmatprep.subr.bf16.mxu0 %v4966_v51  ;;  %v2577_v3 = vor.u32 %v2576_v17, %v2572_v6  ;;  %v8253_v6 = vld [vmem:[#allocation63_spill] sm:$0xff]  ;;  %v2336_v17 = vrot.slane %v2334_v14, 4  ;;  %v2460_v36 = vshll.u32 %v5158_v54, 16  ;;  %v4382_v22 = vrot.slane %v2894_v63, 9  ;;  %v2280_v54 = vld [vmem:[#allocation2 + $0x30] sm:$0xe] }
 0x5ce   : > { %3762 = vmatmul.mubr.bf16.gmra.mrb[4].mxu0 %v3287_v43  ;;  %4703 = vmatprep.subr.bf16.mxu1 %v4966_v51  ;;  %v2465_v25 = vshrl.u32 %v8253_v6, 16  ;;  %v2468_v43 = vshll.u32 %v8253_v6, 16  ;;  %v2447_v40 = vor.u32 %v2446_v58, %v2443_v15  ;;  %v4364_v1 = vrot.slane %v2279_v5, 9 }
 0x5cf   : > { %v3244_v2 = vpop.permute.xlu0 %3243  ;;  %v3110_v18 = vpop.permute.xlu1 %3109  ;;  %v2578_v8 = vrot.slane %v2577_v3, 4  ;;  %v2960_v3 = vrot.slane %v2958_v57, 4  ;;  %v2462_v63 = vrot.slane %v2460_v36, 5 }
 0x5d0   : > { %v3383_v62 = vsel %vm582_vm0, %v8251_v42, %v3244_v2  ;;  %4683 = vmatpush3.bf16.msra.mxu0 %v4966_v51  ;;  %v3323_v12 = vsel %vm582_vm0, %v4403_v26, %v3110_v18  ;;  %v5159_v2 = vld [vmem:[#allocation2 + $0x18] sm:$0xf]  ;;  %v5160_v26 = vld [vmem:[#allocation2 + $0x1c] sm:$0xf]  ;;  %v2467_v46 = vrot.slane %v2465_v25, 4  ;;  %v2470_v0 = vrot.slane %v2468_v43, 5 }
 0x5d1   : > { %3858 = vmatprep.mubr.bf16.mxu1 %v3383_v62  ;;  %4707 = vmatpush3.bf16.msra.mxu1 %v4966_v51  ;;  %v2583_v45 = vsel %vm7108_vm14, %v2578_v8, %v2582_v49  ;;  %v4387_v60 = vcombine.low %v5159_v2, %v5160_v26  ;;  %v2338_v62 = vsel %vm7150_vm2, %v2336_v17, %v2337_v53  ;;  %v2458_v8 = vrot.slane %v2457_v32, 4  ;;  %v8256_v43 = vld [vmem:[#allocation66_spill] sm:$0xff] }
 0x5d2   : > { %3769 = vmatprep.mubr.bf16.mxu0 %v3323_v12  ;;  %v7665_v4 = vcombine.low %v2573_v13, %v2583_v45  ;;  %v5161_v13 = vld [vmem:[#allocation2 + $0x34] sm:$0xf]  ;;  %v7675_v49 = vsel %vm7150_vm2, %v4382_v22, %v2958_v57  ;;  %v7679_v15 = vsel %vm7150_vm2, %v2960_v3, %v2961_v21  ;;  %v2448_v45 = vrot.slane %v2447_v40, 4  ;;  %v5162_v57 = vld [vmem:[#allocation2 + $0x30] sm:$0xf] }
 0x5d3   : > { %v3172_v34 = vpop.permute.xlu0 %3171  ;;  %v2474_v56 = vshll.u32 %v5161_v13, 16  ;;  %v2478_v18 = vshrl.u32 %v5161_v13, 16  ;;  %v4454_v12 = vcombine.low %v7675_v49, %v7679_v15  ;;  %v2463_v21 = vsel %vm7108_vm14, %v2458_v8, %v2462_v63 }
 0x5d4   : > { %v3351_v51 = vsel %vm582_vm0, %v4418_v48, %v3172_v34  ;;  %v2335_v48 = vsel %vm7150_vm2, %v4364_v1, %v2334_v14  ;;  %v7686_v34 = vld [vmem:[#allocation2 + $0x34] sm:$0xf]  ;;  %v2453_v53 = vsel %vm7108_vm14, %v2448_v45, %v7646_v61  ;;  %v2471_v36 = vor.u32 %v2470_v0, %v2467_v46 }
 0x5d5   : > { %3859 = vmatmul.mubr.bf16.gmra.mrb[4].mxu1 %v3351_v51  ;;  %v3038_v42 = vpop.permute.xlu1 %3037  ;;  %v4404_v6 = vcombine.low %v2335_v48, %v2338_v62  ;;  %v4435_v5 = vcombine.low %v5162_v57, %v7686_v34  ;;  %v2476_v17 = vrot.slane %v2474_v56, 5  ;;  %v2480_v25 = vrot.slane %v2478_v18, 4  ;;  %v8258_v56 = vld [vmem:[#allocation67_spill] sm:$0xff]  ;;  %v7705_v57 = vld [vmem:[#allocation2 + $0x40] sm:$0xf] }
 0x5d6   : > { %v3291_v58 = vsel %vm582_vm0, %v4387_v60, %v3038_v42  ;;  %v2341_v51 = vrot.slane %v8256_v43, 5  ;;  %v4419_v40 = vcombine.low %v2453_v53, %v2463_v21  ;;  %v8257_v60 = vld [vmem:[#allocation65_spill] sm:$0xff]  ;;  %v4365_v13 = vrot.slane %v2280_v54, 9  ;;  %v5164_v42 = vld [vmem:[#allocation2 + $0x24] sm:$0xf] }
 0x5d7   : > { %3770 = vmatmul.mubr.bf16.gmra.mrb[8].mxu0 %v3291_v58  ;;  %v2481_v22 = vor.u32 %v2480_v25, %v2476_v17  ;;  %v2484_v1 = vshll.u32 %v8257_v60, 16  ;;  %v2344_v18 = vrot.slane %v8258_v56, 5  ;;  %v5165_v62 = vld [vmem:[#allocation2 + $0x28] sm:$0xf]  ;;  %v2472_v58 = vrot.slane %v2471_v36, 4 }
 0x5d8   : > { %v2343_v2 = vrot.slane %v2341_v51, 4  ;;  %v4388_v8 = vcombine.low %v5164_v42, %v5165_v62  ;;  %v2342_v63 = vsel %vm7150_vm2, %v4365_v13, %v2341_v51  ;;  %v5168_v54 = vld [vmem:[#allocation2 + $0x30] sm:$0xf]  ;;  %v5169_v36 = vld [vmem:[#allocation2 + $0x34] sm:$0xf]  ;;  %v8259_v13 = vcombine.low %v7536_v41, %v7542_v59 }
 0x5d9   : > { %v3112_v32 = vpop.permute.xlu1 %3111  ;;  %v3246_v52 = vpop.permute.xlu0 %3245  ;;  %v2482_v48 = vrot.slane %v2481_v22, 4  ;;  %v2486_v45 = vrot.slane %v2484_v1, 5  ;;  %v4389_v22 = vcombine.low %v5168_v54, %v5169_v36  ;;  %v8261_v59 = vcombine.low %v7314_v19, %v7323_v35  ;;  %v8264_v35 = vld [vmem:[#allocation74_spill] sm:$0xff] }
 0x5da   : > { %v3327_v7 = vsel %vm582_vm0, %v4404_v6, %v3112_v32  ;;  %v3387_v14 = vsel %vm582_vm0, %v4435_v5, %v3246_v52  ;;  %v2345_v46 = vsel %vm7150_vm2, %v2343_v2, %v2344_v18  ;;  %v5166_v6 = vld [vmem:[#allocation2 + $0x3c] sm:$0xf]  ;;  %v2477_v52 = vsel %vm7108_vm14, %v2472_v58, %v2476_v17  ;;  %v7716_v2 = vld [vmem:[#allocation2 + $0x4c] sm:$0xf] }
 0x5db   : > { %3777 = vmatprep.mubr.bf16.mxu0 %v3327_v7  ;;  %3866 = vmatprep.mubr.bf16.mxu1 %v3387_v14  ;;  %v4436_v5 = vcombine.low %v5166_v6, %v7705_v57  ;;  %v4405_v32 = vcombine.low %v2342_v63, %v2345_v46  ;;  %v2487_v21 = vsel %vm7108_vm14, %v2482_v48, %v2486_v45  ;;  %v2923_v6 = vrot.slane %v8264_v35, 5 }
 0x5dc   : > { %v4420_v51 = vcombine.low %v2477_v52, %v2487_v21  ;;  %v8260_v58 = vcombine.low %v7297_v55, %v7299_v29  ;;  %v8263_v63 = vcombine.low %v7342_v47, %v7349_v9  ;;  %v2889_v47 = vld [vmem:[#allocation2 + $0x18] sm:$0xe]  ;;  %v2937_v24 = vrot.slane %v7686_v34, 5  ;;  %v5174_v34 = vld [vmem:[#allocation2 + $0x2c] sm:$0x1] }
 0x5dd   : > { %v3174_v3 = vpop.permute.xlu0 %3173  ;;  %v2925_v21 = vrot.slane %v2923_v6, 4  ;;  %v2951_v50 = vrot.slane %v7716_v2, 5 }
 0x5de   : > { %v3355_v26 = vsel %vm582_vm0, %v4419_v40, %v3174_v3 }
 0x5df   : > { %3867 = vmatmul.mubr.bf16.gmra.mrb[8].mxu1 %v3355_v26  ;;  %v4437_v26 = vcombine.low %v5170_v10, %v7716_v2  ;;  %v2893_v10 = vld [vmem:[#allocation2 + $0x48] sm:$0xe] }
 0x5e0   : > { %v3040_v61 = vpop.permute.xlu1 %3039 }
 0x5e1   : > { %v3295_v0 = vsel %vm582_vm0, %v4388_v8, %v3040_v61 }
 0x5e2   : > { %3778 = vmatmul.mubr.bf16.gmra.mrb[12].mxu0 %v3295_v0  ;;  %v8262_v0 = vcombine.low %v7563_v11, %v7567_v38  ;;  %v8266_v11 = vld [vmem:[#allocation69_spill] sm:$0xff] }
 0x5e3   : > { %v3248_v25 = vpop.permute.xlu0 %3247 }
 0x5e4   : > { %v3114_v43 = vpop.permute.xlu1 %3113  ;;  %v3391_v7 = vsel %vm582_vm0, %v4436_v5, %v3248_v25  ;;  %v8265_v5 = vld [vmem:[#allocation70_spill] sm:$0xff] }
 0x5e5   : > { %v3331_v14 = vsel %vm582_vm0, %v4405_v32, %v3114_v43  ;;  %3874 = vmatprep.mubr.bf16.mxu1 %v3391_v7  ;;  %v4439_v38 = vcombine.low %v8266_v11, %v8265_v5  ;;  %v5172_v43 = vld [vmem:[#allocation2 + $0x20] sm:$0x1] }
 0x5e6   : > { %3785 = vmatprep.mubr.bf16.mxu0 %v3331_v14  ;;  %v2926_v7 = vrot.slane %v5172_v43, 5  ;;  %v5173_v14 = vld [vmem:[#allocation2 + $0x28] sm:$0xf]  ;;  %v2896_v43 = vld [vmem:[#allocation2 + $0x6c] sm:$0xe] }
 0x5e7   : > { %v3176_v53 = vpop.permute.xlu0 %3175 }
 0x5e8   : > { %v3359_v40 = vsel %vm582_vm0, %v4420_v51, %v3176_v53  ;;  %v2930_v51 = vrot.slane %v5173_v14, 5  ;;  %v2927_v54 = vsel %vm7150_vm2, %v2925_v21, %v2926_v7 }
 0x5e9   : > { %3875 = vmatmul.mubr.bf16.gmra.mrb[12].mxu1 %v3359_v40  ;;  %v4377_v40 = vrot.slane %v2889_v47, 9 }
 0x5ea   : > { %v3042_v3 = vpop.permute.xlu1 %3041 }
 0x5eb   : > { %v3299_v17 = vsel %vm582_vm0, %v4389_v22, %v3042_v3  ;;  %v2924_v36 = vsel %vm7150_vm2, %v4377_v40, %v2923_v6 }
 0x5ec   : > { %3786 = vmatmul.mubr.bf16.gmra.mrb[16].mxu0 %v3299_v17  ;;  %v4449_v3 = vcombine.low %v2924_v36, %v2927_v54  ;;  %v2891_v17 = vld [vmem:[#allocation2 + $0x30] sm:$0xe] }
 0x5ee   : > { %v3116_v60 = vpop.permute.xlu1 %3115  ;;  %v3250_v1 = vpop.permute.xlu0 %3249 }
 0x5ef   : > { %v3335_v56 = vsel %vm582_vm0, %v8259_v13, %v3116_v60  ;;  %v3395_v18 = vsel %vm582_vm0, %v4437_v26, %v3250_v1  ;;  %v2890_v26 = vld [vmem:[#allocation2 + $0x24] sm:$0xe]  ;;  %v2939_v60 = vrot.slane %v2937_v24, 4  ;;  %v2953_v1 = vrot.slane %v2951_v50, 4 }
 0x5f0   : > { %3793 = vmatprep.mubr.bf16.mxu0 %v3335_v56  ;;  %3882 = vmatprep.mubr.bf16.mxu1 %v3395_v18  ;;  %v2933_v13 = vrot.slane %v5174_v34, 5  ;;  %v4379_v56 = vrot.slane %v2891_v17, 9  ;;  %v5175_v18 = vld [vmem:[#allocation2 + $0x38] sm:$0x1] }
 0x5f2   : > { %v3178_v42 = vpop.permute.xlu0 %3177 }
 0x5f3   : > { %v3363_v62 = vsel %vm582_vm0, %v7578_v27, %v3178_v42  ;;  %v2940_v42 = vrot.slane %v5175_v18, 5 }
 0x5f4   : > { %3883 = vmatmul.mubr.bf16.gmra.mrb[16].mxu1 %v3363_v62  ;;  %v3044_v8 = vpop.permute.xlu1 %3043  ;;  %v4381_v62 = vrot.slane %v2893_v10, 9 }
 0x5f5   : > { %v3303_v48 = vsel %vm582_vm0, %v8260_v58, %v3044_v8  ;;  %v4378_v8 = vrot.slane %v2890_v26, 9 }
 0x5f6   : > { %3794 = vmatmul.mubr.bf16.gmra.mrb[20].mxu0 %v3303_v48  ;;  %v2944_v48 = vrot.slane %v7705_v57, 5  ;;  %v2952_v57 = vsel %vm7150_vm2, %v4381_v62, %v2951_v50 }
 0x5f7   : > { %v2931_v23 = vsel %vm7150_vm2, %v4378_v8, %v2930_v51 }
 0x5f8   : > { %v3252_v61 = vpop.permute.xlu0 %3251  ;;  %v3118_v41 = vpop.permute.xlu1 %3117 }
 0x5f9   : > { %v3399_v46 = vsel %vm582_vm0, %v8261_v59, %v3252_v61  ;;  %v3339_v27 = vsel %vm582_vm0, %v8262_v0, %v3118_v41  ;;  %v2941_v61 = vsel %vm7150_vm2, %v2939_v60, %v2940_v42  ;;  %v2955_v41 = vsel %vm7150_vm2, %v2953_v1, %v2954_v39 }
 0x5fa   : > { %3890 = vmatprep.mubr.bf16.mxu1 %v3399_v46  ;;  %3801 = vmatprep.mubr.bf16.mxu0 %v3339_v27  ;;  %v2965_v59 = vrot.slane %v8265_v5, 5  ;;  %v2938_v0 = vsel %vm7150_vm2, %v4379_v56, %v2937_v24  ;;  %v2892_v27 = vld [vmem:[#allocation2 + $0x3c] sm:$0xe]  ;;  %v5177_v5 = vld [vmem:[#allocation2 + $0x44] sm:$0x1] }
 0x5fb   : > { %v4380_v6 = vrot.slane %v2892_v27, 9  ;;  %v2947_v11 = vrot.slane %v5177_v5, 5 }
 0x5fc   : > { %v3180_v45 = vpop.permute.xlu0 %3179  ;;  %v2967_v35 = vrot.slane %v2965_v59, 4 }
 0x5fd   : > { %v3367_v55 = vsel %vm582_vm0, %v7609_v44, %v3180_v45  ;;  %v2945_v21 = vsel %vm7150_vm2, %v4380_v6, %v2944_v48 }
 0x5fe   : > { %3891 = vmatmul.mubr.bf16.gmra.mrb[20].mxu1 %v3367_v55  ;;  %v4451_v55 = vcombine.low %v2938_v0, %v2941_v61 }
 0x5ff   : > { %v3046_v29 = vpop.permute.xlu1 %3045 }
 0x600   : > { %v3307_v19 = vsel %vm582_vm0, %v8263_v63, %v3046_v29  ;;  %v4453_v29 = vcombine.low %v2952_v57, %v2955_v41  ;;  %v2946_v63 = vrot.slane %v2944_v48, 4 }
 0x601   : > { %3802 = vmatmul.mubr.bf16.gmra.mrb[24].mxu0 %v3307_v19  ;;  %v2895_v19 = vld [vmem:[#allocation2 + $0x60] sm:$0xe] }
 0x602   : > { %v3254_v25 = vpop.permute.xlu0 %3253 }
 0x603   : > { %v3120_v32 = vpop.permute.xlu1 %3119  ;;  %v3403_v52 = vsel %vm582_vm0, %v4439_v38, %v3254_v25  ;;  %v4383_v38 = vrot.slane %v2895_v19, 9  ;;  %v8267_v25 = vld [vmem:[#allocation71_spill] sm:$0xff] }
 0x604   : > { %v3343_v44 = vsel %vm582_vm0, %v4408_v37, %v3120_v32  ;;  %3898 = vmatprep.mubr.bf16.mxu1 %v3403_v52  ;;  %v2968_v32 = vrot.slane %v8267_v25, 5  ;;  %v2972_v52 = vrot.slane %v7415_v30, 5  ;;  %v4384_v30 = vrot.slane %v2896_v43, 9 }
 0x605   : > { %3809 = vmatprep.mubr.bf16.mxu0 %v3343_v44 }
 0x606   : > { %v3182_v9 = vpop.permute.xlu0 %3181  ;;  %v2969_v44 = vsel %vm7150_vm2, %v2967_v35, %v2968_v32  ;;  %v2974_v14 = vrot.slane %v2972_v52, 4  ;;  %v2973_v54 = vsel %vm7150_vm2, %v4384_v30, %v2972_v52 }
 0x607   : > { %v3371_v53 = vsel %vm582_vm0, %v7642_v16, %v3182_v9  ;;  %v2932_v16 = vrot.slane %v2930_v51, 4  ;;  %v2966_v9 = vsel %vm7150_vm2, %v4383_v38, %v2965_v59  ;;  %v8268_v51 = vld [vmem:[#allocation73_spill] sm:$0xff] }
 0x608   : > { %3899 = vmatmul.mubr.bf16.gmra.mrb[24].mxu1 %v3371_v53  ;;  %v4455_v7 = vcombine.low %v2966_v9, %v2969_v44  ;;  %v2975_v53 = vrot.slane %v8268_v51, 5 }
 0x609   : > { %v3048_v37 = vpop.permute.xlu1 %3047  ;;  %v2934_v58 = vsel %vm7150_vm2, %v2932_v16, %v2933_v13 }
 0x60a   : > { %v3311_v22 = vsel %vm582_vm0, %v4392_v20, %v3048_v37  ;;  %v2976_v40 = vsel %vm7150_vm2, %v2974_v14, %v2975_v53 }
 0x60b   : > { %3810 = vmatmul.mubr.bf16.gmra.mrb[28].mxu0 %v3311_v22  ;;  %v4456_v24 = vcombine.low %v2973_v54, %v2976_v40 }
 0x60c   : > { %4684 = vmatprep.mubr.msk.bf16.mxu0 %vm582_vm0, %v4449_v3 }
 0x60d   : > { %v3256_v2 = vpop.permute.xlu0 %3255 }
 0x60e   : > { %v3407_v20 = vsel %vm582_vm0, %v4440_v28, %v3256_v2  ;;  %v4450_v28 = vcombine.low %v2931_v23, %v2934_v58 }
 0x60f   : > { %3906 = vmatprep.mubr.bf16.mxu1 %v3407_v20 }
 0x611   : > { %v3184_v46 = vpop.permute.xlu0 %3183 }
 0x612   : > { %v3375_v45 = vsel %vm582_vm0, %v7665_v4, %v3184_v46  ;;  %v2948_v4 = vsel %vm7150_vm2, %v2946_v63, %v2947_v11 }
 0x613   : > { %3907 = vmatmul.mubr.bf16.gmra.mrb[28].mxu1 %v3375_v45  ;;  %4685 = vmatmul.mubr.msk.bf16.vlgmr.msra.gmra.mrb[32].mxu0 %vm582_vm0, %v4450_v28  ;;  %v4452_v47 = vcombine.low %v2945_v21, %v2948_v4 }
 0x614   : > { %4688 = vmatprep.mubr.msk.bf16.mxu0 %vm582_vm0, %v4451_v55  ;;  %4692 = vmatprep.mubr.msk.bf16.mxu1 %vm582_vm0, %v4453_v29 }
 0x61b   : > { %4689 = vmatmul.mubr.msk.bf16.gmra.mrb[36].mxu0 %vm582_vm0, %v4452_v47  ;;  %4693 = vmatmul.mubr.msk.bf16.vlgmr.msra.gmra.mrb[32].mxu1 %vm582_vm0, %v4454_v12 }
 0x61c   : > { %4696 = vmatprep.mubr.msk.bf16.mxu1 %vm582_vm0, %v4455_v7 }
 0x623   : > { %4697 = vmatmul.mubr.msk.bf16.gmra.mrb[36].mxu1 %vm582_vm0, %v4456_v24 }
 0x696   : > { %v4552_v50 = vpop.f32.mrb[0].mxu0 }
 0x697   : > { %v4616_v37 = vpop.f32.mrb[0].mxu1  ;;  %v4553_v36 = vpop.f32.mrb[1].mxu0 }
 0x698   : > { %v4554_v49 = vadd.f32 %v4553_v36, %v4552_v50  ;;  %v4617_v15 = vpop.f32.mrb[1].mxu1  ;;  %v4555_v12 = vpop.f32.mrb[2].mxu0 }
 0x699   : > { %v4618_v22 = vadd.f32 %v4617_v15, %v4616_v37  ;;  %v4619_v3 = vpop.f32.mrb[2].mxu1  ;;  %v4556_v16 = vpop.f32.mrb[3].mxu0 }
 0x69a   : > { %v4557_v17 = vadd.f32 %v4556_v16, %v4555_v12  ;;  %v4620_v10 = vpop.f32.mrb[3].mxu1 }
 0x69b   : > { %v4621_v26 = vadd.f32 %v4620_v10, %v4619_v3  ;;  %v7810_v60 = vadd.f32 %v4618_v22, %v4554_v49 }
 0x69d   : > { %v7812_v1 = vadd.f32 %v4621_v26, %v4557_v17 }
 0x6a1   : > { %v4558_v33 = vpop.f32.mrb[4].mxu0 }
 0x6a2   : > { %v4559_v34 = vpop.f32.mrb[5].mxu0 }
 0x6a3   : > { %v4560_v13 = vadd.f32 %v4559_v34, %v4558_v33  ;;  %v4561_v2 = vpop.f32.mrb[6].mxu0 }
 0x6a4   : > { %v4562_v56 = vpop.f32.mrb[7].mxu0 }
 0x6a5   : > { %v4563_v18 = vadd.f32 %v4562_v56, %v4561_v2 }
 0x6a8   : > { %v4622_v42 = vpop.f32.mrb[4].mxu1 }
 0x6a9   : > { %v4623_v62 = vpop.f32.mrb[5].mxu1 }
 0x6aa   : > { %v4624_v31 = vadd.f32 %v4623_v62, %v4622_v42  ;;  %v4625_v39 = vpop.f32.mrb[6].mxu1  ;;  %v4564_v8 = vpop.f32.mrb[8].mxu0 }
 0x6ab   : > { %v4626_v20 = vpop.f32.mrb[7].mxu1  ;;  %v4565_v61 = vpop.f32.mrb[9].mxu0 }
 0x6ac   : > { %v4627_v58 = vadd.f32 %v4626_v20, %v4625_v39  ;;  %v7814_v48 = vadd.f32 %v4624_v31, %v4560_v13  ;;  %v4566_v41 = vadd.f32 %v4565_v61, %v4564_v8  ;;  %v4567_v59 = vpop.f32.mrb[10].mxu0 }
 0x6ad   : > { %v4568_v46 = vpop.f32.mrb[11].mxu0 }
 0x6ae   : > { %v7816_v23 = vadd.f32 %v4627_v58, %v4563_v18  ;;  %v4569_v28 = vadd.f32 %v4568_v46, %v4567_v59 }
 0x6b2   : > { %v4628_v0 = vpop.f32.mrb[8].mxu1 }
 0x6b3   : > { %v4629_v57 = vpop.f32.mrb[9].mxu1 }
 0x6b4   : > { %v4630_v27 = vadd.f32 %v4629_v57, %v4628_v0  ;;  %v4631_v45 = vpop.f32.mrb[10].mxu1 }
 0x6b5   : > { %v4632_v55 = vpop.f32.mrb[11].mxu1  ;;  %v4570_v29 = vpop.f32.mrb[12].mxu0 }
 0x6b6   : > { %v4633_v63 = vadd.f32 %v4632_v55, %v4631_v45  ;;  %v7818_v19 = vadd.f32 %v4630_v27, %v4566_v41  ;;  %v4571_v35 = vpop.f32.mrb[13].mxu0 }
 0x6b7   : > { %v4572_v6 = vadd.f32 %v4571_v35, %v4570_v29  ;;  %v4573_v5 = vpop.f32.mrb[14].mxu0 }
 0x6b8   : > { %v7820_v11 = vadd.f32 %v4633_v63, %v4569_v28  ;;  %v4574_v38 = vpop.f32.mrb[15].mxu0 }
 0x6b9   : > { %v4575_v25 = vadd.f32 %v4574_v38, %v4573_v5  ;;  %v8269_v5 = vld [vmem:[#allocation44_spill] sm:$0xff] }
 0x6ba   : > { %v4014_v38 = vsub.s32 5, %v8269_v5 }
 0x6bc   : > { %v4634_v32 = vpop.f32.mrb[12].mxu1 }
 0x6bd   : > { %v4635_v4 = vpop.f32.mrb[13].mxu1 }
 0x6be   : > { %v4636_v52 = vadd.f32 %v4635_v4, %v4634_v32  ;;  %v4637_v44 = vpop.f32.mrb[14].mxu1  ;;  %v5178_v32 = vld [vmem:[%s6164_s25] sm:$0x3f]  ;;  %s5391_s25 = scalar_lea.vmem %s5390_s5, 4096 }
 0x6bf   : > { %v4638_v21 = vpop.f32.mrb[15].mxu1  ;;  %v4576_v47 = vpop.f32.mrb[16].mxu0  ;;  %v7838_v4 = vrot.slane %v5178_v32, %v4014_v38  ;;  %v8278_v38 = vld [vmem:[#allocation54_spill] sm:$0xff]  ;;  %p5393_p2 = scmp.lt.s32.totalorder %s5391_s25, %s5385_s2 }
 0x6c0   : > { %v4639_v9 = vadd.f32 %v4638_v21, %v4637_v44  ;;  %v7822_v43 = vadd.f32 %v4636_v52, %v4572_v6  ;;  %v4577_v7 = vpop.f32.mrb[17].mxu0 }
 0x6c1   : > { %v4578_v14 = vadd.f32 %v4577_v7, %v4576_v47  ;;  %v4579_v30 = vpop.f32.mrb[18].mxu0  ;;  %p5394_p6 = por %p5393_p2, %p5392_p11 }
 0x6c2   : > { %v7824_v51 = vadd.f32 %v4639_v9, %v4575_v25  ;;  %v4580_v53 = vpop.f32.mrb[19].mxu0 }
 0x6c3   : > { %v4581_v40 = vadd.f32 %v4580_v53, %v4579_v30  ;;  %p5395_p10 = pnand %p5394_p6, %p5388_p3 }
 0x6c7   : > { %v4640_v54 = vpop.f32.mrb[16].mxu1 }
 0x6c8   : > { %v4641_v24 = vpop.f32.mrb[17].mxu1 }
 0x6c9   : > { %v4642_v50 = vadd.f32 %v4641_v24, %v4640_v54  ;;  %v4643_v37 = vpop.f32.mrb[18].mxu1  ;;  %v4582_v49 = vpop.f32.mrb[20].mxu0 }
 0x6ca   : > { %v4644_v36 = vpop.f32.mrb[19].mxu1  ;;  %v4583_v22 = vpop.f32.mrb[21].mxu0 }
 0x6cb   : > { %v4645_v15 = vadd.f32 %v4644_v36, %v4643_v37  ;;  %v7826_v12 = vadd.f32 %v4642_v50, %v4578_v14  ;;  %v4584_v3 = vadd.f32 %v4583_v22, %v4582_v49  ;;  %v4585_v16 = vpop.f32.mrb[22].mxu0 }
 0x6cc   : > { %v4586_v10 = vpop.f32.mrb[23].mxu0 }
 0x6cd   : > { %v7828_v17 = vadd.f32 %v4645_v15, %v4581_v40  ;;  %v4587_v26 = vadd.f32 %v4586_v10, %v4585_v16  ;;  %v8270_v15 = vld [vmem:[#allocation45_spill] sm:$0xff] }
 0x6d1   : > { %v4646_v33 = vpop.f32.mrb[20].mxu1 }
 0x6d2   : > { %v4647_v34 = vpop.f32.mrb[21].mxu1 }
 0x6d3   : > { %v4648_v13 = vadd.f32 %v4647_v34, %v4646_v33  ;;  %v4649_v2 = vpop.f32.mrb[22].mxu1  ;;  %v8273_v33 = vld [vmem:[#allocation48_spill] sm:$0xff] }
 0x6d4   : > { %v4650_v56 = vpop.f32.mrb[23].mxu1  ;;  %v4588_v62 = vpop.f32.mrb[24].mxu0 }
 0x6d5   : > { %v4651_v18 = vadd.f32 %v4650_v56, %v4649_v2  ;;  %v3893_v42 = vadd.f32 %v4648_v13, %v4584_v3  ;;  %v4589_v31 = vpop.f32.mrb[25].mxu0 }
 0x6d6   : > { %v4590_v20 = vadd.f32 %v4589_v31, %v4588_v62  ;;  %v4591_v8 = vpop.f32.mrb[26].mxu0 }
 0x6d7   : > { %v7830_v39 = vadd.f32 %v4651_v18, %v4587_v26  ;;  %v4592_v58 = vpop.f32.mrb[27].mxu0 }
 0x6d8   : > { %v4593_v61 = vadd.f32 %v4592_v58, %v4591_v8 }
 0x6db   : > { %v4652_v41 = vpop.f32.mrb[24].mxu1 }
 0x6dc   : > { %v4653_v59 = vpop.f32.mrb[25].mxu1 }
 0x6dd   : > { %v4654_v46 = vadd.f32 %v4653_v59, %v4652_v41  ;;  %v4655_v28 = vpop.f32.mrb[26].mxu1 }
 0x6de   : > { %v4656_v0 = vpop.f32.mrb[27].mxu1  ;;  %v4594_v57 = vpop.f32.mrb[28].mxu0 }
 0x6df   : > { %v4657_v27 = vadd.f32 %v4656_v0, %v4655_v28  ;;  %v7832_v45 = vadd.f32 %v4654_v46, %v4590_v20  ;;  %v4595_v55 = vpop.f32.mrb[29].mxu0 }
 0x6e0   : > { %v4596_v29 = vadd.f32 %v4595_v55, %v4594_v57  ;;  %v4597_v63 = vpop.f32.mrb[30].mxu0  ;;  %v8276_v55 = vld [vmem:[#allocation56_spill] sm:$0xff] }
 0x6e1   : > { %v7834_v35 = vadd.f32 %v4657_v27, %v4593_v61  ;;  %v4598_v6 = vpop.f32.mrb[31].mxu0  ;;  %v8275_v27 = vld [vmem:[#allocation52_spill] sm:$0xff] }
 0x6e2   : > { %v4599_v25 = vadd.f32 %v4598_v6, %v4597_v63  ;;  %v8277_v6 = vld [vmem:[#allocation49_spill] sm:$0xff] }
 0x6e6   : > { %v4658_v52 = vpop.f32.mrb[28].mxu1  ;;  %v4686_v44 = vpop.f32.mrb[32].mxu0 }
 0x6e7   : > { %v3958_v21 = vadd.f32 %v4686_v44, %v7814_v48  ;;  %v4659_v47 = vpop.f32.mrb[29].mxu1  ;;  %v3949_v9 = vpop.f32.mrb[33].mxu0  ;;  %v8280_v44 = vld [vmem:[#allocation55_spill] sm:$0xff] }
 0x6e8   : > { %v4660_v7 = vadd.f32 %v4659_v47, %v4658_v52  ;;  %v3950_v14 = vadd.f32 %v3949_v9, %v7810_v60  ;;  %v4661_v30 = vpop.f32.mrb[30].mxu1  ;;  %v4687_v53 = vpop.f32.mrb[34].mxu0  ;;  %v8271_v60 = vld [vmem:[#allocation47_spill] sm:$0xff]  ;;  %v8281_v47 = vld [vmem:[#allocation50_spill] sm:$0xff] }
 0x6e9   : > { %v4018_v40 = vmul.f32 %v7838_v4, %v3958_v21  ;;  %v3961_v54 = vadd.f32 %v4687_v53, %v7816_v23  ;;  %v4662_v24 = vpop.f32.mrb[31].mxu1  ;;  %v3952_v50 = vpop.f32.mrb[35].mxu0 }
 0x6ea   : > { %v4016_v37 = vmul.f32 %v7838_v4, %v3950_v14  ;;  %v4663_v36 = vadd.f32 %v4662_v24, %v4661_v30  ;;  %v3953_v49 = vadd.f32 %v3952_v50, %v7812_v1  ;;  %v3909_v48 = vadd.f32 %v4660_v7, %v4596_v29  ;;  %v8272_v1 = vld [vmem:[#allocation46_spill] sm:$0xff]  ;;  %v8282_v7 = vld [vmem:[#allocation53_spill] sm:$0xff] }
 0x6eb   : > { %v4034_v22 = vadd.f32 %v4018_v40, %v8270_v15  ;;  %v4019_v3 = vmul.f32 %v7838_v4, %v3961_v54  ;;  %v8283_v15 = vld [vmem:[#allocation60_spill] sm:$0xff] }
 0x6ec   : > { %v4032_v16 = vadd.f32 %v4016_v37, %v8271_v60  ;;  %v4017_v10 = vmul.f32 %v7838_v4, %v3953_v49  ;;  %v3912_v26 = vadd.f32 %v4663_v36, %v4599_v25 }
 0x6ed   : > { %4050 = vst.msk [vmem:[%s7852_s0 + $0x10] sm:$0xff] %vm582_vm0, %v4034_v22  ;;  %v4035_v23 = vadd.f32 %v4019_v3, %v8272_v1  ;;  %v8284_v3 = vld [vmem:[#allocation58_spill] sm:$0xff] }
 0x6ee   : > { %4048 = vst.msk [vmem:[%s7852_s0] sm:$0xff] %vm582_vm0, %v4032_v16  ;;  %v4033_v34 = vadd.f32 %v4017_v10, %v8273_v33  ;;  %v4690_v13 = vpop.f32.mrb[36].mxu0  ;;  %v4694_v2 = vpop.f32.mrb[32].mxu1  ;;  %v8285_v10 = vld [vmem:[#allocation59_spill] sm:$0xff] }
 0x6ef   : > { %4051 = vst.msk [vmem:[%s7852_s0 + $0x18] sm:$0xff] %vm582_vm0, %v4035_v23  ;;  %v3974_v56 = vadd.f32 %v4690_v13, %v7822_v43  ;;  %v3990_v18 = vadd.f32 %v4694_v2, %v3893_v42  ;;  %v3965_v62 = vpop.f32.mrb[37].mxu0  ;;  %v3981_v31 = vpop.f32.mrb[33].mxu1 }
 0x6f0   : > { %4049 = vst.msk [vmem:[%s7852_s0 + $0x8] sm:$0xff] %vm582_vm0, %v4033_v34  ;;  %v3966_v20 = vadd.f32 %v3965_v62, %v7818_v19  ;;  %v3982_v8 = vadd.f32 %v3981_v31, %v7826_v12  ;;  %v4691_v58 = vpop.f32.mrb[38].mxu0  ;;  %v4695_v61 = vpop.f32.mrb[34].mxu1 }
 0x6f1   : > { %v4022_v41 = vmul.f32 %v7838_v4, %v3974_v56  ;;  %v4026_v59 = vmul.f32 %v7838_v4, %v3990_v18  ;;  %v3977_v46 = vadd.f32 %v4691_v58, %v7824_v51  ;;  %v3993_v43 = vadd.f32 %v4695_v61, %v7830_v39  ;;  %v3968_v42 = vpop.f32.mrb[39].mxu0  ;;  %v3984_v28 = vpop.f32.mrb[35].mxu1 }
 0x6f2   : > { %v4020_v0 = vmul.f32 %v7838_v4, %v3966_v20  ;;  %v4024_v19 = vmul.f32 %v7838_v4, %v3982_v8  ;;  %v3969_v12 = vadd.f32 %v3968_v42, %v7820_v11  ;;  %v3985_v57 = vadd.f32 %v3984_v28, %v7828_v17  ;;  %v8279_v17 = vld [vmem:[#allocation51_spill] sm:$0xff] }
 0x6f3   : > { %v4038_v51 = vadd.f32 %v4022_v41, %v8275_v27  ;;  %v4042_v29 = vadd.f32 %v4026_v59, %v8276_v55  ;;  %v4023_v39 = vmul.f32 %v7838_v4, %v3977_v46  ;;  %v4027_v63 = vmul.f32 %v7838_v4, %v3993_v43 }
 0x6f4   : > { %v4036_v5 = vadd.f32 %v4020_v0, %v8277_v6  ;;  %v4040_v25 = vadd.f32 %v4024_v19, %v8278_v38  ;;  %v4021_v11 = vmul.f32 %v7838_v4, %v3969_v12  ;;  %v4025_v32 = vmul.f32 %v7838_v4, %v3985_v57 }
 0x6f5   : > { %4054 = vst.msk [vmem:[%s7852_s0 + $0x30] sm:$0xff] %vm582_vm0, %v4038_v51  ;;  %4058 = vst.msk [vmem:[%s7852_s0 + $0x50] sm:$0xff] %vm582_vm0, %v4042_v29  ;;  %v4039_v52 = vadd.f32 %v4023_v39, %v8279_v17  ;;  %v4043_v21 = vadd.f32 %v4027_v63, %v8280_v44 }
 0x6f6   : > { %4052 = vst.msk [vmem:[%s7852_s0 + $0x20] sm:$0xff] %vm582_vm0, %v4036_v5  ;;  %4056 = vst.msk [vmem:[%s7852_s0 + $0x40] sm:$0xff] %vm582_vm0, %v4040_v25  ;;  %v4037_v9 = vadd.f32 %v4021_v11, %v8281_v47  ;;  %v4041_v14 = vadd.f32 %v4025_v32, %v8282_v7  ;;  %v4698_v30 = vpop.f32.mrb[36].mxu1 }
 0x6f7   : > { %4055 = vst.msk [vmem:[%s7852_s0 + $0x38] sm:$0xff] %vm582_vm0, %v4039_v52  ;;  %4059 = vst.msk [vmem:[%s7852_s0 + $0x58] sm:$0xff] %vm582_vm0, %v4043_v21  ;;  %v4006_v53 = vadd.f32 %v4698_v30, %v3909_v48  ;;  %v3997_v40 = vpop.f32.mrb[37].mxu1 }
 0x6f8   : > { %4053 = vst.msk [vmem:[%s7852_s0 + $0x28] sm:$0xff] %vm582_vm0, %v4037_v9  ;;  %4057 = vst.msk [vmem:[%s7852_s0 + $0x48] sm:$0xff] %vm582_vm0, %v4041_v14  ;;  %v3998_v54 = vadd.f32 %v3997_v40, %v7832_v45  ;;  %v4699_v24 = vpop.f32.mrb[38].mxu1 }
 0x6f9   : > { %v4030_v50 = vmul.f32 %v7838_v4, %v4006_v53  ;;  %v4009_v37 = vadd.f32 %v4699_v24, %v3912_v26  ;;  %v4000_v36 = vpop.f32.mrb[39].mxu1 }
 0x6fa   : > { %v4028_v49 = vmul.f32 %v7838_v4, %v3998_v54  ;;  %v4001_v48 = vadd.f32 %v4000_v36, %v7834_v35  ;;  %v8286_v35 = vld [vmem:[#allocation57_spill] sm:$0xff] }
 0x6fb   : > { %v4046_v22 = vadd.f32 %v4030_v50, %v8283_v15  ;;  %v4031_v45 = vmul.f32 %v7838_v4, %v4009_v37 }
 0x6fc   : > { %v4044_v60 = vadd.f32 %v4028_v49, %v8284_v3  ;;  %v4029_v16 = vmul.f32 %v7838_v4, %v4001_v48 }
 0x6fd   : > { %4062 = vst.msk [vmem:[%s7852_s0 + $0x70] sm:$0xff] %vm582_vm0, %v4046_v22  ;;  %v4047_v26 = vadd.f32 %v4031_v45, %v8285_v10 }
 0x6fe   : > { %4060 = vst.msk [vmem:[%s7852_s0 + $0x60] sm:$0xff] %vm582_vm0, %v4044_v60  ;;  %v4045_v1 = vadd.f32 %v4029_v16, %v8286_v35 }
 0x6ff   : > { %4063 = vst.msk [vmem:[%s7852_s0 + $0x78] sm:$0xff] %vm582_vm0, %v4047_v26 }
 0x700   : > { %4061 = vst.msk [vmem:[%s7852_s0 + $0x68] sm:$0xff] %vm582_vm0, %v4045_v1 }
 0x701   : > { %5398 = shalt.err (!%p5395_p10)
}
 0x702   : > { %s5399_s13 = scalar_lea.hbm %s7925_s6, 2048  ;;  %s5403_s19 = scalar_lea.hbm %s8288_s27, 8192 }
 0x703   : > { %p5400_p5 = scmp.ne.s32.totalorder %s7925_s6, %s5399_s13  ;;  %p5404_p9 = scmp.lt.u32.totalorder %s7925_s6, %s8288_s27 }
 0x704   : > { %p5405_p13 = scmp.lt.u32.totalorder %s5403_s19, %s5399_s13  ;;  %p5407_p0 = scmp.lt.u32.totalorder %s5399_s13, %s7925_s6 }
 0x705   : > { %p5401_p4 = pnand %p5400_p5, %p8289_p8 }
 0x706   : > { %p5406_p7 = por %p5405_p13, %p5404_p9 }
 0x707   : > { %p5402_p1 = pneg %p5401_p4 }
 0x708   : > { %p5408_p12 = por %p5407_p0, %p5406_p7 }
 0x70a   : > { %p5409_p3 = pnand %p5408_p12, %p5402_p1 }
 0x70c   : > { %5412 = shalt.err (!%p5409_p3)
}
 0x70d   : > { %s5587_s15 = smov 128   ;;  %s5588_s10 = smov 8  }
 0x70e   : > { %4726 = dma.vmem_to_hbm [thread:$0]  (%p8289_p8), %s7917_s20, 2048, %s7925_s6, %s4065_s14, %s5587_s15, %s5587_s15, %s5588_s10  }
 0x70f PF: > { %s8290_s18 = sld [smem:[#allocation28_spill]]  ;;  %p4760_p11 = scmp.ge.s32.totalorder %s5571_s22, 2 }
 0x710   : > { %p8291_p2 = scmp.ne.s32.totalorder %s8154_s26, 0 }
 0x712   : > { %p4752_p6 = pnand %p4760_p11, %p8291_p2 }
 0x715   : > { %s4096_s11 = sand.u32 1, %s8290_s18  }
 0x716   : > { %s4097_s17 = scalar_lea.sflag [#allocation6], %s4096_s11 }
 0x717   : > { %5502 = dma.done.wait (!%p4752_p6), %s4097_s17, 2048  }
 0x718   : > { %5504 = vsyncadd (!%p4752_p6), %s4097_s17, 4294965248  ;;  %s33_s22 = sadd.s32 1, %s5571_s22   ;;  %s8293_s4 = sld [smem:[#allocation41_spill]] }
 0x719   : > { %p7960_p10 = scmp.ge.s32.totalorder %s33_s22, 6   ;;  %s8294_s10 = sld [smem:[#allocation24_spill]] }
 0x71a   : > { %s8295_s11 = sld [smem:[#allocation25_spill]]  ;;  %s8296_s6 = sld [smem:[#allocation43_spill]] }
 0x71b   : > { %s8297_s12 = sld [smem:[#allocation26_spill]]  ;;  %s8298_s13 = sld [smem:[#allocation27_spill]] }
 0x71c   : > { %s8299_s14 = sld [smem:[#allocation40_spill]]  ;;  %s8300_s15 = sld [smem:[#allocation29_spill]] }
 0x71d   : > { %s8301_s16 = sld [smem:[#allocation30_spill]]  ;;  %s8302_s17 = sld [smem:[#allocation42_spill]] }
 0x71e   : > { %s8303_s18 = sld [smem:[#allocation33_spill]]  ;;  %s8304_s20 = sld [smem:[#allocation35_spill]] }
 0x71f   : > { %s8305_s26 = sld [smem:[#allocation36_spill]]  ;;  %s8306_s29 = smov %s5511_s30 }
 0x720   : > { %s8307_s30 = smov %s5515_s9  ;;  %s8308_s9 = smov %s8293_s4 }
 0x721   : > { %s8309_s19 = smov %s5567_s21  ;;  %32 = sbr.rel (!%p7960_p10) target bundleno = 26 (0x1a), region = 155 }
 0x725   : > { %s8310_s21 = smov %s8305_s26 }
 0x728   :  { %4102 = vsyncpa [#allocation5], 1 }
 0x729   :  { %4104 = vsyncpa [#allocation5 + $0x1], 1 }
 0x72a   :  { %4105 = vsyncpa [#allocation8], 1 }
 0x72b   :  { %4107 = vsyncpa [#allocation8 + $0x1], 1 }
 0x72c   :  { %4108 = vsyncpa [#allocation11], 1 }
 0x72d   :  { %4110 = vsyncpa [#allocation11 + $0x1], 1 }
 0x72e   :  { %4111 = vsyncpa [#allocation14], 1 }
 0x72f   :  { %4112 = vsyncpa [#allocation6], 1 }
 0x730   :  { %4114 = vsyncpa [#allocation6 + $0x1], 1 }

</bundles_post_ra>
